<compile_context>
chip_gen: v6e
topology: v6e:2x2x1
jax: 0.10.0
libtpu: 0.0.40
codegen_flags: <defaults>
</compile_context>

<pallas_src>
import jax
import jax.numpy as jnp
from jax import lax
from jax.experimental import pallas as pl
from jax.experimental.pallas import tpu as pltpu


def m_encoder_forward(x_nchw, w1_hwio, w2_hwio):
    """M_Encoder.forward with pooling=True (bn=False, BatchNorm=False).

    Returns (conv, pool), both NCHW, matching the PyTorch module.
    """
    N, Cin, H, W = x_nchw.shape
    Cout = w1_hwio.shape[3]
    assert H % 2 == 0 and W % 2 == 0, "2x2/stride-2 pooling needs even spatial dims"
    HW = H * W

    P = 8 + ((-W) % 8)              # front pad so the interior store offset B is 8-aligned
    B = P + W                       # interior (image) offset inside the padded flat buffer
    PADLEN = B + HW + W + 8         # covers every 3x3 tap window of the flat image
    PBUFLEN = HW + W + 8            # covers the 2x2 pool window shifts

    # NCHW -> flat NHWC rows (row o = h*W + w), channels on the lane (minor) dim.
    x = jnp.transpose(x_nchw, (0, 2, 3, 1)).reshape(N, HW, Cin)

    # Horizontal-boundary masks for the dw = -1 / dw = +1 taps (compile-time constants).
    w_idx = jnp.arange(HW, dtype=jnp.int32) % W
    mask_l = (w_idx != 0).astype(jnp.float32)[:, None]       # kills kw=0 tap at w == 0
    mask_r = (w_idx != W - 1).astype(jnp.float32)[:, None]   # kills kw=2 tap at w == W-1

    # One-hot row-selection matrix: pooled row (a, b) <- flat row 2a*W + 2b.
    a = jnp.arange(H // 2, dtype=jnp.int32)
    b = jnp.arange(W // 2, dtype=jnp.int32)
    src_rows = (2 * a[:, None] * W + 2 * b[None, :]).reshape(-1)
    sel = jax.nn.one_hot(src_rows, HW, dtype=jnp.float32)     # (HW//4, HW)

    def kernel(x_ref, w1_ref, w2_ref, ml_ref, mr_ref, sel_ref,
               conv_ref, pool_ref, xpad_ref, ypad_ref, pbuf_ref):
        ml = ml_ref[...]                                      # (HW, 1)
        mr = mr_ref[...]                                      # (HW, 1)

        def conv3x3_relu(src, w_ref, pad_ref):
            # src: (HW, C) f32 value; pad_ref: (PADLEN, C) flat zero-padded scratch.
            c = pad_ref.shape[1]
            cout = w_ref.shape[3]
            # Zero only the halo rows (8-aligned stores); the interior is overwritten.
            pad_ref[0:B, :] = jnp.zeros((B, c), pad_ref.dtype)
            pad_ref[B + HW:PADLEN, :] = jnp.zeros((PADLEN - B - HW, c), pad_ref.dtype)
            pad_ref[B:B + HW, :] = src                         # 8-aligned interior store
            t = pad_ref[...]
            acc = jnp.zeros((HW, cout), jnp.float32)
            for kh in range(3):
                base = B + (kh - 1) * W                        # 8-aligned base per row-tap
                for kw in range(3):
                    start = base + (kw - 1)
                    patch = t[start:start + HW, :]             # shifted whole-image window
                    if kw == 0:
                        patch = patch * ml                     # zero wrapped-around left tap
                    elif kw == 2:
                        patch = patch * mr                     # zero wrapped-around right tap
                    acc = acc + jnp.dot(patch, w_ref[kh, kw],
                                        preferred_element_type=jnp.float32)
            return jnp.maximum(acc, 0.0)                       # ReLU

        y1 = conv3x3_relu(x_ref[0].astype(jnp.float32), w1_ref, xpad_ref)
        y2 = conv3x3_relu(y1, w2_ref, ypad_ref)

        conv_ref[0] = y2.astype(conv_ref.dtype)

        # 2x2 / stride-2 max pool: neighborhood max via shifted views of a zero-padded
        # flat buffer, then a one-hot row gather on the MXU.
        pbuf_ref[0:HW, :] = y2
        pbuf_ref[HW:PBUFLEN, :] = jnp.zeros((PBUFLEN - HW, Cout), jnp.float32)
        t = pbuf_ref[...]
        m = jnp.maximum(jnp.maximum(t[0:HW, :], t[1:1 + HW, :]),
                        jnp.maximum(t[W:W + HW, :], t[W + 1:W + 1 + HW, :]))
        pooled = jnp.dot(sel_ref[...], m, preferred_element_type=jnp.float32)
        pool_ref[0] = pooled.astype(pool_ref.dtype)

    conv_flat, pool_flat = pl.pallas_call(
        kernel,
        out_shape=(jax.ShapeDtypeStruct((N, HW, Cout), x_nchw.dtype),
                   jax.ShapeDtypeStruct((N, HW // 4, Cout), x_nchw.dtype)),
        grid=(N,),
        in_specs=[
            pl.BlockSpec((1, HW, Cin), lambda n: (n, 0, 0)),
            pl.BlockSpec((3, 3, Cin, Cout), lambda n: (0, 0, 0, 0)),
            pl.BlockSpec((3, 3, Cout, Cout), lambda n: (0, 0, 0, 0)),
            pl.BlockSpec((HW, 1), lambda n: (0, 0)),
            pl.BlockSpec((HW, 1), lambda n: (0, 0)),
            pl.BlockSpec((HW // 4, HW), lambda n: (0, 0)),
        ],
        out_specs=(
            pl.BlockSpec((1, HW, Cout), lambda n: (n, 0, 0)),
            pl.BlockSpec((1, HW // 4, Cout), lambda n: (n, 0, 0)),
        ),
        scratch_shapes=[
            pltpu.VMEM((PADLEN, Cin), jnp.float32),    # padded conv1 input
            pltpu.VMEM((PADLEN, Cout), jnp.float32),   # padded y1 (conv2 input)
            pltpu.VMEM((PBUFLEN, Cout), jnp.float32),  # padded y2 for the pool shifts
        ],
        compiler_params=pltpu.CompilerParams(dimension_semantics=("parallel",)),
    )(x, w1_hwio, w2_hwio, mask_l, mask_r, sel)

    conv = jnp.transpose(conv_flat.reshape(N, H, W, Cout), (0, 3, 1, 2))
    pool = jnp.transpose(pool_flat.reshape(N, H // 2, W // 2, Cout), (0, 3, 1, 2))
    return conv, pool

# TODO(synk): optional BatchNorm / GroupNorm branches of ConvBnRelu2d (disabled by the
# module defaults bn=False, BatchNorm=False) are not implemented in the kernel.


# ------------------------- reference (plain JAX) for sanity -------------------------

def _reference(x_nchw, w1_hwio, w2_hwio):
    x = jnp.transpose(x_nchw, (0, 2, 3, 1))
    dn = ("NHWC", "HWIO", "NHWC")
    y1 = jax.nn.relu(lax.conv_general_dilated(x, w1_hwio, (1, 1), "SAME",
                                              dimension_numbers=dn))
    y2 = jax.nn.relu(lax.conv_general_dilated(y1, w2_hwio, (1, 1), "SAME",
                                              dimension_numbers=dn))
    pool = lax.reduce_window(y2, -jnp.inf, lax.max,
                             (1, 2, 2, 1), (1, 2, 2, 1), "VALID")
    return jnp.transpose(y2, (0, 3, 1, 2)), jnp.transpose(pool, (0, 3, 1, 2))


if __name__ == "__main__":
    # Small shapes consistent with the module: batch=2, in_ch=4, out_ch=8, spatial=16x16.
    N, Cin, Cout, H, W = 2, 4, 8, 16, 16
    key = jax.random.PRNGKey(0)
    kx, kw1, kw2 = jax.random.split(key, 3)

    x = jax.random.normal(kx, (N, Cin, H, W), dtype=jnp.float32)
    # Deterministic synthetic conv weights (no bias), stored directly in HWIO.
    w1 = 0.1 * jax.random.normal(kw1, (3, 3, Cin, Cout), dtype=jnp.float32)
    w2 = 0.1 * jax.random.normal(kw2, (3, 3, Cout, Cout), dtype=jnp.float32)

    conv_out, pool_out = jax.jit(m_encoder_forward)(x, w1, w2)
    jax.block_until_ready((conv_out, pool_out))

    ref_conv, ref_pool = _reference(x, w1, w2)
    assert conv_out.shape == (N, Cout, H, W)
    assert pool_out.shape == (N, Cout, H // 2, W // 2)
    assert jnp.allclose(conv_out, ref_conv, rtol=2e-2, atol=2e-2)
    assert jnp.allclose(pool_out, ref_pool, rtol=2e-2, atol=2e-2)

    print("KERNEL_OK")
</pallas_src>

<mosaic_0001>
module attributes {stable_mosaic.version = 11 : i64} {
  func.func @kernel(%arg0: i32, %arg1: memref<1x256x4xf32, #tpu.memory_space<vmem>>, %arg2: memref<3x3x4x8xf32, #tpu.memory_space<vmem>>, %arg3: memref<3x3x8x8xf32, #tpu.memory_space<vmem>>, %arg4: memref<256x1xf32, #tpu.memory_space<vmem>>, %arg5: memref<256x1xf32, #tpu.memory_space<vmem>>, %arg6: memref<64x256xf32, #tpu.memory_space<vmem>>, %arg7: memref<1x256x8xf32, #tpu.memory_space<vmem>>, %arg8: memref<1x64x8xf32, #tpu.memory_space<vmem>>, %arg9: memref<304x4xf32, #tpu.memory_space<vmem>>, %arg10: memref<304x8xf32, #tpu.memory_space<vmem>>, %arg11: memref<280x8xf32, #tpu.memory_space<vmem>>) attributes {dimension_semantics = [#tpu.dimension_semantics<parallel>], iteration_bounds = array<i64: 2>, scalar_prefetch = 0 : i64, scratch_operands = 3 : i64, tpu.core_type = #tpu.core_type<tc>, window_params = [{transform_indices = @transform_0, window_bounds = array<i64: 1, 256, 4>}, {pipeline_mode = #tpu.pipeline_mode<synchronous>, transform_indices = @transform_1, window_bounds = array<i64: 3, 3, 4, 8>}, {pipeline_mode = #tpu.pipeline_mode<synchronous>, transform_indices = @transform_2, window_bounds = array<i64: 3, 3, 8, 8>}, {pipeline_mode = #tpu.pipeline_mode<synchronous>, transform_indices = @transform_3, window_bounds = array<i64: 256, 1>}, {pipeline_mode = #tpu.pipeline_mode<synchronous>, transform_indices = @transform_4, window_bounds = array<i64: 256, 1>}, {pipeline_mode = #tpu.pipeline_mode<synchronous>, transform_indices = @transform_5, window_bounds = array<i64: 64, 256>}, {transform_indices = @transform_6, window_bounds = array<i64: 1, 256, 8>}, {transform_indices = @transform_7, window_bounds = array<i64: 1, 64, 8>}]} {
    %c0 = arith.constant 0 : index
    %c0_0 = arith.constant 0 : index
    %0 = vector.load %arg4[%c0, %c0_0] : memref<256x1xf32, #tpu.memory_space<vmem>>, vector<256x1xf32>
    %c0_1 = arith.constant 0 : index
    %c0_2 = arith.constant 0 : index
    %1 = vector.load %arg5[%c0_1, %c0_2] : memref<256x1xf32, #tpu.memory_space<vmem>>, vector<256x1xf32>
    %c0_3 = arith.constant 0 : index
    %c0_4 = arith.constant 0 : index
    %c0_5 = arith.constant 0 : index
    %2 = vector.load %arg1[%c0_3, %c0_4, %c0_5] : memref<1x256x4xf32, #tpu.memory_space<vmem>>, vector<1x256x4xf32>
    %3 = vector.shape_cast %2 : vector<1x256x4xf32> to vector<256x4xf32>
    %cst = arith.constant 0.000000e+00 : f32
    %4 = vector.broadcast %cst : f32 to vector<24x4xf32>
    %c0_6 = arith.constant 0 : index
    %c0_7 = arith.constant 0 : index
    %5 = vector.load %arg9[%c0_6, %c0_7] : memref<304x4xf32, #tpu.memory_space<vmem>>, vector<24x4xf32>
    tpu.vector_store %arg9[%c0_6, %c0_7], %4 {strides = array<i32>} : memref<304x4xf32, #tpu.memory_space<vmem>>, vector<24x4xf32>,
    %cst_8 = arith.constant 0.000000e+00 : f32
    %6 = vector.broadcast %cst_8 : f32 to vector<24x4xf32>
    %c280 = arith.constant 280 : index
    %c0_9 = arith.constant 0 : index
    %7 = vector.load %arg9[%c280, %c0_9] : memref<304x4xf32, #tpu.memory_space<vmem>>, vector<24x4xf32>
    tpu.vector_store %arg9[%c280, %c0_9], %6 {strides = array<i32>} : memref<304x4xf32, #tpu.memory_space<vmem>>, vector<24x4xf32>,
    %c24 = arith.constant 24 : index
    %c0_10 = arith.constant 0 : index
    %8 = vector.load %arg9[%c24, %c0_10] : memref<304x4xf32, #tpu.memory_space<vmem>>, vector<256x4xf32>
    tpu.vector_store %arg9[%c24, %c0_10], %3 {strides = array<i32>} : memref<304x4xf32, #tpu.memory_space<vmem>>, vector<256x4xf32>,
    %c0_11 = arith.constant 0 : index
    %c0_12 = arith.constant 0 : index
    %9 = vector.load %arg9[%c0_11, %c0_12] : memref<304x4xf32, #tpu.memory_space<vmem>>, vector<304x4xf32>
    %cst_13 = arith.constant 0.000000e+00 : f32
    %10 = vector.broadcast %cst_13 : f32 to vector<256x8xf32>
    %11 = vector.extract_strided_slice %9 {offsets = [7, 0], sizes = [256, 4], strides = [1, 1]} : vector<304x4xf32> to vector<256x4xf32>
    %12 = vector.broadcast %0 : vector<256x1xf32> to vector<256x4xf32>
    %13 = arith.mulf %11, %12 : vector<256x4xf32>
    %c0_14 = arith.constant 0 : index
    %c0_15 = arith.constant 0 : index
    %c0_16 = arith.constant 0 : index
    %c0_17 = arith.constant 0 : index
    %14 = vector.load %arg2[%c0_14, %c0_15, %c0_16, %c0_17] : memref<3x3x4x8xf32, #tpu.memory_space<vmem>>, vector<1x1x4x8xf32>
    %15 = vector.shape_cast %14 : vector<1x1x4x8xf32> to vector<4x8xf32>
    %cst_18 = arith.constant dense<0.000000e+00> : vector<256x8xf32>
    %16 = tpu.matmul %13, %15, %cst_18 {dimension_numbers = #tpu.dot_dimension_numbers<[1], [0], [0], [1], [0, 0, 1, 1], [], []>} : vector<256x4xf32>, vector<4x8xf32>, vector<256x8xf32> -> vector<256x8xf32>
    %17 = arith.addf %10, %16 : vector<256x8xf32>
    %18 = vector.extract_strided_slice %9 {offsets = [8, 0], sizes = [256, 4], strides = [1, 1]} : vector<304x4xf32> to vector<256x4xf32>
    %c0_19 = arith.constant 0 : index
    %c1 = arith.constant 1 : index
    %c0_20 = arith.constant 0 : index
    %c0_21 = arith.constant 0 : index
    %19 = vector.load %arg2[%c0_19, %c1, %c0_20, %c0_21] : memref<3x3x4x8xf32, #tpu.memory_space<vmem>>, vector<1x1x4x8xf32>
    %20 = vector.shape_cast %19 : vector<1x1x4x8xf32> to vector<4x8xf32>
    %cst_22 = arith.constant dense<0.000000e+00> : vector<256x8xf32>
    %21 = tpu.matmul %18, %20, %cst_22 {dimension_numbers = #tpu.dot_dimension_numbers<[1], [0], [0], [1], [0, 0, 1, 1], [], []>} : vector<256x4xf32>, vector<4x8xf32>, vector<256x8xf32> -> vector<256x8xf32>
    %22 = arith.addf %17, %21 : vector<256x8xf32>
    %23 = vector.extract_strided_slice %9 {offsets = [9, 0], sizes = [256, 4], strides = [1, 1]} : vector<304x4xf32> to vector<256x4xf32>
    %24 = vector.broadcast %1 : vector<256x1xf32> to vector<256x4xf32>
    %25 = arith.mulf %23, %24 : vector<256x4xf32>
    %c0_23 = arith.constant 0 : index
    %c2 = arith.constant 2 : index
    %c0_24 = arith.constant 0 : index
    %c0_25 = arith.constant 0 : index
    %26 = vector.load %arg2[%c0_23, %c2, %c0_24, %c0_25] : memref<3x3x4x8xf32, #tpu.memory_space<vmem>>, vector<1x1x4x8xf32>
    %27 = vector.shape_cast %26 : vector<1x1x4x8xf32> to vector<4x8xf32>
    %cst_26 = arith.constant dense<0.000000e+00> : vector<256x8xf32>
    %28 = tpu.matmul %25, %27, %cst_26 {dimension_numbers = #tpu.dot_dimension_numbers<[1], [0], [0], [1], [0, 0, 1, 1], [], []>} : vector<256x4xf32>, vector<4x8xf32>, vector<256x8xf32> -> vector<256x8xf32>
    %29 = arith.addf %22, %28 : vector<256x8xf32>
    %30 = vector.extract_strided_slice %9 {offsets = [23, 0], sizes = [256, 4], strides = [1, 1]} : vector<304x4xf32> to vector<256x4xf32>
    %31 = vector.broadcast %0 : vector<256x1xf32> to vector<256x4xf32>
    %32 = arith.mulf %30, %31 : vector<256x4xf32>
    %c1_27 = arith.constant 1 : index
    %c0_28 = arith.constant 0 : index
    %c0_29 = arith.constant 0 : index
    %c0_30 = arith.constant 0 : index
    %33 = vector.load %arg2[%c1_27, %c0_28, %c0_29, %c0_30] : memref<3x3x4x8xf32, #tpu.memory_space<vmem>>, vector<1x1x4x8xf32>
    %34 = vector.shape_cast %33 : vector<1x1x4x8xf32> to vector<4x8xf32>
    %cst_31 = arith.constant dense<0.000000e+00> : vector<256x8xf32>
    %35 = tpu.matmul %32, %34, %cst_31 {dimension_numbers = #tpu.dot_dimension_numbers<[1], [0], [0], [1], [0, 0, 1, 1], [], []>} : vector<256x4xf32>, vector<4x8xf32>, vector<256x8xf32> -> vector<256x8xf32>
    %36 = arith.addf %29, %35 : vector<256x8xf32>
    %37 = vector.extract_strided_slice %9 {offsets = [24, 0], sizes = [256, 4], strides = [1, 1]} : vector<304x4xf32> to vector<256x4xf32>
    %c1_32 = arith.constant 1 : index
    %c1_33 = arith.constant 1 : index
    %c0_34 = arith.constant 0 : index
    %c0_35 = arith.constant 0 : index
    %38 = vector.load %arg2[%c1_32, %c1_33, %c0_34, %c0_35] : memref<3x3x4x8xf32, #tpu.memory_space<vmem>>, vector<1x1x4x8xf32>
    %39 = vector.shape_cast %38 : vector<1x1x4x8xf32> to vector<4x8xf32>
    %cst_36 = arith.constant dense<0.000000e+00> : vector<256x8xf32>
    %40 = tpu.matmul %37, %39, %cst_36 {dimension_numbers = #tpu.dot_dimension_numbers<[1], [0], [0], [1], [0, 0, 1, 1], [], []>} : vector<256x4xf32>, vector<4x8xf32>, vector<256x8xf32> -> vector<256x8xf32>
    %41 = arith.addf %36, %40 : vector<256x8xf32>
    %42 = vector.extract_strided_slice %9 {offsets = [25, 0], sizes = [256, 4], strides = [1, 1]} : vector<304x4xf32> to vector<256x4xf32>
    %43 = vector.broadcast %1 : vector<256x1xf32> to vector<256x4xf32>
    %44 = arith.mulf %42, %43 : vector<256x4xf32>
    %c1_37 = arith.constant 1 : index
    %c2_38 = arith.constant 2 : index
    %c0_39 = arith.constant 0 : index
    %c0_40 = arith.constant 0 : index
    %45 = vector.load %arg2[%c1_37, %c2_38, %c0_39, %c0_40] : memref<3x3x4x8xf32, #tpu.memory_space<vmem>>, vector<1x1x4x8xf32>
    %46 = vector.shape_cast %45 : vector<1x1x4x8xf32> to vector<4x8xf32>
    %cst_41 = arith.constant dense<0.000000e+00> : vector<256x8xf32>
    %47 = tpu.matmul %44, %46, %cst_41 {dimension_numbers = #tpu.dot_dimension_numbers<[1], [0], [0], [1], [0, 0, 1, 1], [], []>} : vector<256x4xf32>, vector<4x8xf32>, vector<256x8xf32> -> vector<256x8xf32>
    %48 = arith.addf %41, %47 : vector<256x8xf32>
    %49 = vector.extract_strided_slice %9 {offsets = [39, 0], sizes = [256, 4], strides = [1, 1]} : vector<304x4xf32> to vector<256x4xf32>
    %50 = vector.broadcast %0 : vector<256x1xf32> to vector<256x4xf32>
    %51 = arith.mulf %49, %50 : vector<256x4xf32>
    %c2_42 = arith.constant 2 : index
    %c0_43 = arith.constant 0 : index
    %c0_44 = arith.constant 0 : index
    %c0_45 = arith.constant 0 : index
    %52 = vector.load %arg2[%c2_42, %c0_43, %c0_44, %c0_45] : memref<3x3x4x8xf32, #tpu.memory_space<vmem>>, vector<1x1x4x8xf32>
    %53 = vector.shape_cast %52 : vector<1x1x4x8xf32> to vector<4x8xf32>
    %cst_46 = arith.constant dense<0.000000e+00> : vector<256x8xf32>
    %54 = tpu.matmul %51, %53, %cst_46 {dimension_numbers = #tpu.dot_dimension_numbers<[1], [0], [0], [1], [0, 0, 1, 1], [], []>} : vector<256x4xf32>, vector<4x8xf32>, vector<256x8xf32> -> vector<256x8xf32>
    %55 = arith.addf %48, %54 : vector<256x8xf32>
    %56 = vector.extract_strided_slice %9 {offsets = [40, 0], sizes = [256, 4], strides = [1, 1]} : vector<304x4xf32> to vector<256x4xf32>
    %c2_47 = arith.constant 2 : index
    %c1_48 = arith.constant 1 : index
    %c0_49 = arith.constant 0 : index
    %c0_50 = arith.constant 0 : index
    %57 = vector.load %arg2[%c2_47, %c1_48, %c0_49, %c0_50] : memref<3x3x4x8xf32, #tpu.memory_space<vmem>>, vector<1x1x4x8xf32>
    %58 = vector.shape_cast %57 : vector<1x1x4x8xf32> to vector<4x8xf32>
    %cst_51 = arith.constant dense<0.000000e+00> : vector<256x8xf32>
    %59 = tpu.matmul %56, %58, %cst_51 {dimension_numbers = #tpu.dot_dimension_numbers<[1], [0], [0], [1], [0, 0, 1, 1], [], []>} : vector<256x4xf32>, vector<4x8xf32>, vector<256x8xf32> -> vector<256x8xf32>
    %60 = arith.addf %55, %59 : vector<256x8xf32>
    %61 = vector.extract_strided_slice %9 {offsets = [41, 0], sizes = [256, 4], strides = [1, 1]} : vector<304x4xf32> to vector<256x4xf32>
    %62 = vector.broadcast %1 : vector<256x1xf32> to vector<256x4xf32>
    %63 = arith.mulf %61, %62 : vector<256x4xf32>
    %c2_52 = arith.constant 2 : index
    %c2_53 = arith.constant 2 : index
    %c0_54 = arith.constant 0 : index
    %c0_55 = arith.constant 0 : index
    %64 = vector.load %arg2[%c2_52, %c2_53, %c0_54, %c0_55] : memref<3x3x4x8xf32, #tpu.memory_space<vmem>>, vector<1x1x4x8xf32>
    %65 = vector.shape_cast %64 : vector<1x1x4x8xf32> to vector<4x8xf32>
    %cst_56 = arith.constant dense<0.000000e+00> : vector<256x8xf32>
    %66 = tpu.matmul %63, %65, %cst_56 {dimension_numbers = #tpu.dot_dimension_numbers<[1], [0], [0], [1], [0, 0, 1, 1], [], []>} : vector<256x4xf32>, vector<4x8xf32>, vector<256x8xf32> -> vector<256x8xf32>
    %67 = arith.addf %60, %66 : vector<256x8xf32>
    %cst_57 = arith.constant 0.000000e+00 : f32
    %68 = vector.broadcast %cst_57 : f32 to vector<256x8xf32>
    %69 = arith.maximumf %67, %68 : vector<256x8xf32>
    %cst_58 = arith.constant 0.000000e+00 : f32
    %70 = vector.broadcast %cst_58 : f32 to vector<24x8xf32>
    %c0_59 = arith.constant 0 : index
    %c0_60 = arith.constant 0 : index
    %71 = vector.load %arg10[%c0_59, %c0_60] : memref<304x8xf32, #tpu.memory_space<vmem>>, vector<24x8xf32>
    tpu.vector_store %arg10[%c0_59, %c0_60], %70 {strides = array<i32>} : memref<304x8xf32, #tpu.memory_space<vmem>>, vector<24x8xf32>,
    %cst_61 = arith.constant 0.000000e+00 : f32
    %72 = vector.broadcast %cst_61 : f32 to vector<24x8xf32>
    %c280_62 = arith.constant 280 : index
    %c0_63 = arith.constant 0 : index
    %73 = vector.load %arg10[%c280_62, %c0_63] : memref<304x8xf32, #tpu.memory_space<vmem>>, vector<24x8xf32>
    tpu.vector_store %arg10[%c280_62, %c0_63], %72 {strides = array<i32>} : memref<304x8xf32, #tpu.memory_space<vmem>>, vector<24x8xf32>,
    %c24_64 = arith.constant 24 : index
    %c0_65 = arith.constant 0 : index
    %74 = vector.load %arg10[%c24_64, %c0_65] : memref<304x8xf32, #tpu.memory_space<vmem>>, vector<256x8xf32>
    tpu.vector_store %arg10[%c24_64, %c0_65], %69 {strides = array<i32>} : memref<304x8xf32, #tpu.memory_space<vmem>>, vector<256x8xf32>,
    %c0_66 = arith.constant 0 : index
    %c0_67 = arith.constant 0 : index
    %75 = vector.load %arg10[%c0_66, %c0_67] : memref<304x8xf32, #tpu.memory_space<vmem>>, vector<304x8xf32>
    %cst_68 = arith.constant 0.000000e+00 : f32
    %76 = vector.broadcast %cst_68 : f32 to vector<256x8xf32>
    %77 = vector.extract_strided_slice %75 {offsets = [7, 0], sizes = [256, 8], strides = [1, 1]} : vector<304x8xf32> to vector<256x8xf32>
    %78 = vector.broadcast %0 : vector<256x1xf32> to vector<256x8xf32>
    %79 = arith.mulf %77, %78 : vector<256x8xf32>
    %c0_69 = arith.constant 0 : index
    %c0_70 = arith.constant 0 : index
    %c0_71 = arith.constant 0 : index
    %c0_72 = arith.constant 0 : index
    %80 = vector.load %arg3[%c0_69, %c0_70, %c0_71, %c0_72] : memref<3x3x8x8xf32, #tpu.memory_space<vmem>>, vector<1x1x8x8xf32>
    %81 = vector.shape_cast %80 : vector<1x1x8x8xf32> to vector<8x8xf32>
    %cst_73 = arith.constant dense<0.000000e+00> : vector<256x8xf32>
    %82 = tpu.matmul %79, %81, %cst_73 {dimension_numbers = #tpu.dot_dimension_numbers<[1], [0], [0], [1], [0, 0, 1, 1], [], []>} : vector<256x8xf32>, vector<8x8xf32>, vector<256x8xf32> -> vector<256x8xf32>
    %83 = arith.addf %76, %82 : vector<256x8xf32>
    %84 = vector.extract_strided_slice %75 {offsets = [8, 0], sizes = [256, 8], strides = [1, 1]} : vector<304x8xf32> to vector<256x8xf32>
    %c0_74 = arith.constant 0 : index
    %c1_75 = arith.constant 1 : index
    %c0_76 = arith.constant 0 : index
    %c0_77 = arith.constant 0 : index
    %85 = vector.load %arg3[%c0_74, %c1_75, %c0_76, %c0_77] : memref<3x3x8x8xf32, #tpu.memory_space<vmem>>, vector<1x1x8x8xf32>
    %86 = vector.shape_cast %85 : vector<1x1x8x8xf32> to vector<8x8xf32>
    %cst_78 = arith.constant dense<0.000000e+00> : vector<256x8xf32>
    %87 = tpu.matmul %84, %86, %cst_78 {dimension_numbers = #tpu.dot_dimension_numbers<[1], [0], [0], [1], [0, 0, 1, 1], [], []>} : vector<256x8xf32>, vector<8x8xf32>, vector<256x8xf32> -> vector<256x8xf32>
    %88 = arith.addf %83, %87 : vector<256x8xf32>
    %89 = vector.extract_strided_slice %75 {offsets = [9, 0], sizes = [256, 8], strides = [1, 1]} : vector<304x8xf32> to vector<256x8xf32>
    %90 = vector.broadcast %1 : vector<256x1xf32> to vector<256x8xf32>
    %91 = arith.mulf %89, %90 : vector<256x8xf32>
    %c0_79 = arith.constant 0 : index
    %c2_80 = arith.constant 2 : index
    %c0_81 = arith.constant 0 : index
    %c0_82 = arith.constant 0 : index
    %92 = vector.load %arg3[%c0_79, %c2_80, %c0_81, %c0_82] : memref<3x3x8x8xf32, #tpu.memory_space<vmem>>, vector<1x1x8x8xf32>
    %93 = vector.shape_cast %92 : vector<1x1x8x8xf32> to vector<8x8xf32>
    %cst_83 = arith.constant dense<0.000000e+00> : vector<256x8xf32>
    %94 = tpu.matmul %91, %93, %cst_83 {dimension_numbers = #tpu.dot_dimension_numbers<[1], [0], [0], [1], [0, 0, 1, 1], [], []>} : vector<256x8xf32>, vector<8x8xf32>, vector<256x8xf32> -> vector<256x8xf32>
    %95 = arith.addf %88, %94 : vector<256x8xf32>
    %96 = vector.extract_strided_slice %75 {offsets = [23, 0], sizes = [256, 8], strides = [1, 1]} : vector<304x8xf32> to vector<256x8xf32>
    %97 = vector.broadcast %0 : vector<256x1xf32> to vector<256x8xf32>
    %98 = arith.mulf %96, %97 : vector<256x8xf32>
    %c1_84 = arith.constant 1 : index
    %c0_85 = arith.constant 0 : index
    %c0_86 = arith.constant 0 : index
    %c0_87 = arith.constant 0 : index
    %99 = vector.load %arg3[%c1_84, %c0_85, %c0_86, %c0_87] : memref<3x3x8x8xf32, #tpu.memory_space<vmem>>, vector<1x1x8x8xf32>
    %100 = vector.shape_cast %99 : vector<1x1x8x8xf32> to vector<8x8xf32>
    %cst_88 = arith.constant dense<0.000000e+00> : vector<256x8xf32>
    %101 = tpu.matmul %98, %100, %cst_88 {dimension_numbers = #tpu.dot_dimension_numbers<[1], [0], [0], [1], [0, 0, 1, 1], [], []>} : vector<256x8xf32>, vector<8x8xf32>, vector<256x8xf32> -> vector<256x8xf32>
    %102 = arith.addf %95, %101 : vector<256x8xf32>
    %103 = vector.extract_strided_slice %75 {offsets = [24, 0], sizes = [256, 8], strides = [1, 1]} : vector<304x8xf32> to vector<256x8xf32>
    %c1_89 = arith.constant 1 : index
    %c1_90 = arith.constant 1 : index
    %c0_91 = arith.constant 0 : index
    %c0_92 = arith.constant 0 : index
    %104 = vector.load %arg3[%c1_89, %c1_90, %c0_91, %c0_92] : memref<3x3x8x8xf32, #tpu.memory_space<vmem>>, vector<1x1x8x8xf32>
    %105 = vector.shape_cast %104 : vector<1x1x8x8xf32> to vector<8x8xf32>
    %cst_93 = arith.constant dense<0.000000e+00> : vector<256x8xf32>
    %106 = tpu.matmul %103, %105, %cst_93 {dimension_numbers = #tpu.dot_dimension_numbers<[1], [0], [0], [1], [0, 0, 1, 1], [], []>} : vector<256x8xf32>, vector<8x8xf32>, vector<256x8xf32> -> vector<256x8xf32>
    %107 = arith.addf %102, %106 : vector<256x8xf32>
    %108 = vector.extract_strided_slice %75 {offsets = [25, 0], sizes = [256, 8], strides = [1, 1]} : vector<304x8xf32> to vector<256x8xf32>
    %109 = vector.broadcast %1 : vector<256x1xf32> to vector<256x8xf32>
    %110 = arith.mulf %108, %109 : vector<256x8xf32>
    %c1_94 = arith.constant 1 : index
    %c2_95 = arith.constant 2 : index
    %c0_96 = arith.constant 0 : index
    %c0_97 = arith.constant 0 : index
    %111 = vector.load %arg3[%c1_94, %c2_95, %c0_96, %c0_97] : memref<3x3x8x8xf32, #tpu.memory_space<vmem>>, vector<1x1x8x8xf32>
    %112 = vector.shape_cast %111 : vector<1x1x8x8xf32> to vector<8x8xf32>
    %cst_98 = arith.constant dense<0.000000e+00> : vector<256x8xf32>
    %113 = tpu.matmul %110, %112, %cst_98 {dimension_numbers = #tpu.dot_dimension_numbers<[1], [0], [0], [1], [0, 0, 1, 1], [], []>} : vector<256x8xf32>, vector<8x8xf32>, vector<256x8xf32> -> vector<256x8xf32>
    %114 = arith.addf %107, %113 : vector<256x8xf32>
    %115 = vector.extract_strided_slice %75 {offsets = [39, 0], sizes = [256, 8], strides = [1, 1]} : vector<304x8xf32> to vector<256x8xf32>
    %116 = vector.broadcast %0 : vector<256x1xf32> to vector<256x8xf32>
    %117 = arith.mulf %115, %116 : vector<256x8xf32>
    %c2_99 = arith.constant 2 : index
    %c0_100 = arith.constant 0 : index
    %c0_101 = arith.constant 0 : index
    %c0_102 = arith.constant 0 : index
    %118 = vector.load %arg3[%c2_99, %c0_100, %c0_101, %c0_102] : memref<3x3x8x8xf32, #tpu.memory_space<vmem>>, vector<1x1x8x8xf32>
    %119 = vector.shape_cast %118 : vector<1x1x8x8xf32> to vector<8x8xf32>
    %cst_103 = arith.constant dense<0.000000e+00> : vector<256x8xf32>
    %120 = tpu.matmul %117, %119, %cst_103 {dimension_numbers = #tpu.dot_dimension_numbers<[1], [0], [0], [1], [0, 0, 1, 1], [], []>} : vector<256x8xf32>, vector<8x8xf32>, vector<256x8xf32> -> vector<256x8xf32>
    %121 = arith.addf %114, %120 : vector<256x8xf32>
    %122 = vector.extract_strided_slice %75 {offsets = [40, 0], sizes = [256, 8], strides = [1, 1]} : vector<304x8xf32> to vector<256x8xf32>
    %c2_104 = arith.constant 2 : index
    %c1_105 = arith.constant 1 : index
    %c0_106 = arith.constant 0 : index
    %c0_107 = arith.constant 0 : index
    %123 = vector.load %arg3[%c2_104, %c1_105, %c0_106, %c0_107] : memref<3x3x8x8xf32, #tpu.memory_space<vmem>>, vector<1x1x8x8xf32>
    %124 = vector.shape_cast %123 : vector<1x1x8x8xf32> to vector<8x8xf32>
    %cst_108 = arith.constant dense<0.000000e+00> : vector<256x8xf32>
    %125 = tpu.matmul %122, %124, %cst_108 {dimension_numbers = #tpu.dot_dimension_numbers<[1], [0], [0], [1], [0, 0, 1, 1], [], []>} : vector<256x8xf32>, vector<8x8xf32>, vector<256x8xf32> -> vector<256x8xf32>
    %126 = arith.addf %121, %125 : vector<256x8xf32>
    %127 = vector.extract_strided_slice %75 {offsets = [41, 0], sizes = [256, 8], strides = [1, 1]} : vector<304x8xf32> to vector<256x8xf32>
    %128 = vector.broadcast %1 : vector<256x1xf32> to vector<256x8xf32>
    %129 = arith.mulf %127, %128 : vector<256x8xf32>
    %c2_109 = arith.constant 2 : index
    %c2_110 = arith.constant 2 : index
    %c0_111 = arith.constant 0 : index
    %c0_112 = arith.constant 0 : index
    %130 = vector.load %arg3[%c2_109, %c2_110, %c0_111, %c0_112] : memref<3x3x8x8xf32, #tpu.memory_space<vmem>>, vector<1x1x8x8xf32>
    %131 = vector.shape_cast %130 : vector<1x1x8x8xf32> to vector<8x8xf32>
    %cst_113 = arith.constant dense<0.000000e+00> : vector<256x8xf32>
    %132 = tpu.matmul %129, %131, %cst_113 {dimension_numbers = #tpu.dot_dimension_numbers<[1], [0], [0], [1], [0, 0, 1, 1], [], []>} : vector<256x8xf32>, vector<8x8xf32>, vector<256x8xf32> -> vector<256x8xf32>
    %133 = arith.addf %126, %132 : vector<256x8xf32>
    %cst_114 = arith.constant 0.000000e+00 : f32
    %134 = vector.broadcast %cst_114 : f32 to vector<256x8xf32>
    %135 = arith.maximumf %133, %134 : vector<256x8xf32>
    %c0_115 = arith.constant 0 : index
    %c0_116 = arith.constant 0 : index
    %c0_117 = arith.constant 0 : index
    %136 = vector.load %arg7[%c0_115, %c0_116, %c0_117] : memref<1x256x8xf32, #tpu.memory_space<vmem>>, vector<1x256x8xf32>
    %137 = vector.shape_cast %136 : vector<1x256x8xf32> to vector<256x8xf32>
    %138 = vector.shape_cast %135 : vector<256x8xf32> to vector<1x256x8xf32>
    tpu.vector_store %arg7[%c0_115, %c0_116, %c0_117], %138 {strides = array<i32>} : memref<1x256x8xf32, #tpu.memory_space<vmem>>, vector<1x256x8xf32>,
    %c0_118 = arith.constant 0 : index
    %c0_119 = arith.constant 0 : index
    %139 = vector.load %arg11[%c0_118, %c0_119] : memref<280x8xf32, #tpu.memory_space<vmem>>, vector<256x8xf32>
    tpu.vector_store %arg11[%c0_118, %c0_119], %135 {strides = array<i32>} : memref<280x8xf32, #tpu.memory_space<vmem>>, vector<256x8xf32>,
    %cst_120 = arith.constant 0.000000e+00 : f32
    %140 = vector.broadcast %cst_120 : f32 to vector<24x8xf32>
    %c256 = arith.constant 256 : index
    %c0_121 = arith.constant 0 : index
    %141 = vector.load %arg11[%c256, %c0_121] : memref<280x8xf32, #tpu.memory_space<vmem>>, vector<24x8xf32>
    tpu.vector_store %arg11[%c256, %c0_121], %140 {strides = array<i32>} : memref<280x8xf32, #tpu.memory_space<vmem>>, vector<24x8xf32>,
    %c0_122 = arith.constant 0 : index
    %c0_123 = arith.constant 0 : index
    %142 = vector.load %arg11[%c0_122, %c0_123] : memref<280x8xf32, #tpu.memory_space<vmem>>, vector<280x8xf32>
    %143 = vector.extract_strided_slice %142 {offsets = [0, 0], sizes = [256, 8], strides = [1, 1]} : vector<280x8xf32> to vector<256x8xf32>
    %144 = vector.extract_strided_slice %142 {offsets = [1, 0], sizes = [256, 8], strides = [1, 1]} : vector<280x8xf32> to vector<256x8xf32>
    %145 = arith.maximumf %143, %144 : vector<256x8xf32>
    %146 = vector.extract_strided_slice %142 {offsets = [16, 0], sizes = [256, 8], strides = [1, 1]} : vector<280x8xf32> to vector<256x8xf32>
    %147 = vector.extract_strided_slice %142 {offsets = [17, 0], sizes = [256, 8], strides = [1, 1]} : vector<280x8xf32> to vector<256x8xf32>
    %148 = arith.maximumf %146, %147 : vector<256x8xf32>
    %149 = arith.maximumf %145, %148 : vector<256x8xf32>
    %c0_124 = arith.constant 0 : index
    %c0_125 = arith.constant 0 : index
    %150 = vector.load %arg6[%c0_124, %c0_125] : memref<64x256xf32, #tpu.memory_space<vmem>>, vector<64x256xf32>
    %cst_126 = arith.constant dense<0.000000e+00> : vector<64x8xf32>
    %151 = tpu.matmul %150, %149, %cst_126 {dimension_numbers = #tpu.dot_dimension_numbers<[1], [0], [0], [1], [0, 0, 1, 1], [], []>} : vector<64x256xf32>, vector<256x8xf32>, vector<64x8xf32> -> vector<64x8xf32>
    %c0_127 = arith.constant 0 : index
    %c0_128 = arith.constant 0 : index
    %c0_129 = arith.constant 0 : index
    %152 = vector.load %arg8[%c0_127, %c0_128, %c0_129] : memref<1x64x8xf32, #tpu.memory_space<vmem>>, vector<1x64x8xf32>
    %153 = vector.shape_cast %152 : vector<1x64x8xf32> to vector<64x8xf32>
    %154 = vector.shape_cast %151 : vector<64x8xf32> to vector<1x64x8xf32>
    tpu.vector_store %arg8[%c0_127, %c0_128, %c0_129], %154 {strides = array<i32>} : memref<1x64x8xf32, #tpu.memory_space<vmem>>, vector<1x64x8xf32>,
    return
  }
  func.func @transform_0(%arg0: i32) -> (i32, i32, i32) {
    %c0_i32 = arith.constant 0 : i32
    %c0_i32_0 = arith.constant 0 : i32
    %c0_i32_1 = arith.constant 0 : i32
    return %arg0, %c0_i32, %c0_i32_0 : i32, i32, i32
  }
  func.func @transform_1(%arg0: i32) -> (i32, i32, i32, i32) {
    %c0_i32 = arith.constant 0 : i32
    %c0_i32_0 = arith.constant 0 : i32
    %c0_i32_1 = arith.constant 0 : i32
    %c0_i32_2 = arith.constant 0 : i32
    %c0_i32_3 = arith.constant 0 : i32
    return %c0_i32, %c0_i32_0, %c0_i32_1, %c0_i32_2 : i32, i32, i32, i32
  }
  func.func @transform_2(%arg0: i32) -> (i32, i32, i32, i32) {
    %c0_i32 = arith.constant 0 : i32
    %c0_i32_0 = arith.constant 0 : i32
    %c0_i32_1 = arith.constant 0 : i32
    %c0_i32_2 = arith.constant 0 : i32
    %c0_i32_3 = arith.constant 0 : i32
    return %c0_i32, %c0_i32_0, %c0_i32_1, %c0_i32_2 : i32, i32, i32, i32
  }
  func.func @transform_3(%arg0: i32) -> (i32, i32) {
    %c0_i32 = arith.constant 0 : i32
    %c0_i32_0 = arith.constant 0 : i32
    %c0_i32_1 = arith.constant 0 : i32
    return %c0_i32, %c0_i32_0 : i32, i32
  }
  func.func @transform_4(%arg0: i32) -> (i32, i32) {
    %c0_i32 = arith.constant 0 : i32
    %c0_i32_0 = arith.constant 0 : i32
    %c0_i32_1 = arith.constant 0 : i32
    return %c0_i32, %c0_i32_0 : i32, i32
  }
  func.func @transform_5(%arg0: i32) -> (i32, i32) {
    %c0_i32 = arith.constant 0 : i32
    %c0_i32_0 = arith.constant 0 : i32
    %c0_i32_1 = arith.constant 0 : i32
    return %c0_i32, %c0_i32_0 : i32, i32
  }
  func.func @transform_6(%arg0: i32) -> (i32, i32, i32) {
    %c0_i32 = arith.constant 0 : i32
    %c0_i32_0 = arith.constant 0 : i32
    %c0_i32_1 = arith.constant 0 : i32
    return %arg0, %c0_i32, %c0_i32_0 : i32, i32, i32
  }
  func.func @transform_7(%arg0: i32) -> (i32, i32, i32) {
    %c0_i32 = arith.constant 0 : i32
    %c0_i32_0 = arith.constant 0 : i32
    %c0_i32_1 = arith.constant 0 : i32
    return %arg0, %c0_i32, %c0_i32_0 : i32, i32, i32
  }
}

</mosaic_0001>

<bundles_post_ra>
// kernel: m_encoder_forward.1
= control target key start
LH: loop header
LB: loop body
LE: loop exit
PB: predicated region body
PF: predicated region fallthrough
CT: control target
= control target key end

     0   :  { %s11022_s24 = smov 0   ;;  %s15255_s0 = inlined_call_operand.vmem [shape: f32[2,256,4], index: 0, kind: input, shape index: {}]   ;;  %s15256_s1 = inlined_call_operand.vmem [shape: f32[3,3,4,8], index: 1, kind: input, shape index: {}]   ;;  %s15257_s2 = inlined_call_operand.vmem [shape: f32[3,3,8,8], index: 2, kind: input, shape index: {}]   ;;  %s15258_s3 = inlined_call_operand.vmem [shape: f32[256,1], index: 3, kind: input, shape index: {}]   ;;  %s15259_s4 = inlined_call_operand.vmem [shape: f32[256,1], index: 4, kind: input, shape index: {}]   ;;  %s15260_s5 = inlined_call_operand.vmem [shape: f32[64,256], index: 5, kind: input, shape index: {}]   ;;  %s15261_s6 = inlined_call_operand.vmem [shape: f32[2,256,8], index: 6, kind: output, shape index: {0}]   ;;  %s15262_s7 = inlined_call_operand.vmem [shape: f32[2,64,8], index: 7, kind: output, shape index: {1}]  }
   0x1 LB: > { %s8695_s25 = sadd.s32 4294967295, %s10978_s24   ;;  %p8699_p0 = scmp.ge.s32.totalorder %s10978_s24, 1  ;;  %s10978_s24 = sphi %s11022_s24, %s18_s24  }
   0x2   : > { %p240_p1 = scmp.lt.s32.totalorder %s10978_s24, 3 }
   0x4   : > { %p241_p2 = pnand %p8699_p0, %p240_p1 }
   0x6   : > { %244 = sbr.rel (%p241_p2) target bundleno = 1394 (0x572), region = 44 }
   0xb   : > { %v294_v0 = vld [vmem:[%s15258_s3 + $0x10] sm:$0xff]  ;;  %v292_v1 = vld [vmem:[%s15258_s3] sm:$0xff]  ;;  %vm388_vm0 = vcmask 31744   ;;  %v10980_v2 = vmov 0   ;;  %v15263_v3 = vmov 0.0   ;;  %v293_v5 = vld [vmem:[%s15258_s3 + $0x8] sm:$0xff] }
   0xc   : > { %10875 = vset.pattern.permute.xlu1 %v10980_v2  ;;  %10874 = vset.pattern.permute.xlu0 %v10980_v2  ;;  %390 = vst.msk [vmem:[#allocation2 + $0x8] sm:$0xff] %vm388_vm0, %v15263_v3  ;;  %389 = vst.msk [vmem:[#allocation2] sm:$0xff] %vm388_vm0, %v15263_v3  ;;  %v324_v4 = vld [vmem:[%s15259_s4] sm:$0xff]  ;;  %p277_p3 = scmp.lt.s32.totalorder %s8695_s25, 1  ;;  %v326_v6 = vld [vmem:[%s15259_s4 + $0x10] sm:$0xff]  ;;  %vm822_vm1 = vcmask 1043456  }
   0xd   : > { %475 = vperm.xlu1 %10875, %v294_v0   ;;  %467 = vperm.xlu0 %10874, %v292_v1   ;;  %391 = vst.msk [vmem:[#allocation2 + $0x10] sm:$0xff] %vm388_vm0, %v15263_v3  ;;  %392 = vst.msk [vmem:[#allocation2 + $0x118] sm:$0xff] %vm388_vm0, %v15263_v3  ;;  %v325_v7 = vld [vmem:[%s15259_s4 + $0x8] sm:$0xff]  ;;  %v296_v8 = vld [vmem:[%s15258_s3 + $0x20] sm:$0xff]  ;;  %vm593_vm2 = vcmask 1046528   ;;  %vm1084_vm3 = vcmask 1040384  }
   0xe   : > { %393 = vst.msk [vmem:[#allocation2 + $0x120] sm:$0xff] %vm388_vm0, %v15263_v3  ;;  %394 = vst.msk [vmem:[#allocation2 + $0x128] sm:$0xff] %vm388_vm0, %v15263_v3  ;;  %s16188_s25 = smov (!%p277_p3, %s8695_s25), 1  ;;  %v295_v9 = vld [vmem:[%s15258_s3 + $0x18] sm:$0xff]  ;;  %v328_v10 = vld [vmem:[%s15259_s4 + $0x20] sm:$0xff]  ;;  %vm4519_vm4 = vcmask 64512  }
   0xf   : > { %s9309_s19 = sshll.u32 %s16188_s25, 8  ;;  %v327_v11 = vld [vmem:[%s15259_s4 + $0x18] sm:$0xff]  ;;  %v8706_v12 = vld [vmem:[%s15256_s1 + $0x4] sm:$0xf]  ;;  %v298_v16 = vld [vmem:[%s15258_s3 + $0x30] sm:$0xff]  ;;  %s9311_s10 = sshll.u32 %s16188_s25, 6 }
  0x10   : > { %s11077_s26 = scalar_lea.vmem %s15255_s0, %s9309_s19  ;;  %9962 = vmatprep.subr.msk.mxu0 %vm822_vm1, %v8706_v12  ;;  %10862 = vmatprep.subr.msk.mxu1 %vm822_vm1, %v8706_v12  ;;  %v297_v18 = vld [vmem:[%s15258_s3 + $0x28] sm:$0xff]  ;;  %v330_v24 = vld [vmem:[%s15259_s4 + $0x30] sm:$0xff]  ;;  %v300_v31 = vld [vmem:[%s15258_s3 + $0x40] sm:$0xff]  ;;  %s15234_s13 = scalar_lea.vmem %s15262_s7, %s9311_s10 }
  0x11   : > { %1444 = vperm.xlu1 %10875, %v324_v4   ;;  %471 = vperm.xlu0 %10874, %v293_v5   ;;  %v356_v15 = vld [vmem:[%s11077_s26] sm:$0xff]  ;;  %v357_v17 = vld [vmem:[%s11077_s26 + $0x8] sm:$0xff]  ;;  %v358_v19 = vld [vmem:[%s11077_s26 + $0x10] sm:$0xff] }
  0x12   : > { %9963 = vmatpush3.msk.msra.mxu0 %vm822_vm1, %v8706_v12  ;;  %395 = vst.msk [vmem:[#allocation2 + $0x18] sm:$0xff] %vm388_vm0, %v356_v15  ;;  %396 = vst.msk [vmem:[#allocation2 + $0x20] sm:$0xff] %vm388_vm0, %v357_v17  ;;  %v359_v20 = vld [vmem:[%s11077_s26 + $0x18] sm:$0xff]  ;;  %10863 = vmatpush3.msk.msra.mxu1 %vm822_vm1, %v8706_v12  ;;  %v360_v21 = vld [vmem:[%s11077_s26 + $0x20] sm:$0xff] }
  0x13   : > { %v11085_v13 = vld [vmem:[#allocation2 + $0x8] sm:$0xff]  ;;  %397 = vst.msk [vmem:[#allocation2 + $0x28] sm:$0xff] %vm388_vm0, %v358_v19  ;;  %398 = vst.msk [vmem:[#allocation2 + $0x30] sm:$0xff] %vm388_vm0, %v359_v20  ;;  %v362_v23 = vld [vmem:[%s11077_s26 + $0x30] sm:$0xff] }
  0x14   : > { %9964 = vmatprep.mubr.msk.f32.mxu0 %vm388_vm0, %v11085_v13  ;;  %v11090_v14 = vld [vmem:[#allocation2 + $0x10] sm:$0xff]  ;;  %v361_v22 = vld [vmem:[%s11077_s26 + $0x28] sm:$0xff]  ;;  %399 = vst.msk [vmem:[#allocation2 + $0x38] sm:$0xff] %vm388_vm0, %v360_v21  ;;  %401 = vst.msk [vmem:[#allocation2 + $0x48] sm:$0xff] %vm388_vm0, %v362_v23 }
  0x15   : > { %1452 = vperm.xlu1 %10875, %v326_v6   ;;  %1448 = vperm.xlu0 %10874, %v325_v7   ;;  %400 = vst.msk [vmem:[#allocation2 + $0x40] sm:$0xff] %vm388_vm0, %v361_v22  ;;  %v363_v25 = vld [vmem:[%s11077_s26 + $0x38] sm:$0xff]  ;;  %v329_v26 = vld [vmem:[%s15259_s4 + $0x28] sm:$0xff]  ;;  %v364_v27 = vld [vmem:[%s11077_s26 + $0x40] sm:$0xff] }
  0x16   : > { %9965 = vmatmul.mubr.msk.f32.vlgmr.msra.gmra.mxu0 %vm388_vm0, %v11090_v14  ;;  %402 = vst.msk [vmem:[#allocation2 + $0x50] sm:$0xff] %vm388_vm0, %v363_v25  ;;  %v365_v28 = vld [vmem:[%s11077_s26 + $0x48] sm:$0xff]  ;;  %403 = vst.msk [vmem:[#allocation2 + $0x58] sm:$0xff] %vm388_vm0, %v364_v27  ;;  %v366_v29 = vld [vmem:[%s11077_s26 + $0x50] sm:$0xff] }
  0x17   : > { %404 = vst.msk [vmem:[#allocation2 + $0x60] sm:$0xff] %vm388_vm0, %v365_v28  ;;  %v367_v30 = vld [vmem:[%s11077_s26 + $0x58] sm:$0xff]  ;;  %405 = vst.msk [vmem:[#allocation2 + $0x68] sm:$0xff] %vm388_vm0, %v366_v29  ;;  %v368_v34 = vld [vmem:[%s11077_s26 + $0x60] sm:$0xff] }
  0x18   : > { %406 = vst.msk [vmem:[#allocation2 + $0x70] sm:$0xff] %vm388_vm0, %v367_v30  ;;  %v378_v35 = vld [vmem:[%s11077_s26 + $0xb0] sm:$0xff]  ;;  %v299_v36 = vld [vmem:[%s15258_s3 + $0x38] sm:$0xff]  ;;  %407 = vst.msk [vmem:[#allocation2 + $0x78] sm:$0xff] %vm388_vm0, %v368_v34 }
  0x19   : > { %483 = vperm.xlu1 %10875, %v296_v8   ;;  %479 = vperm.xlu0 %10874, %v295_v9   ;;  %v11134_v32 = vld [vmem:[#allocation2 + $0x18] sm:$0xff]  ;;  %v11138_v33 = vld [vmem:[#allocation2 + $0x20] sm:$0xff]  ;;  %417 = vst.msk [vmem:[#allocation2 + $0xc8] sm:$0xff] %vm388_vm0, %v378_v35  ;;  %v369_v38 = vld [vmem:[%s11077_s26 + $0x68] sm:$0xff] }
  0x1a   : > { %9967 = vmatprep.mubr.msk.f32.mxu0 %vm388_vm0, %v11134_v32  ;;  %v11147_v37 = vld [vmem:[#allocation2 + $0x28] sm:$0xff]  ;;  %408 = vst.msk [vmem:[#allocation2 + $0x80] sm:$0xff] %vm388_vm0, %v369_v38  ;;  %v379_v39 = vld [vmem:[%s11077_s26 + $0xb8] sm:$0xff]  ;;  %v11158_v40 = vld [vmem:[#allocation2 + $0x30] sm:$0xff] }
  0x1b   : > { %9968 = vmatmul.mubr.msk.f32.gmra.mxu0 %vm388_vm0, %v11138_v33  ;;  %418 = vst.msk [vmem:[#allocation2 + $0xd0] sm:$0xff] %vm388_vm0, %v379_v39  ;;  %v11161_v41 = vld [vmem:[#allocation2 + $0x38] sm:$0xff]  ;;  %v370_v42 = vld [vmem:[%s11077_s26 + $0x70] sm:$0xff]  ;;  %v380_v43 = vld [vmem:[%s11077_s26 + $0xc0] sm:$0xff] }
  0x1c   : > { %9970 = vmatprep.mubr.msk.f32.mxu0 %vm388_vm0, %v11147_v37  ;;  %v332_v44 = vld [vmem:[%s15259_s4 + $0x40] sm:$0xff]  ;;  %v331_v45 = vld [vmem:[%s15259_s4 + $0x38] sm:$0xff]  ;;  %409 = vst.msk [vmem:[#allocation2 + $0x88] sm:$0xff] %vm388_vm0, %v370_v42  ;;  %419 = vst.msk [vmem:[#allocation2 + $0xd8] sm:$0xff] %vm388_vm0, %v380_v43 }
  0x1d   : > { %1460 = vperm.xlu1 %10875, %v328_v10   ;;  %1456 = vperm.xlu0 %10874, %v327_v11   ;;  %v371_v46 = vld [vmem:[%s11077_s26 + $0x78] sm:$0xff]  ;;  %v11176_v47 = vld [vmem:[#allocation2 + $0x40] sm:$0xff]  ;;  %v381_v48 = vld [vmem:[%s11077_s26 + $0xc8] sm:$0xff] }
  0x1e   : > { %410 = vst.msk [vmem:[#allocation2 + $0x90] sm:$0xff] %vm388_vm0, %v371_v46  ;;  %v302_v49 = vld [vmem:[%s15258_s3 + $0x50] sm:$0xff]  ;;  %420 = vst.msk [vmem:[#allocation2 + $0xe0] sm:$0xff] %vm388_vm0, %v381_v48  ;;  %v372_v50 = vld [vmem:[%s11077_s26 + $0x80] sm:$0xff] }
  0x1f   : > { %9971 = vmatmul.mubr.msk.f32.gmra.mxu0 %vm388_vm0, %v11158_v40  ;;  %v382_v51 = vld [vmem:[%s11077_s26 + $0xd0] sm:$0xff]  ;;  %v373_v52 = vld [vmem:[%s11077_s26 + $0x88] sm:$0xff]  ;;  %411 = vst.msk [vmem:[#allocation2 + $0x98] sm:$0xff] %vm388_vm0, %v372_v50  ;;  %v383_v55 = vld [vmem:[%s11077_s26 + $0xd8] sm:$0xff] }
  0x20   : > { %9973 = vmatprep.mubr.msk.f32.mxu0 %vm388_vm0, %v11161_v41  ;;  %v11189_v53 = vld [vmem:[#allocation2 + $0x48] sm:$0xff]  ;;  %421 = vst.msk [vmem:[#allocation2 + $0xe8] sm:$0xff] %vm388_vm0, %v382_v51  ;;  %412 = vst.msk [vmem:[#allocation2 + $0xa0] sm:$0xff] %vm388_vm0, %v373_v52  ;;  %v374_v57 = vld [vmem:[%s11077_s26 + $0x90] sm:$0xff] }
  0x21   : > { %491 = vperm.xlu1 %10875, %v298_v16   ;;  %487 = vperm.xlu0 %10874, %v297_v18   ;;  %v452_v54 = vld [vmem:[#allocation2 + $0xc8] sm:$0xff]  ;;  %422 = vst.msk [vmem:[#allocation2 + $0xf0] sm:$0xff] %vm388_vm0, %v383_v55  ;;  %v384_v58 = vld [vmem:[%s11077_s26 + $0xe0] sm:$0xff]  ;;  %413 = vst.msk [vmem:[#allocation2 + $0xa8] sm:$0xff] %vm388_vm0, %v374_v57 }
  0x22   : > { %v301_v56 = vld [vmem:[%s15258_s3 + $0x48] sm:$0xff]  ;;  %10000 = vmatprep.mubr.msk.f32.mxu1 %vm388_vm0, %v452_v54  ;;  %v453_v59 = vld [vmem:[#allocation2 + $0xd0] sm:$0xff]  ;;  %423 = vst.msk [vmem:[#allocation2 + $0xf8] sm:$0xff] %vm388_vm0, %v384_v58  ;;  %v375_v60 = vld [vmem:[%s11077_s26 + $0x98] sm:$0xff] }
  0x23   : > { %9974 = vmatmul.mubr.msk.f32.gmra.mxu0 %vm388_vm0, %v11176_v47  ;;  %v385_v61 = vld [vmem:[%s11077_s26 + $0xe8] sm:$0xff]  ;;  %v11210_v62 = vld [vmem:[#allocation2 + $0x50] sm:$0xff]  ;;  %10001 = vmatmul.mubr.msk.f32.vlgmr.msra.gmra.mxu1 %vm388_vm0, %v453_v59  ;;  %414 = vst.msk [vmem:[#allocation2 + $0xb0] sm:$0xff] %vm388_vm0, %v375_v60  ;;  %v723_v63 = vld [vmem:[%s15256_s1] sm:$0xf] }
  0x24   : > { %9976 = vmatprep.mubr.msk.f32.mxu0 %vm388_vm0, %v11189_v53  ;;  %424 = vst.msk [vmem:[#allocation2 + $0x100] sm:$0xff] %vm388_vm0, %v385_v61  ;;  %v376_v0 = vld [vmem:[%s11077_s26 + $0xa0] sm:$0xff]  ;;  %v11219_v1 = vld [vmem:[#allocation2 + $0x58] sm:$0xff]  ;;  %v377_v4 = vld [vmem:[%s11077_s26 + $0xa8] sm:$0xff]  ;;  %10012 = vmatprep.subr.msk.mxu1 %vm822_vm1, %v723_v63 }
  0x25   : > { %1468 = vperm.xlu1 %10875, %v330_v24   ;;  %1464 = vperm.xlu0 %10874, %v329_v26   ;;  %v454_v2 = vld [vmem:[#allocation2 + $0xd8] sm:$0xff]  ;;  %415 = vst.msk [vmem:[#allocation2 + $0xb8] sm:$0xff] %vm388_vm0, %v376_v0  ;;  %v334_v5 = vld [vmem:[%s15259_s4 + $0x50] sm:$0xff]  ;;  %v333_v6 = vld [vmem:[%s15259_s4 + $0x48] sm:$0xff] }
  0x26   : > { %10003 = vmatprep.mubr.msk.f32.mxu1 %vm388_vm0, %v454_v2  ;;  %416 = vst.msk [vmem:[#allocation2 + $0xc0] sm:$0xff] %vm388_vm0, %v377_v4  ;;  %v455_v7 = vld [vmem:[#allocation2 + $0xe0] sm:$0xff]  ;;  %10013 = vmatpush3.msk.msra.mxu1 %vm822_vm1, %v723_v63  ;;  %v8773_v8 = vld [vmem:[%s15256_s1 + $0x8] sm:$0xf]  ;;  %v303_v16 = vld [vmem:[%s15258_s3 + $0x58] sm:$0xff] }
  0x27   : > { %9977 = vmatmul.mubr.msk.f32.gmra.mxu0 %vm388_vm0, %v11210_v62  ;;  %v11240_v9 = vld [vmem:[#allocation2 + $0x60] sm:$0xff]  ;;  %10004 = vmatmul.mubr.msk.f32.gmra.mxu1 %vm388_vm0, %v455_v7  ;;  %v456_v10 = vld [vmem:[#allocation2 + $0xe8] sm:$0xff]  ;;  %v11257_v18 = vld [vmem:[#allocation2 + $0x70] sm:$0xff] }
  0x28   : > { %9979 = vmatprep.mubr.msk.f32.mxu0 %vm388_vm0, %v11219_v1  ;;  %v11243_v11 = vld [vmem:[#allocation2 + $0x68] sm:$0xff]  ;;  %v457_v12 = vld [vmem:[#allocation2 + $0xf0] sm:$0xff]  ;;  %v304_v15 = vld [vmem:[%s15258_s3 + $0x60] sm:$0xff]  ;;  %10006 = vmatprep.mubr.msk.f32.mxu1 %vm388_vm0, %v456_v10 }
  0x29   : > { %499 = vperm.xlu1 %10875, %v300_v31   ;;  %495 = vperm.xlu0 %10874, %v299_v36   ;;  %v458_v17 = vld [vmem:[#allocation2 + $0xf8] sm:$0xff]  ;;  %v336_v21 = vld [vmem:[%s15259_s4 + $0x60] sm:$0xff]  ;;  %v11277_v24 = vld [vmem:[#allocation2 + $0x88] sm:$0xff] }
  0x2a   : > { %10062 = vmatprep.subr.msk.mxu0 %vm822_vm1, %v8773_v8  ;;  %v11260_v19 = vld [vmem:[#allocation2 + $0x78] sm:$0xff]  ;;  %v11274_v23 = vld [vmem:[#allocation2 + $0x80] sm:$0xff]  ;;  %v306_v25 = vld [vmem:[%s15258_s3 + $0x70] sm:$0xff] }
  0x2b   : > { %9980 = vmatmul.mubr.msk.f32.gmra.mxu0 %vm388_vm0, %v11240_v9  ;;  %10007 = vmatmul.mubr.msk.f32.gmra.mxu1 %vm388_vm0, %v457_v12  ;;  %v459_v20 = vld [vmem:[#allocation2 + $0x100] sm:$0xff]  ;;  %v335_v22 = vld [vmem:[%s15259_s4 + $0x58] sm:$0xff]  ;;  %v305_v26 = vld [vmem:[%s15258_s3 + $0x68] sm:$0xff] }
  0x2c   : > { %9982 = vmatprep.mubr.msk.f32.mxu0 %vm388_vm0, %v11243_v11  ;;  %10009 = vmatprep.mubr.msk.f32.mxu1 %vm388_vm0, %v458_v17  ;;  %v11289_v27 = vld [vmem:[#allocation2 + $0x90] sm:$0xff]  ;;  %v11291_v28 = vld [vmem:[#allocation2 + $0x98] sm:$0xff]  ;;  %v337_v30 = vld [vmem:[%s15259_s4 + $0x68] sm:$0xff] }
  0x2d   : > { %1476 = vperm.xlu1 %10875, %v332_v44   ;;  %1472 = vperm.xlu0 %10874, %v331_v45   ;;  %v338_v29 = vld [vmem:[%s15259_s4 + $0x70] sm:$0xff]  ;;  %v11303_v31 = vld [vmem:[#allocation2 + $0xa0] sm:$0xff]  ;;  %v11305_v34 = vld [vmem:[#allocation2 + $0xa8] sm:$0xff] }
  0x2e   : > { %10063 = vmatpush3.msk.msra.mxu0 %vm822_vm1, %v8773_v8  ;;  %v308_v35 = vld [vmem:[%s15258_s3 + $0x80] sm:$0xff]  ;;  %v307_v36 = vld [vmem:[%s15258_s3 + $0x78] sm:$0xff]  ;;  %v11317_v38 = vld [vmem:[#allocation2 + $0xb0] sm:$0xff] }
  0x2f   : > { %9983 = vmatmul.mubr.msk.f32.gmra.mxu0 %vm388_vm0, %v11257_v18  ;;  %10010 = vmatmul.mubr.msk.f32.gmra.mxu1 %vm388_vm0, %v459_v20  ;;  %v11319_v39 = vld [vmem:[#allocation2 + $0xb8] sm:$0xff]  ;;  %v340_v42 = vld [vmem:[%s15259_s4 + $0x80] sm:$0xff]  ;;  %v310_v45 = vld [vmem:[%s15258_s3 + $0x90] sm:$0xff] }
  0x30   : > { %9985 = vmatprep.mubr.msk.f32.mxu0 %vm388_vm0, %v11260_v19  ;;  %v339_v43 = vld [vmem:[%s15259_s4 + $0x78] sm:$0xff]  ;;  %v11331_v44 = vld [vmem:[#allocation2 + $0xc0] sm:$0xff]  ;;  %v309_v46 = vld [vmem:[%s15258_s3 + $0x88] sm:$0xff] }
  0x31   : > { %507 = vperm.xlu1 %10875, %v302_v49   ;;  %503 = vperm.xlu0 %10874, %v301_v56   ;;  %v342_v48 = vld [vmem:[%s15259_s4 + $0x90] sm:$0xff]  ;;  %v341_v49 = vld [vmem:[%s15259_s4 + $0x88] sm:$0xff]  ;;  %v312_v50 = vld [vmem:[%s15258_s3 + $0xa0] sm:$0xff] }
  0x32   : > { %v311_v51 = vld [vmem:[%s15258_s3 + $0x98] sm:$0xff]  ;;  %v344_v52 = vld [vmem:[%s15259_s4 + $0xa0] sm:$0xff]  ;;  %v314_v55 = vld [vmem:[%s15258_s3 + $0xb0] sm:$0xff] }
  0x33   : > { %9986 = vmatmul.mubr.msk.f32.gmra.mxu0 %vm388_vm0, %v11274_v23  ;;  %v343_v54 = vld [vmem:[%s15259_s4 + $0x98] sm:$0xff]  ;;  %v313_v56 = vld [vmem:[%s15258_s3 + $0xa8] sm:$0xff]  ;;  %v346_v57 = vld [vmem:[%s15259_s4 + $0xb0] sm:$0xff] }
  0x34   : > { %9988 = vmatprep.mubr.msk.f32.mxu0 %vm388_vm0, %v11277_v24  ;;  %v345_v58 = vld [vmem:[%s15259_s4 + $0xa8] sm:$0xff]  ;;  %v316_v59 = vld [vmem:[%s15258_s3 + $0xc0] sm:$0xff]  ;;  %v315_v60 = vld [vmem:[%s15258_s3 + $0xb8] sm:$0xff] }
  0x35   : > { %1484 = vperm.xlu1 %10875, %v334_v5   ;;  %1480 = vperm.xlu0 %10874, %v333_v6   ;;  %v348_v61 = vld [vmem:[%s15259_s4 + $0xc0] sm:$0xff]  ;;  %v347_v63 = vld [vmem:[%s15259_s4 + $0xb8] sm:$0xff]  ;;  %v318_v0 = vld [vmem:[%s15258_s3 + $0xd0] sm:$0xff] }
  0x36   : > { %v317_v2 = vld [vmem:[%s15258_s3 + $0xc8] sm:$0xff]  ;;  %v350_v4 = vld [vmem:[%s15259_s4 + $0xd0] sm:$0xff]  ;;  %v320_v10 = vld [vmem:[%s15258_s3 + $0xe0] sm:$0xff] }
  0x37   : > { %9989 = vmatmul.mubr.msk.f32.gmra.mxu0 %vm388_vm0, %v11289_v27  ;;  %v349_v5 = vld [vmem:[%s15259_s4 + $0xc8] sm:$0xff]  ;;  %v11403_v7 = vld [vmem:[%s15256_s1 + $0x10] sm:$0xf]  ;;  %v319_v12 = vld [vmem:[%s15258_s3 + $0xd8] sm:$0xff] }
  0x38   : > { %9991 = vmatprep.mubr.msk.f32.mxu0 %vm388_vm0, %v11291_v28  ;;  %v11398_v6 = vld [vmem:[%s15256_s1 + $0xc] sm:$0xf]  ;;  %10162 = vmatprep.subr.msk.mxu0 %vm822_vm1, %v11403_v7  ;;  %v386_v8 = vld [vmem:[%s11077_s26 + $0xf0] sm:$0xff]  ;;  %v351_v17 = vld [vmem:[%s15259_s4 + $0xd8] sm:$0xff] }
  0x39   : > { %515 = vperm.xlu1 %10875, %v304_v15   ;;  %511 = vperm.xlu0 %10874, %v303_v16   ;;  %425 = vst.msk [vmem:[#allocation2 + $0x108] sm:$0xff] %vm388_vm0, %v386_v8  ;;  %v387_v15 = vld [vmem:[%s11077_s26 + $0xf8] sm:$0xff]  ;;  %v352_v16 = vld [vmem:[%s15259_s4 + $0xe0] sm:$0xff]  ;;  %v322_v20 = vld [vmem:[%s15258_s3 + $0xf0] sm:$0xff]  ;;  %s14895_s26 = scalar_lea.vmem %s15261_s6, %s9309_s19 }
  0x3a   : > { %10112 = vmatprep.subr.msk.mxu1 %vm822_vm1, %v11398_v6  ;;  %426 = vst.msk [vmem:[#allocation2 + $0x110] sm:$0xff] %vm388_vm0, %v387_v15 }
  0x3b   : > { %9992 = vmatmul.mubr.msk.f32.gmra.mxu0 %vm388_vm0, %v11303_v31 }
  0x3c   : > { %9994 = vmatprep.mubr.msk.f32.mxu0 %vm388_vm0, %v11305_v34 }
  0x3d   : > { %1492 = vperm.xlu1 %10875, %v336_v21   ;;  %1488 = vperm.xlu0 %10874, %v335_v22   ;;  %v321_v21 = vld [vmem:[%s15258_s3 + $0xe8] sm:$0xff]  ;;  %v354_v22 = vld [vmem:[%s15259_s4 + $0xf0] sm:$0xff] }
  0x3f   : > { %9995 = vmatmul.mubr.msk.f32.gmra.mxu0 %vm388_vm0, %v11317_v38 }
  0x40   : > { %9997 = vmatprep.mubr.msk.f32.mxu0 %vm388_vm0, %v11319_v39 }
  0x41   : > { %523 = vperm.xlu1 %10875, %v306_v25   ;;  %519 = vperm.xlu0 %10874, %v305_v26   ;;  %v353_v25 = vld [vmem:[%s15259_s4 + $0xe8] sm:$0xff]  ;;  %v355_v26 = vld [vmem:[%s15259_s4 + $0xf8] sm:$0xff] }
  0x43   : > { %9998 = vmatmul.mubr.msk.f32.gmra.mxu0 %vm388_vm0, %v11331_v44 }
  0x45   : > { %1500 = vperm.xlu1 %10875, %v338_v29   ;;  %1496 = vperm.xlu0 %10874, %v337_v30   ;;  %v323_v29 = vld [vmem:[%s15258_s3 + $0xf8] sm:$0xff] }
  0x49   : > { %531 = vperm.xlu1 %10875, %v308_v35   ;;  %527 = vperm.xlu0 %10874, %v307_v36  }
  0x4d   : > { %1508 = vperm.xlu1 %10875, %v340_v42   ;;  %1504 = vperm.xlu0 %10874, %v339_v43   ;;  %v427_v42 = vld [vmem:[#allocation2] sm:$0xff] }
  0x51   : > { %539 = vperm.xlu1 %10875, %v310_v45   ;;  %535 = vperm.xlu0 %10874, %v309_v46  }
  0x55   : > { %1516 = vperm.xlu1 %10875, %v342_v48   ;;  %1512 = vperm.xlu0 %10874, %v341_v49  }
  0x59   : > { %547 = vperm.xlu1 %10875, %v312_v50   ;;  %543 = vperm.xlu0 %10874, %v311_v51  }
  0x5d   : > { %1524 = vperm.xlu1 %10875, %v344_v52   ;;  %1520 = vperm.xlu0 %10874, %v343_v54  }
  0x61   : > { %555 = vperm.xlu1 %10875, %v314_v55   ;;  %551 = vperm.xlu0 %10874, %v313_v56  }
  0x65   : > { %1532 = vperm.xlu1 %10875, %v346_v57   ;;  %1528 = vperm.xlu0 %10874, %v345_v58  }
  0x69   : > { %563 = vperm.xlu1 %10875, %v316_v59   ;;  %559 = vperm.xlu0 %10874, %v315_v60  }
  0x6d   : > { %1540 = vperm.xlu1 %10875, %v348_v61   ;;  %1536 = vperm.xlu0 %10874, %v347_v63  }
  0x71   : > { %571 = vperm.xlu1 %10875, %v318_v0   ;;  %567 = vperm.xlu0 %10874, %v317_v2  }
  0x75   : > { %1548 = vperm.xlu1 %10875, %v350_v4   ;;  %1544 = vperm.xlu0 %10874, %v349_v5  }
  0x79   : > { %579 = vperm.xlu1 %10875, %v320_v10   ;;  %575 = vperm.xlu0 %10874, %v319_v12  }
  0x7d   : > { %1556 = vperm.xlu1 %10875, %v352_v16   ;;  %1552 = vperm.xlu0 %10874, %v351_v17  }
  0x81   : > { %587 = vperm.xlu1 %10875, %v322_v20   ;;  %583 = vperm.xlu0 %10874, %v321_v21  }
  0x85   : > { %1564 = vperm.xlu1 %10875, %v354_v22   ;;  %1560 = vperm.xlu0 %10874, %v353_v25  }
  0x88   : > { %v476_v30 = vpop.permute.xlu1 %475  ;;  %v468_v35 = vpop.permute.xlu0 %467 }
  0x89   : > { %1568 = vperm.xlu1 %10875, %v355_v26   ;;  %591 = vperm.xlu0 %10874, %v323_v29   ;;  %v11443_v36 = vrot.slane %v468_v35, 1  ;;  %v597_v46 = vrot.slane %v476_v30, 1 }
  0x8b   : > { %15465 = vst [vmem:[#allocation5_spill] sm:$0xff] %v11443_v36  ;;  %v690_v50 = vmul.f32 %v11443_v36, %v427_v42 }
  0x8c   : > { %v1445_v43 = vpop.permute.xlu1 %1444  ;;  %v472_v45 = vpop.permute.xlu0 %471 }
  0x8d   : > { %v595_v48 = vrot.slane %v472_v45, 1  ;;  %v11445_v49 = vrot.slane %v1445_v43, 7  ;;  %v1085_v60 = vrot.slane %v690_v50, 7 }
  0x8f   : > { %15466 = vst [vmem:[#allocation6_spill] sm:$0xff] %v11445_v49  ;;  %v11450_v51 = vsel %vm593_vm2, %v11443_v36, %v595_v48  ;;  %v11453_v52 = vsel %vm593_vm2, %v595_v48, %v597_v46  ;;  %v1666_v0 = vmul.f32 %v11445_v49, %v11085_v13 }
  0x90   : > { %15467 = vst [vmem:[#allocation7_spill] sm:$0xff] %v11450_v51  ;;  %15468 = vst [vmem:[#allocation8_spill] sm:$0xff] %v11453_v52  ;;  %v1453_v54 = vpop.permute.xlu1 %1452  ;;  %v1449_v55 = vpop.permute.xlu0 %1448  ;;  %v691_v56 = vmul.f32 %v11450_v51, %v11085_v13  ;;  %v692_v57 = vmul.f32 %v11453_v52, %v11090_v14 }
  0x91   : > { %v1573_v58 = vrot.slane %v1453_v54, 7  ;;  %v1571_v59 = vrot.slane %v1449_v55, 7  ;;  %v1734_v20 = vrot.slane %v1666_v0, 1 }
  0x92   : > { %v1086_v61 = vrot.slane %v691_v56, 7  ;;  %v1088_v63 = vrot.slane %v692_v57, 7 }
  0x93   : > { %v11463_v2 = vsel %vm1084_vm3, %v11445_v49, %v1571_v59  ;;  %v11466_v4 = vsel %vm1084_vm3, %v1571_v59, %v1573_v58 }
  0x94   : > { %15469 = vst [vmem:[#allocation9_spill] sm:$0xff] %v11463_v2  ;;  %15470 = vst [vmem:[#allocation10_spill] sm:$0xff] %v11466_v4  ;;  %v484_v5 = vpop.permute.xlu1 %483  ;;  %v480_v8 = vpop.permute.xlu0 %479  ;;  %v1087_v10 = vsel %vm1084_vm3, %v1085_v60, %v1086_v61  ;;  %v1089_v12 = vsel %vm1084_vm3, %v1086_v61, %v1088_v63  ;;  %v1667_v15 = vmul.f32 %v11463_v2, %v11090_v14 }
  0x95   : > { %v601_v16 = vrot.slane %v484_v5, 1  ;;  %v599_v17 = vrot.slane %v480_v8, 1  ;;  %10014 = vmatprep.mubr.msk.f32.mxu1 %vm388_vm0, %v1087_v10  ;;  %v1668_v13 = vmul.f32 %v11466_v4, %v11134_v32  ;;  %v11940_v4 = vld [vmem:[#allocation2 + $0x20] sm:$0xff] }
  0x96   : > { %10015 = vmatmul.mubr.msk.f32.vlgmr.msra.gmra.mxu1 %vm388_vm0, %v1089_v12  ;;  %v1735_v21 = vrot.slane %v1667_v15, 1  ;;  %v2125_v49 = vmul.f32 %v11940_v4, %v11453_v52 }
  0x97   : > { %v11477_v22 = vsel %vm593_vm2, %v597_v46, %v599_v17  ;;  %v11480_v25 = vsel %vm593_vm2, %v599_v17, %v601_v16  ;;  %v1737_v26 = vrot.slane %v1668_v13, 1  ;;  %10113 = vmatpush3.msk.msra.mxu1 %vm822_vm1, %v11398_v6 }
  0x98   : > { %15471 = vst [vmem:[#allocation11_spill] sm:$0xff] %v11477_v22  ;;  %15472 = vst [vmem:[#allocation12_spill] sm:$0xff] %v11480_v25  ;;  %v1461_v14 = vpop.permute.xlu1 %1460  ;;  %v1457_v29 = vpop.permute.xlu0 %1456  ;;  %v1736_v30 = vsel %vm593_vm2, %v1734_v20, %v1735_v21  ;;  %v693_v35 = vmul.f32 %v11477_v22, %v11134_v32  ;;  %v694_v42 = vmul.f32 %v11480_v25, %v11138_v33 }
  0x99   : > { %v1577_v43 = vrot.slane %v1461_v14, 7  ;;  %v1575_v45 = vrot.slane %v1457_v29, 7  ;;  %10064 = vmatprep.mubr.msk.f32.mxu0 %vm388_vm0, %v1736_v30  ;;  %v1738_v46 = vsel %vm593_vm2, %v1735_v21, %v1737_v26 }
  0x9a   : > { %10065 = vmatmul.mubr.msk.f32.vlgmr.msra.gmra.mxu0 %vm388_vm0, %v1738_v46  ;;  %v1090_v48 = vrot.slane %v693_v35, 7  ;;  %v1092_v6 = vrot.slane %v694_v42, 7 }
  0x9b   : > { %v11493_v50 = vsel %vm1084_vm3, %v1573_v58, %v1575_v45  ;;  %v11496_v54 = vsel %vm1084_vm3, %v1575_v45, %v1577_v43  ;;  %10163 = vmatpush3.msk.msra.mxu0 %vm822_vm1, %v11403_v7 }
  0x9c   : > { %15473 = vst [vmem:[#allocation13_spill] sm:$0xff] %v11493_v50  ;;  %15474 = vst [vmem:[#allocation14_spill] sm:$0xff] %v11496_v54  ;;  %v492_v32 = vpop.permute.xlu1 %491  ;;  %v488_v55 = vpop.permute.xlu0 %487  ;;  %v1091_v56 = vsel %vm1084_vm3, %v1088_v63, %v1090_v48  ;;  %v1093_v57 = vsel %vm1084_vm3, %v1090_v48, %v1092_v6  ;;  %v1669_v59 = vmul.f32 %v11493_v50, %v11138_v33 }
  0x9d   : > { %v1670_v60 = vmul.f32 %v11496_v54, %v11147_v37  ;;  %v605_v58 = vrot.slane %v492_v32, 1  ;;  %v603_v61 = vrot.slane %v488_v55, 1  ;;  %10017 = vmatprep.mubr.msk.f32.mxu1 %vm388_vm0, %v1091_v56 }
  0x9e   : > { %10018 = vmatmul.mubr.msk.f32.gmra.mxu1 %vm388_vm0, %v1093_v57  ;;  %v1739_v0 = vrot.slane %v1669_v59, 1 }
  0x9f   : > { %v1741_v7 = vrot.slane %v1670_v60, 1  ;;  %v11509_v5 = vsel %vm593_vm2, %v601_v16, %v603_v61  ;;  %v11512_v63 = vsel %vm593_vm2, %v603_v61, %v605_v58 }
  0xa0   : > { %15475 = vst [vmem:[#allocation15_spill] sm:$0xff] %v11509_v5  ;;  %15476 = vst [vmem:[#allocation16_spill] sm:$0xff] %v11512_v63  ;;  %v1469_v8 = vpop.permute.xlu1 %1468  ;;  %v1465_v10 = vpop.permute.xlu0 %1464  ;;  %v1740_v33 = vsel %vm593_vm2, %v1737_v26, %v1739_v0  ;;  %v695_v15 = vmul.f32 %v11509_v5, %v11147_v37  ;;  %v696_v17 = vmul.f32 %v11512_v63, %v11158_v40 }
  0xa1   : > { %v1742_v12 = vsel %vm593_vm2, %v1739_v0, %v1741_v7  ;;  %v1581_v13 = vrot.slane %v1469_v8, 7  ;;  %v1579_v20 = vrot.slane %v1465_v10, 7  ;;  %10067 = vmatprep.mubr.msk.f32.mxu0 %vm388_vm0, %v1740_v33 }
  0xa2   : > { %10068 = vmatmul.mubr.msk.f32.gmra.mxu0 %vm388_vm0, %v1742_v12  ;;  %v1094_v16 = vrot.slane %v695_v15, 7  ;;  %v1096_v21 = vrot.slane %v696_v17, 7 }
  0xa3   : > { %v11523_v14 = vsel %vm1084_vm3, %v1577_v43, %v1579_v20  ;;  %v11526_v26 = vsel %vm1084_vm3, %v1579_v20, %v1581_v13 }
  0xa4   : > { %15477 = vst [vmem:[#allocation17_spill] sm:$0xff] %v11523_v14  ;;  %15478 = vst [vmem:[#allocation18_spill] sm:$0xff] %v11526_v26  ;;  %v500_v29 = vpop.permute.xlu1 %499  ;;  %v496_v30 = vpop.permute.xlu0 %495  ;;  %v1095_v37 = vsel %vm1084_vm3, %v1092_v6, %v1094_v16  ;;  %v1097_v35 = vsel %vm1084_vm3, %v1094_v16, %v1096_v21  ;;  %v1671_v42 = vmul.f32 %v11523_v14, %v11158_v40 }
  0xa5   : > { %v1672_v45 = vmul.f32 %v11526_v26, %v11161_v41  ;;  %v609_v46 = vrot.slane %v500_v29, 1  ;;  %v607_v48 = vrot.slane %v496_v30, 1  ;;  %10020 = vmatprep.mubr.msk.f32.mxu1 %vm388_vm0, %v1095_v37 }
  0xa6   : > { %10021 = vmatmul.mubr.msk.f32.gmra.mxu1 %vm388_vm0, %v1097_v35  ;;  %v1743_v43 = vrot.slane %v1671_v42, 1 }
  0xa7   : > { %v1745_v32 = vrot.slane %v1672_v45, 1  ;;  %v11537_v55 = vsel %vm593_vm2, %v605_v58, %v607_v48  ;;  %v11540_v6 = vsel %vm593_vm2, %v607_v48, %v609_v46 }
  0xa8   : > { %15479 = vst [vmem:[#allocation19_spill] sm:$0xff] %v11537_v55  ;;  %15480 = vst [vmem:[#allocation20_spill] sm:$0xff] %v11540_v6  ;;  %v1477_v56 = vpop.permute.xlu1 %1476  ;;  %v1473_v57 = vpop.permute.xlu0 %1472  ;;  %v1744_v40 = vsel %vm593_vm2, %v1741_v7, %v1743_v43  ;;  %v697_v60 = vmul.f32 %v11537_v55, %v11161_v41  ;;  %v698_v61 = vmul.f32 %v11540_v6, %v11176_v47 }
  0xa9   : > { %v1746_v59 = vsel %vm593_vm2, %v1743_v43, %v1745_v32  ;;  %v1585_v0 = vrot.slane %v1477_v56, 7  ;;  %v1583_v8 = vrot.slane %v1473_v57, 7  ;;  %10070 = vmatprep.mubr.msk.f32.mxu0 %vm388_vm0, %v1744_v40 }
  0xaa   : > { %10071 = vmatmul.mubr.msk.f32.gmra.mxu0 %vm388_vm0, %v1746_v59  ;;  %v1098_v58 = vrot.slane %v697_v60, 7  ;;  %v1100_v10 = vrot.slane %v698_v61, 7  ;;  %v11594_v61 = vld [vmem:[%s15256_s1 + $0x18] sm:$0xf] }
  0xab   : > { %v11551_v33 = vsel %vm1084_vm3, %v1581_v13, %v1583_v8  ;;  %v11554_v7 = vsel %vm1084_vm3, %v1583_v8, %v1585_v0  ;;  %10262 = vmatprep.subr.msk.mxu0 %vm822_vm1, %v11594_v61 }
  0xac   : > { %15481 = vst [vmem:[#allocation21_spill] sm:$0xff] %v11551_v33  ;;  %15482 = vst [vmem:[#allocation22_spill] sm:$0xff] %v11554_v7  ;;  %v508_v12 = vpop.permute.xlu1 %507  ;;  %v504_v15 = vpop.permute.xlu0 %503  ;;  %v1099_v41 = vsel %vm1084_vm3, %v1096_v21, %v1098_v58  ;;  %v1101_v17 = vsel %vm1084_vm3, %v1098_v58, %v1100_v10  ;;  %v1673_v20 = vmul.f32 %v11551_v33, %v11176_v47 }
  0xad   : > { %v1674_v16 = vmul.f32 %v11554_v7, %v11189_v53  ;;  %v613_v29 = vrot.slane %v508_v12, 1  ;;  %v611_v30 = vrot.slane %v504_v15, 1  ;;  %10023 = vmatprep.mubr.msk.f32.mxu1 %vm388_vm0, %v1099_v41 }
  0xae   : > { %10024 = vmatmul.mubr.msk.f32.gmra.mxu1 %vm388_vm0, %v1101_v17  ;;  %v1747_v13 = vrot.slane %v1673_v20, 1 }
  0xaf   : > { %v1749_v37 = vrot.slane %v1674_v16, 1  ;;  %v11565_v35 = vsel %vm593_vm2, %v609_v46, %v611_v30  ;;  %v11568_v21 = vsel %vm593_vm2, %v611_v30, %v613_v29 }
  0xb0   : > { %15483 = vst [vmem:[#allocation23_spill] sm:$0xff] %v11565_v35  ;;  %15484 = vst [vmem:[#allocation24_spill] sm:$0xff] %v11568_v21  ;;  %v1485_v42 = vpop.permute.xlu1 %1484  ;;  %v1481_v45 = vpop.permute.xlu0 %1480  ;;  %v1748_v47 = vsel %vm593_vm2, %v1745_v32, %v1747_v13  ;;  %v699_v43 = vmul.f32 %v11565_v35, %v11189_v53  ;;  %v700_v56 = vmul.f32 %v11568_v21, %v11210_v62  ;;  %v11581_v32 = vld [vmem:[%s15256_s1 + $0x14] sm:$0xf] }
  0xb1   : > { %v1750_v48 = vsel %vm593_vm2, %v1747_v13, %v1749_v37  ;;  %v1589_v57 = vrot.slane %v1485_v42, 7  ;;  %v1587_v40 = vrot.slane %v1481_v45, 7  ;;  %10073 = vmatprep.mubr.msk.f32.mxu0 %vm388_vm0, %v1748_v47  ;;  %10212 = vmatprep.subr.msk.mxu1 %vm822_vm1, %v11581_v32 }
  0xb2   : > { %10074 = vmatmul.mubr.msk.f32.gmra.mxu0 %vm388_vm0, %v1750_v48  ;;  %v1102_v46 = vrot.slane %v699_v43, 7  ;;  %v1104_v59 = vrot.slane %v700_v56, 7 }
  0xb3   : > { %v11584_v60 = vsel %vm1084_vm3, %v1585_v0, %v1587_v40  ;;  %v11587_v53 = vsel %vm1084_vm3, %v1587_v40, %v1589_v57 }
  0xb4   : > { %15485 = vst [vmem:[#allocation25_spill] sm:$0xff] %v11584_v60  ;;  %15486 = vst [vmem:[#allocation26_spill] sm:$0xff] %v11587_v53  ;;  %v516_v8 = vpop.permute.xlu1 %515  ;;  %v512_v58 = vpop.permute.xlu0 %511  ;;  %v1103_v12 = vsel %vm1084_vm3, %v1100_v10, %v1102_v46  ;;  %v1105_v15 = vsel %vm1084_vm3, %v1102_v46, %v1104_v59  ;;  %v1675_v0 = vmul.f32 %v11584_v60, %v11210_v62 }
  0xb5   : > { %v1676_v41 = vmul.f32 %v11587_v53, %v11219_v1  ;;  %v617_v17 = vrot.slane %v516_v8, 1  ;;  %v615_v20 = vrot.slane %v512_v58, 1  ;;  %10026 = vmatprep.mubr.msk.f32.mxu1 %vm388_vm0, %v1103_v12 }
  0xb6   : > { %10027 = vmatmul.mubr.msk.f32.gmra.mxu1 %vm388_vm0, %v1105_v15  ;;  %v1751_v16 = vrot.slane %v1675_v0, 1 }
  0xb7   : > { %v1753_v30 = vrot.slane %v1676_v41, 1  ;;  %v11607_v10 = vsel %vm593_vm2, %v613_v29, %v615_v20  ;;  %v11610_v13 = vsel %vm593_vm2, %v615_v20, %v617_v17 }
  0xb8   : > { %15487 = vst [vmem:[#allocation27_spill] sm:$0xff] %v11607_v10  ;;  %15488 = vst [vmem:[#allocation28_spill] sm:$0xff] %v11610_v13  ;;  %v1493_v62 = vpop.permute.xlu1 %1492  ;;  %v1489_v42 = vpop.permute.xlu0 %1488  ;;  %v1752_v45 = vsel %vm593_vm2, %v1749_v37, %v1751_v16  ;;  %v701_v48 = vmul.f32 %v11607_v10, %v11219_v1  ;;  %v702_v43 = vmul.f32 %v11610_v13, %v11240_v9 }
  0xb9   : > { %v1754_v47 = vsel %vm593_vm2, %v1751_v16, %v1753_v30  ;;  %v1593_v56 = vrot.slane %v1493_v62, 7  ;;  %v1591_v40 = vrot.slane %v1489_v42, 7  ;;  %10076 = vmatprep.mubr.msk.f32.mxu0 %vm388_vm0, %v1752_v45 }
  0xba   : > { %10077 = vmatmul.mubr.msk.f32.gmra.mxu0 %vm388_vm0, %v1754_v47  ;;  %v1106_v29 = vrot.slane %v701_v48, 7  ;;  %v1108_v46 = vrot.slane %v702_v43, 7 }
  0xbb   : > { %v11621_v8 = vsel %vm1084_vm3, %v1589_v57, %v1591_v40  ;;  %v11624_v37 = vsel %vm1084_vm3, %v1591_v40, %v1593_v56 }
  0xbc   : > { %15489 = vst [vmem:[#allocation29_spill] sm:$0xff] %v11621_v8  ;;  %15490 = vst [vmem:[#allocation30_spill] sm:$0xff] %v11624_v37  ;;  %v524_v58 = vpop.permute.xlu1 %523  ;;  %v520_v12 = vpop.permute.xlu0 %519  ;;  %v1107_v1 = vsel %vm1084_vm3, %v1104_v59, %v1106_v29  ;;  %v1109_v15 = vsel %vm1084_vm3, %v1106_v29, %v1108_v46  ;;  %v1677_v0 = vmul.f32 %v11621_v8, %v11240_v9 }
  0xbd   : > { %v1678_v41 = vmul.f32 %v11624_v37, %v11243_v11  ;;  %v621_v20 = vrot.slane %v524_v58, 1  ;;  %v619_v16 = vrot.slane %v520_v12, 1  ;;  %10029 = vmatprep.mubr.msk.f32.mxu1 %vm388_vm0, %v1107_v1 }
  0xbe   : > { %10030 = vmatmul.mubr.msk.f32.gmra.mxu1 %vm388_vm0, %v1109_v15  ;;  %v1755_v57 = vrot.slane %v1677_v0, 1 }
  0xbf   : > { %v1757_v62 = vrot.slane %v1678_v41, 1  ;;  %v11635_v42 = vsel %vm593_vm2, %v617_v17, %v619_v16  ;;  %v11638_v59 = vsel %vm593_vm2, %v619_v16, %v621_v20 }
  0xc0   : > { %15491 = vst [vmem:[#allocation31_spill] sm:$0xff] %v11635_v42  ;;  %15492 = vst [vmem:[#allocation32_spill] sm:$0xff] %v11638_v59  ;;  %v1501_v45 = vpop.permute.xlu1 %1500  ;;  %v1497_v47 = vpop.permute.xlu0 %1496  ;;  %v1756_v9 = vsel %vm593_vm2, %v1753_v30, %v1755_v57  ;;  %v703_v43 = vmul.f32 %v11635_v42, %v11243_v11  ;;  %v704_v40 = vmul.f32 %v11638_v59, %v11257_v18 }
  0xc1   : > { %v1758_v48 = vsel %vm593_vm2, %v1755_v57, %v1757_v62  ;;  %v1597_v29 = vrot.slane %v1501_v45, 7  ;;  %v1595_v58 = vrot.slane %v1497_v47, 7  ;;  %10079 = vmatprep.mubr.msk.f32.mxu0 %vm388_vm0, %v1756_v9 }
  0xc2   : > { %10080 = vmatmul.mubr.msk.f32.gmra.mxu0 %vm388_vm0, %v1758_v48  ;;  %v1110_v17 = vrot.slane %v703_v43, 7  ;;  %v1112_v12 = vrot.slane %v704_v40, 7 }
  0xc3   : > { %v11649_v1 = vsel %vm1084_vm3, %v1593_v56, %v1595_v58  ;;  %v11652_v30 = vsel %vm1084_vm3, %v1595_v58, %v1597_v29 }
  0xc4   : > { %15493 = vst [vmem:[#allocation33_spill] sm:$0xff] %v11649_v1  ;;  %15494 = vst [vmem:[#allocation34_spill] sm:$0xff] %v11652_v30  ;;  %v532_v15 = vpop.permute.xlu1 %531  ;;  %v528_v0 = vpop.permute.xlu0 %527  ;;  %v1111_v11 = vsel %vm1084_vm3, %v1108_v46, %v1110_v17  ;;  %v1113_v41 = vsel %vm1084_vm3, %v1110_v17, %v1112_v12  ;;  %v1679_v16 = vmul.f32 %v11649_v1, %v11257_v18 }
  0xc5   : > { %v1680_v57 = vmul.f32 %v11652_v30, %v11260_v19  ;;  %v625_v45 = vrot.slane %v532_v15, 1  ;;  %v623_v47 = vrot.slane %v528_v0, 1  ;;  %10032 = vmatprep.mubr.msk.f32.mxu1 %vm388_vm0, %v1111_v11 }
  0xc6   : > { %10033 = vmatmul.mubr.msk.f32.gmra.mxu1 %vm388_vm0, %v1113_v41  ;;  %v1759_v56 = vrot.slane %v1679_v16, 1 }
  0xc7   : > { %v1761_v9 = vrot.slane %v1680_v57, 1  ;;  %v11663_v48 = vsel %vm593_vm2, %v621_v20, %v623_v47  ;;  %v11666_v46 = vsel %vm593_vm2, %v623_v47, %v625_v45 }
  0xc8   : > { %15495 = vst [vmem:[#allocation35_spill] sm:$0xff] %v11663_v48  ;;  %15496 = vst [vmem:[#allocation36_spill] sm:$0xff] %v11666_v46  ;;  %v1509_v43 = vpop.permute.xlu1 %1508  ;;  %v1505_v40 = vpop.permute.xlu0 %1504  ;;  %v1760_v18 = vsel %vm593_vm2, %v1757_v62, %v1759_v56  ;;  %v705_v17 = vmul.f32 %v11663_v48, %v11260_v19  ;;  %v706_v15 = vmul.f32 %v11666_v46, %v11274_v23 }
  0xc9   : > { %v1762_v58 = vsel %vm593_vm2, %v1759_v56, %v1761_v9  ;;  %v1601_v0 = vrot.slane %v1509_v43, 7  ;;  %v1599_v11 = vrot.slane %v1505_v40, 7  ;;  %10082 = vmatprep.mubr.msk.f32.mxu0 %vm388_vm0, %v1760_v18 }
  0xca   : > { %10083 = vmatmul.mubr.msk.f32.gmra.mxu0 %vm388_vm0, %v1762_v58  ;;  %v1114_v20 = vrot.slane %v705_v17, 7  ;;  %v1116_v41 = vrot.slane %v706_v15, 7 }
  0xcb   : > { %v11677_v16 = vsel %vm1084_vm3, %v1597_v29, %v1599_v11  ;;  %v11680_v62 = vsel %vm1084_vm3, %v1599_v11, %v1601_v0 }
  0xcc   : > { %15497 = vst [vmem:[#allocation37_spill] sm:$0xff] %v11677_v16  ;;  %15498 = vst [vmem:[#allocation38_spill] sm:$0xff] %v11680_v62  ;;  %v540_v57 = vpop.permute.xlu1 %539  ;;  %v536_v47 = vpop.permute.xlu0 %535  ;;  %v1115_v19 = vsel %vm1084_vm3, %v1112_v12, %v1114_v20  ;;  %v1117_v56 = vsel %vm1084_vm3, %v1114_v20, %v1116_v41  ;;  %v1681_v43 = vmul.f32 %v11677_v16, %v11274_v23 }
  0xcd   : > { %v1682_v40 = vmul.f32 %v11680_v62, %v11277_v24  ;;  %v629_v18 = vrot.slane %v540_v57, 1  ;;  %v627_v58 = vrot.slane %v536_v47, 1  ;;  %10035 = vmatprep.mubr.msk.f32.mxu1 %vm388_vm0, %v1115_v19 }
  0xce   : > { %10036 = vmatmul.mubr.msk.f32.gmra.mxu1 %vm388_vm0, %v1117_v56  ;;  %v1763_v29 = vrot.slane %v1681_v43, 1 }
  0xcf   : > { %v1765_v17 = vrot.slane %v1682_v40, 1  ;;  %v11691_v15 = vsel %vm593_vm2, %v625_v45, %v627_v58  ;;  %v11694_v12 = vsel %vm593_vm2, %v627_v58, %v629_v18 }
  0xd0   : > { %15499 = vst [vmem:[#allocation39_spill] sm:$0xff] %v11691_v15  ;;  %15500 = vst [vmem:[#allocation40_spill] sm:$0xff] %v11694_v12  ;;  %v1517_v11 = vpop.permute.xlu1 %1516  ;;  %v1513_v20 = vpop.permute.xlu0 %1512  ;;  %v1764_v23 = vsel %vm593_vm2, %v1761_v9, %v1763_v29  ;;  %v707_v57 = vmul.f32 %v11691_v15, %v11277_v24  ;;  %v708_v47 = vmul.f32 %v11694_v12, %v11289_v27 }
  0xd1   : > { %v1766_v3 = vsel %vm593_vm2, %v1763_v29, %v1765_v17  ;;  %v1605_v19 = vrot.slane %v1517_v11, 7  ;;  %v1603_v56 = vrot.slane %v1513_v20, 7  ;;  %10085 = vmatprep.mubr.msk.f32.mxu0 %vm388_vm0, %v1764_v23 }
  0xd2   : > { %10086 = vmatmul.mubr.msk.f32.gmra.mxu0 %vm388_vm0, %v1766_v3  ;;  %v1118_v45 = vrot.slane %v707_v57, 7  ;;  %v1120_v43 = vrot.slane %v708_v47, 7 }
  0xd3   : > { %v11705_v40 = vsel %vm1084_vm3, %v1601_v0, %v1603_v56  ;;  %v11708_v9 = vsel %vm1084_vm3, %v1603_v56, %v1605_v19 }
  0xd4   : > { %15501 = vst [vmem:[#allocation41_spill] sm:$0xff] %v11705_v40  ;;  %15502 = vst [vmem:[#allocation42_spill] sm:$0xff] %v11708_v9  ;;  %v548_v58 = vpop.permute.xlu1 %547  ;;  %v544_v29 = vpop.permute.xlu0 %543  ;;  %v1119_v24 = vsel %vm1084_vm3, %v1116_v41, %v1118_v45  ;;  %v1121_v62 = vsel %vm1084_vm3, %v1118_v45, %v1120_v43  ;;  %v1683_v11 = vmul.f32 %v11705_v40, %v11289_v27 }
  0xd5   : > { %v1684_v3 = vmul.f32 %v11708_v9, %v11291_v28  ;;  %v633_v20 = vrot.slane %v548_v58, 1  ;;  %v631_v23 = vrot.slane %v544_v29, 1  ;;  %10038 = vmatprep.mubr.msk.f32.mxu1 %vm388_vm0, %v1119_v24 }
  0xd6   : > { %10039 = vmatmul.mubr.msk.f32.gmra.mxu1 %vm388_vm0, %v1121_v62  ;;  %v1767_v0 = vrot.slane %v1683_v11, 1 }
  0xd7   : > { %v1769_v57 = vrot.slane %v1684_v3, 1  ;;  %v11719_v47 = vsel %vm593_vm2, %v629_v18, %v631_v23  ;;  %v11722_v41 = vsel %vm593_vm2, %v631_v23, %v633_v20 }
  0xd8   : > { %15503 = vst [vmem:[#allocation43_spill] sm:$0xff] %v11719_v47  ;;  %15504 = vst [vmem:[#allocation44_spill] sm:$0xff] %v11722_v41  ;;  %v1525_v56 = vpop.permute.xlu1 %1524  ;;  %v1521_v45 = vpop.permute.xlu0 %1520  ;;  %v1768_v27 = vsel %vm593_vm2, %v1765_v17, %v1767_v0  ;;  %v709_v58 = vmul.f32 %v11719_v47, %v11291_v28  ;;  %v710_v62 = vmul.f32 %v11722_v41, %v11303_v31 }
  0xd9   : > { %v1770_v9 = vsel %vm593_vm2, %v1767_v0, %v1769_v57  ;;  %v1609_v29 = vrot.slane %v1525_v56, 7  ;;  %v1607_v24 = vrot.slane %v1521_v45, 7  ;;  %10088 = vmatprep.mubr.msk.f32.mxu0 %vm388_vm0, %v1768_v27 }
  0xda   : > { %10089 = vmatmul.mubr.msk.f32.gmra.mxu0 %vm388_vm0, %v1770_v9  ;;  %v1122_v18 = vrot.slane %v709_v58, 7  ;;  %v1124_v11 = vrot.slane %v710_v62, 7 }
  0xdb   : > { %v11733_v3 = vsel %vm1084_vm3, %v1605_v19, %v1607_v24  ;;  %v11736_v17 = vsel %vm1084_vm3, %v1607_v24, %v1609_v29 }
  0xdc   : > { %15505 = vst [vmem:[#allocation45_spill] sm:$0xff] %v11733_v3  ;;  %15506 = vst [vmem:[#allocation46_spill] sm:$0xff] %v11736_v17  ;;  %v556_v23 = vpop.permute.xlu1 %555  ;;  %v552_v0 = vpop.permute.xlu0 %551  ;;  %v1123_v28 = vsel %vm1084_vm3, %v1120_v43, %v1122_v18  ;;  %v1125_v40 = vsel %vm1084_vm3, %v1122_v18, %v1124_v11  ;;  %v1685_v56 = vmul.f32 %v11733_v3, %v11303_v31 }
  0xdd   : > { %v1686_v9 = vmul.f32 %v11736_v17, %v11305_v34  ;;  %v637_v45 = vrot.slane %v556_v23, 1  ;;  %v635_v27 = vrot.slane %v552_v0, 1  ;;  %10041 = vmatprep.mubr.msk.f32.mxu1 %vm388_vm0, %v1123_v28 }
  0xde   : > { %10042 = vmatmul.mubr.msk.f32.gmra.mxu1 %vm388_vm0, %v1125_v40  ;;  %v1771_v19 = vrot.slane %v1685_v56, 1 }
  0xdf   : > { %v1773_v58 = vrot.slane %v1686_v9, 1  ;;  %v11747_v62 = vsel %vm593_vm2, %v633_v20, %v635_v27  ;;  %v11750_v43 = vsel %vm593_vm2, %v635_v27, %v637_v45 }
  0xe0   : > { %15507 = vst [vmem:[#allocation47_spill] sm:$0xff] %v11747_v62  ;;  %15508 = vst [vmem:[#allocation48_spill] sm:$0xff] %v11750_v43  ;;  %v1533_v24 = vpop.permute.xlu1 %1532  ;;  %v1529_v18 = vpop.permute.xlu0 %1528  ;;  %v1772_v31 = vsel %vm593_vm2, %v1769_v57, %v1771_v19  ;;  %v711_v23 = vmul.f32 %v11747_v62, %v11305_v34  ;;  %v712_v40 = vmul.f32 %v11750_v43, %v11317_v38 }
  0xe1   : > { %v1774_v17 = vsel %vm593_vm2, %v1771_v19, %v1773_v58  ;;  %v1613_v0 = vrot.slane %v1533_v24, 7  ;;  %v1611_v28 = vrot.slane %v1529_v18, 7  ;;  %10091 = vmatprep.mubr.msk.f32.mxu0 %vm388_vm0, %v1772_v31 }
  0xe2   : > { %10092 = vmatmul.mubr.msk.f32.gmra.mxu0 %vm388_vm0, %v1774_v17  ;;  %v1126_v20 = vrot.slane %v711_v23, 7  ;;  %v1128_v56 = vrot.slane %v712_v40, 7 }
  0xe3   : > { %v11761_v9 = vsel %vm1084_vm3, %v1609_v29, %v1611_v28  ;;  %v11764_v57 = vsel %vm1084_vm3, %v1611_v28, %v1613_v0 }
  0xe4   : > { %15509 = vst [vmem:[#allocation49_spill] sm:$0xff] %v11761_v9  ;;  %15510 = vst [vmem:[#allocation50_spill] sm:$0xff] %v11764_v57  ;;  %v564_v27 = vpop.permute.xlu1 %563  ;;  %v560_v19 = vpop.permute.xlu0 %559  ;;  %v1127_v34 = vsel %vm1084_vm3, %v1124_v11, %v1126_v20  ;;  %v1129_v3 = vsel %vm1084_vm3, %v1126_v20, %v1128_v56  ;;  %v1687_v24 = vmul.f32 %v11761_v9, %v11317_v38 }
  0xe5   : > { %v1688_v17 = vmul.f32 %v11764_v57, %v11319_v39  ;;  %v641_v18 = vrot.slane %v564_v27, 1  ;;  %v639_v31 = vrot.slane %v560_v19, 1  ;;  %10044 = vmatprep.mubr.msk.f32.mxu1 %vm388_vm0, %v1127_v34 }
  0xe6   : > { %10045 = vmatmul.mubr.msk.f32.gmra.mxu1 %vm388_vm0, %v1129_v3  ;;  %v1775_v29 = vrot.slane %v1687_v24, 1 }
  0xe7   : > { %v1777_v23 = vrot.slane %v1688_v17, 1  ;;  %v11775_v40 = vsel %vm593_vm2, %v637_v45, %v639_v31  ;;  %v11778_v11 = vsel %vm593_vm2, %v639_v31, %v641_v18 }
  0xe8   : > { %15511 = vst [vmem:[#allocation51_spill] sm:$0xff] %v11775_v40  ;;  %15512 = vst [vmem:[#allocation52_spill] sm:$0xff] %v11778_v11  ;;  %v1541_v28 = vpop.permute.xlu1 %1540  ;;  %v1537_v20 = vpop.permute.xlu0 %1536  ;;  %v1776_v38 = vsel %vm593_vm2, %v1773_v58, %v1775_v29  ;;  %v713_v27 = vmul.f32 %v11775_v40, %v11319_v39  ;;  %v714_v3 = vmul.f32 %v11778_v11, %v11331_v44 }
  0xe9   : > { %v1778_v57 = vsel %vm593_vm2, %v1775_v29, %v1777_v23  ;;  %v1617_v19 = vrot.slane %v1541_v28, 7  ;;  %v1615_v34 = vrot.slane %v1537_v20, 7  ;;  %10094 = vmatprep.mubr.msk.f32.mxu0 %vm388_vm0, %v1776_v38  ;;  %v11798_v20 = vld [vmem:[#allocation2 + $0xc8] sm:$0xff] }
  0xea   : > { %10095 = vmatmul.mubr.msk.f32.gmra.mxu0 %vm388_vm0, %v1778_v57  ;;  %v1130_v45 = vrot.slane %v713_v27, 7  ;;  %v1132_v24 = vrot.slane %v714_v3, 7 }
  0xeb   : > { %v11789_v17 = vsel %vm1084_vm3, %v1613_v0, %v1615_v34  ;;  %v11792_v58 = vsel %vm1084_vm3, %v1615_v34, %v1617_v19 }
  0xec   : > { %15513 = vst [vmem:[#allocation53_spill] sm:$0xff] %v11789_v17  ;;  %15514 = vst [vmem:[#allocation54_spill] sm:$0xff] %v11792_v58  ;;  %v572_v31 = vpop.permute.xlu1 %571  ;;  %v568_v29 = vpop.permute.xlu0 %567  ;;  %v1131_v39 = vsel %vm1084_vm3, %v1128_v56, %v1130_v45  ;;  %v1133_v9 = vsel %vm1084_vm3, %v1130_v45, %v1132_v24  ;;  %v1689_v28 = vmul.f32 %v11789_v17, %v11331_v44 }
  0xed   : > { %v1690_v57 = vmul.f32 %v11798_v20, %v11792_v58  ;;  %v645_v38 = vrot.slane %v572_v31, 1  ;;  %v643_v0 = vrot.slane %v568_v29, 1  ;;  %10047 = vmatprep.mubr.msk.f32.mxu1 %vm388_vm0, %v1131_v39  ;;  %v11814_v29 = vld [vmem:[#allocation2 + $0xd0] sm:$0xff] }
  0xee   : > { %10048 = vmatmul.mubr.msk.f32.gmra.mxu1 %vm388_vm0, %v1133_v9  ;;  %v1779_v27 = vrot.slane %v1689_v28, 1 }
  0xef   : > { %v1781_v3 = vrot.slane %v1690_v57, 1  ;;  %v11805_v56 = vsel %vm593_vm2, %v641_v18, %v643_v0  ;;  %v11808_v34 = vsel %vm593_vm2, %v643_v0, %v645_v38 }
  0xf0   : > { %15515 = vst [vmem:[#allocation55_spill] sm:$0xff] %v11805_v56  ;;  %15516 = vst [vmem:[#allocation56_spill] sm:$0xff] %v11808_v34  ;;  %v1549_v44 = vpop.permute.xlu1 %1548  ;;  %v1545_v45 = vpop.permute.xlu0 %1544  ;;  %v1780_v17 = vsel %vm593_vm2, %v1777_v23, %v1779_v27  ;;  %v715_v31 = vmul.f32 %v11798_v20, %v11805_v56  ;;  %v716_v9 = vmul.f32 %v11814_v29, %v11808_v34 }
  0xf1   : > { %v1782_v58 = vsel %vm593_vm2, %v1779_v27, %v1781_v3  ;;  %v1621_v39 = vrot.slane %v1549_v44, 7  ;;  %v1619_v18 = vrot.slane %v1545_v45, 7  ;;  %10097 = vmatprep.mubr.msk.f32.mxu0 %vm388_vm0, %v1780_v17  ;;  %v11830_v17 = vld [vmem:[#allocation2 + $0xd8] sm:$0xff] }
  0xf2   : > { %10098 = vmatmul.mubr.msk.f32.gmra.mxu0 %vm388_vm0, %v1782_v58  ;;  %v1134_v28 = vrot.slane %v715_v31, 7  ;;  %v1136_v57 = vrot.slane %v716_v9, 7 }
  0xf3   : > { %v11821_v23 = vsel %vm1084_vm3, %v1617_v19, %v1619_v18  ;;  %v11824_v0 = vsel %vm1084_vm3, %v1619_v18, %v1621_v39 }
  0xf4   : > { %15517 = vst [vmem:[#allocation57_spill] sm:$0xff] %v11821_v23  ;;  %15518 = vst [vmem:[#allocation58_spill] sm:$0xff] %v11824_v0  ;;  %v580_v27 = vpop.permute.xlu1 %579  ;;  %v576_v16 = vpop.permute.xlu0 %575  ;;  %v1135_v30 = vsel %vm1084_vm3, %v1132_v24, %v1134_v28  ;;  %v1137_v1 = vsel %vm1084_vm3, %v1134_v28, %v1136_v57  ;;  %v1691_v44 = vmul.f32 %v11814_v29, %v11821_v23 }
  0xf5   : > { %v1692_v58 = vmul.f32 %v11830_v17, %v11824_v0  ;;  %v649_v45 = vrot.slane %v580_v27, 1  ;;  %v647_v19 = vrot.slane %v576_v16, 1  ;;  %10050 = vmatprep.mubr.msk.f32.mxu1 %vm388_vm0, %v1135_v30  ;;  %v11846_v30 = vld [vmem:[#allocation2 + $0xe0] sm:$0xff] }
  0xf6   : > { %10051 = vmatmul.mubr.msk.f32.gmra.mxu1 %vm388_vm0, %v1137_v1  ;;  %v1783_v31 = vrot.slane %v1691_v44, 1 }
  0xf7   : > { %v1785_v9 = vrot.slane %v1692_v58, 1  ;;  %v11837_v24 = vsel %vm593_vm2, %v645_v38, %v647_v19  ;;  %v11840_v18 = vsel %vm593_vm2, %v647_v19, %v649_v45  ;;  %v11852_v19 = vpop.f32.mrf.mxu0 }
  0xf8   : > { %15519 = vst [vmem:[#allocation59_spill] sm:$0xff] %v11837_v24  ;;  %15520 = vst [vmem:[#allocation60_spill] sm:$0xff] %v11840_v18  ;;  %v1557_v28 = vpop.permute.xlu1 %1556  ;;  %v1553_v23 = vpop.permute.xlu0 %1552  ;;  %v1784_v37 = vsel %vm593_vm2, %v1781_v3, %v1783_v31  ;;  %v717_v16 = vmul.f32 %v11830_v17, %v11837_v24  ;;  %v718_v1 = vmul.f32 %v11846_v30, %v11840_v18 }
  0xf9   : > { %v1786_v0 = vsel %vm593_vm2, %v1783_v31, %v1785_v9  ;;  %v1625_v27 = vrot.slane %v1557_v28, 7  ;;  %v1623_v38 = vrot.slane %v1553_v23, 7  ;;  %10100 = vmatprep.mubr.msk.f32.mxu0 %vm388_vm0, %v1784_v37  ;;  %15521 = vst [vmem:[#allocation61_spill] sm:$0xff] %v11852_v19  ;;  %v11870_v19 = vpop.f32.mrf.mxu0 }
  0xfa   : > { %10101 = vmatmul.mubr.msk.f32.gmra.mxu0 %vm388_vm0, %v1786_v0  ;;  %v1138_v44 = vrot.slane %v717_v16, 7  ;;  %v1140_v58 = vrot.slane %v718_v1, 7  ;;  %v11864_v0 = vld [vmem:[#allocation2 + $0xe8] sm:$0xff]  ;;  %15524 = vst [vmem:[#allocation64_spill] sm:$0xff] %v11870_v19 }
  0xfb   : > { %v11855_v3 = vsel %vm1084_vm3, %v1621_v39, %v1623_v38  ;;  %v11858_v31 = vsel %vm1084_vm3, %v1623_v38, %v1625_v27  ;;  %v11888_v19 = vpop.f32.mrf.mxu0 }
  0xfc   : > { %15522 = vst [vmem:[#allocation62_spill] sm:$0xff] %v11855_v3  ;;  %15523 = vst [vmem:[#allocation63_spill] sm:$0xff] %v11858_v31  ;;  %v588_v8 = vpop.permute.xlu1 %587  ;;  %v584_v53 = vpop.permute.xlu0 %583  ;;  %v1139_v60 = vsel %vm1084_vm3, %v1136_v57, %v1138_v44  ;;  %v1141_v23 = vsel %vm1084_vm3, %v1138_v44, %v1140_v58  ;;  %v1693_v37 = vmul.f32 %v11846_v30, %v11855_v3 }
  0xfd   : > { %v1694_v28 = vmul.f32 %v11864_v0, %v11858_v31  ;;  %v653_v16 = vrot.slane %v588_v8, 1  ;;  %v651_v39 = vrot.slane %v584_v53, 1  ;;  %10053 = vmatprep.mubr.msk.f32.mxu1 %vm388_vm0, %v1139_v60  ;;  %v11882_v8 = vld [vmem:[#allocation2 + $0xf0] sm:$0xff]  ;;  %15527 = vst [vmem:[#allocation67_spill] sm:$0xff] %v11888_v19  ;;  %v11913_v19 = vld [vmem:[#allocation2 + $0x18] sm:$0xff] }
  0xfe   : > { %10054 = vmatmul.mubr.msk.f32.gmra.mxu1 %vm388_vm0, %v1141_v23  ;;  %v1787_v1 = vrot.slane %v1693_v37, 1 }
  0xff   : > { %v1789_v38 = vrot.slane %v1694_v28, 1  ;;  %v11873_v57 = vsel %vm593_vm2, %v649_v45, %v651_v39  ;;  %v11876_v44 = vsel %vm593_vm2, %v651_v39, %v653_v16 }
 0x100   : > { %15525 = vst [vmem:[#allocation65_spill] sm:$0xff] %v11873_v57  ;;  %15526 = vst [vmem:[#allocation66_spill] sm:$0xff] %v11876_v44  ;;  %v1565_v3 = vpop.permute.xlu1 %1564  ;;  %v1561_v7 = vpop.permute.xlu0 %1560  ;;  %v1788_v31 = vsel %vm593_vm2, %v1785_v9, %v1787_v1  ;;  %v719_v60 = vmul.f32 %v11864_v0, %v11873_v57  ;;  %v720_v23 = vmul.f32 %v11882_v8, %v11876_v44 }
 0x101   : > { %v1790_v53 = vsel %vm593_vm2, %v1787_v1, %v1789_v38  ;;  %v1629_v37 = vrot.slane %v1565_v3, 7  ;;  %v1627_v45 = vrot.slane %v1561_v7, 7  ;;  %10103 = vmatprep.mubr.msk.f32.mxu0 %vm388_vm0, %v1788_v31  ;;  %v11900_v31 = vld [vmem:[#allocation2 + $0xf8] sm:$0xff] }
 0x102   : > { %10104 = vmatmul.mubr.msk.f32.gmra.mxu0 %vm388_vm0, %v1790_v53  ;;  %v1142_v28 = vrot.slane %v719_v60, 7  ;;  %v1144_v39 = vrot.slane %v720_v23, 7 }
 0x103   : > { %v11891_v9 = vsel %vm1084_vm3, %v1625_v27, %v1627_v45  ;;  %v11894_v1 = vsel %vm1084_vm3, %v1627_v45, %v1629_v37  ;;  %v11910_v45 = vld [vmem:[#allocation2 + $0x108] sm:$0xff] }
 0x104   : > { %15528 = vst [vmem:[#allocation68_spill] sm:$0xff] %v11891_v9  ;;  %15529 = vst [vmem:[#allocation69_spill] sm:$0xff] %v11894_v1  ;;  %v1569_v33 = vpop.permute.xlu1 %1568  ;;  %v592_v26 = vpop.permute.xlu0 %591  ;;  %v1143_v14 = vsel %vm1084_vm3, %v1140_v58, %v1142_v28  ;;  %v1145_v7 = vsel %vm1084_vm3, %v1142_v28, %v1144_v39  ;;  %v1695_v3 = vmul.f32 %v11882_v8, %v11891_v9  ;;  %v10883_v28 = vld [vmem:[#allocation2 + $0x10] sm:$0xff] }
 0x105   : > { %v1696_v53 = vmul.f32 %v11900_v31, %v11894_v1  ;;  %v11904_v60 = vrot.slane %v1569_v33, 7  ;;  %v11906_v27 = vrot.slane %v592_v26, 1  ;;  %10056 = vmatprep.mubr.msk.f32.mxu1 %vm388_vm0, %v1143_v14  ;;  %v2123_v9 = vmul.f32 %v10883_v28, %v11443_v36  ;;  %v11917_v33 = vpop.f32.mrf.mxu0  ;;  %v11945_v36 = vld [vmem:[#allocation2 + $0x28] sm:$0xff] }
 0x106   : > { %10057 = vmatmul.mubr.msk.f32.gmra.mxu1 %vm388_vm0, %v1145_v7  ;;  %v1791_v23 = vrot.slane %v1695_v3, 1  ;;  %v2124_v1 = vmul.f32 %v11913_v19, %v11450_v51  ;;  %15532 = vst [vmem:[#allocation72_spill] sm:$0xff] %v11917_v33  ;;  %v11927_v7 = vld [vmem:[#allocation2 + $0x100] sm:$0xff]  ;;  %15535 = vst [vmem:[#allocation75_spill] sm:$0xff] %v11945_v36  ;;  %v2126_v51 = vmul.f32 %v11945_v36, %v11477_v22 }
 0x107   : > { %15530 = vst [vmem:[#allocation70_spill] sm:$0xff] %v11904_v60  ;;  %15531 = vst [vmem:[#allocation71_spill] sm:$0xff] %v11906_v27  ;;  %v1793_v58 = vrot.slane %v1696_v53, 1  ;;  %v11921_v26 = vsel %vm593_vm2, %v653_v16, %v11906_v27  ;;  %v11925_v14 = vsel %vm1084_vm3, %v1629_v37, %v11904_v60  ;;  %v722_v3 = vmul.f32 %v11927_v7, %v11906_v27 }
 0x108   : > { %15533 = vst [vmem:[#allocation73_spill] sm:$0xff] %v11921_v26  ;;  %15534 = vst [vmem:[#allocation74_spill] sm:$0xff] %v11925_v14  ;;  %v1698_v53 = vmul.f32 %v11904_v60, %v11910_v45  ;;  %v1792_v28 = vsel %vm593_vm2, %v1789_v38, %v1791_v23  ;;  %v721_v16 = vmul.f32 %v11900_v31, %v11921_v26 }
 0x109   : > { %v1794_v33 = vsel %vm593_vm2, %v1791_v23, %v1793_v58  ;;  %v1697_v54 = vmul.f32 %v11927_v7, %v11925_v14  ;;  %10106 = vmatprep.mubr.msk.f32.mxu0 %vm388_vm0, %v1792_v28  ;;  %v1148_v37 = vrot.slane %v722_v3, 7  ;;  %v2192_v23 = vrot.slane %v2124_v1, 7  ;;  %v11949_v14 = vpop.f32.mrf.mxu0  ;;  %v11957_v1 = vld [vmem:[#allocation2 + $0x30] sm:$0xff] }
 0x10a   : > { %v1797_v50 = vrot.slane %v1698_v53, 1  ;;  %10107 = vmatmul.mubr.msk.f32.gmra.mxu0 %vm388_vm0, %v1794_v33  ;;  %v1146_v38 = vrot.slane %v721_v16, 7  ;;  %15536 = vst [vmem:[#allocation76_spill] sm:$0xff] %v11949_v14  ;;  %v2191_v28 = vrot.slane %v2123_v9, 7  ;;  %v2127_v33 = vmul.f32 %v11957_v1, %v11480_v25  ;;  %v12064_v14 = vld [vmem:[#allocation2 + $0x70] sm:$0xff] }
 0x10b   : > { %v1795_v60 = vrot.slane %v1697_v54, 1  ;;  %v2194_v54 = vrot.slane %v2125_v49, 7  ;;  %v2196_v9 = vrot.slane %v2126_v51, 7  ;;  %v15538_v49 = vmov 0.0  }
 0x10c   : > { %v1147_v3 = vsel %vm1084_vm3, %v1144_v39, %v1146_v38  ;;  %v1149_v2 = vsel %vm1084_vm3, %v1146_v38, %v1148_v37  ;;  %v2193_v39 = vsel %vm1084_vm3, %v2191_v28, %v2192_v23  ;;  %4520 = vst.msk [vmem:[#allocation3] sm:$0xff] %vm4519_vm4, %v15538_v49  ;;  %4521 = vst.msk [vmem:[#allocation3 + $0x8] sm:$0xff] %vm4519_vm4, %v15538_v49  ;;  %v12000_v28 = vld [vmem:[#allocation2 + $0x48] sm:$0xff] }
 0x10d   : > { %v1796_v53 = vsel %vm593_vm2, %v1793_v58, %v1795_v60  ;;  %v1798_v52 = vsel %vm593_vm2, %v1795_v60, %v1797_v50  ;;  %10059 = vmatprep.mubr.msk.f32.mxu1 %vm388_vm0, %v1147_v3  ;;  %v11964_v58 = vld [vmem:[#allocation2 + $0x38] sm:$0xff]  ;;  %v11968_v60 = vpop.f32.mrf.mxu0  ;;  %4522 = vst.msk [vmem:[#allocation3 + $0x10] sm:$0xff] %vm4519_vm4, %v15538_v49  ;;  %4523 = vst.msk [vmem:[#allocation3 + $0x118] sm:$0xff] %vm4519_vm4, %v15538_v49  ;;  %v2195_v51 = vsel %vm1084_vm3, %v2192_v23, %v2194_v54 }
 0x10e   : > { %10109 = vmatprep.mubr.msk.f32.mxu0 %vm388_vm0, %v1796_v53  ;;  %10060 = vmatmul.mubr.msk.f32.gmra.mxu1 %vm388_vm0, %v1149_v2  ;;  %v2128_v50 = vmul.f32 %v11964_v58, %v11509_v5  ;;  %15537 = vst [vmem:[#allocation77_spill] sm:$0xff] %v11968_v60  ;;  %4524 = vst.msk [vmem:[#allocation3 + $0x120] sm:$0xff] %vm4519_vm4, %v15538_v49  ;;  %v11992_v2 = vld [vmem:[#allocation2 + $0x40] sm:$0xff]  ;;  %v2197_v37 = vsel %vm1084_vm3, %v2194_v54, %v2196_v9  ;;  %v12009_v53 = vld [vmem:[%s15256_s1 + $0x1c] sm:$0xf] }
 0x10f   : > { %10110 = vmatmul.mubr.msk.f32.gmra.mxu0 %vm388_vm0, %v1798_v52  ;;  %10114 = vmatprep.mubr.msk.f32.mxu1 %vm388_vm0, %v2193_v39  ;;  %4525 = vst.msk [vmem:[#allocation3 + $0x128] sm:$0xff] %vm4519_vm4, %v15538_v49  ;;  %8236 = vst.msk [vmem:[#allocation4 + $0x100] sm:$0xff] %vm4519_vm4, %v15538_v49  ;;  %v2198_v52 = vrot.slane %v2127_v33, 7  ;;  %v2129_v16 = vmul.f32 %v11992_v2, %v11512_v63  ;;  %v2130_v3 = vmul.f32 %v12000_v28, %v11537_v55  ;;  %v12004_v23 = vpop.f32.mrf.mxu0  ;;  %v12014_v33 = vld [vmem:[%s15256_s1 + $0x20] sm:$0xf] }
 0x110   : > { %10164 = vmatprep.mubr.msk.f32.mxu0 %vm388_vm0, %v11913_v19  ;;  %8237 = vst.msk [vmem:[#allocation4 + $0x108] sm:$0xff] %vm4519_vm4, %v15538_v49  ;;  %8238 = vst.msk [vmem:[#allocation4 + $0x110] sm:$0xff] %vm4519_vm4, %v15538_v49  ;;  %v2200_v38 = vrot.slane %v2128_v50, 7  ;;  %v12024_v50 = vld [vmem:[#allocation2 + $0x50] sm:$0xff]  ;;  %v12046_v60 = vld [vmem:[#allocation2 + $0x60] sm:$0xff] }
 0x111   : > { %15539 = vst [vmem:[#allocation78_spill] sm:$0xff] %v12004_v23  ;;  %v2199_v54 = vsel %vm1084_vm3, %v2196_v9, %v2198_v52  ;;  %v2202_v39 = vrot.slane %v2129_v16, 7  ;;  %v2131_v49 = vmul.f32 %v12024_v50, %v11540_v6  ;;  %v12036_v9 = vld [vmem:[#allocation2 + $0x58] sm:$0xff]  ;;  %v12040_v16 = vpop.f32.mrf.mxu0 }
 0x112   : > { %10115 = vmatmul.mubr.msk.f32.vlgmr.msra.gmra.mxu1 %vm388_vm0, %v2195_v51  ;;  %v2132_v51 = vmul.f32 %v12036_v9, %v11565_v35  ;;  %15540 = vst [vmem:[#allocation79_spill] sm:$0xff] %v12040_v16 }
 0x113   : > { %10165 = vmatmul.mubr.msk.f32.vlgmr.msra.gmra.mxu0 %vm388_vm0, %v11940_v4  ;;  %10117 = vmatprep.mubr.msk.f32.mxu1 %vm388_vm0, %v2197_v37  ;;  %v2203_v37 = vsel %vm1084_vm3, %v2200_v38, %v2202_v39 }
 0x114   : > { %10167 = vmatprep.mubr.msk.f32.mxu0 %vm388_vm0, %v11945_v36  ;;  %10213 = vmatpush3.msk.msra.mxu1 %vm822_vm1, %v11581_v32  ;;  %v2201_v32 = vsel %vm1084_vm3, %v2198_v52, %v2200_v38  ;;  %v2133_v52 = vmul.f32 %v12046_v60, %v11568_v21  ;;  %v2208_v16 = vrot.slane %v2132_v51, 7  ;;  %v12058_v38 = vpop.f32.mrf.mxu0 }
 0x115   : > { %10263 = vmatpush3.msk.msra.mxu0 %vm822_vm1, %v11594_v61  ;;  %10312 = vmatprep.subr.msk.mxu1 %vm822_vm1, %v12009_v53  ;;  %v2204_v61 = vrot.slane %v2130_v3, 7  ;;  %15541 = vst [vmem:[#allocation80_spill] sm:$0xff] %v12058_v38 }
 0x116   : > { %10362 = vmatprep.subr.msk.mxu0 %vm822_vm1, %v12014_v33  ;;  %10118 = vmatmul.mubr.msk.f32.gmra.mxu1 %vm388_vm0, %v2199_v54  ;;  %v2206_v54 = vrot.slane %v2131_v49, 7 }
 0x117   : > { %10168 = vmatmul.mubr.msk.f32.gmra.mxu0 %vm388_vm0, %v11957_v1  ;;  %10120 = vmatprep.mubr.msk.f32.mxu1 %vm388_vm0, %v2201_v32  ;;  %v2205_v3 = vsel %vm1084_vm3, %v2202_v39, %v2204_v61  ;;  %v12054_v32 = vld [vmem:[#allocation2 + $0x68] sm:$0xff]  ;;  %v2135_v39 = vmul.f32 %v12064_v14, %v11610_v13  ;;  %v12082_v13 = vld [vmem:[#allocation2 + $0x80] sm:$0xff] }
 0x118   : > { %10170 = vmatprep.mubr.msk.f32.mxu0 %vm388_vm0, %v11964_v58  ;;  %v2134_v23 = vmul.f32 %v12054_v32, %v11607_v10  ;;  %v2207_v49 = vsel %vm1084_vm3, %v2204_v61, %v2206_v54  ;;  %v2209_v51 = vsel %vm1084_vm3, %v2206_v54, %v2208_v16  ;;  %v12076_v61 = vpop.f32.mrf.mxu0 }
 0x119   : > { %15542 = vst [vmem:[#allocation81_spill] sm:$0xff] %v12076_v61 }
 0x11a   : > { %10121 = vmatmul.mubr.msk.f32.gmra.mxu1 %vm388_vm0, %v2203_v37  ;;  %v2210_v37 = vrot.slane %v2133_v52, 7  ;;  %v2212_v38 = vrot.slane %v2134_v23, 7  ;;  %v2137_v23 = vmul.f32 %v12082_v13, %v11638_v59  ;;  %v12100_v59 = vld [vmem:[#allocation2 + $0x90] sm:$0xff] }
 0x11b   : > { %10171 = vmatmul.mubr.msk.f32.gmra.mxu0 %vm388_vm0, %v11992_v2  ;;  %10123 = vmatprep.mubr.msk.f32.mxu1 %vm388_vm0, %v2205_v3  ;;  %v12072_v3 = vld [vmem:[#allocation2 + $0x78] sm:$0xff] }
 0x11c   : > { %10173 = vmatprep.mubr.msk.f32.mxu0 %vm388_vm0, %v12000_v28  ;;  %v2136_v10 = vmul.f32 %v12072_v3, %v11635_v42  ;;  %v2211_v52 = vsel %vm1084_vm3, %v2208_v16, %v2210_v37  ;;  %v2213_v54 = vsel %vm1084_vm3, %v2210_v37, %v2212_v38  ;;  %v12094_v16 = vpop.f32.mrf.mxu0 }
 0x11d   : > { %15544 = vst [vmem:[#allocation83_spill] sm:$0xff] %v12094_v16 }
 0x11e   : > { %10124 = vmatmul.mubr.msk.f32.gmra.mxu1 %vm388_vm0, %v2207_v49  ;;  %v2214_v49 = vrot.slane %v2135_v39, 7  ;;  %v2216_v61 = vrot.slane %v2136_v10, 7  ;;  %v2139_v10 = vmul.f32 %v12100_v59, %v11666_v46  ;;  %v12118_v46 = vld [vmem:[#allocation2 + $0xa0] sm:$0xff] }
 0x11f   : > { %10174 = vmatmul.mubr.msk.f32.gmra.mxu0 %vm388_vm0, %v12024_v50  ;;  %10126 = vmatprep.mubr.msk.f32.mxu1 %vm388_vm0, %v2209_v51  ;;  %v12090_v51 = vld [vmem:[#allocation2 + $0x88] sm:$0xff] }
 0x120   : > { %10176 = vmatprep.mubr.msk.f32.mxu0 %vm388_vm0, %v12036_v9  ;;  %15543 = vst [vmem:[#allocation82_spill] sm:$0xff] %v12090_v51  ;;  %v2138_v42 = vmul.f32 %v12090_v51, %v11663_v48  ;;  %v2215_v39 = vsel %vm1084_vm3, %v2212_v38, %v2214_v49  ;;  %v2217_v37 = vsel %vm1084_vm3, %v2214_v49, %v2216_v61  ;;  %v12112_v38 = vpop.f32.mrf.mxu0 }
 0x121   : > { %15545 = vst [vmem:[#allocation84_spill] sm:$0xff] %v12112_v38 }
 0x122   : > { %10127 = vmatmul.mubr.msk.f32.gmra.mxu1 %vm388_vm0, %v2211_v52  ;;  %v2218_v52 = vrot.slane %v2137_v23, 7  ;;  %v2220_v16 = vrot.slane %v2138_v42, 7  ;;  %v2141_v42 = vmul.f32 %v12118_v46, %v11694_v12  ;;  %v12136_v12 = vld [vmem:[#allocation2 + $0xb0] sm:$0xff] }
 0x123   : > { %10177 = vmatmul.mubr.msk.f32.gmra.mxu0 %vm388_vm0, %v12046_v60  ;;  %10129 = vmatprep.mubr.msk.f32.mxu1 %vm388_vm0, %v2213_v54  ;;  %v12108_v54 = vld [vmem:[#allocation2 + $0x98] sm:$0xff] }
 0x124   : > { %10179 = vmatprep.mubr.msk.f32.mxu0 %vm388_vm0, %v12054_v32  ;;  %v2140_v48 = vmul.f32 %v12108_v54, %v11691_v15  ;;  %v2219_v23 = vsel %vm1084_vm3, %v2216_v61, %v2218_v52  ;;  %v2221_v49 = vsel %vm1084_vm3, %v2218_v52, %v2220_v16  ;;  %v12130_v61 = vpop.f32.mrf.mxu0 }
 0x125   : > { %15546 = vst [vmem:[#allocation85_spill] sm:$0xff] %v12130_v61 }
 0x126   : > { %10130 = vmatmul.mubr.msk.f32.gmra.mxu1 %vm388_vm0, %v2215_v39  ;;  %v2222_v39 = vrot.slane %v2139_v10, 7  ;;  %v2224_v38 = vrot.slane %v2140_v48, 7  ;;  %v2143_v48 = vmul.f32 %v12136_v12, %v11722_v41  ;;  %v12154_v41 = vld [vmem:[#allocation2 + $0xc0] sm:$0xff] }
 0x127   : > { %10180 = vmatmul.mubr.msk.f32.gmra.mxu0 %vm388_vm0, %v12064_v14  ;;  %10132 = vmatprep.mubr.msk.f32.mxu1 %vm388_vm0, %v2217_v37  ;;  %v12126_v37 = vld [vmem:[#allocation2 + $0xa8] sm:$0xff]  ;;  %15548 = vst [vmem:[#allocation87_spill] sm:$0xff] %v12154_v41 }
 0x128   : > { %10182 = vmatprep.mubr.msk.f32.mxu0 %vm388_vm0, %v12072_v3  ;;  %v2142_v15 = vmul.f32 %v12126_v37, %v11719_v47  ;;  %v2223_v10 = vsel %vm1084_vm3, %v2220_v16, %v2222_v39  ;;  %v2225_v52 = vsel %vm1084_vm3, %v2222_v39, %v2224_v38  ;;  %v12148_v16 = vpop.f32.mrf.mxu0 }
 0x129   : > { %15547 = vst [vmem:[#allocation86_spill] sm:$0xff] %v12148_v16 }
 0x12a   : > { %10133 = vmatmul.mubr.msk.f32.gmra.mxu1 %vm388_vm0, %v2219_v23  ;;  %v2226_v23 = vrot.slane %v2141_v42, 7  ;;  %v2228_v61 = vrot.slane %v2142_v15, 7  ;;  %v2145_v15 = vmul.f32 %v12154_v41, %v11750_v43 }
 0x12b   : > { %10183 = vmatmul.mubr.msk.f32.gmra.mxu0 %vm388_vm0, %v12082_v13  ;;  %10135 = vmatprep.mubr.msk.f32.mxu1 %vm388_vm0, %v2221_v49  ;;  %v12144_v49 = vld [vmem:[#allocation2 + $0xb8] sm:$0xff] }
 0x12c   : > { %10185 = vmatprep.mubr.msk.f32.mxu0 %vm388_vm0, %v12090_v51  ;;  %v2144_v47 = vmul.f32 %v12144_v49, %v11747_v62  ;;  %v2227_v42 = vsel %vm1084_vm3, %v2224_v38, %v2226_v23  ;;  %v2229_v39 = vsel %vm1084_vm3, %v2226_v23, %v2228_v61  ;;  %v12164_v62 = vpop.f32.mrf.mxu0 }
 0x12d   : > { %15549 = vst [vmem:[#allocation88_spill] sm:$0xff] %v12164_v62  ;;  %v12178_v62 = vpop.f32.mrf.mxu1 }
 0x12e   : > { %10136 = vmatmul.mubr.msk.f32.gmra.mxu1 %vm388_vm0, %v2223_v10  ;;  %v2230_v10 = vrot.slane %v2143_v48, 7  ;;  %v2232_v16 = vrot.slane %v2144_v47, 7  ;;  %v2234_v48 = vrot.slane %v2145_v15, 7  ;;  %15550 = vst [vmem:[#allocation89_spill] sm:$0xff] %v12178_v62 }
 0x12f   : > { %10186 = vmatmul.mubr.msk.f32.gmra.mxu0 %vm388_vm0, %v12100_v59  ;;  %10138 = vmatprep.mubr.msk.f32.mxu1 %vm388_vm0, %v2225_v52  ;;  %v2146_v52 = vmul.f32 %v11798_v20, %v11775_v40  ;;  %v12180_v40 = vpop.f32.mrf.mxu0  ;;  %v12194_v62 = vpop.f32.mrf.mxu1 }
 0x130   : > { %10188 = vmatprep.mubr.msk.f32.mxu0 %vm388_vm0, %v12108_v54  ;;  %v2231_v38 = vsel %vm1084_vm3, %v2228_v61, %v2230_v10  ;;  %v2233_v47 = vsel %vm1084_vm3, %v2230_v10, %v2232_v16  ;;  %15551 = vst [vmem:[#allocation90_spill] sm:$0xff] %v12180_v40  ;;  %v2235_v61 = vsel %vm1084_vm3, %v2232_v16, %v2234_v48  ;;  %15552 = vst [vmem:[#allocation91_spill] sm:$0xff] %v12194_v62 }
 0x131   : > { %v2236_v23 = vrot.slane %v2146_v52, 7  ;;  %v12196_v40 = vpop.f32.mrf.mxu0  ;;  %v12210_v62 = vpop.f32.mrf.mxu1 }
 0x132   : > { %10139 = vmatmul.mubr.msk.f32.gmra.mxu1 %vm388_vm0, %v2227_v42  ;;  %v2147_v42 = vmul.f32 %v11814_v29, %v11778_v11  ;;  %15553 = vst [vmem:[#allocation92_spill] sm:$0xff] %v12196_v40  ;;  %15554 = vst [vmem:[#allocation93_spill] sm:$0xff] %v12210_v62 }
 0x133   : > { %10189 = vmatmul.mubr.msk.f32.gmra.mxu0 %vm388_vm0, %v12118_v46  ;;  %10141 = vmatprep.mubr.msk.f32.mxu1 %vm388_vm0, %v2229_v39  ;;  %v2148_v39 = vmul.f32 %v11830_v17, %v11805_v56  ;;  %v2237_v10 = vsel %vm1084_vm3, %v2234_v48, %v2236_v23  ;;  %v12212_v40 = vpop.f32.mrf.mxu0  ;;  %v12226_v62 = vpop.f32.mrf.mxu1 }
 0x134   : > { %10191 = vmatprep.mubr.msk.f32.mxu0 %vm388_vm0, %v12126_v37  ;;  %v2238_v15 = vrot.slane %v2147_v42, 7  ;;  %15555 = vst [vmem:[#allocation94_spill] sm:$0xff] %v12212_v40  ;;  %15556 = vst [vmem:[#allocation95_spill] sm:$0xff] %v12226_v62 }
 0x135   : > { %v2240_v52 = vrot.slane %v2148_v39, 7  ;;  %v12228_v40 = vpop.f32.mrf.mxu0 }
 0x136   : > { %10142 = vmatmul.mubr.msk.f32.gmra.mxu1 %vm388_vm0, %v2231_v38  ;;  %v2149_v38 = vmul.f32 %v11846_v30, %v11808_v34  ;;  %v2239_v16 = vsel %vm1084_vm3, %v2236_v23, %v2238_v15  ;;  %15557 = vst [vmem:[#allocation96_spill] sm:$0xff] %v12228_v40  ;;  %v15559_v40 = vld [vmem:[#allocation9_spill] sm:$0xff] }
 0x137   : > { %10192 = vmatmul.mubr.msk.f32.gmra.mxu0 %vm388_vm0, %v12136_v12  ;;  %10144 = vmatprep.mubr.msk.f32.mxu1 %vm388_vm0, %v2233_v47  ;;  %v2150_v47 = vmul.f32 %v11864_v0, %v11837_v24  ;;  %v2241_v48 = vsel %vm1084_vm3, %v2238_v15, %v2240_v52  ;;  %v15566_v24 = vld [vmem:[#allocation13_spill] sm:$0xff] }
 0x138   : > { %10194 = vmatprep.mubr.msk.f32.mxu0 %vm388_vm0, %v12144_v49  ;;  %v2242_v42 = vrot.slane %v2149_v38, 7 }
 0x139   : > { %v2244_v39 = vrot.slane %v2150_v47, 7 }
 0x13a   : > { %10145 = vmatmul.mubr.msk.f32.gmra.mxu1 %vm388_vm0, %v2235_v61  ;;  %v2151_v61 = vmul.f32 %v11882_v8, %v11840_v18  ;;  %v2243_v23 = vsel %vm1084_vm3, %v2240_v52, %v2242_v42  ;;  %v12233_v52 = vld [vmem:[#allocation2 + $0x110] sm:$0xff] }
 0x13b   : > { %10195 = vmatmul.mubr.msk.f32.gmra.mxu0 %vm388_vm0, %v12154_v41  ;;  %10147 = vmatprep.mubr.msk.f32.mxu1 %vm388_vm0, %v2237_v10  ;;  %v2152_v10 = vmul.f32 %v11900_v31, %v11873_v57  ;;  %v2245_v15 = vsel %vm1084_vm3, %v2242_v42, %v2244_v39  ;;  %v2155_v42 = vmul.f32 %v11906_v27, %v12233_v52 }
 0x13c   : > { %10197 = vmatprep.mubr.msk.f32.mxu0 %vm388_vm0, %v11798_v20  ;;  %v2246_v38 = vrot.slane %v2151_v61, 7 }
 0x13d   : > { %v2248_v47 = vrot.slane %v2152_v10, 7  ;;  %v2254_v18 = vrot.slane %v2155_v42, 7 }
 0x13e   : > { %10148 = vmatmul.mubr.msk.f32.gmra.mxu1 %vm388_vm0, %v2239_v16  ;;  %v2153_v16 = vmul.f32 %v11927_v7, %v11876_v44  ;;  %v2247_v61 = vsel %vm1084_vm3, %v2244_v39, %v2246_v38  ;;  %v15560_v44 = vld [vmem:[#allocation7_spill] sm:$0xff] }
 0x13f   : > { %10198 = vmatmul.mubr.msk.f32.gmra.mxu0 %vm388_vm0, %v11814_v29  ;;  %10150 = vmatprep.mubr.msk.f32.mxu1 %vm388_vm0, %v2241_v48  ;;  %v2154_v48 = vmul.f32 %v11921_v26, %v11910_v45  ;;  %v2249_v10 = vsel %vm1084_vm3, %v2246_v38, %v2248_v47  ;;  %v2849_v26 = vmul.f32 %v11940_v4, %v15559_v40  ;;  %v15563_v38 = vld [vmem:[#allocation6_spill] sm:$0xff] }
 0x140   : > { %10200 = vmatprep.mubr.msk.f32.mxu0 %vm388_vm0, %v11830_v17  ;;  %v3306_v39 = vmul.f32 %v11945_v36, %v15560_v44  ;;  %v15565_v44 = vld [vmem:[#allocation10_spill] sm:$0xff] }
 0x141   : > { %v2252_v62 = vrot.slane %v2154_v48, 7  ;;  %v2848_v48 = vmul.f32 %v11913_v19, %v15563_v38  ;;  %v2917_v19 = vrot.slane %v2849_v26, 1  ;;  %v3309_v26 = vmul.f32 %v11992_v2, %v11480_v25 }
 0x142   : > { %10151 = vmatmul.mubr.msk.f32.gmra.mxu1 %vm388_vm0, %v2243_v23  ;;  %v2250_v23 = vrot.slane %v2153_v16, 7  ;;  %v12248_v16 = vpop.f32.mrf.mxu0 }
 0x143   : > { %10201 = vmatmul.mubr.msk.f32.gmra.mxu0 %vm388_vm0, %v11846_v30  ;;  %10153 = vmatprep.mubr.msk.f32.mxu1 %vm388_vm0, %v2245_v15  ;;  %v12242_v15 = vpop.f32.mrf.mxu1  ;;  %15561 = vst [vmem:[#allocation98_spill] sm:$0xff] %v12248_v16  ;;  %v2850_v16 = vmul.f32 %v11945_v36, %v15565_v44  ;;  %v2916_v42 = vrot.slane %v2848_v48, 1  ;;  %v15569_v36 = vld [vmem:[#allocation14_spill] sm:$0xff]  ;;  %v15570_v44 = vld [vmem:[#allocation17_spill] sm:$0xff] }
 0x144   : > { %10203 = vmatprep.mubr.msk.f32.mxu0 %vm388_vm0, %v11864_v0  ;;  %15558 = vst [vmem:[#allocation97_spill] sm:$0xff] %v12242_v15  ;;  %v15564_v15 = vld [vmem:[#allocation8_spill] sm:$0xff]  ;;  %v2251_v40 = vsel %vm1084_vm3, %v2248_v47, %v2250_v23  ;;  %v3308_v47 = vmul.f32 %v11964_v58, %v11477_v22  ;;  %v2853_v22 = vmul.f32 %v11992_v2, %v15570_v44 }
 0x145   : > { %v3307_v57 = vmul.f32 %v11957_v1, %v15564_v15  ;;  %v12268_v38 = vpop.f32.mrf.mxu1  ;;  %v12270_v15 = vpop.f32.mrf.mxu0 }
 0x146   : > { %10154 = vmatmul.mubr.msk.f32.gmra.mxu1 %vm388_vm0, %v2247_v61  ;;  %v15562_v61 = vld [vmem:[#allocation5_spill] sm:$0xff]  ;;  %15567 = vst [vmem:[#allocation99_spill] sm:$0xff] %v12268_v38  ;;  %15568 = vst [vmem:[#allocation100_spill] sm:$0xff] %v12270_v15  ;;  %v2919_v38 = vrot.slane %v2850_v16, 1 }
 0x147   : > { %10204 = vmatmul.mubr.msk.f32.gmra.mxu0 %vm388_vm0, %v11882_v8  ;;  %10156 = vmatprep.mubr.msk.f32.mxu1 %vm388_vm0, %v2249_v10  ;;  %v3305_v27 = vmul.f32 %v11940_v4, %v15562_v61  ;;  %v2851_v10 = vmul.f32 %v11957_v1, %v15566_v24  ;;  %v2253_v4 = vsel %vm1084_vm3, %v2250_v23, %v2252_v62  ;;  %v3374_v61 = vrot.slane %v3306_v39, 7  ;;  %v12289_v48 = vpop.f32.mrf.mxu1  ;;  %v12291_v25 = vpop.f32.mrf.mxu0 }
 0x148   : > { %10206 = vmatprep.mubr.msk.f32.mxu0 %vm388_vm0, %v11900_v31  ;;  %v3376_v24 = vrot.slane %v3307_v57, 7  ;;  %v2852_v23 = vmul.f32 %v11964_v58, %v15569_v36  ;;  %v2255_v39 = vsel %vm1084_vm3, %v2252_v62, %v2254_v18  ;;  %v2918_v57 = vsel %vm593_vm2, %v2916_v42, %v2917_v19  ;;  %15571 = vst [vmem:[#allocation101_spill] sm:$0xff] %v12289_v48 }
 0x149   : > { %v2921_v15 = vrot.slane %v2851_v10, 1  ;;  %15572 = vst [vmem:[#allocation102_spill] sm:$0xff] %v12291_v25  ;;  %v3310_v62 = vmul.f32 %v12000_v28, %v11509_v5  ;;  %v3380_v10 = vrot.slane %v3309_v26, 7  ;;  %v2925_v48 = vrot.slane %v2853_v22, 1 }
 0x14a   : > { %10157 = vmatmul.mubr.msk.f32.gmra.mxu1 %vm388_vm0, %v2251_v40  ;;  %v3373_v40 = vrot.slane %v3305_v27, 7  ;;  %v3377_v18 = vsel %vm1084_vm3, %v3374_v61, %v3376_v24  ;;  %v2923_v16 = vrot.slane %v2852_v23, 1  ;;  %v3311_v25 = vmul.f32 %v12024_v50, %v11512_v63  ;;  %v12309_v23 = vpop.f32.mrf.mxu0 }
 0x14b   : > { %10207 = vmatmul.mubr.msk.f32.gmra.mxu0 %vm388_vm0, %v11927_v7  ;;  %10159 = vmatprep.mubr.msk.f32.mxu1 %vm388_vm0, %v2253_v4  ;;  %v3378_v4 = vrot.slane %v3308_v47, 7  ;;  %v2922_v47 = vsel %vm593_vm2, %v2919_v38, %v2921_v15  ;;  %15575 = vst [vmem:[#allocation104_spill] sm:$0xff] %v12309_v23  ;;  %v3382_v26 = vrot.slane %v3310_v62, 7  ;;  %v3312_v22 = vmul.f32 %v12036_v9, %v11537_v55  ;;  %v15578_v55 = vld [vmem:[#allocation22_spill] sm:$0xff] }
 0x14c   : > { %10209 = vmatprep.mubr.msk.f32.mxu0 %vm388_vm0, %v11910_v45  ;;  %v3375_v27 = vsel %vm1084_vm3, %v3373_v40, %v3374_v61  ;;  %v2920_v40 = vsel %vm593_vm2, %v2917_v19, %v2919_v38  ;;  %v12307_v61 = vpop.f32.mrf.mxu1  ;;  %v12320_v38 = vld [vmem:[%s15257_s2 + $0x8] sm:$0xff]  ;;  %v2924_v62 = vsel %vm593_vm2, %v2921_v15, %v2923_v16  ;;  %v3384_v5 = vrot.slane %v3311_v25, 7 }
 0x14d   : > { %15574 = vst [vmem:[#allocation103_spill] sm:$0xff] %v12307_v61  ;;  %v3313_v63 = vmul.f32 %v12046_v60, %v11540_v6  ;;  %v15579_v61 = vld [vmem:[#allocation25_spill] sm:$0xff]  ;;  %v15581_v6 = vld [vmem:[#allocation26_spill] sm:$0xff] }
 0x14e   : > { %10160 = vmatmul.mubr.msk.f32.gmra.mxu1 %vm388_vm0, %v2255_v39  ;;  %v15573_v39 = vld [vmem:[#allocation18_spill] sm:$0xff]  ;;  %v2857_v15 = vmul.f32 %v12046_v60, %v15579_v61  ;;  %v2858_v23 = vmul.f32 %v12054_v32, %v15581_v6 }
 0x14f   : > { %10210 = vmatmul.mubr.msk.f32.gmra.mxu0 %vm388_vm0, %v12233_v52  ;;  %10214 = vmatprep.mubr.msk.f32.mxu1 %vm388_vm0, %v2918_v57  ;;  %v2854_v42 = vmul.f32 %v12000_v28, %v15573_v39  ;;  %v3379_v57 = vsel %vm1084_vm3, %v3376_v24, %v3378_v4  ;;  %v12325_v24 = vld [vmem:[%s15257_s2] sm:$0xff] }
 0x150   : > { %10264 = vmatprep.mubr.msk.f32.mxu0 %vm388_vm0, %v3375_v27  ;;  %v15576_v27 = vld [vmem:[#allocation21_spill] sm:$0xff]  ;;  %15577 = vst [vmem:[#allocation105_spill] sm:$0xff] %v12325_v24 }
 0x151   : > { %v2855_v19 = vmul.f32 %v12024_v50, %v15576_v27 }
 0x152   : > { %10215 = vmatmul.mubr.msk.f32.vlgmr.msra.gmra.mxu1 %vm388_vm0, %v2920_v40  ;;  %v2927_v40 = vrot.slane %v2854_v42, 1  ;;  %v3314_v42 = vmul.f32 %v12054_v32, %v11565_v35  ;;  %v3385_v35 = vsel %vm1084_vm3, %v3382_v26, %v3384_v5 }
 0x153   : > { %10265 = vmatmul.mubr.msk.f32.vlgmr.msra.gmra.mxu0 %vm388_vm0, %v3377_v18  ;;  %10217 = vmatprep.mubr.msk.f32.mxu1 %vm388_vm0, %v2922_v47  ;;  %v3381_v18 = vsel %vm1084_vm3, %v3378_v4, %v3380_v10  ;;  %v2856_v47 = vmul.f32 %v12036_v9, %v15578_v55  ;;  %v2929_v25 = vrot.slane %v2855_v19, 1  ;;  %v3388_v55 = vrot.slane %v3313_v63, 7 }
 0x154   : > { %10267 = vmatprep.mubr.msk.f32.mxu0 %vm388_vm0, %v3379_v57  ;;  %10313 = vmatpush3.msk.msra.mxu1 %vm822_vm1, %v12009_v53  ;;  %v2926_v57 = vsel %vm593_vm2, %v2923_v16, %v2925_v48  ;;  %v3383_v53 = vsel %vm1084_vm3, %v3380_v10, %v3382_v26  ;;  %v3386_v16 = vrot.slane %v3312_v22, 7  ;;  %v3315_v10 = vmul.f32 %v12064_v14, %v11568_v21  ;;  %v15583_v22 = vld [vmem:[#allocation61_spill] sm:$0xff]  ;;  %v15584_v21 = vld [vmem:[#allocation27_spill] sm:$0xff] }
 0x155   : > { %10363 = vmatpush3.msk.msra.mxu0 %vm822_vm1, %v12014_v33  ;;  %10412 = vmatprep.subr.mxu1 %v12320_v38  ;;  %v12345_v33 = vpop.f32.mrf.mxu0  ;;  %v2931_v61 = vrot.slane %v2856_v47, 1  ;;  %v3316_v6 = vmul.f32 %v12072_v3, %v15584_v21  ;;  %v2935_v63 = vrot.slane %v2858_v23, 1  ;;  %v15593_v21 = vld [vmem:[#allocation32_spill] sm:$0xff] }
 0x156   : > { %10462 = vmatprep.subr.mxu0 %v12325_v24  ;;  %v10016_v4 = vpop.f32.mrf.mxu1  ;;  %10218 = vmatmul.mubr.msk.f32.gmra.mxu1 %vm388_vm0, %v2924_v62  ;;  %15580 = vst [vmem:[#allocation106_spill] sm:$0xff] %v12345_v33  ;;  %v2928_v62 = vsel %vm593_vm2, %v2925_v48, %v2927_v40  ;;  %v2930_v48 = vsel %vm593_vm2, %v2927_v40, %v2929_v25 }
 0x157   : > { %10268 = vmatmul.mubr.msk.f32.gmra.mxu0 %vm388_vm0, %v3381_v18  ;;  %10220 = vmatprep.mubr.msk.f32.mxu1 %vm388_vm0, %v2926_v57  ;;  %v15582_v18 = vld [vmem:[#allocation29_spill] sm:$0xff]  ;;  %v1289_v33 = vadd.f32 %v10016_v4, %v15583_v22  ;;  %v2933_v57 = vrot.slane %v2857_v15, 1  ;;  %v3387_v47 = vsel %vm1084_vm3, %v3384_v5, %v3386_v16  ;;  %v2932_v15 = vsel %vm593_vm2, %v2929_v25, %v2931_v61 }
 0x158   : > { %10270 = vmatprep.mubr.msk.f32.mxu0 %vm388_vm0, %v3383_v53  ;;  %v2859_v19 = vmul.f32 %v12064_v14, %v15582_v18  ;;  %v3390_v53 = vrot.slane %v3314_v42, 7  ;;  %v12370_v26 = vpop.f32.mrf.mxu1  ;;  %v3389_v40 = vsel %vm1084_vm3, %v3386_v16, %v3388_v55  ;;  %v15587_v42 = vld [vmem:[#allocation30_spill] sm:$0xff]  ;;  %v3394_v25 = vrot.slane %v3316_v6, 7  ;;  %v15590_v16 = vld [vmem:[#allocation31_spill] sm:$0xff] }
 0x159   : > { %15586 = vst [vmem:[#allocation107_spill] sm:$0xff] %v12370_v26  ;;  %v2934_v5 = vsel %vm593_vm2, %v2931_v61, %v2933_v57  ;;  %v3318_v61 = vmul.f32 %v12090_v51, %v15590_v16  ;;  %v15594_v26 = vld [vmem:[#allocation67_spill] sm:$0xff] }
 0x15a   : > { %v10066_v24 = vpop.f32.mrf.mxu0  ;;  %10221 = vmatmul.mubr.msk.f32.gmra.mxu1 %vm388_vm0, %v2928_v62  ;;  %v2937_v4 = vrot.slane %v2859_v19, 1  ;;  %v2860_v62 = vmul.f32 %v12072_v3, %v15587_v42  ;;  %v3391_v23 = vsel %vm1084_vm3, %v3388_v55, %v3390_v53  ;;  %v15592_v55 = vld [vmem:[#allocation34_spill] sm:$0xff] }
 0x15b   : > { %10271 = vmatmul.mubr.msk.f32.gmra.mxu0 %vm388_vm0, %v3385_v35  ;;  %v12366_v18 = vadd.f32 %v10066_v24, %v1289_v33  ;;  %10223 = vmatprep.mubr.msk.f32.mxu1 %vm388_vm0, %v2930_v48  ;;  %v3392_v35 = vrot.slane %v3315_v10, 7  ;;  %v15588_v24 = vld [vmem:[#allocation28_spill] sm:$0xff]  ;;  %v15589_v10 = vld [vmem:[#allocation33_spill] sm:$0xff]  ;;  %v2936_v48 = vsel %vm593_vm2, %v2933_v57, %v2935_v63  ;;  %v2862_v6 = vmul.f32 %v12090_v51, %v15592_v55  ;;  %v15596_v55 = vld [vmem:[#allocation35_spill] sm:$0xff] }
 0x15c   : > { %10273 = vmatprep.mubr.msk.f32.mxu0 %vm388_vm0, %v3387_v47  ;;  %v3317_v33 = vmul.f32 %v12082_v13, %v15588_v24  ;;  %v2861_v19 = vmul.f32 %v12082_v13, %v15589_v10  ;;  %v12389_v47 = vpop.f32.mrf.mxu0  ;;  %v3319_v24 = vmul.f32 %v12100_v59, %v15593_v21  ;;  %v15595_v10 = vld [vmem:[#allocation37_spill] sm:$0xff]  ;;  %v3320_v51 = vmul.f32 %v12108_v54, %v15596_v55 }
 0x15d   : > { %15585 = vst [vmem:[#allocation61_spill] sm:$0xff] %v12366_v18  ;;  %15591 = vst [vmem:[#allocation108_spill] sm:$0xff] %v12389_v47  ;;  %v2939_v18 = vrot.slane %v2860_v62, 1  ;;  %v3398_v47 = vrot.slane %v3318_v61, 7  ;;  %v2943_v62 = vrot.slane %v2862_v6, 1 }
 0x15e   : > { %v10019_v22 = vpop.f32.mrf.mxu1  ;;  %10224 = vmatmul.mubr.msk.f32.gmra.mxu1 %vm388_vm0, %v2932_v15  ;;  %v3393_v15 = vsel %vm1084_vm3, %v3390_v53, %v3392_v35  ;;  %v3395_v53 = vsel %vm1084_vm3, %v3392_v35, %v3394_v25 }
 0x15f   : > { %10274 = vmatmul.mubr.msk.f32.gmra.mxu0 %vm388_vm0, %v3389_v40  ;;  %10226 = vmatprep.mubr.msk.f32.mxu1 %vm388_vm0, %v2934_v5  ;;  %v2938_v40 = vsel %vm593_vm2, %v2935_v63, %v2937_v4  ;;  %v1299_v16 = vadd.f32 %v10019_v22, %v15594_v26  ;;  %v3396_v5 = vrot.slane %v3317_v33, 7  ;;  %v2941_v63 = vrot.slane %v2861_v19, 1  ;;  %v15599_v22 = vld [vmem:[#allocation38_spill] sm:$0xff] }
 0x160   : > { %10276 = vmatprep.mubr.msk.f32.mxu0 %vm388_vm0, %v3391_v23  ;;  %v2863_v23 = vmul.f32 %v12100_v59, %v15595_v10  ;;  %v12409_v26 = vpop.f32.mrf.mxu1  ;;  %v3400_v33 = vrot.slane %v3319_v24, 7  ;;  %v2940_v19 = vsel %vm593_vm2, %v2937_v4, %v2939_v18  ;;  %v15603_v4 = vld [vmem:[#allocation42_spill] sm:$0xff] }
 0x161   : > { %15598 = vst [vmem:[#allocation109_spill] sm:$0xff] %v12409_v26  ;;  %v3397_v61 = vsel %vm1084_vm3, %v3394_v25, %v3396_v5  ;;  %v2942_v24 = vsel %vm593_vm2, %v2939_v18, %v2941_v63  ;;  %v3399_v6 = vsel %vm1084_vm3, %v3396_v5, %v3398_v47  ;;  %v15602_v26 = vld [vmem:[#allocation39_spill] sm:$0xff]  ;;  %v2866_v25 = vmul.f32 %v12126_v37, %v15603_v4  ;;  %v15605_v5 = vld [vmem:[#allocation76_spill] sm:$0xff]  ;;  %v15607_v4 = vld [vmem:[#allocation45_spill] sm:$0xff] }
 0x162   : > { %v10069_v57 = vpop.f32.mrf.mxu0  ;;  %10227 = vmatmul.mubr.msk.f32.gmra.mxu1 %vm388_vm0, %v2936_v48  ;;  %v2864_v48 = vmul.f32 %v12108_v54, %v15599_v22  ;;  %v15606_v22 = vld [vmem:[#allocation40_spill] sm:$0xff] }
 0x163   : > { %10277 = vmatmul.mubr.msk.f32.gmra.mxu0 %vm388_vm0, %v3393_v15  ;;  %v12405_v21 = vadd.f32 %v10069_v57, %v1299_v16  ;;  %10229 = vmatprep.mubr.msk.f32.mxu1 %vm388_vm0, %v2938_v40  ;;  %v15600_v15 = vld [vmem:[#allocation36_spill] sm:$0xff]  ;;  %v2945_v16 = vrot.slane %v2863_v23, 1  ;;  %v15601_v57 = vld [vmem:[#allocation41_spill] sm:$0xff] }
 0x164   : > { %10279 = vmatprep.mubr.msk.f32.mxu0 %vm388_vm0, %v3395_v53  ;;  %v3321_v35 = vmul.f32 %v12118_v46, %v15600_v15  ;;  %v2865_v40 = vmul.f32 %v12118_v46, %v15601_v57  ;;  %v3402_v53 = vrot.slane %v3320_v51, 7  ;;  %v3322_v15 = vmul.f32 %v12126_v37, %v15602_v26  ;;  %v12429_v23 = vpop.f32.mrf.mxu0 }
 0x165   : > { %15597 = vst [vmem:[#allocation67_spill] sm:$0xff] %v12405_v21  ;;  %15604 = vst [vmem:[#allocation110_spill] sm:$0xff] %v12429_v23  ;;  %v2947_v18 = vrot.slane %v2864_v48, 1  ;;  %v2946_v57 = vsel %vm593_vm2, %v2943_v62, %v2945_v16  ;;  %v15608_v48 = vld [vmem:[#allocation43_spill] sm:$0xff] }
 0x166   : > { %v10022_v55 = vpop.f32.mrf.mxu1  ;;  %10230 = vmatmul.mubr.msk.f32.gmra.mxu1 %vm388_vm0, %v2940_v19  ;;  %v2944_v19 = vsel %vm593_vm2, %v2941_v63, %v2943_v62  ;;  %v3404_v21 = vrot.slane %v3321_v35, 7  ;;  %v2949_v26 = vrot.slane %v2865_v40, 1  ;;  %v3403_v23 = vsel %vm1084_vm3, %v3400_v33, %v3402_v53 }
 0x167   : > { %10280 = vmatmul.mubr.msk.f32.gmra.mxu0 %vm388_vm0, %v3397_v61  ;;  %10232 = vmatprep.mubr.msk.f32.mxu1 %vm388_vm0, %v2942_v24  ;;  %v3401_v61 = vsel %vm1084_vm3, %v3398_v47, %v3400_v33  ;;  %v1309_v51 = vadd.f32 %v10022_v55, %v15605_v5  ;;  %v3323_v24 = vmul.f32 %v12136_v12, %v15606_v22  ;;  %v3406_v63 = vrot.slane %v3322_v15, 7  ;;  %v15611_v15 = vld [vmem:[#allocation46_spill] sm:$0xff] }
 0x168   : > { %10282 = vmatprep.mubr.msk.f32.mxu0 %vm388_vm0, %v3399_v6  ;;  %v2867_v47 = vmul.f32 %v12136_v12, %v15607_v4  ;;  %v3324_v55 = vmul.f32 %v12144_v49, %v15608_v48  ;;  %v2951_v62 = vrot.slane %v2866_v25, 1  ;;  %v12448_v40 = vpop.f32.mrf.mxu1  ;;  %v3405_v33 = vsel %vm1084_vm3, %v3402_v53, %v3404_v21  ;;  %v15612_v48 = vld [vmem:[#allocation44_spill] sm:$0xff] }
 0x169   : > { %15610 = vst [vmem:[#allocation111_spill] sm:$0xff] %v12448_v40  ;;  %v2950_v5 = vsel %vm593_vm2, %v2947_v18, %v2949_v26  ;;  %v3408_v22 = vrot.slane %v3323_v24, 7  ;;  %v15614_v40 = vld [vmem:[#allocation47_spill] sm:$0xff] }
 0x16a   : > { %v10072_v6 = vpop.f32.mrf.mxu0  ;;  %10233 = vmatmul.mubr.msk.f32.gmra.mxu1 %vm388_vm0, %v2944_v19  ;;  %v2948_v19 = vsel %vm593_vm2, %v2945_v16, %v2947_v18  ;;  %v3407_v16 = vsel %vm1084_vm3, %v3404_v21, %v3406_v63  ;;  %v2953_v53 = vrot.slane %v2867_v47, 1  ;;  %v3410_v25 = vrot.slane %v3324_v55, 7  ;;  %v15617_v47 = vld [vmem:[#allocation53_spill] sm:$0xff] }
 0x16b   : > { %10283 = vmatmul.mubr.msk.f32.gmra.mxu0 %vm388_vm0, %v3401_v61  ;;  %v12444_v35 = vadd.f32 %v10072_v6, %v1309_v51  ;;  %10235 = vmatprep.mubr.msk.f32.mxu1 %vm388_vm0, %v2946_v57  ;;  %v2868_v61 = vmul.f32 %v12144_v49, %v15611_v15  ;;  %v3325_v51 = vmul.f32 %v12154_v41, %v15612_v48  ;;  %v15613_v6 = vld [vmem:[#allocation49_spill] sm:$0xff] }
 0x16c   : > { %10285 = vmatprep.mubr.msk.f32.mxu0 %vm388_vm0, %v3403_v23  ;;  %v2869_v57 = vmul.f32 %v12154_v41, %v15613_v6  ;;  %v2952_v18 = vsel %vm593_vm2, %v2949_v26, %v2951_v62  ;;  %v12467_v24 = vpop.f32.mrf.mxu0  ;;  %v15616_v6 = vld [vmem:[#allocation50_spill] sm:$0xff]  ;;  %v3327_v21 = vmul.f32 %v11814_v29, %v11750_v43  ;;  %v2871_v55 = vmul.f32 %v11814_v29, %v15617_v47  ;;  %v15619_v43 = vld [vmem:[#allocation51_spill] sm:$0xff] }
 0x16d   : > { %15609 = vst [vmem:[#allocation76_spill] sm:$0xff] %v12444_v35  ;;  %v3326_v35 = vmul.f32 %v11798_v20, %v15614_v40  ;;  %15615 = vst [vmem:[#allocation112_spill] sm:$0xff] %v12467_v24  ;;  %v2955_v48 = vrot.slane %v2868_v61, 1  ;;  %v3412_v15 = vrot.slane %v3325_v51, 7  ;;  %v2954_v26 = vsel %vm593_vm2, %v2951_v62, %v2953_v53 }
 0x16e   : > { %v10025_v23 = vpop.f32.mrf.mxu1  ;;  %10236 = vmatmul.mubr.msk.f32.gmra.mxu1 %vm388_vm0, %v2948_v19  ;;  %v2870_v19 = vmul.f32 %v11798_v20, %v15616_v6  ;;  %v3411_v20 = vsel %vm1084_vm3, %v3408_v22, %v3410_v25  ;;  %v3328_v24 = vmul.f32 %v11830_v17, %v15619_v43 }
 0x16f   : > { %10286 = vmatmul.mubr.msk.f32.gmra.mxu0 %vm388_vm0, %v3405_v33  ;;  %10238 = vmatprep.mubr.msk.f32.mxu1 %vm388_vm0, %v2950_v5  ;;  %v15618_v33 = vld [vmem:[#allocation78_spill] sm:$0xff]  ;;  %v3409_v5 = vsel %vm1084_vm3, %v3406_v63, %v3408_v22  ;;  %v3414_v61 = vrot.slane %v3326_v35, 7  ;;  %v2956_v51 = vsel %vm593_vm2, %v2953_v53, %v2955_v48  ;;  %v3413_v62 = vsel %vm1084_vm3, %v3410_v25, %v3412_v15 }
 0x170   : > { %10288 = vmatprep.mubr.msk.f32.mxu0 %vm388_vm0, %v3407_v16  ;;  %v1319_v40 = vadd.f32 %v10025_v23, %v15618_v33  ;;  %v2957_v16 = vrot.slane %v2869_v57, 1  ;;  %v12487_v63 = vpop.f32.mrf.mxu1  ;;  %v2959_v57 = vrot.slane %v2870_v19, 1  ;;  %v3416_v23 = vrot.slane %v3327_v21, 7  ;;  %v15621_v35 = vld [vmem:[#allocation54_spill] sm:$0xff]  ;;  %v15622_v21 = vld [vmem:[#allocation57_spill] sm:$0xff] }
 0x171   : > { %15620 = vst [vmem:[#allocation78_spill] sm:$0xff] %v12487_v63  ;;  %v2872_v33 = vmul.f32 %v11830_v17, %v15621_v35  ;;  %v3415_v53 = vsel %vm1084_vm3, %v3412_v15, %v3414_v61  ;;  %v3418_v19 = vrot.slane %v3328_v24, 7  ;;  %v15623_v17 = vld [vmem:[#allocation58_spill] sm:$0xff] }
 0x172   : > { %v10075_v41 = vpop.f32.mrf.mxu0  ;;  %10239 = vmatmul.mubr.msk.f32.gmra.mxu1 %vm388_vm0, %v2952_v18  ;;  %v2961_v18 = vrot.slane %v2871_v55, 1  ;;  %v2958_v22 = vsel %vm593_vm2, %v2955_v48, %v2957_v16  ;;  %v2873_v55 = vmul.f32 %v11846_v30, %v15622_v21  ;;  %v3330_v48 = vmul.f32 %v11864_v0, %v11805_v56  ;;  %v15626_v56 = vld [vmem:[#allocation62_spill] sm:$0xff] }
 0x173   : > { %10289 = vmatmul.mubr.msk.f32.gmra.mxu0 %vm388_vm0, %v3409_v5  ;;  %v12483_v29 = vadd.f32 %v10075_v41, %v1319_v40  ;;  %10241 = vmatprep.mubr.msk.f32.mxu1 %vm388_vm0, %v2954_v26  ;;  %v3329_v41 = vmul.f32 %v11846_v30, %v11778_v11  ;;  %v2874_v25 = vmul.f32 %v11864_v0, %v15623_v17 }
 0x174   : > { %10291 = vmatprep.mubr.msk.f32.mxu0 %vm388_vm0, %v3411_v20  ;;  %v12507_v5 = vpop.f32.mrf.mxu0  ;;  %v2960_v26 = vsel %vm593_vm2, %v2957_v16, %v2959_v57  ;;  %v3417_v15 = vsel %vm1084_vm3, %v3414_v61, %v3416_v23  ;;  %v2962_v24 = vsel %vm593_vm2, %v2959_v57, %v2961_v18  ;;  %v3331_v30 = vmul.f32 %v11882_v8, %v11808_v34  ;;  %v15625_v20 = vld [vmem:[#allocation80_spill] sm:$0xff]  ;;  %v15627_v57 = vld [vmem:[#allocation59_spill] sm:$0xff] }
 0x175   : > { %15624 = vst [vmem:[#allocation113_spill] sm:$0xff] %v12507_v5  ;;  %v3419_v0 = vsel %vm1084_vm3, %v3416_v23, %v3418_v19  ;;  %v2965_v16 = vrot.slane %v2873_v55, 1  ;;  %v3422_v61 = vrot.slane %v3330_v48, 7  ;;  %v3332_v11 = vmul.f32 %v11900_v31, %v15627_v57 }
 0x176   : > { %v10028_v40 = vpop.f32.mrf.mxu1  ;;  %10242 = vmatmul.mubr.msk.f32.gmra.mxu1 %vm388_vm0, %v2956_v51 }
 0x177   : > { %10292 = vmatmul.mubr.msk.f32.gmra.mxu0 %vm388_vm0, %v3413_v62  ;;  %10244 = vmatprep.mubr.msk.f32.mxu1 %vm388_vm0, %v2958_v22  ;;  %v1329_v51 = vadd.f32 %v10028_v40, %v15625_v20  ;;  %v2963_v62 = vrot.slane %v2872_v33, 1  ;;  %v3420_v22 = vrot.slane %v3329_v41, 7  ;;  %v2967_v33 = vrot.slane %v2874_v25, 1  ;;  %v15630_v40 = vld [vmem:[#allocation63_spill] sm:$0xff]  ;;  %v15632_v20 = vld [vmem:[#allocation68_spill] sm:$0xff] }
 0x178   : > { %10294 = vmatprep.mubr.msk.f32.mxu0 %vm388_vm0, %v3415_v53  ;;  %v2875_v53 = vmul.f32 %v11882_v8, %v15626_v56  ;;  %v12526_v8 = vpop.f32.mrf.mxu1  ;;  %v3424_v41 = vrot.slane %v3331_v30, 7  ;;  %v3426_v30 = vrot.slane %v3332_v11, 7 }
 0x179   : > { %15629 = vst [vmem:[#allocation114_spill] sm:$0xff] %v12526_v8  ;;  %v2964_v55 = vsel %vm593_vm2, %v2961_v18, %v2963_v62  ;;  %v3421_v48 = vsel %vm1084_vm3, %v3418_v19, %v3420_v22  ;;  %v2966_v25 = vsel %vm593_vm2, %v2963_v62, %v2965_v16  ;;  %v2968_v18 = vsel %vm593_vm2, %v2965_v16, %v2967_v33  ;;  %v15635_v62 = vld [vmem:[#allocation69_spill] sm:$0xff] }
 0x17a   : > { %v10078_v43 = vpop.f32.mrf.mxu0  ;;  %10245 = vmatmul.mubr.msk.f32.gmra.mxu1 %vm388_vm0, %v2960_v26  ;;  %v2876_v26 = vmul.f32 %v11900_v31, %v15630_v40  ;;  %v3423_v31 = vsel %vm1084_vm3, %v3420_v22, %v3422_v61  ;;  %v3425_v19 = vsel %vm1084_vm3, %v3422_v61, %v3424_v41  ;;  %v15636_v22 = vld [vmem:[#allocation83_spill] sm:$0xff]  ;;  %v3427_v61 = vsel %vm1084_vm3, %v3424_v41, %v3426_v30 }
 0x17b   : > { %10295 = vmatmul.mubr.msk.f32.gmra.mxu0 %vm388_vm0, %v3417_v15  ;;  %v12522_v34 = vadd.f32 %v10078_v43, %v1329_v51  ;;  %10247 = vmatprep.mubr.msk.f32.mxu1 %vm388_vm0, %v2962_v24  ;;  %v15631_v15 = vld [vmem:[#allocation60_spill] sm:$0xff]  ;;  %v2969_v43 = vrot.slane %v2875_v53, 1  ;;  %v2877_v24 = vmul.f32 %v11927_v7, %v15632_v20 }
 0x17c   : > { %10297 = vmatprep.mubr.msk.f32.mxu0 %vm388_vm0, %v3419_v0  ;;  %v3333_v23 = vmul.f32 %v11927_v7, %v15631_v15  ;;  %v15633_v0 = vld [vmem:[#allocation65_spill] sm:$0xff]  ;;  %v12545_v7 = vpop.f32.mrf.mxu0  ;;  %v2971_v53 = vrot.slane %v2876_v26, 1 }
 0x17d   : > { %15628 = vst [vmem:[#allocation80_spill] sm:$0xff] %v12522_v34  ;;  %v3334_v57 = vmul.f32 %v15633_v0, %v11910_v45  ;;  %15634 = vst [vmem:[#allocation115_spill] sm:$0xff] %v12545_v7  ;;  %v2970_v15 = vsel %vm593_vm2, %v2967_v33, %v2969_v43  ;;  %v2973_v0 = vrot.slane %v2877_v24, 1  ;;  %v12563_v24 = vld [vmem:[#allocation2 + $0x120] sm:$0xff] }
 0x17e   : > { %v10031_v51 = vpop.f32.mrf.mxu1  ;;  %10248 = vmatmul.mubr.msk.f32.gmra.mxu1 %vm388_vm0, %v2964_v55  ;;  %v3428_v55 = vrot.slane %v3333_v23, 7 }
 0x17f   : > { %10298 = vmatmul.mubr.msk.f32.gmra.mxu0 %vm388_vm0, %v3421_v48  ;;  %10250 = vmatprep.mubr.msk.f32.mxu1 %vm388_vm0, %v2966_v25  ;;  %v2878_v48 = vmul.f32 %v15635_v62, %v11910_v45  ;;  %v1339_v11 = vadd.f32 %v10031_v51, %v15636_v22  ;;  %v15637_v25 = vld [vmem:[#allocation66_spill] sm:$0xff]  ;;  %v3430_v26 = vrot.slane %v3334_v57, 7  ;;  %v15639_v51 = vld [vmem:[#allocation73_spill] sm:$0xff] }
 0x180   : > { %10300 = vmatprep.mubr.msk.f32.mxu0 %vm388_vm0, %v3423_v31  ;;  %v3335_v5 = vmul.f32 %v15637_v25, %v12233_v52  ;;  %v12554_v31 = vld [vmem:[#allocation2 + $0x118] sm:$0xff]  ;;  %v15638_v45 = vld [vmem:[#allocation74_spill] sm:$0xff]  ;;  %v3429_v57 = vsel %vm1084_vm3, %v3426_v30, %v3428_v55  ;;  %v2974_v25 = vsel %vm593_vm2, %v2971_v53, %v2973_v0 }
 0x181   : > { %v2879_v23 = vmul.f32 %v15638_v45, %v12233_v52  ;;  %v3336_v33 = vmul.f32 %v15639_v51, %v12554_v31  ;;  %v2975_v41 = vrot.slane %v2878_v48, 1  ;;  %v15642_v51 = vld [vmem:[#allocation70_spill] sm:$0xff]  ;;  %v15644_v30 = vld [vmem:[#allocation9_spill] sm:$0xff] }
 0x182   : > { %v10081_v16 = vpop.f32.mrf.mxu0  ;;  %10251 = vmatmul.mubr.msk.f32.gmra.mxu1 %vm388_vm0, %v2968_v18  ;;  %v12569_v18 = vpop.f32.mrf.mxu1  ;;  %v3432_v7 = vrot.slane %v3335_v5, 7  ;;  %v2880_v8 = vmul.f32 %v15642_v51, %v12554_v31  ;;  %v4031_v48 = vmul.f32 %v11957_v1, %v15644_v30  ;;  %v15645_v5 = vld [vmem:[#allocation10_spill] sm:$0xff] }
 0x183   : > { %10301 = vmatmul.mubr.msk.f32.gmra.mxu0 %vm388_vm0, %v3425_v19  ;;  %v12565_v22 = vadd.f32 %v10081_v16, %v1339_v11  ;;  %10253 = vmatprep.mubr.msk.f32.mxu1 %vm388_vm0, %v2970_v15  ;;  %15641 = vst [vmem:[#allocation116_spill] sm:$0xff] %v12569_v18  ;;  %v2972_v19 = vsel %vm593_vm2, %v2969_v43, %v2971_v53  ;;  %v15643_v11 = vld [vmem:[#allocation71_spill] sm:$0xff]  ;;  %v2977_v43 = vrot.slane %v2879_v23, 1  ;;  %v15646_v18 = vld [vmem:[#allocation6_spill] sm:$0xff] }
 0x184   : > { %10303 = vmatprep.mubr.msk.f32.mxu0 %vm388_vm0, %v3427_v61  ;;  %v3337_v16 = vmul.f32 %v15643_v11, %v12563_v24  ;;  %v3431_v15 = vsel %vm1084_vm3, %v3428_v55, %v3430_v26  ;;  %v3434_v61 = vrot.slane %v3336_v33, 7  ;;  %v4032_v53 = vmul.f32 %v11964_v58, %v15645_v5  ;;  %v12587_v11 = vpop.f32.mrf.mxu0  ;;  %v15648_v55 = vld [vmem:[#allocation85_spill] sm:$0xff] }
 0x185   : > { %15640 = vst [vmem:[#allocation83_spill] sm:$0xff] %v12565_v22  ;;  %v3433_v33 = vsel %vm1084_vm3, %v3430_v26, %v3432_v7  ;;  %v2979_v34 = vrot.slane %v2880_v8, 1  ;;  %v2978_v58 = vsel %vm593_vm2, %v2975_v41, %v2977_v43 }
 0x186   : > { %v10034_v63 = vpop.f32.mrf.mxu1  ;;  %10254 = vmatmul.mubr.msk.f32.gmra.mxu1 %vm388_vm0, %v2972_v19  ;;  %v2976_v19 = vsel %vm593_vm2, %v2973_v0, %v2975_v41  ;;  %v3436_v1 = vrot.slane %v3337_v16, 7  ;;  %v15649_v0 = vld [vmem:[#allocation13_spill] sm:$0xff]  ;;  %v4101_v26 = vrot.slane %v4032_v53, 1 }
 0x187   : > { %10304 = vmatmul.mubr.msk.f32.gmra.mxu0 %vm388_vm0, %v3429_v57  ;;  %10256 = vmatprep.mubr.msk.f32.mxu1 %vm388_vm0, %v2974_v25  ;;  %v15647_v57 = vld [vmem:[#allocation75_spill] sm:$0xff]  ;;  %v1349_v23 = vadd.f32 %v10034_v63, %v15648_v55  ;;  %v3435_v25 = vsel %vm1084_vm3, %v3432_v7, %v3434_v61  ;;  %v4033_v5 = vmul.f32 %v11992_v2, %v15649_v0 }
 0x188   : > { %10306 = vmatprep.mubr.msk.f32.mxu0 %vm388_vm0, %v3431_v15  ;;  %v4030_v22 = vmul.f32 %v15647_v57, %v15646_v18  ;;  %v4099_v15 = vrot.slane %v4031_v48, 1  ;;  %v12604_v63 = vpop.f32.mrf.mxu1  ;;  %v2980_v16 = vsel %vm593_vm2, %v2977_v43, %v2979_v34  ;;  %v3437_v41 = vsel %vm1084_vm3, %v3434_v61, %v3436_v1 }
 0x189   : > { %v4034_v7 = vmul.f32 %v12000_v28, %v15569_v36  ;;  %v15650_v28 = vld [vmem:[#allocation88_spill] sm:$0xff] }
 0x18a   : > { %v10084_v30 = vpop.f32.mrf.mxu0  ;;  %10257 = vmatmul.mubr.msk.f32.gmra.mxu1 %vm388_vm0, %v2976_v19  ;;  %v4098_v8 = vrot.slane %v4030_v22, 1  ;;  %v4035_v19 = vmul.f32 %v12024_v50, %v15570_v44  ;;  %v10907_v22 = vld [vmem:[#allocation2 + $0x28] sm:$0xff]  ;;  %v4102_v53 = vsel %vm593_vm2, %v4099_v15, %v4101_v26 }
 0x18b   : > { %10307 = vmatmul.mubr.msk.f32.gmra.mxu0 %vm388_vm0, %v3433_v33  ;;  %v12600_v57 = vadd.f32 %v10084_v30, %v1349_v23  ;;  %10259 = vmatprep.mubr.msk.f32.mxu1 %vm388_vm0, %v2978_v58  ;;  %v4103_v30 = vrot.slane %v4033_v5, 1  ;;  %v4105_v55 = vrot.slane %v4034_v7, 1  ;;  %v4036_v23 = vmul.f32 %v12036_v9, %v15573_v39  ;;  %v10908_v33 = vld [vmem:[#allocation2 + $0x30] sm:$0xff] }
 0x18c   : > { %10309 = vmatprep.mubr.msk.f32.mxu0 %vm388_vm0, %v3435_v25  ;;  %v4100_v2 = vsel %vm593_vm2, %v4098_v8, %v4099_v15  ;;  %v12617_v34 = vpop.f32.mrf.mxu0  ;;  %v4107_v1 = vrot.slane %v4035_v19, 1  ;;  %v4037_v58 = vmul.f32 %v12046_v60, %v15576_v27  ;;  %v15651_v25 = vld [vmem:[#allocation90_spill] sm:$0xff]  ;;  %v10909_v15 = vld [vmem:[#allocation2 + $0x38] sm:$0xff]  ;;  %v15686_v27 = vld [vmem:[#allocation83_spill] sm:$0xff] }
 0x18d   : > { %v4104_v50 = vsel %vm593_vm2, %v4101_v26, %v4103_v30  ;;  %v4106_v26 = vsel %vm593_vm2, %v4103_v30, %v4105_v55  ;;  %v15653_v60 = vld [vmem:[#allocation22_spill] sm:$0xff] }
 0x18e   : > { %v10037_v48 = vpop.f32.mrf.mxu1  ;;  %10260 = vmatmul.mubr.msk.f32.gmra.mxu1 %vm388_vm0, %v2980_v16 }
 0x18f   : > { %10310 = vmatmul.mubr.msk.f32.gmra.mxu0 %vm388_vm0, %v3437_v41  ;;  %10314 = vmatprep.mubr.msk.f32.mxu1 %vm388_vm0, %v10907_v22  ;;  %v1359_v61 = vadd.f32 %v10037_v48, %v15650_v28  ;;  %v15652_v41 = vld [vmem:[#allocation105_spill] sm:$0xff]  ;;  %v4109_v48 = vrot.slane %v4036_v23, 1  ;;  %v10910_v22 = vld [vmem:[#allocation2 + $0x40] sm:$0xff]  ;;  %v4111_v28 = vrot.slane %v4037_v58, 1  ;;  %v15655_v23 = vld [vmem:[#allocation92_spill] sm:$0xff] }
 0x190   : > { %10364 = vmatprep.mubr.msk.f32.mxu0 %vm388_vm0, %v4100_v2  ;;  %v1353_v43 = vpop.f32.mrf.mxu1  ;;  %v4038_v2 = vmul.f32 %v12054_v32, %v15653_v60 }
 0x191   : > { %v1354_v8 = vadd.f32 %v1353_v43, %v15651_v25  ;;  %v4108_v43 = vsel %vm593_vm2, %v4105_v55, %v4107_v1  ;;  %v10912_v55 = vld [vmem:[#allocation2 + $0x50] sm:$0xff] }
 0x192   : > { %v10087_v5 = vpop.f32.mrf.mxu0  ;;  %10315 = vmatmul.mubr.msk.f32.vlgmr.msra.gmra.mxu1 %vm388_vm0, %v10908_v33  ;;  %v4113_v33 = vrot.slane %v4038_v2, 1 }
 0x193   : > { %10365 = vmatmul.mubr.msk.f32.vlgmr.msra.gmra.mxu0 %vm388_vm0, %v4102_v53  ;;  %v12629_v16 = vadd.f32 %v10087_v5, %v1359_v61  ;;  %10317 = vmatprep.mubr.msk.f32.mxu1 %vm388_vm0, %v10909_v15  ;;  %v10911_v53 = vld [vmem:[#allocation2 + $0x48] sm:$0xff]  ;;  %v4110_v5 = vsel %vm593_vm2, %v4107_v1, %v4109_v48  ;;  %v15657_v15 = vld [vmem:[#allocation29_spill] sm:$0xff] }
 0x194   : > { %10367 = vmatprep.mubr.msk.f32.mxu0 %vm388_vm0, %v4104_v50  ;;  %v2002_v9 = vpop.f32.mrf.mxu0  ;;  %10413 = vmatpush3.msra.mxu1 %v12320_v38  ;;  %v15654_v38 = vld [vmem:[#allocation25_spill] sm:$0xff]  ;;  %v15656_v50 = vld [vmem:[#allocation26_spill] sm:$0xff] }
 0x195   : > { %10463 = vmatpush3.msra.mxu0 %v15652_v41  ;;  %v12635_v7 = vadd.f32 %v2002_v9, %v1354_v8  ;;  %v4039_v61 = vmul.f32 %v12064_v14, %v15654_v38  ;;  %v4040_v25 = vmul.f32 %v12072_v3, %v15656_v50  ;;  %v4112_v14 = vsel %vm593_vm2, %v4109_v48, %v4111_v28  ;;  %v15658_v41 = vld [vmem:[#allocation94_spill] sm:$0xff]  ;;  %v10913_v1 = vld [vmem:[#allocation2 + $0x58] sm:$0xff]  ;;  %v15684_v38 = vld [vmem:[#allocation80_spill] sm:$0xff] }
 0x196   : > { %v10040_v19 = vpop.f32.mrf.mxu1  ;;  %10318 = vmatmul.mubr.msk.f32.gmra.mxu1 %vm388_vm0, %v10910_v22  ;;  %v4041_v9 = vmul.f32 %v12082_v13, %v15657_v15  ;;  %v4114_v22 = vsel %vm593_vm2, %v4111_v28, %v4113_v33  ;;  %v15659_v48 = vld [vmem:[#allocation82_spill] sm:$0xff]  ;;  %v15661_v28 = vld [vmem:[#allocation96_spill] sm:$0xff] }
 0x197   : > { %10368 = vmatmul.mubr.msk.f32.gmra.mxu0 %vm388_vm0, %v4106_v26  ;;  %10320 = vmatprep.mubr.msk.f32.mxu1 %vm388_vm0, %v10911_v53  ;;  %v1369_v32 = vadd.f32 %v10040_v19, %v15655_v23  ;;  %v4115_v58 = vrot.slane %v4039_v61, 1  ;;  %v4042_v61 = vmul.f32 %v15659_v48, %v15587_v42  ;;  %v10914_v13 = vld [vmem:[#allocation2 + $0x60] sm:$0xff] }
 0x198   : > { %10370 = vmatprep.mubr.msk.f32.mxu0 %vm388_vm0, %v4108_v43  ;;  %v1363_v30 = vpop.f32.mrf.mxu1  ;;  %v4117_v43 = vrot.slane %v4040_v25, 1  ;;  %v4119_v23 = vrot.slane %v4041_v9, 1  ;;  %v4045_v9 = vmul.f32 %v12118_v46, %v15595_v10 }
 0x199   : > { %v1364_v26 = vadd.f32 %v1363_v30, %v15658_v41  ;;  %v4116_v30 = vsel %vm593_vm2, %v4113_v33, %v4115_v58  ;;  %v15662_v41 = vld [vmem:[#allocation34_spill] sm:$0xff] }
 0x19a   : > { %v10090_v8 = vpop.f32.mrf.mxu0  ;;  %10321 = vmatmul.mubr.msk.f32.gmra.mxu1 %vm388_vm0, %v10912_v55  ;;  %v4118_v55 = vsel %vm593_vm2, %v4115_v58, %v4117_v43  ;;  %v10917_v58 = vld [vmem:[#allocation2 + $0x78] sm:$0xff] }
 0x19b   : > { %10371 = vmatmul.mubr.msk.f32.gmra.mxu0 %vm388_vm0, %v4110_v5  ;;  %v12657_v19 = vadd.f32 %v10090_v8, %v1369_v32  ;;  %10323 = vmatprep.mubr.msk.f32.mxu1 %vm388_vm0, %v10913_v1  ;;  %v15660_v32 = vld [vmem:[#allocation33_spill] sm:$0xff]  ;;  %v10915_v8 = vld [vmem:[#allocation2 + $0x68] sm:$0xff] }
 0x19c   : > { %10373 = vmatprep.mubr.msk.f32.mxu0 %vm388_vm0, %v4112_v14  ;;  %v2012_v3 = vpop.f32.mrf.mxu0  ;;  %v4043_v5 = vmul.f32 %v12100_v59, %v15660_v32  ;;  %v4121_v14 = vrot.slane %v4042_v61, 1  ;;  %v4120_v59 = vsel %vm593_vm2, %v4117_v43, %v4119_v23 }
 0x19d   : > { %v12661_v2 = vadd.f32 %v2012_v3, %v1364_v26  ;;  %v4044_v26 = vmul.f32 %v12108_v54, %v15662_v41  ;;  %v10916_v3 = vld [vmem:[#allocation2 + $0x70] sm:$0xff] }
 0x19e   : > { %v10043_v53 = vpop.f32.mrf.mxu1  ;;  %10324 = vmatmul.mubr.msk.f32.gmra.mxu1 %vm388_vm0, %v10914_v13  ;;  %v4123_v33 = vrot.slane %v4043_v5, 1  ;;  %v4122_v48 = vsel %vm593_vm2, %v4119_v23, %v4121_v14  ;;  %v4127_v5 = vrot.slane %v4045_v9, 1  ;;  %v10920_v9 = vld [vmem:[#allocation2 + $0x90] sm:$0xff] }
 0x19f   : > { %10374 = vmatmul.mubr.msk.f32.gmra.mxu0 %vm388_vm0, %v4114_v22  ;;  %10326 = vmatprep.mubr.msk.f32.mxu1 %vm388_vm0, %v10915_v8  ;;  %v1379_v25 = vadd.f32 %v10043_v53, %v15661_v28  ;;  %v4125_v61 = vrot.slane %v4044_v26, 1  ;;  %v15663_v53 = vld [vmem:[#allocation38_spill] sm:$0xff]  ;;  %v15664_v8 = vld [vmem:[#allocation41_spill] sm:$0xff] }
 0x1a0   : > { %10376 = vmatprep.mubr.msk.f32.mxu0 %vm388_vm0, %v4116_v30  ;;  %v12686_v54 = vpop.f32.mrf.mxu1  ;;  %v4046_v13 = vmul.f32 %v12126_v37, %v15663_v53  ;;  %v10918_v30 = vld [vmem:[#allocation2 + $0x80] sm:$0xff]  ;;  %v4124_v46 = vsel %vm593_vm2, %v4121_v14, %v4123_v33  ;;  %v4047_v28 = vmul.f32 %v12136_v12, %v15664_v8  ;;  %v15665_v37 = vld [vmem:[#allocation100_spill] sm:$0xff] }
 0x1a1   : > { %v4126_v26 = vsel %vm593_vm2, %v4123_v33, %v4125_v61  ;;  %v4128_v12 = vsel %vm593_vm2, %v4125_v61, %v4127_v5  ;;  %v10921_v33 = vld [vmem:[#allocation2 + $0x98] sm:$0xff] }
 0x1a2   : > { %v10093_v1 = vpop.f32.mrf.mxu0  ;;  %10327 = vmatmul.mubr.msk.f32.gmra.mxu1 %vm388_vm0, %v10916_v3  ;;  %v15666_v3 = vld [vmem:[#allocation42_spill] sm:$0xff] }
 0x1a3   : > { %10377 = vmatmul.mubr.msk.f32.gmra.mxu0 %vm388_vm0, %v4118_v55  ;;  %v12682_v22 = vadd.f32 %v10093_v1, %v1379_v25  ;;  %10329 = vmatprep.mubr.msk.f32.mxu1 %vm388_vm0, %v10917_v58  ;;  %v10919_v25 = vld [vmem:[#allocation2 + $0x88] sm:$0xff]  ;;  %v4129_v1 = vrot.slane %v4046_v13, 1  ;;  %v4131_v58 = vrot.slane %v4047_v28, 1  ;;  %v10923_v28 = vld [vmem:[#allocation2 + $0xa0] sm:$0xff] }
 0x1a4   : > { %10379 = vmatprep.mubr.msk.f32.mxu0 %vm388_vm0, %v4120_v59  ;;  %v12698_v23 = vpop.f32.mrf.mxu0  ;;  %v4048_v59 = vmul.f32 %v12144_v49, %v15666_v3  ;;  %v10926_v3 = vld [vmem:[#allocation2 + $0xd8] sm:$0xff] }
 0x1a5   : > { %v4130_v13 = vsel %vm593_vm2, %v4127_v5, %v4129_v1 }
 0x1a6   : > { %v10046_v43 = vpop.f32.mrf.mxu1  ;;  %10330 = vmatmul.mubr.msk.f32.gmra.mxu1 %vm388_vm0, %v10918_v30 }
 0x1a7   : > { %10380 = vmatmul.mubr.msk.f32.gmra.mxu0 %vm388_vm0, %v4122_v48  ;;  %10332 = vmatprep.mubr.msk.f32.mxu1 %vm388_vm0, %v10919_v25  ;;  %v1389_v55 = vadd.f32 %v10046_v43, %v15665_v37  ;;  %v15667_v48 = vld [vmem:[#allocation87_spill] sm:$0xff]  ;;  %v4133_v43 = vrot.slane %v4048_v59, 1  ;;  %v15668_v37 = vld [vmem:[#allocation46_spill] sm:$0xff]  ;;  %v15670_v59 = vld [vmem:[#allocation104_spill] sm:$0xff] }
 0x1a8   : > { %10382 = vmatprep.mubr.msk.f32.mxu0 %vm388_vm0, %v4124_v46  ;;  %v4049_v30 = vmul.f32 %v15667_v48, %v15607_v4  ;;  %v12713_v49 = vpop.f32.mrf.mxu1  ;;  %v10922_v25 = vld [vmem:[#allocation2 + $0xc8] sm:$0xff] }
 0x1a9   : > { %v4134_v4 = vsel %vm593_vm2, %v4131_v58, %v4133_v43 }
 0x1aa   : > { %v10096_v14 = vpop.f32.mrf.mxu0  ;;  %10333 = vmatmul.mubr.msk.f32.gmra.mxu1 %vm388_vm0, %v10920_v9  ;;  %v10924_v9 = vld [vmem:[#allocation2 + $0xd0] sm:$0xff] }
 0x1ab   : > { %10383 = vmatmul.mubr.msk.f32.gmra.mxu0 %vm388_vm0, %v4126_v26  ;;  %v12709_v46 = vadd.f32 %v10096_v14, %v1389_v55  ;;  %10335 = vmatprep.mubr.msk.f32.mxu1 %vm388_vm0, %v10921_v33  ;;  %v4050_v26 = vmul.f32 %v10922_v25, %v15668_v37  ;;  %v4132_v55 = vsel %vm593_vm2, %v4129_v1, %v4131_v58  ;;  %v4135_v14 = vrot.slane %v4049_v30, 1  ;;  %v10925_v33 = vld [vmem:[#allocation2 + $0xa8] sm:$0xff]  ;;  %v10927_v30 = vld [vmem:[#allocation2 + $0xb0] sm:$0xff]  ;;  %v10929_v58 = vld [vmem:[#allocation2 + $0xb8] sm:$0xff] }
 0x1ac   : > { %10385 = vmatprep.mubr.msk.f32.mxu0 %vm388_vm0, %v4128_v12  ;;  %v15669_v12 = vld [vmem:[#allocation49_spill] sm:$0xff]  ;;  %v12723_v5 = vpop.f32.mrf.mxu0 }
 0x1ad   : > { %v4051_v48 = vmul.f32 %v10924_v9, %v15669_v12 }
 0x1ae   : > { %v10049_v61 = vpop.f32.mrf.mxu1  ;;  %10336 = vmatmul.mubr.msk.f32.gmra.mxu1 %vm388_vm0, %v10923_v28  ;;  %v4137_v28 = vrot.slane %v4050_v26, 1 }
 0x1af   : > { %10386 = vmatmul.mubr.msk.f32.gmra.mxu0 %vm388_vm0, %v4130_v13  ;;  %10338 = vmatprep.mubr.msk.f32.mxu1 %vm388_vm0, %v10925_v33  ;;  %v1399_v37 = vadd.f32 %v10049_v61, %v15670_v59  ;;  %v4052_v13 = vmul.f32 %v10926_v3, %v15616_v6  ;;  %v4139_v12 = vrot.slane %v4051_v48, 1  ;;  %v10928_v33 = vld [vmem:[#allocation2 + $0xe0] sm:$0xff] }
 0x1b0   : > { %10388 = vmatprep.mubr.msk.f32.mxu0 %vm388_vm0, %v4132_v55  ;;  %v4136_v55 = vsel %vm593_vm2, %v4133_v43, %v4135_v14  ;;  %v4053_v8 = vmul.f32 %v10928_v33, %v15617_v47  ;;  %v12736_v26 = vpop.f32.mrf.mxu1  ;;  %v4138_v61 = vsel %vm593_vm2, %v4135_v14, %v4137_v28  ;;  %v10931_v48 = vld [vmem:[#allocation2 + $0xc0] sm:$0xff] }
 0x1b1   : > { %v4141_v59 = vrot.slane %v4052_v13, 1  ;;  %v15671_v13 = vld [vmem:[#allocation89_spill] sm:$0xff] }
 0x1b2   : > { %v10099_v1 = vpop.f32.mrf.mxu0  ;;  %10339 = vmatmul.mubr.msk.f32.gmra.mxu1 %vm388_vm0, %v10927_v30  ;;  %v10930_v30 = vld [vmem:[#allocation2 + $0xe8] sm:$0xff] }
 0x1b3   : > { %10389 = vmatmul.mubr.msk.f32.gmra.mxu0 %vm388_vm0, %v4134_v4  ;;  %v12732_v53 = vadd.f32 %v10099_v1, %v1399_v37  ;;  %10341 = vmatprep.mubr.msk.f32.mxu1 %vm388_vm0, %v10929_v58  ;;  %v4054_v4 = vmul.f32 %v10930_v30, %v15621_v35  ;;  %v4140_v37 = vsel %vm593_vm2, %v4137_v28, %v4139_v12  ;;  %v4143_v1 = vrot.slane %v4053_v8, 1 }
 0x1b4   : > { %10391 = vmatprep.mubr.msk.f32.mxu0 %vm388_vm0, %v4136_v55  ;;  %v10932_v55 = vld [vmem:[#allocation2 + $0xf0] sm:$0xff]  ;;  %v12746_v14 = vpop.f32.mrf.mxu0  ;;  %v4142_v47 = vsel %vm593_vm2, %v4139_v12, %v4141_v59 }
 0x1b5   : > { %v4055_v58 = vmul.f32 %v10932_v55, %v15622_v21  ;;  %v4145_v6 = vrot.slane %v4054_v4, 1  ;;  %v4144_v8 = vsel %vm593_vm2, %v4141_v59, %v4143_v1  ;;  %v4059_v59 = vmul.f32 %v15632_v20, %v12233_v52 }
 0x1b6   : > { %v10052_v43 = vpop.f32.mrf.mxu1  ;;  %10342 = vmatmul.mubr.msk.f32.gmra.mxu1 %vm388_vm0, %v10931_v48  ;;  %v10933_v48 = vld [vmem:[#allocation2 + $0xf8] sm:$0xff] }
 0x1b7   : > { %10392 = vmatmul.mubr.msk.f32.gmra.mxu0 %vm388_vm0, %v4138_v61  ;;  %10344 = vmatprep.mubr.msk.f32.mxu1 %vm388_vm0, %v10922_v25  ;;  %v1409_v35 = vadd.f32 %v10052_v43, %v15671_v13  ;;  %v4056_v61 = vmul.f32 %v10933_v48, %v15623_v17  ;;  %v4147_v28 = vrot.slane %v4055_v58, 1  ;;  %v4146_v4 = vsel %vm593_vm2, %v4143_v1, %v4145_v6  ;;  %v15672_v1 = vld [vmem:[#allocation93_spill] sm:$0xff]  ;;  %v15681_v17 = vld [vmem:[#allocation76_spill] sm:$0xff] }
 0x1b8   : > { %10394 = vmatprep.mubr.msk.f32.mxu0 %vm388_vm0, %v4140_v37  ;;  %v10934_v37 = vld [vmem:[#allocation2 + $0x100] sm:$0xff]  ;;  %v12759_v12 = vpop.f32.mrf.mxu1 }
 0x1b9   : > { %v4057_v25 = vmul.f32 %v10934_v37, %v15626_v56  ;;  %v4149_v43 = vrot.slane %v4056_v61, 1 }
 0x1ba   : > { %v10102_v10 = vpop.f32.mrf.mxu0  ;;  %10345 = vmatmul.mubr.msk.f32.gmra.mxu1 %vm388_vm0, %v10924_v9  ;;  %v10935_v9 = vld [vmem:[#allocation2 + $0x108] sm:$0xff] }
 0x1bb   : > { %10395 = vmatmul.mubr.msk.f32.gmra.mxu0 %vm388_vm0, %v4142_v47  ;;  %v12755_v21 = vadd.f32 %v10102_v10, %v1409_v35  ;;  %10347 = vmatprep.mubr.msk.f32.mxu1 %vm388_vm0, %v10926_v3  ;;  %v4058_v47 = vmul.f32 %v10935_v9, %v15630_v40  ;;  %v4148_v10 = vsel %vm593_vm2, %v4145_v6, %v4147_v28  ;;  %v4151_v35 = vrot.slane %v4057_v25, 1  ;;  %v464_v25 = vld [vmem:[#allocation2 + $0x128] sm:$0xff] }
 0x1bc   : > { %10397 = vmatprep.mubr.msk.f32.mxu0 %vm388_vm0, %v4144_v8  ;;  %v12770_v3 = vpop.f32.mrf.mxu0  ;;  %v4150_v61 = vsel %vm593_vm2, %v4147_v28, %v4149_v43  ;;  %v4155_v6 = vrot.slane %v4059_v59, 1  ;;  %v4559_v28 = vld [vmem:[#allocation3 + $0x8] sm:$0xff] }
 0x1bd   : > { %v4153_v8 = vrot.slane %v4058_v47, 1  ;;  %v4152_v52 = vsel %vm593_vm2, %v4149_v43, %v4151_v35  ;;  %v4558_v43 = vld [vmem:[#allocation3] sm:$0xff] }
 0x1be   : > { %v10055_v13 = vpop.f32.mrf.mxu1  ;;  %10348 = vmatmul.mubr.msk.f32.gmra.mxu1 %vm388_vm0, %v10928_v33  ;;  %v4060_v33 = vmul.f32 %v15635_v62, %v12554_v31 }
 0x1bf   : > { %10398 = vmatmul.mubr.msk.f32.gmra.mxu0 %vm388_vm0, %v4146_v4  ;;  %10350 = vmatprep.mubr.msk.f32.mxu1 %vm388_vm0, %v10930_v30  ;;  %v1419_v58 = vadd.f32 %v10055_v13, %v15672_v1  ;;  %v4061_v30 = vmul.f32 %v15638_v45, %v12563_v24  ;;  %v4062_v1 = vmul.f32 %v15642_v51, %v464_v25  ;;  %v4560_v25 = vld [vmem:[#allocation3 + $0x10] sm:$0xff]  ;;  %v15675_v51 = vld [vmem:[#allocation97_spill] sm:$0xff] }
 0x1c0   : > { %10400 = vmatprep.mubr.msk.f32.mxu0 %vm388_vm0, %v4148_v10  ;;  %v12785_v47 = vpop.f32.mrf.mxu1  ;;  %v4157_v13 = vrot.slane %v4060_v33, 1 }
 0x1c1   : > { %v4161_v62 = vrot.slane %v4062_v1, 1 }
 0x1c2   : > { %v10105_v4 = vpop.f32.mrf.mxu0  ;;  %10351 = vmatmul.mubr.msk.f32.gmra.mxu1 %vm388_vm0, %v10932_v55  ;;  %v4154_v55 = vsel %vm593_vm2, %v4151_v35, %v4153_v8  ;;  %v15674_v35 = vld [vmem:[#allocation5_spill] sm:$0xff] }
 0x1c3   : > { %10401 = vmatmul.mubr.msk.f32.gmra.mxu0 %vm388_vm0, %v4150_v61  ;;  %v12781_v10 = vadd.f32 %v10105_v4, %v1419_v58  ;;  %10353 = vmatprep.mubr.msk.f32.mxu1 %vm388_vm0, %v10933_v48  ;;  %v4156_v58 = vsel %vm593_vm2, %v4153_v8, %v4155_v6  ;;  %v4159_v61 = vrot.slane %v4061_v30, 1  ;;  %v15673_v4 = vld [vmem:[#allocation7_spill] sm:$0xff]  ;;  %v4596_v33 = vmul.f32 %v4558_v43, %v15674_v35  ;;  %v10936_v30 = vld [vmem:[#allocation2 + $0x110] sm:$0xff] }
 0x1c4   : > { %10403 = vmatprep.mubr.msk.f32.mxu0 %vm388_vm0, %v4152_v52  ;;  %v4597_v52 = vmul.f32 %v4559_v28, %v15673_v4  ;;  %v12795_v48 = vpop.f32.mrf.mxu0 }
 0x1c5   : > { %v4986_v1 = vrot.slane %v4596_v33, 7  ;;  %v4162_v43 = vsel %vm593_vm2, %v4159_v61, %v4161_v62 }
 0x1c6   : > { %v10058_v59 = vpop.f32.mrf.mxu1  ;;  %10354 = vmatmul.mubr.msk.f32.gmra.mxu1 %vm388_vm0, %v10934_v37  ;;  %v4158_v37 = vsel %vm593_vm2, %v4155_v6, %v4157_v13 }
 0x1c7   : > { %10404 = vmatmul.mubr.msk.f32.gmra.mxu0 %vm388_vm0, %v4154_v55  ;;  %10356 = vmatprep.mubr.msk.f32.mxu1 %vm388_vm0, %v10935_v9  ;;  %v1429_v45 = vadd.f32 %v10058_v59, %v15675_v51  ;;  %v15676_v55 = vld [vmem:[#allocation8_spill] sm:$0xff]  ;;  %v4160_v9 = vsel %vm593_vm2, %v4157_v13, %v4159_v61  ;;  %v15678_v13 = vld [vmem:[#allocation101_spill] sm:$0xff] }
 0x1c8   : > { %10406 = vmatprep.mubr.msk.f32.mxu0 %vm388_vm0, %v4156_v58  ;;  %v12801_v20 = vmul.f32 %v4560_v25, %v15676_v55  ;;  %v4987_v58 = vrot.slane %v4597_v52, 7  ;;  %v12811_v51 = vpop.f32.mrf.mxu1 }
 0x1ca   : > { %15677 = vst [vmem:[#allocation75_spill] sm:$0xff] %v12801_v20  ;;  %v10108_v8 = vpop.f32.mrf.mxu0  ;;  %10357 = vmatmul.mubr.msk.f32.gmra.mxu1 %vm388_vm0, %v10936_v30  ;;  %v15413_v59 = vrot.slane %v12801_v20, 7 }
 0x1cb   : > { %10407 = vmatmul.mubr.msk.f32.gmra.mxu0 %vm388_vm0, %v4158_v37  ;;  %v12806_v40 = vadd.f32 %v10108_v8, %v1429_v45  ;;  %10359 = vmatprep.mubr.msk.f32.mxu1 %vm388_vm0, %v12554_v31  ;;  %v4988_v45 = vsel %vm1084_vm3, %v4986_v1, %v4987_v58 }
 0x1cc   : > { %10409 = vmatprep.mubr.msk.f32.mxu0 %vm388_vm0, %v4160_v9  ;;  %v12813_v6 = vpop.f32.mrf.mxu0  ;;  %v15679_v9 = vld [vmem:[#allocation61_spill] sm:$0xff] }
 0x1ce   : > { %v10061_v37 = vpop.f32.mrf.mxu1  ;;  %10360 = vmatmul.mubr.msk.f32.gmra.mxu1 %vm388_vm0, %v12563_v24  ;;  %v4990_v24 = vsel %vm1084_vm3, %v4987_v58, %v15413_v59 }
 0x1cf   : > { %v10111_v30 = vpop.f32.mrf.mxu0  ;;  %10410 = vmatmul.mubr.msk.f32.gmra.mxu0 %vm388_vm0, %v4162_v43  ;;  %v1439_v31 = vadd.f32 %v10061_v37, %v15678_v13  ;;  %10414 = vmatprep.mubr.msk.f32.mxu1 %vm4519_vm4, %v4559_v28  ;;  %v15680_v13 = vld [vmem:[#allocation67_spill] sm:$0xff] }
 0x1d0   : > { %10464 = vmatprep.mubr.msk.f32.mxu0 %vm4519_vm4, %v4988_v45  ;;  %v12824_v52 = vpop.f32.mrf.mxu1 }
 0x1d1   : > { %v12826_v62 = vpop.f32.mrf.mxu0  ;;  %v12828_v61 = vadd.f32 %v10111_v30, %v1439_v31 }
 0x1d2   : > { %v10116_v33 = vpop.f32.mrf.mxu1  ;;  %10415 = vmatmul.mubr.msk.f32.vlgmr.msra.gmra.mxu1 %vm4519_vm4, %v4560_v25 }
 0x1d3   : > { %v10166_v8 = vpop.f32.mrf.mxu0  ;;  %10465 = vmatmul.mubr.msk.f32.vlgmr.msra.gmra.mxu0 %vm4519_vm4, %v4990_v24  ;;  %v2549_v1 = vadd.f32 %v10116_v33, %v15679_v9 }
 0x1d4   : > { %v12836_v43 = vpop.f32.mrf.mxu1 }
 0x1d5   : > { %v12838_v28 = vpop.f32.mrf.mxu0  ;;  %v12840_v37 = vadd.f32 %v10166_v8, %v2549_v1 }
 0x1d6   : > { %v10119_v30 = vpop.f32.mrf.mxu1 }
 0x1d7   : > { %v10169_v45 = vpop.f32.mrf.mxu0  ;;  %v2551_v31 = vadd.f32 %v10119_v30, %v15680_v13 }
 0x1d8   : > { %v12843_v56 = vpop.f32.mrf.mxu1 }
 0x1d9   : > { %v12845_v58 = vpop.f32.mrf.mxu0  ;;  %v12847_v59 = vadd.f32 %v10169_v45, %v2551_v31 }
 0x1da   : > { %v10122_v25 = vpop.f32.mrf.mxu1 }
 0x1db   : > { %v10172_v24 = vpop.f32.mrf.mxu0  ;;  %v2553_v33 = vadd.f32 %v10122_v25, %v15681_v17 }
 0x1dc   : > { %v12850_v9 = vpop.f32.mrf.mxu1 }
 0x1dd   : > { %v12852_v41 = vpop.f32.mrf.mxu0  ;;  %v12854_v8 = vadd.f32 %v10172_v24, %v2553_v33 }
 0x1de   : > { %v10125_v1 = vpop.f32.mrf.mxu1 }
 0x1df   : > { %15682 = vst [vmem:[#allocation85_spill] sm:$0xff] %v12854_v8  ;;  %v10175_v32 = vpop.f32.mrf.mxu0  ;;  %v2555_v30 = vadd.f32 %v10125_v1, %v12483_v29  ;;  %v15776_v8 = vld [vmem:[#allocation84_spill] sm:$0xff] }
 0x1e0   : > { %v12857_v13 = vpop.f32.mrf.mxu1 }
 0x1e1   : > { %v12859_v42 = vpop.f32.mrf.mxu0  ;;  %v12861_v45 = vadd.f32 %v10175_v32, %v2555_v30 }
 0x1e2   : > { %v10128_v31 = vpop.f32.mrf.mxu1 }
 0x1e3   : > { %15683 = vst [vmem:[#allocation88_spill] sm:$0xff] %v12861_v45  ;;  %v10178_v15 = vpop.f32.mrf.mxu0  ;;  %v2557_v17 = vadd.f32 %v10128_v31, %v15684_v38 }
 0x1e4   : > { %v12864_v25 = vpop.f32.mrf.mxu1 }
 0x1e5   : > { %v12866_v50 = vpop.f32.mrf.mxu0  ;;  %v12868_v24 = vadd.f32 %v10178_v15, %v2557_v17 }
 0x1e6   : > { %v10131_v33 = vpop.f32.mrf.mxu1 }
 0x1e7   : > { %15685 = vst [vmem:[#allocation90_spill] sm:$0xff] %v12868_v24  ;;  %v10181_v60 = vpop.f32.mrf.mxu0  ;;  %v2559_v29 = vadd.f32 %v10131_v33, %v15686_v27 }
 0x1e8   : > { %v12871_v1 = vpop.f32.mrf.mxu1 }
 0x1e9   : > { %v12873_v39 = vpop.f32.mrf.mxu0  ;;  %v12875_v32 = vadd.f32 %v10181_v60, %v2559_v29 }
 0x1ea   : > { %v10134_v30 = vpop.f32.mrf.mxu1 }
 0x1eb   : > { %15687 = vst [vmem:[#allocation105_spill] sm:$0xff] %v12875_v32  ;;  %v10184_v55 = vpop.f32.mrf.mxu0  ;;  %v2561_v38 = vadd.f32 %v10134_v30, %v12600_v57 }
 0x1ec   : > { %v12878_v31 = vpop.f32.mrf.mxu1 }
 0x1ed   : > { %v12880_v44 = vpop.f32.mrf.mxu0  ;;  %v12882_v15 = vadd.f32 %v10184_v55, %v2561_v38 }
 0x1ee   : > { %15688 = vst [vmem:[#allocation92_spill] sm:$0xff] %v12880_v44  ;;  %v10137_v17 = vpop.f32.mrf.mxu1  ;;  %v15771_v44 = vld [vmem:[#allocation78_spill] sm:$0xff] }
 0x1ef   : > { %15689 = vst [vmem:[#allocation94_spill] sm:$0xff] %v12882_v15  ;;  %v10187_v0 = vpop.f32.mrf.mxu0  ;;  %v2563_v27 = vadd.f32 %v10137_v17, %v12629_v16 }
 0x1f0   : > { %v12885_v33 = vpop.f32.mrf.mxu1 }
 0x1f1   : > { %v12887_v36 = vpop.f32.mrf.mxu0  ;;  %v12889_v60 = vadd.f32 %v10187_v0, %v2563_v27 }
 0x1f2   : > { %15690 = vst [vmem:[#allocation82_spill] sm:$0xff] %v12887_v36  ;;  %v10140_v29 = vpop.f32.mrf.mxu1 }
 0x1f3   : > { %15691 = vst [vmem:[#allocation96_spill] sm:$0xff] %v12889_v60  ;;  %v10190_v4 = vpop.f32.mrf.mxu0  ;;  %v2565_v57 = vadd.f32 %v10140_v29, %v12657_v19 }
 0x1f4   : > { %v12892_v30 = vpop.f32.mrf.mxu1 }
 0x1f5   : > { %v12894_v35 = vpop.f32.mrf.mxu0  ;;  %v12896_v55 = vadd.f32 %v10190_v4, %v2565_v57 }
 0x1f6   : > { %15692 = vst [vmem:[#allocation100_spill] sm:$0xff] %v12894_v35  ;;  %v10143_v38 = vpop.f32.mrf.mxu1  ;;  %v15768_v35 = vld [vmem:[#allocation77_spill] sm:$0xff] }
 0x1f7   : > { %15693 = vst [vmem:[#allocation87_spill] sm:$0xff] %v12896_v55  ;;  %v10193_v18 = vpop.f32.mrf.mxu0  ;;  %v2567_v16 = vadd.f32 %v10143_v38, %v12682_v22 }
 0x1f8   : > { %v12899_v17 = vpop.f32.mrf.mxu1 }
 0x1f9   : > { %15694 = vst [vmem:[#allocation104_spill] sm:$0xff] %v12899_v17  ;;  %v12901_v20 = vpop.f32.mrf.mxu0  ;;  %v12903_v0 = vadd.f32 %v10193_v18, %v2567_v16  ;;  %v15783_v17 = vld [vmem:[#allocation115_spill] sm:$0xff] }
 0x1fa   : > { %15695 = vst [vmem:[#allocation89_spill] sm:$0xff] %v12901_v20  ;;  %v10146_v27 = vpop.f32.mrf.mxu1 }
 0x1fb   : > { %15696 = vst [vmem:[#allocation93_spill] sm:$0xff] %v12903_v0  ;;  %v10196_v60 = vpop.f32.mrf.mxu0  ;;  %v2569_v19 = vadd.f32 %v10146_v27, %v12709_v46 }
 0x1fc   : > { %v12906_v29 = vpop.f32.mrf.mxu1 }
 0x1fd   : > { %15697 = vst [vmem:[#allocation97_spill] sm:$0xff] %v12906_v29  ;;  %v12908_v15 = vpop.f32.mrf.mxu0  ;;  %v12910_v4 = vadd.f32 %v10196_v60, %v2569_v19 }
 0x1fe   : > { %15698 = vst [vmem:[#allocation101_spill] sm:$0xff] %v12908_v15  ;;  %v10149_v57 = vpop.f32.mrf.mxu1 }
 0x1ff   : > { %15699 = vst [vmem:[#allocation61_spill] sm:$0xff] %v12910_v4  ;;  %v10199_v55 = vpop.f32.mrf.mxu0  ;;  %v2571_v22 = vadd.f32 %v10149_v57, %v12732_v53  ;;  %v9076_v57 = vld [vmem:[%s15257_s2 + $0x10] sm:$0xff] }
 0x200   : > { %v12913_v38 = vpop.f32.mrf.mxu1  ;;  %10512 = vmatprep.subr.mxu1 %v9076_v57 }
 0x201   : > { %15700 = vst [vmem:[#allocation67_spill] sm:$0xff] %v12913_v38  ;;  %v12915_v32 = vpop.f32.mrf.mxu0  ;;  %v12917_v18 = vadd.f32 %v10199_v55, %v2571_v22  ;;  %10513 = vmatpush3.msra.mxu1 %v9076_v57 }
 0x202   : > { %15701 = vst [vmem:[#allocation76_spill] sm:$0xff] %v12915_v32  ;;  %v10152_v16 = vpop.f32.mrf.mxu1 }
 0x203   : > { %15702 = vst [vmem:[#allocation80_spill] sm:$0xff] %v12917_v18  ;;  %v10202_v0 = vpop.f32.mrf.mxu0  ;;  %v2573_v46 = vadd.f32 %v10152_v16, %v12755_v21 }
 0x204   : > { %v12920_v27 = vpop.f32.mrf.mxu1 }
 0x205   : > { %15703 = vst [vmem:[#allocation83_spill] sm:$0xff] %v12920_v27  ;;  %v12922_v24 = vpop.f32.mrf.mxu0  ;;  %v12924_v60 = vadd.f32 %v10202_v0, %v2573_v46 }
 0x206   : > { %15704 = vst [vmem:[#allocation117_spill] sm:$0xff] %v12922_v24  ;;  %v10155_v19 = vpop.f32.mrf.mxu1 }
 0x207   : > { %15705 = vst [vmem:[#allocation118_spill] sm:$0xff] %v12924_v60  ;;  %v10205_v4 = vpop.f32.mrf.mxu0  ;;  %v2575_v53 = vadd.f32 %v10155_v19, %v12781_v10 }
 0x208   : > { %v12930_v55 = vpop.f32.mrf.mxu1 }
 0x209   : > { %15706 = vst [vmem:[#allocation119_spill] sm:$0xff] %v12930_v55  ;;  %v12932_v22 = vpop.f32.mrf.mxu0  ;;  %v12934_v21 = vadd.f32 %v10205_v4, %v2575_v53 }
 0x20a   : > { %15707 = vst [vmem:[#allocation120_spill] sm:$0xff] %v12932_v22  ;;  %v10158_v16 = vpop.f32.mrf.mxu1 }
 0x20b   : > { %15708 = vst [vmem:[#allocation121_spill] sm:$0xff] %v12934_v21  ;;  %v10208_v18 = vpop.f32.mrf.mxu0  ;;  %v2577_v0 = vadd.f32 %v10158_v16, %v12806_v40 }
 0x20c   : > { %v12937_v46 = vpop.f32.mrf.mxu1 }
 0x20d   : > { %15709 = vst [vmem:[#allocation122_spill] sm:$0xff] %v12937_v46  ;;  %v12939_v60 = vpop.f32.mrf.mxu0  ;;  %v12941_v10 = vadd.f32 %v10208_v18, %v2577_v0 }
 0x20e   : > { %15710 = vst [vmem:[#allocation123_spill] sm:$0xff] %v12939_v60  ;;  %v10161_v19 = vpop.f32.mrf.mxu1 }
 0x20f   : > { %15711 = vst [vmem:[#allocation124_spill] sm:$0xff] %v12941_v10  ;;  %v10211_v24 = vpop.f32.mrf.mxu0  ;;  %v2579_v32 = vadd.f32 %v10161_v19, %v12828_v61 }
 0x210   : > { %v12944_v55 = vpop.f32.mrf.mxu1 }
 0x211   : > { %15712 = vst [vmem:[#allocation125_spill] sm:$0xff] %v12944_v55  ;;  %v12946_v22 = vpop.f32.mrf.mxu0  ;;  %v12948_v4 = vadd.f32 %v10211_v24, %v2579_v32 }
 0x212   : > { %15713 = vst [vmem:[#allocation126_spill] sm:$0xff] %v12946_v22  ;;  %v12950_v53 = vpop.f32.mrf.mxu1 }
 0x213   : > { %15714 = vst [vmem:[#allocation127_spill] sm:$0xff] %v12948_v4  ;;  %v12952_v57 = vpop.f32.mrf.mxu0 }
 0x214   : > { %v12954_v40 = vpop.f32.mrf.mxu1 }
 0x215   : > { %v12956_v16 = vpop.f32.mrf.mxu0 }
 0x216   : > { %v12958_v18 = vpop.f32.mrf.mxu1 }
 0x217   : > { %v12960_v0 = vpop.f32.mrf.mxu0 }
 0x218   : > { %15715 = vst [vmem:[#allocation128_spill] sm:$0xff] %v12960_v0  ;;  %v12962_v10 = vpop.f32.mrf.mxu1 }
 0x219   : > { %v12964_v61 = vpop.f32.mrf.mxu0 }
 0x21a   : > { %15716 = vst [vmem:[#allocation129_spill] sm:$0xff] %v12964_v61  ;;  %v12966_v19 = vpop.f32.mrf.mxu1  ;;  %v15766_v61 = vld [vmem:[#allocation72_spill] sm:$0xff] }
 0x21b   : > { %15717 = vst [vmem:[#allocation130_spill] sm:$0xff] %v12966_v19  ;;  %v12968_v24 = vpop.f32.mrf.mxu0 }
 0x21c   : > { %15718 = vst [vmem:[#allocation131_spill] sm:$0xff] %v12968_v24  ;;  %v12970_v32 = vpop.f32.mrf.mxu1  ;;  %v9109_v24 = vld [vmem:[%s15257_s2 + $0x18] sm:$0xff] }
 0x21d   : > { %15719 = vst [vmem:[#allocation132_spill] sm:$0xff] %v12970_v32  ;;  %v12972_v4 = vpop.f32.mrf.mxu0  ;;  %10562 = vmatprep.subr.mxu0 %v9109_v24  ;;  %v15767_v32 = vld [vmem:[#allocation109_spill] sm:$0xff] }
 0x21e   : > { %15720 = vst [vmem:[#allocation133_spill] sm:$0xff] %v12972_v4  ;;  %v12974_v21 = vpop.f32.mrf.mxu1  ;;  %10563 = vmatpush3.msra.mxu0 %v9109_v24 }
 0x21f   : > { %15721 = vst [vmem:[#allocation134_spill] sm:$0xff] %v12974_v21  ;;  %v12976_v22 = vpop.f32.mrf.mxu0 }
 0x220   : > { %15722 = vst [vmem:[#allocation135_spill] sm:$0xff] %v12976_v22  ;;  %v12978_v60 = vpop.f32.mrf.mxu1 }
 0x221   : > { %15723 = vst [vmem:[#allocation136_spill] sm:$0xff] %v12978_v60  ;;  %v12980_v55 = vpop.f32.mrf.mxu0 }
 0x222   : > { %15724 = vst [vmem:[#allocation137_spill] sm:$0xff] %v12980_v55  ;;  %v12982_v46 = vpop.f32.mrf.mxu1 }
 0x223   : > { %15725 = vst [vmem:[#allocation138_spill] sm:$0xff] %v12982_v46  ;;  %v12984_v27 = vpop.f32.mrf.mxu0 }
 0x224   : > { %15726 = vst [vmem:[#allocation139_spill] sm:$0xff] %v12984_v27  ;;  %v12989_v45 = vpop.f32.mrf.mxu1 }
 0x225   : > { %15727 = vst [vmem:[#allocation140_spill] sm:$0xff] %v12989_v45  ;;  %v12991_v38 = vpop.f32.mrf.mxu0 }
 0x226   : > { %15728 = vst [vmem:[#allocation141_spill] sm:$0xff] %v12991_v38  ;;  %v12993_v4 = vpop.f32.mrf.mxu1 }
 0x227   : > { %15729 = vst [vmem:[#allocation142_spill] sm:$0xff] %v12993_v4  ;;  %v12995_v22 = vpop.f32.mrf.mxu0 }
 0x228   : > { %15730 = vst [vmem:[#allocation143_spill] sm:$0xff] %v12995_v22  ;;  %v12997_v60 = vpop.f32.mrf.mxu1 }
 0x229   : > { %15731 = vst [vmem:[#allocation144_spill] sm:$0xff] %v12997_v60  ;;  %v12999_v55 = vpop.f32.mrf.mxu0 }
 0x22a   : > { %15732 = vst [vmem:[#allocation145_spill] sm:$0xff] %v12999_v55  ;;  %v13001_v46 = vpop.f32.mrf.mxu1 }
 0x22b   : > { %15733 = vst [vmem:[#allocation146_spill] sm:$0xff] %v13001_v46  ;;  %v13003_v27 = vpop.f32.mrf.mxu0 }
 0x22c   : > { %15734 = vst [vmem:[#allocation147_spill] sm:$0xff] %v13003_v27  ;;  %v13005_v21 = vpop.f32.mrf.mxu1 }
 0x22d   : > { %15735 = vst [vmem:[#allocation148_spill] sm:$0xff] %v13005_v21  ;;  %v13007_v15 = vpop.f32.mrf.mxu0 }
 0x22e   : > { %15736 = vst [vmem:[#allocation149_spill] sm:$0xff] %v13007_v15  ;;  %v13009_v45 = vpop.f32.mrf.mxu1 }
 0x22f   : > { %15737 = vst [vmem:[#allocation150_spill] sm:$0xff] %v13009_v45  ;;  %v13011_v38 = vpop.f32.mrf.mxu0 }
 0x230   : > { %15738 = vst [vmem:[#allocation151_spill] sm:$0xff] %v13011_v38  ;;  %v13013_v24 = vpop.f32.mrf.mxu1 }
 0x231   : > { %15739 = vst [vmem:[#allocation152_spill] sm:$0xff] %v13013_v24  ;;  %v13015_v4 = vpop.f32.mrf.mxu0 }
 0x232   : > { %15740 = vst [vmem:[#allocation153_spill] sm:$0xff] %v13015_v4  ;;  %v13017_v22 = vpop.f32.mrf.mxu1 }
 0x233   : > { %15741 = vst [vmem:[#allocation154_spill] sm:$0xff] %v13017_v22  ;;  %v13019_v60 = vpop.f32.mrf.mxu0 }
 0x234   : > { %15742 = vst [vmem:[#allocation155_spill] sm:$0xff] %v13019_v60  ;;  %v13021_v55 = vpop.f32.mrf.mxu1 }
 0x235   : > { %15743 = vst [vmem:[#allocation156_spill] sm:$0xff] %v13021_v55  ;;  %v13023_v46 = vpop.f32.mrf.mxu0 }
 0x236   : > { %15744 = vst [vmem:[#allocation157_spill] sm:$0xff] %v13023_v46  ;;  %v13025_v27 = vpop.f32.mrf.mxu1 }
 0x237   : > { %15745 = vst [vmem:[#allocation158_spill] sm:$0xff] %v13025_v27  ;;  %v13027_v21 = vpop.f32.mrf.mxu0 }
 0x238   : > { %15746 = vst [vmem:[#allocation159_spill] sm:$0xff] %v13027_v21  ;;  %v13029_v15 = vpop.f32.mrf.mxu1 }
 0x239   : > { %15747 = vst [vmem:[#allocation160_spill] sm:$0xff] %v13029_v15  ;;  %v13031_v45 = vpop.f32.mrf.mxu0 }
 0x23a   : > { %15748 = vst [vmem:[#allocation161_spill] sm:$0xff] %v13031_v45  ;;  %v13033_v38 = vpop.f32.mrf.mxu1  ;;  %v9142_v45 = vld [vmem:[%s15257_s2 + $0x20] sm:$0xff] }
 0x23b   : > { %15749 = vst [vmem:[#allocation162_spill] sm:$0xff] %v13033_v38  ;;  %v13035_v24 = vpop.f32.mrf.mxu0  ;;  %10612 = vmatprep.subr.mxu1 %v9142_v45  ;;  %v15762_v38 = vld [vmem:[#allocation107_spill] sm:$0xff]  ;;  %v1294_v45 = vadd.f32 %v15767_v32, %v15766_v61  ;;  %v15779_v32 = vld [vmem:[#allocation110_spill] sm:$0xff] }
 0x23c   : > { %15750 = vst [vmem:[#allocation163_spill] sm:$0xff] %v13035_v24  ;;  %v13037_v4 = vpop.f32.mrf.mxu1 }
 0x23d   : > { %15751 = vst [vmem:[#allocation164_spill] sm:$0xff] %v13037_v4  ;;  %v13039_v22 = vpop.f32.mrf.mxu0 }
 0x23e   : > { %15752 = vst [vmem:[#allocation165_spill] sm:$0xff] %v13039_v22  ;;  %v13041_v60 = vpop.f32.mrf.mxu1 }
 0x23f   : > { %15753 = vst [vmem:[#allocation166_spill] sm:$0xff] %v13041_v60  ;;  %v13043_v55 = vpop.f32.mrf.mxu0  ;;  %v15761_v60 = vld [vmem:[#allocation64_spill] sm:$0xff] }
 0x240   : > { %15754 = vst [vmem:[#allocation167_spill] sm:$0xff] %v13043_v55  ;;  %v13045_v46 = vpop.f32.mrf.mxu1  ;;  %v1284_v55 = vadd.f32 %v15762_v38, %v15761_v60  ;;  %v15774_v38 = vld [vmem:[#allocation81_spill] sm:$0xff]  ;;  %v15775_v60 = vld [vmem:[#allocation114_spill] sm:$0xff] }
 0x241   : > { %15755 = vst [vmem:[#allocation168_spill] sm:$0xff] %v13045_v46  ;;  %v13047_v27 = vpop.f32.mrf.mxu0 }
 0x242   : > { %15756 = vst [vmem:[#allocation169_spill] sm:$0xff] %v13047_v27  ;;  %v13052_v21 = vpop.f32.mrf.mxu1  ;;  %v15765_v27 = vld [vmem:[#allocation108_spill] sm:$0xff] }
 0x243   : > { %15757 = vst [vmem:[#allocation170_spill] sm:$0xff] %v13052_v21  ;;  %v13054_v24 = vpop.f32.mrf.mxu0  ;;  %v2091_v20 = vadd.f32 %v15765_v27, %v1284_v55  ;;  %v15769_v21 = vld [vmem:[#allocation111_spill] sm:$0xff]  ;;  %v15778_v27 = vld [vmem:[#allocation86_spill] sm:$0xff] }
 0x244   : > { %15758 = vst [vmem:[#allocation171_spill] sm:$0xff] %v13054_v24  ;;  %v13056_v4 = vpop.f32.mrf.mxu1  ;;  %v1304_v36 = vadd.f32 %v15769_v21, %v15768_v35  ;;  %v15770_v24 = vld [vmem:[#allocation79_spill] sm:$0xff]  ;;  %v1344_v55 = vadd.f32 %v12604_v63, %v15778_v27  ;;  %v2093_v35 = vadd.f32 %v15779_v32, %v1294_v45  ;;  %v15780_v21 = vld [vmem:[#allocation112_spill] sm:$0xff]  ;;  %v15785_v45 = vld [vmem:[#allocation106_spill] sm:$0xff] }
 0x245   : > { %15759 = vst [vmem:[#allocation172_spill] sm:$0xff] %v13056_v4  ;;  %v13058_v22 = vpop.f32.mrf.mxu0  ;;  %v1314_v4 = vadd.f32 %v15771_v44, %v15770_v24  ;;  %v2548_v61 = vadd.f32 %v12836_v43, %v2091_v20  ;;  %v15781_v44 = vld [vmem:[#allocation98_spill] sm:$0xff]  ;;  %v15786_v27 = vld [vmem:[#allocation91_spill] sm:$0xff] }
 0x246   : > { %15760 = vst [vmem:[#allocation173_spill] sm:$0xff] %v13058_v22  ;;  %v13062_v15 = vpop.f32.mrf.mxu1  ;;  %v2095_v29 = vadd.f32 %v15780_v21, %v1304_v36  ;;  %v1374_v24 = vadd.f32 %v12686_v54, %v15781_v44  ;;  %v2103_v63 = vadd.f32 %v12617_v34, %v1344_v55  ;;  %v15784_v43 = vld [vmem:[#allocation102_spill] sm:$0xff]  ;;  %v1394_v54 = vadd.f32 %v12736_v26, %v15785_v45  ;;  %v15788_v26 = vld [vmem:[#allocation95_spill] sm:$0xff] }
 0x247   : > { %15763 = vst [vmem:[#allocation64_spill] sm:$0xff] %v13062_v15  ;;  %v13064_v46 = vpop.f32.mrf.mxu0  ;;  %v1324_v15 = vadd.f32 %v15775_v60, %v15774_v38  ;;  %v15782_v38 = vld [vmem:[#allocation113_spill] sm:$0xff]  ;;  %v1384_v36 = vadd.f32 %v12713_v49, %v15784_v43  ;;  %v1404_v32 = vadd.f32 %v12759_v12, %v15786_v27  ;;  %v2816_v34 = vadd.f32 %v12838_v28, %v2548_v61  ;;  %v15789_v12 = vld [vmem:[#allocation99_spill] sm:$0xff] }
 0x248   : > { %15764 = vst [vmem:[#allocation107_spill] sm:$0xff] %v13064_v46  ;;  %v13073_v19 = vpop.f32.mrf.mxu1  ;;  %v15777_v46 = vld [vmem:[#allocation116_spill] sm:$0xff]  ;;  %v2097_v60 = vadd.f32 %v15782_v38, %v1314_v4  ;;  %v2109_v20 = vadd.f32 %v12698_v23, %v1374_v24  ;;  %v2550_v23 = vadd.f32 %v12843_v56, %v2093_v35  ;;  %v3274_v49 = vadd.f32 %v12950_v53, %v12840_v37 }
 0x249   : > { %15772 = vst [vmem:[#allocation108_spill] sm:$0xff] %v13073_v19  ;;  %v13075_v22 = vpop.f32.mrf.mxu0  ;;  %v1334_v0 = vadd.f32 %v15777_v46, %v15776_v8  ;;  %v2099_v8 = vadd.f32 %v15783_v17, %v1324_v15  ;;  %v15787_v15 = vld [vmem:[#allocation103_spill] sm:$0xff]  ;;  %v2111_v17 = vadd.f32 %v12723_v5, %v1384_v36  ;;  %v1424_v55 = vadd.f32 %v12811_v51, %v15789_v12 }
 0x24a   : > { %15773 = vst [vmem:[#allocation72_spill] sm:$0xff] %v13075_v22  ;;  %v13088_v19 = vpop.f32.mrf.mxu1  ;;  %v2552_v44 = vadd.f32 %v12850_v9, %v2095_v29  ;;  %v2113_v28 = vadd.f32 %v12746_v14, %v1394_v54  ;;  %v2115_v56 = vadd.f32 %v12770_v3, %v1404_v32  ;;  %v2554_v37 = vadd.f32 %v12857_v13, %v2097_v60 }
 0x24b   : > { %v13090_v22 = vpop.f32.mrf.mxu0  ;;  %v2101_v46 = vadd.f32 %v12587_v11, %v1334_v0  ;;  %v1434_v11 = vadd.f32 %v12824_v52, %v15787_v15  ;;  %v1414_v0 = vadd.f32 %v12785_v47, %v15788_v26  ;;  %v3273_v5 = vadd.f32 %v12954_v40, %v2816_v34  ;;  %v15799_v34 = vld [vmem:[#allocation129_spill] sm:$0xff] }
 0x24c   : > { %v13103_v21 = vpop.f32.mrf.mxu1  ;;  %v2119_v47 = vadd.f32 %v12813_v6, %v1424_v55  ;;  %v2556_v51 = vadd.f32 %v12864_v25, %v2099_v8  ;;  %v2818_v3 = vadd.f32 %v12845_v58, %v2550_v23  ;;  %v3731_v13 = vadd.f32 %v12952_v57, %v3274_v49  ;;  %v15801_v55 = vld [vmem:[#allocation101_spill] sm:$0xff] }
 0x24d   : > { %v13105_v4 = vpop.f32.mrf.mxu0  ;;  %v2117_v53 = vadd.f32 %v12795_v48, %v1414_v0  ;;  %v2558_v9 = vadd.f32 %v12871_v1, %v2101_v46  ;;  %v2121_v14 = vadd.f32 %v12826_v62, %v1434_v11  ;;  %v3276_v40 = vadd.f32 %v12958_v18, %v12847_v59  ;;  %v15800_v0 = vld [vmem:[#allocation89_spill] sm:$0xff] }
 0x24e   : > { %v13119_v24 = vpop.f32.mrf.mxu1  ;;  %v2820_v48 = vadd.f32 %v12852_v41, %v2552_v44  ;;  %v2560_v6 = vadd.f32 %v12878_v31, %v2103_v63  ;;  %v2562_v25 = vadd.f32 %v12885_v33, %v12635_v7  ;;  %v2564_v1 = vadd.f32 %v12892_v30, %v12661_v2  ;;  %v15790_v31 = vld [vmem:[#allocation104_spill] sm:$0xff]  ;;  %v15791_v7 = vld [vmem:[#allocation97_spill] sm:$0xff] }
 0x24f   : > { %v13121_v52 = vpop.f32.mrf.mxu0  ;;  %v2822_v62 = vadd.f32 %v12859_v42, %v2554_v37  ;;  %v3730_v58 = vadd.f32 %v12956_v16, %v3273_v5  ;;  %v3275_v57 = vadd.f32 %v12962_v10, %v2818_v3  ;;  %v2824_v59 = vadd.f32 %v12866_v50, %v2556_v51  ;;  %v15792_v30 = vld [vmem:[#allocation128_spill] sm:$0xff]  ;;  %v15793_v63 = vld [vmem:[#allocation85_spill] sm:$0xff]  ;;  %v15794_v42 = vld [vmem:[#allocation130_spill] sm:$0xff] }
 0x250   : > { %v13131_v29 = vpop.f32.mrf.mxu1  ;;  %v13151_v41 = vadd.f32 %v12873_v39, %v2558_v9  ;;  %v2566_v18 = vadd.f32 %v15790_v31, %v2109_v20  ;;  %v2568_v33 = vadd.f32 %v15791_v7, %v2111_v17  ;;  %v3733_v46 = vadd.f32 %v15792_v30, %v3276_v40  ;;  %v15795_v10 = vld [vmem:[#allocation92_spill] sm:$0xff]  ;;  %v15796_v50 = vld [vmem:[#allocation82_spill] sm:$0xff]  ;;  %v15802_v37 = vld [vmem:[#allocation67_spill] sm:$0xff] }
 0x251   : > { %v13133_v61 = vpop.f32.mrf.mxu0  ;;  %v3278_v43 = vadd.f32 %v15794_v42, %v15793_v63  ;;  %v13159_v45 = vadd.f32 %v15795_v10, %v2560_v6  ;;  %v13162_v54 = vadd.f32 %v15796_v50, %v2562_v25  ;;  %v15797_v39 = vld [vmem:[#allocation100_spill] sm:$0xff]  ;;  %v3732_v23 = vadd.f32 %v15799_v34, %v3275_v57  ;;  %v15804_v9 = vld [vmem:[#allocation134_spill] sm:$0xff]  ;;  %v15807_v57 = vld [vmem:[#allocation119_spill] sm:$0xff] }
 0x252   : > { %v10316_v35 = vpop.f32.mrf.mxu1  ;;  %v13165_v27 = vadd.f32 %v15797_v39, %v2564_v1  ;;  %v15798_v20 = vld [vmem:[#allocation132_spill] sm:$0xff]  ;;  %v13170_v12 = vadd.f32 %v15800_v0, %v2566_v18  ;;  %v13173_v44 = vadd.f32 %v15801_v55, %v2568_v33  ;;  %v2570_v5 = vadd.f32 %v15802_v37, %v2113_v28  ;;  %v15808_v31 = vld [vmem:[#allocation122_spill] sm:$0xff]  ;;  %v15809_v7 = vld [vmem:[#allocation133_spill] sm:$0xff] }
 0x253   : > { %v10366_v38 = vpop.f32.mrf.mxu0  ;;  %v3999_v60 = vadd.f32 %v10316_v35, %v3731_v13  ;;  %v3277_v32 = vadd.f32 %v15798_v20, %v2820_v48  ;;  %v15803_v51 = vld [vmem:[#allocation88_spill] sm:$0xff]  ;;  %v15805_v48 = vld [vmem:[#allocation131_spill] sm:$0xff]  ;;  %v2576_v18 = vadd.f32 %v15808_v31, %v2119_v47  ;;  %v15814_v50 = vld [vmem:[#allocation90_spill] sm:$0xff] }
 0x254   : > { %v3839_v8 = vpop.f32.mrf.mxu1  ;;  %v3280_v3 = vadd.f32 %v15804_v9, %v15803_v51  ;;  %v3735_v6 = vadd.f32 %v15805_v48, %v3278_v43  ;;  %v15811_v43 = vld [vmem:[#allocation76_spill] sm:$0xff]  ;;  %v15813_v10 = vld [vmem:[#allocation135_spill] sm:$0xff]  ;;  %v15815_v47 = vld [vmem:[#allocation138_spill] sm:$0xff] }
 0x255   : > { %v4296_v2 = vpop.f32.mrf.mxu0  ;;  %v4456_v16 = vadd.f32 %v10366_v38, %v3999_v60  ;;  %v3998_v36 = vadd.f32 %v3839_v8, %v3730_v58  ;;  %v15806_v38 = vld [vmem:[#allocation83_spill] sm:$0xff]  ;;  %v2574_v60 = vadd.f32 %v15807_v57, %v2117_v53  ;;  %v3734_v28 = vadd.f32 %v15809_v7, %v3277_v32  ;;  %v15820_v37 = vld [vmem:[#allocation105_spill] sm:$0xff]  ;;  %v15827_v31 = vld [vmem:[#allocation146_spill] sm:$0xff] }
 0x256   : > { %v10319_v15 = vpop.f32.mrf.mxu1  ;;  %v2572_v58 = vadd.f32 %v15806_v38, %v2115_v56  ;;  %v3737_v53 = vadd.f32 %v15813_v10, %v3280_v3  ;;  %v3282_v39 = vadd.f32 %v15815_v47, %v15814_v50  ;;  %v15832_v10 = vld [vmem:[#allocation150_spill] sm:$0xff] }
 0x257   : > { %v10369_v11 = vpop.f32.mrf.mxu0  ;;  %v4488_v49 = vmax.f32 %v4456_v16, 0.0  ;;  %v4455_v17 = vadd.f32 %v4296_v2, %v3998_v36  ;;  %v4001_v26 = vadd.f32 %v10319_v15, %v3733_v46  ;;  %v15810_v2 = vld [vmem:[#allocation136_spill] sm:$0xff]  ;;  %v13187_v16 = vadd.f32 %v15811_v43, %v2570_v5  ;;  %v15812_v36 = vld [vmem:[#allocation125_spill] sm:$0xff]  ;;  %v15821_v5 = vld [vmem:[#allocation142_spill] sm:$0xff] }
 0x258   : > { %v3849_v13 = vpop.f32.mrf.mxu1  ;;  %v3279_v30 = vadd.f32 %v15810_v2, %v2822_v62  ;;  %v2578_v56 = vadd.f32 %v15812_v36, %v2121_v14  ;;  %v15816_v15 = vld [vmem:[#allocation140_spill] sm:$0xff]  ;;  %v15819_v14 = vld [vmem:[#allocation123_spill] sm:$0xff]  ;;  %v3284_v51 = vadd.f32 %v15821_v5, %v15820_v37 }
 0x259   : > { %v4306_v40 = vpop.f32.mrf.mxu0  ;;  %4527 = vst.msk [vmem:[#allocation3 + $0x20] sm:$0xff] %vm4519_vm4, %v4488_v49  ;;  %v4487_v25 = vmax.f32 %v4455_v17, 0.0  ;;  %v4458_v1 = vadd.f32 %v10369_v11, %v4001_v26  ;;  %v4000_v35 = vadd.f32 %v3849_v13, %v3732_v23  ;;  %v3281_v11 = vadd.f32 %v15816_v15, %v2824_v59  ;;  %v15817_v49 = vld [vmem:[#allocation117_spill] sm:$0xff]  ;;  %v15818_v26 = vld [vmem:[#allocation120_spill] sm:$0xff] }
 0x25a   : > { %v10322_v33 = vpop.f32.mrf.mxu1  ;;  %v13196_v17 = vadd.f32 %v15817_v49, %v2572_v58  ;;  %v13199_v0 = vadd.f32 %v15818_v26, %v2574_v60  ;;  %v13202_v55 = vadd.f32 %v15819_v14, %v2576_v18  ;;  %v15822_v59 = vld [vmem:[#allocation137_spill] sm:$0xff]  ;;  %v15825_v58 = vld [vmem:[#allocation144_spill] sm:$0xff]  ;;  %v15826_v60 = vld [vmem:[#allocation94_spill] sm:$0xff] }
 0x25b   : > { %v10372_v8 = vpop.f32.mrf.mxu0  ;;  %4526 = vst.msk [vmem:[#allocation3 + $0x18] sm:$0xff] %vm4519_vm4, %v4487_v25  ;;  %v4490_v46 = vmax.f32 %v4458_v1, 0.0  ;;  %v4457_v63 = vadd.f32 %v4306_v40, %v4000_v35  ;;  %v4003_v42 = vadd.f32 %v10322_v33, %v3735_v6  ;;  %v3736_v13 = vadd.f32 %v15822_v59, %v3279_v30  ;;  %v15823_v25 = vld [vmem:[#allocation126_spill] sm:$0xff]  ;;  %v15824_v35 = vld [vmem:[#allocation139_spill] sm:$0xff]  ;;  %v15830_v36 = vld [vmem:[#allocation148_spill] sm:$0xff] }
 0x25c   : > { %v3859_v20 = vpop.f32.mrf.mxu1  ;;  %v13209_v1 = vadd.f32 %v15823_v25, %v2578_v56  ;;  %v3739_v38 = vadd.f32 %v15824_v35, %v3282_v39  ;;  %v3283_v57 = vadd.f32 %v15825_v58, %v13151_v41  ;;  %v3286_v18 = vadd.f32 %v15827_v31, %v15826_v60  ;;  %v15831_v41 = vld [vmem:[#allocation96_spill] sm:$0xff]  ;;  %v15835_v49 = vld [vmem:[#allocation145_spill] sm:$0xff]  ;;  %v15836_v14 = vld [vmem:[#allocation147_spill] sm:$0xff] }
 0x25d   : > { %v4316_v32 = vpop.f32.mrf.mxu0  ;;  %4529 = vst.msk [vmem:[#allocation3 + $0x30] sm:$0xff] %vm4519_vm4, %v4490_v46  ;;  %v4489_v62 = vmax.f32 %v4457_v63, 0.0  ;;  %v4460_v34 = vadd.f32 %v10372_v8, %v4003_v42  ;;  %v4002_v23 = vadd.f32 %v3859_v20, %v3734_v28  ;;  %v15828_v8 = vld [vmem:[#allocation141_spill] sm:$0xff]  ;;  %v15829_v42 = vld [vmem:[#allocation143_spill] sm:$0xff]  ;;  %v3285_v56 = vadd.f32 %v15830_v36, %v13159_v45  ;;  %v15833_v20 = vld [vmem:[#allocation12_spill] sm:$0xff] }
 0x25e   : > { %v10325_v9 = vpop.f32.mrf.mxu1  ;;  %v3738_v2 = vadd.f32 %v15828_v8, %v3281_v11  ;;  %v3741_v43 = vadd.f32 %v15829_v42, %v3284_v51  ;;  %v15834_v45 = vld [vmem:[#allocation11_spill] sm:$0xff]  ;;  %v3740_v26 = vadd.f32 %v15835_v49, %v3283_v57  ;;  %v3743_v37 = vadd.f32 %v15836_v14, %v3286_v18  ;;  %v15837_v5 = vld [vmem:[#allocation152_spill] sm:$0xff]  ;;  %v15838_v25 = vld [vmem:[#allocation149_spill] sm:$0xff] }
 0x25f   : > { %v10375_v3 = vpop.f32.mrf.mxu0  ;;  %4528 = vst.msk [vmem:[#allocation3 + $0x28] sm:$0xff] %vm4519_vm4, %v4489_v62  ;;  %v4492_v40 = vmax.f32 %v4460_v34, 0.0  ;;  %v4459_v48 = vadd.f32 %v4316_v32, %v4002_v23  ;;  %v4005_v6 = vadd.f32 %v10325_v9, %v3737_v53  ;;  %v3288_v53 = vadd.f32 %v15832_v10, %v15831_v41  ;;  %v13239_v23 = vld [vmem:[%s15257_s2 + $0x28] sm:$0xff]  ;;  %v15840_v18 = vld [vmem:[#allocation16_spill] sm:$0xff]  ;;  %v15844_v36 = vld [vmem:[#allocation154_spill] sm:$0xff] }
 0x260   : > { %v3869_v7 = vpop.f32.mrf.mxu1  ;;  %v13216_v33 = vld [vmem:[#allocation3 + $0x20] sm:$0xff]  ;;  %v3287_v51 = vadd.f32 %v15837_v5, %v13162_v54  ;;  %10662 = vmatprep.subr.mxu0 %v13239_v23  ;;  %v3742_v35 = vadd.f32 %v15838_v25, %v3285_v56  ;;  %v15843_v42 = vld [vmem:[#allocation87_spill] sm:$0xff] }
 0x261   : > { %v4326_v28 = vpop.f32.mrf.mxu0  ;;  %4531 = vst.msk [vmem:[#allocation3 + $0x40] sm:$0xff] %vm4519_vm4, %v4492_v40  ;;  %v4491_v30 = vmax.f32 %v4459_v48, 0.0  ;;  %v4462_v46 = vadd.f32 %v10375_v3, %v4005_v6  ;;  %v4004_v63 = vadd.f32 %v3869_v7, %v3736_v13  ;;  %v13229_v32 = vmul.f32 %v13216_v33, %v15833_v20  ;;  %v15847_v49 = vld [vmem:[#allocation156_spill] sm:$0xff] }
 0x262   : > { %v10328_v50 = vpop.f32.mrf.mxu1  ;;  %v13225_v39 = vld [vmem:[#allocation3 + $0x18] sm:$0xff]  ;;  %v3290_v56 = vadd.f32 %v15844_v36, %v15843_v42  ;;  %v3289_v14 = vadd.f32 %v15847_v49, %v13165_v27  ;;  %v15855_v49 = vld [vmem:[#allocation24_spill] sm:$0xff] }
 0x263   : > { %v10378_v47 = vpop.f32.mrf.mxu0  ;;  %4530 = vst.msk [vmem:[#allocation3 + $0x38] sm:$0xff] %vm4519_vm4, %v4491_v30  ;;  %v4494_v15 = vmax.f32 %v4462_v46, 0.0  ;;  %v4461_v11 = vadd.f32 %v4326_v28, %v4004_v63  ;;  %v4007_v62 = vadd.f32 %v10328_v50, %v3739_v38  ;;  %10417 = vmatprep.mubr.msk.f32.mxu1 %vm4519_vm4, %v13225_v39  ;;  %v4599_v34 = vmul.f32 %v13225_v39, %v15834_v45  ;;  %v15839_v38 = vld [vmem:[#allocation151_spill] sm:$0xff] }
 0x264   : > { %v3879_v9 = vpop.f32.mrf.mxu1  ;;  %10418 = vmatmul.mubr.msk.f32.gmra.mxu1 %vm4519_vm4, %v13216_v33  ;;  %v13247_v59 = vld [vmem:[#allocation3 + $0x30] sm:$0xff]  ;;  %v13253_v58 = vadd.f32 %v15839_v38, %v3288_v53  ;;  %v4993_v31 = vrot.slane %v13229_v32, 7  ;;  %v15841_v30 = vld [vmem:[#allocation75_spill] sm:$0xff]  ;;  %v15846_v32 = vld [vmem:[#allocation153_spill] sm:$0xff] }
 0x265   : > { %v4336_v3 = vpop.f32.mrf.mxu0  ;;  %4533 = vst.msk [vmem:[#allocation3 + $0x50] sm:$0xff] %vm4519_vm4, %v4494_v15  ;;  %v4493_v13 = vmax.f32 %v4461_v11, 0.0  ;;  %v4464_v40 = vadd.f32 %v10378_v47, %v4007_v62  ;;  %v4006_v48 = vadd.f32 %v3879_v9, %v3738_v2  ;;  %v4991_v6 = vrot.slane %v4599_v34, 7  ;;  %v15845_v50 = vld [vmem:[#allocation15_spill] sm:$0xff] }
 0x266   : > { %v10331_v54 = vpop.f32.mrf.mxu1  ;;  %v13255_v60 = vld [vmem:[#allocation3 + $0x28] sm:$0xff]  ;;  %v13260_v7 = vmul.f32 %v13247_v59, %v15840_v18  ;;  %v15842_v46 = vrot.slane %v15841_v30, 7  ;;  %v3744_v15 = vadd.f32 %v15846_v32, %v3287_v51  ;;  %v15849_v27 = vld [vmem:[#allocation19_spill] sm:$0xff] }
 0x267   : > { %v10381_v57 = vpop.f32.mrf.mxu0  ;;  %4532 = vst.msk [vmem:[#allocation3 + $0x48] sm:$0xff] %vm4519_vm4, %v4493_v13  ;;  %v4496_v28 = vmax.f32 %v4464_v40, 0.0  ;;  %v4463_v8 = vadd.f32 %v4336_v3, %v4006_v48  ;;  %v4009_v2 = vadd.f32 %v10331_v54, %v3741_v43  ;;  %10420 = vmatprep.mubr.msk.f32.mxu1 %vm4519_vm4, %v13255_v60  ;;  %v4994_v53 = vsel %vm1084_vm3, %v4991_v6, %v4993_v31  ;;  %v15848_v48 = vld [vmem:[#allocation20_spill] sm:$0xff]  ;;  %v15850_v54 = vld [vmem:[#allocation155_spill] sm:$0xff] }
 0x268   : > { %v4992_v63 = vsel %vm1084_vm3, %v15842_v46, %v4991_v6  ;;  %v3889_v41 = vpop.f32.mrf.mxu1  ;;  %10421 = vmatmul.mubr.msk.f32.gmra.mxu1 %vm4519_vm4, %v13247_v59  ;;  %v13274_v43 = vld [vmem:[#allocation3 + $0x40] sm:$0xff]  ;;  %v4601_v47 = vmul.f32 %v13255_v60, %v15845_v50  ;;  %v4997_v40 = vrot.slane %v13260_v7, 7 }
 0x269   : > { %v4346_v10 = vpop.f32.mrf.mxu0  ;;  %10467 = vmatprep.mubr.msk.f32.mxu0 %vm4519_vm4, %v4992_v63  ;;  %4535 = vst.msk [vmem:[#allocation3 + $0x60] sm:$0xff] %vm4519_vm4, %v4496_v28  ;;  %v4495_v11 = vmax.f32 %v4463_v8, 0.0  ;;  %v4466_v62 = vadd.f32 %v10381_v57, %v4009_v2  ;;  %v4008_v34 = vadd.f32 %v3889_v41, %v3740_v26  ;;  %v13288_v51 = vmul.f32 %v13274_v43, %v15848_v48  ;;  %v15851_v28 = vld [vmem:[#allocation93_spill] sm:$0xff]  ;;  %v15852_v8 = vld [vmem:[#allocation158_spill] sm:$0xff] }
 0x26a   : > { %10468 = vmatmul.mubr.msk.f32.gmra.mxu0 %vm4519_vm4, %v4994_v53  ;;  %v10334_v5 = vpop.f32.mrf.mxu1  ;;  %v13283_v3 = vld [vmem:[#allocation3 + $0x38] sm:$0xff]  ;;  %v4995_v13 = vrot.slane %v4601_v47, 7  ;;  %v3747_v57 = vadd.f32 %v15850_v54, %v3290_v56  ;;  %v3292_v7 = vadd.f32 %v15852_v8, %v15851_v28  ;;  %v15854_v47 = vld [vmem:[#allocation160_spill] sm:$0xff] }
 0x26b   : > { %v10384_v9 = vpop.f32.mrf.mxu0  ;;  %4534 = vst.msk [vmem:[#allocation3 + $0x58] sm:$0xff] %vm4519_vm4, %v4495_v11  ;;  %v4498_v6 = vmax.f32 %v4466_v62, 0.0  ;;  %v4465_v26 = vadd.f32 %v4346_v10, %v4008_v34  ;;  %v4011_v25 = vadd.f32 %v10334_v5, %v3743_v37  ;;  %10423 = vmatprep.mubr.msk.f32.mxu1 %vm4519_vm4, %v13283_v3  ;;  %v4603_v38 = vmul.f32 %v13283_v3, %v15849_v27  ;;  %v15853_v10 = vld [vmem:[#allocation157_spill] sm:$0xff]  ;;  %v15859_v8 = vld [vmem:[#allocation159_spill] sm:$0xff] }
 0x26c   : > { %v3899_v2 = vpop.f32.mrf.mxu1  ;;  %10424 = vmatmul.mubr.msk.f32.gmra.mxu1 %vm4519_vm4, %v13274_v43  ;;  %v4996_v46 = vsel %vm1084_vm3, %v4993_v31, %v4995_v13  ;;  %v4998_v37 = vsel %vm1084_vm3, %v4995_v13, %v4997_v40  ;;  %v13302_v63 = vld [vmem:[#allocation3 + $0x50] sm:$0xff]  ;;  %v3746_v53 = vadd.f32 %v15853_v10, %v3289_v14  ;;  %v3291_v32 = vadd.f32 %v15854_v47, %v13170_v12  ;;  %v15856_v13 = vld [vmem:[#allocation61_spill] sm:$0xff] }
 0x26d   : > { %v4356_v30 = vpop.f32.mrf.mxu0  ;;  %4537 = vst.msk [vmem:[#allocation3 + $0x70] sm:$0xff] %vm4519_vm4, %v4498_v6  ;;  %v4497_v42 = vmax.f32 %v4465_v26, 0.0  ;;  %v4468_v36 = vadd.f32 %v10384_v9, %v4011_v25  ;;  %v4010_v41 = vadd.f32 %v3899_v2, %v3742_v35  ;;  %10470 = vmatprep.mubr.msk.f32.mxu0 %vm4519_vm4, %v4996_v46  ;;  %v4999_v56 = vrot.slane %v4603_v38, 7  ;;  %v15857_v6 = vld [vmem:[#allocation162_spill] sm:$0xff] }
 0x26e   : > { %10471 = vmatmul.mubr.msk.f32.gmra.mxu0 %vm4519_vm4, %v4998_v37  ;;  %v10337_v31 = vpop.f32.mrf.mxu1  ;;  %v13310_v62 = vld [vmem:[#allocation3 + $0x48] sm:$0xff]  ;;  %v5001_v34 = vrot.slane %v13288_v51, 7  ;;  %v13315_v5 = vmul.f32 %v13302_v63, %v15855_v49  ;;  %v3294_v26 = vadd.f32 %v15857_v6, %v15856_v13  ;;  %v3749_v2 = vadd.f32 %v15859_v8, %v3292_v7  ;;  %v15860_v37 = vld [vmem:[#allocation164_spill] sm:$0xff]  ;;  %v15864_v13 = vld [vmem:[#allocation163_spill] sm:$0xff] }
 0x26f   : > { %v10387_v11 = vpop.f32.mrf.mxu0  ;;  %4536 = vst.msk [vmem:[#allocation3 + $0x68] sm:$0xff] %vm4519_vm4, %v4497_v42  ;;  %v4500_v35 = vmax.f32 %v4468_v36, 0.0  ;;  %v4467_v9 = vadd.f32 %v4356_v30, %v4010_v41  ;;  %v4013_v14 = vadd.f32 %v10337_v31, %v13253_v58  ;;  %10426 = vmatprep.mubr.msk.f32.mxu1 %vm4519_vm4, %v13310_v62  ;;  %v5000_v12 = vsel %vm1084_vm3, %v4997_v40, %v4999_v56  ;;  %v15858_v58 = vld [vmem:[#allocation23_spill] sm:$0xff]  ;;  %v15861_v31 = vld [vmem:[#allocation28_spill] sm:$0xff] }
 0x270   : > { %v3909_v25 = vpop.f32.mrf.mxu1  ;;  %10427 = vmatmul.mubr.msk.f32.gmra.mxu1 %vm4519_vm4, %v13302_v63  ;;  %10473 = vmatprep.mubr.msk.f32.mxu0 %vm4519_vm4, %v5000_v12  ;;  %v5002_v38 = vsel %vm1084_vm3, %v4999_v56, %v5001_v34  ;;  %v13328_v54 = vld [vmem:[#allocation3 + $0x60] sm:$0xff]  ;;  %v4605_v28 = vmul.f32 %v13310_v62, %v15858_v58  ;;  %v3293_v42 = vadd.f32 %v15860_v37, %v13173_v44  ;;  %v5005_v47 = vrot.slane %v13315_v5, 7  ;;  %v15862_v44 = vld [vmem:[#allocation27_spill] sm:$0xff]  ;;  %v15867_v37 = vld [vmem:[#allocation166_spill] sm:$0xff] }
 0x271   : > { %v4366_v51 = vpop.f32.mrf.mxu0  ;;  %4539 = vst.msk [vmem:[#allocation3 + $0x80] sm:$0xff] %vm4519_vm4, %v4500_v35  ;;  %v4499_v40 = vmax.f32 %v4467_v9, 0.0  ;;  %v4470_v30 = vadd.f32 %v10387_v11, %v4013_v14  ;;  %v4012_v46 = vadd.f32 %v3909_v25, %v3744_v15  ;;  %v13342_v7 = vmul.f32 %v13328_v54, %v15861_v31  ;;  %v15863_v14 = vld [vmem:[#allocation161_spill] sm:$0xff] }
 0x272   : > { %10474 = vmatmul.mubr.msk.f32.gmra.mxu0 %vm4519_vm4, %v5002_v38  ;;  %v10340_v36 = vpop.f32.mrf.mxu1  ;;  %v13337_v56 = vld [vmem:[#allocation3 + $0x58] sm:$0xff]  ;;  %v5003_v10 = vrot.slane %v4605_v28, 7  ;;  %v3748_v12 = vadd.f32 %v15863_v14, %v3291_v32  ;;  %v3751_v6 = vadd.f32 %v15864_v13, %v3294_v26  ;;  %v15865_v26 = vld [vmem:[#allocation165_spill] sm:$0xff] }
 0x273   : > { %v10390_v41 = vpop.f32.mrf.mxu0  ;;  %4538 = vst.msk [vmem:[#allocation3 + $0x78] sm:$0xff] %vm4519_vm4, %v4499_v40  ;;  %v4502_v11 = vmax.f32 %v4470_v30, 0.0  ;;  %v4469_v15 = vadd.f32 %v4366_v51, %v4012_v46  ;;  %v4015_v35 = vadd.f32 %v10340_v36, %v3747_v57  ;;  %10429 = vmatprep.mubr.msk.f32.mxu1 %vm4519_vm4, %v13337_v56  ;;  %v4607_v9 = vmul.f32 %v13337_v56, %v15862_v44  ;;  %v15866_v46 = vld [vmem:[#allocation80_spill] sm:$0xff] }
 0x274   : > { %v3919_v5 = vpop.f32.mrf.mxu1  ;;  %10430 = vmatmul.mubr.msk.f32.gmra.mxu1 %vm4519_vm4, %v13328_v54  ;;  %v5004_v38 = vsel %vm1084_vm3, %v5001_v34, %v5003_v10  ;;  %v5006_v51 = vsel %vm1084_vm3, %v5003_v10, %v5005_v47  ;;  %v13355_v57 = vld [vmem:[#allocation3 + $0x70] sm:$0xff]  ;;  %v3750_v30 = vadd.f32 %v15865_v26, %v3293_v42  ;;  %v3296_v36 = vadd.f32 %v15867_v37, %v15866_v46  ;;  %v15874_v37 = vld [vmem:[#allocation172_spill] sm:$0xff] }
 0x275   : > { %v4376_v25 = vpop.f32.mrf.mxu0  ;;  %4541 = vst.msk [vmem:[#allocation3 + $0x90] sm:$0xff] %vm4519_vm4, %v4502_v11  ;;  %v4501_v28 = vmax.f32 %v4469_v15, 0.0  ;;  %v4472_v8 = vadd.f32 %v10390_v41, %v4015_v35  ;;  %v4014_v40 = vadd.f32 %v3919_v5, %v3746_v53  ;;  %10476 = vmatprep.mubr.msk.f32.mxu0 %vm4519_vm4, %v5004_v38  ;;  %v5007_v32 = vrot.slane %v4607_v9, 7  ;;  %v15868_v11 = vld [vmem:[#allocation32_spill] sm:$0xff] }
 0x276   : > { %10477 = vmatmul.mubr.msk.f32.gmra.mxu0 %vm4519_vm4, %v5006_v51  ;;  %v10343_v34 = vpop.f32.mrf.mxu1  ;;  %v13363_v10 = vld [vmem:[#allocation3 + $0x68] sm:$0xff]  ;;  %v5009_v13 = vrot.slane %v13342_v7, 7  ;;  %v13368_v41 = vmul.f32 %v13355_v57, %v15868_v11  ;;  %v15869_v9 = vld [vmem:[#allocation168_spill] sm:$0xff] }
 0x277   : > { %v10393_v14 = vpop.f32.mrf.mxu0  ;;  %4540 = vst.msk [vmem:[#allocation3 + $0x88] sm:$0xff] %vm4519_vm4, %v4501_v28  ;;  %v4504_v53 = vmax.f32 %v4472_v8, 0.0  ;;  %v4471_v15 = vadd.f32 %v4376_v25, %v4014_v40  ;;  %v4017_v42 = vadd.f32 %v10343_v34, %v3749_v2  ;;  %10432 = vmatprep.mubr.msk.f32.mxu1 %vm4519_vm4, %v13363_v10  ;;  %v5008_v35 = vsel %vm1084_vm3, %v5005_v47, %v5007_v32  ;;  %v15871_v2 = vld [vmem:[#allocation31_spill] sm:$0xff]  ;;  %v15872_v8 = vld [vmem:[#allocation118_spill] sm:$0xff] }
 0x278   : > { %v3295_v5 = vadd.f32 %v15869_v9, %v13187_v16  ;;  %v3929_v38 = vpop.f32.mrf.mxu1  ;;  %10433 = vmatmul.mubr.msk.f32.gmra.mxu1 %vm4519_vm4, %v13355_v57  ;;  %10479 = vmatprep.mubr.msk.f32.mxu0 %vm4519_vm4, %v5008_v35  ;;  %v5010_v7 = vsel %vm1084_vm3, %v5007_v32, %v5009_v13  ;;  %v13380_v28 = vld [vmem:[#allocation3 + $0x80] sm:$0xff]  ;;  %v4609_v25 = vmul.f32 %v13363_v10, %v15871_v2  ;;  %v15873_v40 = vld [vmem:[#allocation170_spill] sm:$0xff]  ;;  %v5013_v31 = vrot.slane %v13368_v41, 7 }
 0x279   : > { %v4386_v51 = vpop.f32.mrf.mxu0  ;;  %15870 = vst [vmem:[#allocation109_spill] sm:$0xff] %v13380_v28  ;;  %v3298_v47 = vadd.f32 %v15873_v40, %v15872_v8  ;;  %4543 = vst.msk [vmem:[#allocation3 + $0xa0] sm:$0xff] %vm4519_vm4, %v4504_v53  ;;  %v4503_v16 = vmax.f32 %v4471_v15, 0.0  ;;  %v4474_v26 = vadd.f32 %v10393_v14, %v4017_v42  ;;  %v4016_v46 = vadd.f32 %v3929_v38, %v3748_v12  ;;  %v15875_v2 = vld [vmem:[#allocation36_spill] sm:$0xff]  ;;  %v15877_v42 = vld [vmem:[#allocation167_spill] sm:$0xff] }
 0x27a   : > { %v3297_v34 = vadd.f32 %v15874_v37, %v13196_v17  ;;  %10480 = vmatmul.mubr.msk.f32.gmra.mxu0 %vm4519_vm4, %v5010_v7  ;;  %v10346_v35 = vpop.f32.mrf.mxu1  ;;  %v13390_v9 = vld [vmem:[#allocation3 + $0x78] sm:$0xff]  ;;  %v5011_v11 = vrot.slane %v4609_v25, 7  ;;  %v13395_v8 = vmul.f32 %v13380_v28, %v15875_v2  ;;  %v3753_v38 = vadd.f32 %v15877_v42, %v3296_v36  ;;  %v15878_v7 = vld [vmem:[#allocation169_spill] sm:$0xff] }
 0x27b   : > { %v10396_v32 = vpop.f32.mrf.mxu0  ;;  %4542 = vst.msk [vmem:[#allocation3 + $0x98] sm:$0xff] %vm4519_vm4, %v4503_v16  ;;  %v4506_v14 = vmax.f32 %v4474_v26, 0.0  ;;  %v4473_v12 = vadd.f32 %v4386_v51, %v4016_v46  ;;  %v4019_v53 = vadd.f32 %v10346_v35, %v3751_v6  ;;  %10435 = vmatprep.mubr.msk.f32.mxu1 %vm4519_vm4, %v13390_v9  ;;  %v15876_v17 = vld [vmem:[#allocation35_spill] sm:$0xff]  ;;  %v3752_v25 = vadd.f32 %v15878_v7, %v3295_v5  ;;  %v15880_v42 = vld [vmem:[#allocation173_spill] sm:$0xff] }
 0x27c   : > { %v4611_v15 = vmul.f32 %v13390_v9, %v15876_v17  ;;  %v3939_v41 = vpop.f32.mrf.mxu1  ;;  %10436 = vmatmul.mubr.msk.f32.gmra.mxu1 %vm4519_vm4, %v13380_v28  ;;  %v5012_v16 = vsel %vm1084_vm3, %v5009_v13, %v5011_v11  ;;  %v5014_v51 = vsel %vm1084_vm3, %v5011_v11, %v5013_v31  ;;  %v13408_v6 = vld [vmem:[#allocation3 + $0x90] sm:$0xff]  ;;  %v15879_v5 = vld [vmem:[#allocation171_spill] sm:$0xff]  ;;  %v3754_v7 = vadd.f32 %v15880_v42, %v3297_v34  ;;  %v15881_v28 = vld [vmem:[#allocation40_spill] sm:$0xff] }
 0x27d   : > { %v4396_v40 = vpop.f32.mrf.mxu0  ;;  %4545 = vst.msk [vmem:[#allocation3 + $0xb0] sm:$0xff] %vm4519_vm4, %v4506_v14  ;;  %v4505_v26 = vmax.f32 %v4473_v12, 0.0  ;;  %v4476_v46 = vadd.f32 %v10396_v32, %v4019_v53  ;;  %v4018_v37 = vadd.f32 %v3939_v41, %v3750_v30  ;;  %10482 = vmatprep.mubr.msk.f32.mxu0 %vm4519_vm4, %v5012_v16  ;;  %v3755_v35 = vadd.f32 %v15879_v5, %v3298_v47  ;;  %v15882_v34 = vld [vmem:[#allocation121_spill] sm:$0xff]  ;;  %v15883_v53 = vld [vmem:[#allocation64_spill] sm:$0xff] }
 0x27e   : > { %v5015_v36 = vrot.slane %v4611_v15, 7  ;;  %10483 = vmatmul.mubr.msk.f32.gmra.mxu0 %vm4519_vm4, %v5014_v51  ;;  %v10349_v2 = vpop.f32.mrf.mxu1  ;;  %v13415_v17 = vld [vmem:[#allocation3 + $0x88] sm:$0xff]  ;;  %v5017_v11 = vrot.slane %v13395_v8, 7  ;;  %v13420_v14 = vmul.f32 %v13408_v6, %v15881_v28  ;;  %v3300_v15 = vadd.f32 %v15883_v53, %v15882_v34  ;;  %v15886_v5 = vld [vmem:[#allocation124_spill] sm:$0xff] }
 0x27f   : > { %v10399_v13 = vpop.f32.mrf.mxu0  ;;  %4544 = vst.msk [vmem:[#allocation3 + $0xa8] sm:$0xff] %vm4519_vm4, %v4505_v26  ;;  %v4508_v30 = vmax.f32 %v4476_v46, 0.0  ;;  %v4475_v32 = vadd.f32 %v4396_v40, %v4018_v37  ;;  %v4021_v12 = vadd.f32 %v10349_v2, %v3753_v38  ;;  %10438 = vmatprep.mubr.msk.f32.mxu1 %vm4519_vm4, %v13415_v17  ;;  %v15884_v2 = vld [vmem:[#allocation39_spill] sm:$0xff]  ;;  %v15885_v40 = vld [vmem:[#allocation108_spill] sm:$0xff]  ;;  %v3302_v42 = vadd.f32 %v13088_v19, %v15886_v5 }
 0x280   : > { %v5016_v47 = vsel %vm1084_vm3, %v5013_v31, %v5015_v36  ;;  %v3949_v41 = vpop.f32.mrf.mxu1  ;;  %10439 = vmatmul.mubr.msk.f32.gmra.mxu1 %vm4519_vm4, %v13408_v6  ;;  %v5018_v8 = vsel %vm1084_vm3, %v5015_v36, %v5017_v11  ;;  %v13432_v51 = vld [vmem:[#allocation3 + $0xa0] sm:$0xff]  ;;  %v4613_v38 = vmul.f32 %v13415_v17, %v15884_v2  ;;  %v3299_v31 = vadd.f32 %v15885_v40, %v13199_v0  ;;  %v15888_v19 = vld [vmem:[#allocation43_spill] sm:$0xff] }
 0x281   : > { %v4406_v16 = vpop.f32.mrf.mxu0  ;;  %10485 = vmatprep.mubr.msk.f32.mxu0 %vm4519_vm4, %v5016_v47  ;;  %4547 = vst.msk [vmem:[#allocation3 + $0xc0] sm:$0xff] %vm4519_vm4, %v4508_v30  ;;  %v4507_v26 = vmax.f32 %v4475_v32, 0.0  ;;  %v4478_v46 = vadd.f32 %v10399_v13, %v4021_v12  ;;  %v4020_v37 = vadd.f32 %v3949_v41, %v3752_v25  ;;  %v5021_v28 = vrot.slane %v13420_v14, 7  ;;  %v15887_v2 = vld [vmem:[#allocation44_spill] sm:$0xff]  ;;  %v15889_v12 = vld [vmem:[#allocation107_spill] sm:$0xff] }
 0x282   : > { %10486 = vmatmul.mubr.msk.f32.gmra.mxu0 %vm4519_vm4, %v5018_v8  ;;  %v10352_v47 = vpop.f32.mrf.mxu1  ;;  %v13442_v34 = vld [vmem:[#allocation3 + $0x98] sm:$0xff]  ;;  %v5019_v53 = vrot.slane %v4613_v38, 7  ;;  %v13447_v0 = vmul.f32 %v13432_v51, %v15887_v2  ;;  %v3757_v41 = vadd.f32 %v15889_v12, %v3300_v15  ;;  %v3301_v14 = vadd.f32 %v13103_v21, %v13202_v55  ;;  %v15890_v21 = vld [vmem:[#allocation72_spill] sm:$0xff] }
 0x283   : > { %v10402_v36 = vpop.f32.mrf.mxu0  ;;  %4546 = vst.msk [vmem:[#allocation3 + $0xb8] sm:$0xff] %vm4519_vm4, %v4507_v26  ;;  %v4510_v13 = vmax.f32 %v4478_v46, 0.0  ;;  %v4477_v25 = vadd.f32 %v4406_v16, %v4020_v37  ;;  %v4023_v30 = vadd.f32 %v10352_v47, %v3755_v35  ;;  %10441 = vmatprep.mubr.msk.f32.mxu1 %vm4519_vm4, %v13442_v34  ;;  %v4615_v32 = vmul.f32 %v13442_v34, %v15888_v19  ;;  %v15891_v2 = vld [vmem:[#allocation48_spill] sm:$0xff] }
 0x284   : > { %v3959_v8 = vpop.f32.mrf.mxu1  ;;  %10442 = vmatmul.mubr.msk.f32.gmra.mxu1 %vm4519_vm4, %v13432_v51  ;;  %v5020_v40 = vsel %vm1084_vm3, %v5017_v11, %v5019_v53  ;;  %v5022_v35 = vsel %vm1084_vm3, %v5019_v53, %v5021_v28  ;;  %v13461_v16 = vld [vmem:[#allocation3 + $0xb0] sm:$0xff]  ;;  %v3756_v55 = vadd.f32 %v15890_v21, %v3299_v31  ;;  %v3759_v5 = vadd.f32 %v13090_v22, %v3302_v42  ;;  %v15892_v31 = vld [vmem:[#allocation127_spill] sm:$0xff] }
 0x285   : > { %v4416_v38 = vpop.f32.mrf.mxu0  ;;  %4549 = vst.msk [vmem:[#allocation3 + $0xd0] sm:$0xff] %vm4519_vm4, %v4510_v13  ;;  %v4509_v26 = vmax.f32 %v4477_v25, 0.0  ;;  %v4480_v46 = vadd.f32 %v10402_v36, %v4023_v30  ;;  %v4022_v37 = vadd.f32 %v3959_v8, %v3754_v7  ;;  %10488 = vmatprep.mubr.msk.f32.mxu0 %vm4519_vm4, %v5020_v40  ;;  %v5023_v15 = vrot.slane %v4615_v32, 7 }
 0x286   : > { %10489 = vmatmul.mubr.msk.f32.gmra.mxu0 %vm4519_vm4, %v5022_v35  ;;  %v10355_v47 = vpop.f32.mrf.mxu1  ;;  %v13468_v12 = vld [vmem:[#allocation3 + $0xa8] sm:$0xff]  ;;  %v5025_v53 = vrot.slane %v13447_v0, 7  ;;  %v4618_v13 = vmul.f32 %v13461_v16, %v15891_v2  ;;  %v3304_v42 = vadd.f32 %v13119_v24, %v15892_v31  ;;  %v3758_v40 = vadd.f32 %v13105_v4, %v3301_v14 }
 0x287   : > { %v10405_v11 = vpop.f32.mrf.mxu0  ;;  %4548 = vst.msk [vmem:[#allocation3 + $0xc8] sm:$0xff] %vm4519_vm4, %v4509_v26  ;;  %v4512_v7 = vmax.f32 %v4480_v46, 0.0  ;;  %v4479_v36 = vadd.f32 %v4416_v38, %v4022_v37  ;;  %v4025_v25 = vadd.f32 %v10355_v47, %v3757_v41  ;;  %10444 = vmatprep.mubr.msk.f32.mxu1 %vm4519_vm4, %v13468_v12  ;;  %v5024_v22 = vsel %vm1084_vm3, %v5021_v28, %v5023_v15  ;;  %v15893_v41 = vld [vmem:[#allocation47_spill] sm:$0xff] }
 0x288   : > { %v3969_v30 = vpop.f32.mrf.mxu1  ;;  %10445 = vmatmul.mubr.msk.f32.gmra.mxu1 %vm4519_vm4, %v13461_v16  ;;  %10491 = vmatprep.mubr.msk.f32.mxu0 %vm4519_vm4, %v5024_v22  ;;  %v5026_v0 = vsel %vm1084_vm3, %v5023_v15, %v5025_v53  ;;  %v13483_v8 = vld [vmem:[#allocation3 + $0xc0] sm:$0xff]  ;;  %v4617_v38 = vmul.f32 %v13468_v12, %v15893_v41  ;;  %v3303_v26 = vadd.f32 %v13131_v29, %v13209_v1  ;;  %v5029_v47 = vrot.slane %v4618_v13, 7  ;;  %v15895_v29 = vld [vmem:[#allocation51_spill] sm:$0xff] }
 0x289   : > { %v4426_v32 = vpop.f32.mrf.mxu0  ;;  %4551 = vst.msk [vmem:[#allocation3 + $0xe0] sm:$0xff] %vm4519_vm4, %v4512_v7  ;;  %v4511_v28 = vmax.f32 %v4479_v36, 0.0  ;;  %v4482_v24 = vadd.f32 %v10405_v11, %v4025_v25  ;;  %v4024_v35 = vadd.f32 %v3969_v30, %v3756_v55  ;;  %v15894_v22 = vld [vmem:[#allocation52_spill] sm:$0xff]  ;;  %v3761_v55 = vadd.f32 %v13121_v52, %v3304_v42 }
 0x28a   : > { %10492 = vmatmul.mubr.msk.f32.gmra.mxu0 %vm4519_vm4, %v5026_v0  ;;  %v10358_v46 = vpop.f32.mrf.mxu1  ;;  %v13492_v15 = vld [vmem:[#allocation3 + $0xb8] sm:$0xff]  ;;  %v5027_v21 = vrot.slane %v4617_v38, 7  ;;  %v4620_v31 = vmul.f32 %v13483_v8, %v15894_v22  ;;  %v3760_v52 = vadd.f32 %v13133_v61, %v3303_v26  ;;  %v15912_v22 = vld [vmem:[#allocation13_spill] sm:$0xff] }
 0x28b   : > { %v10408_v37 = vpop.f32.mrf.mxu0  ;;  %4550 = vst.msk [vmem:[#allocation3 + $0xd8] sm:$0xff] %vm4519_vm4, %v4511_v28  ;;  %v4514_v4 = vmax.f32 %v4482_v24, 0.0  ;;  %v4481_v14 = vadd.f32 %v4426_v32, %v4024_v35  ;;  %v4027_v11 = vadd.f32 %v10358_v46, %v3759_v5  ;;  %10447 = vmatprep.mubr.msk.f32.mxu1 %vm4519_vm4, %v13492_v15  ;;  %v4619_v1 = vmul.f32 %v13492_v15, %v15895_v29  ;;  %v15896_v35 = vld [vmem:[#allocation56_spill] sm:$0xff] }
 0x28c   : > { %v3979_v7 = vpop.f32.mrf.mxu1  ;;  %10448 = vmatmul.mubr.msk.f32.gmra.mxu1 %vm4519_vm4, %v13483_v8  ;;  %v5028_v13 = vsel %vm1084_vm3, %v5025_v53, %v5027_v21  ;;  %v5030_v25 = vsel %vm1084_vm3, %v5027_v21, %v5029_v47  ;;  %v13506_v30 = vld [vmem:[#allocation3 + $0xd0] sm:$0xff]  ;;  %v5033_v53 = vrot.slane %v4620_v31, 7 }
 0x28d   : > { %v4436_v36 = vpop.f32.mrf.mxu0  ;;  %4553 = vst.msk [vmem:[#allocation3 + $0xf0] sm:$0xff] %vm4519_vm4, %v4514_v4  ;;  %v4513_v5 = vmax.f32 %v4481_v14, 0.0  ;;  %v4484_v32 = vadd.f32 %v10408_v37, %v4027_v11  ;;  %v4026_v0 = vadd.f32 %v3979_v7, %v3758_v40  ;;  %10494 = vmatprep.mubr.msk.f32.mxu0 %vm4519_vm4, %v5028_v13  ;;  %v5031_v38 = vrot.slane %v4619_v1, 7  ;;  %v15897_v11 = vld [vmem:[#allocation55_spill] sm:$0xff] }
 0x28e   : > { %10495 = vmatmul.mubr.msk.f32.gmra.mxu0 %vm4519_vm4, %v5030_v25  ;;  %v10361_v42 = vpop.f32.mrf.mxu1  ;;  %v13512_v24 = vld [vmem:[#allocation3 + $0xc8] sm:$0xff]  ;;  %v4622_v46 = vmul.f32 %v13506_v30, %v15896_v35 }
 0x28f   : > { %v10411_v28 = vpop.f32.mrf.mxu0  ;;  %4552 = vst.msk [vmem:[#allocation3 + $0xe8] sm:$0xff] %vm4519_vm4, %v4513_v5  ;;  %v4516_v21 = vmax.f32 %v4484_v32, 0.0  ;;  %v4483_v37 = vadd.f32 %v4436_v36, %v4026_v0  ;;  %v4029_v40 = vadd.f32 %v10361_v42, %v3761_v55  ;;  %10450 = vmatprep.mubr.msk.f32.mxu1 %vm4519_vm4, %v13512_v24  ;;  %v5032_v61 = vsel %vm1084_vm3, %v5029_v47, %v5031_v38  ;;  %v15898_v47 = vld [vmem:[#allocation60_spill] sm:$0xff] }
 0x290   : > { %v3989_v26 = vpop.f32.mrf.mxu1  ;;  %10451 = vmatmul.mubr.msk.f32.gmra.mxu1 %vm4519_vm4, %v13506_v30  ;;  %10497 = vmatprep.mubr.msk.f32.mxu0 %vm4519_vm4, %v5032_v61  ;;  %v5034_v31 = vsel %vm1084_vm3, %v5031_v38, %v5033_v53  ;;  %v13524_v14 = vld [vmem:[#allocation3 + $0xe0] sm:$0xff]  ;;  %v4621_v1 = vmul.f32 %v13512_v24, %v15897_v11  ;;  %v5037_v38 = vrot.slane %v4622_v46, 7 }
 0x291   : > { %v4446_v4 = vpop.f32.mrf.mxu0  ;;  %4555 = vst.msk [vmem:[#allocation3 + $0x100] sm:$0xff] %vm4519_vm4, %v4516_v21  ;;  %v4515_v55 = vmax.f32 %v4483_v37, 0.0  ;;  %v4486_v7 = vadd.f32 %v10411_v28, %v4029_v40  ;;  %v4028_v36 = vadd.f32 %v3989_v26, %v3760_v52  ;;  %v4624_v13 = vmul.f32 %v13524_v14, %v15898_v47  ;;  %v15900_v52 = vld [vmem:[#allocation59_spill] sm:$0xff]  ;;  %v10937_v40 = vld [vmem:[#allocation3 + $0x10] sm:$0xff]  ;;  %v15902_v26 = vld [vmem:[#allocation9_spill] sm:$0xff] }
 0x292   : > { %10498 = vmatmul.mubr.msk.f32.gmra.mxu0 %vm4519_vm4, %v5034_v31  ;;  %v10416_v25 = vpop.f32.mrf.mxu1  ;;  %v13532_v32 = vld [vmem:[#allocation3 + $0xd8] sm:$0xff]  ;;  %v5035_v0 = vrot.slane %v4621_v1, 7 }
 0x293   : > { %v10466_v5 = vpop.f32.mrf.mxu0  ;;  %4554 = vst.msk [vmem:[#allocation3 + $0xf8] sm:$0xff] %vm4519_vm4, %v4515_v55  ;;  %v4518_v42 = vmax.f32 %v4486_v7, 0.0  ;;  %v4485_v61 = vadd.f32 %v4446_v4, %v4028_v36  ;;  %10453 = vmatprep.mubr.msk.f32.mxu1 %vm4519_vm4, %v13532_v32  ;;  %v4623_v28 = vmul.f32 %v13532_v32, %v15900_v52  ;;  %v5341_v4 = vmul.f32 %v10937_v40, %v15902_v26  ;;  %v15903_v7 = vld [vmem:[#allocation66_spill] sm:$0xff]  ;;  %v15910_v47 = vld [vmem:[#allocation71_spill] sm:$0xff] }
 0x294   : > { %v13535_v35 = vadd.f32 %v10466_v5, %v10416_v25  ;;  %10454 = vmatmul.mubr.msk.f32.gmra.mxu1 %vm4519_vm4, %v13524_v14  ;;  %v5036_v21 = vsel %vm1084_vm3, %v5033_v53, %v5035_v0  ;;  %v5038_v37 = vsel %vm1084_vm3, %v5035_v0, %v5037_v38  ;;  %v13545_v46 = vld [vmem:[#allocation3 + $0xf0] sm:$0xff]  ;;  %v5041_v55 = vrot.slane %v4624_v13, 7  ;;  %v10938_v25 = vld [vmem:[#allocation3 + $0x8] sm:$0xff] }
 0x295   : > { %15901 = vst [vmem:[#allocation111_spill] sm:$0xff] %v13545_v46  ;;  %4557 = vst.msk [vmem:[#allocation3 + $0x110] sm:$0xff] %vm4519_vm4, %v4518_v42  ;;  %v4517_v31 = vmax.f32 %v4485_v61, 0.0  ;;  %10500 = vmatprep.mubr.msk.f32.mxu0 %vm4519_vm4, %v5036_v21  ;;  %v5039_v1 = vrot.slane %v4623_v28, 7  ;;  %v4626_v36 = vmul.f32 %v13545_v46, %v15903_v7  ;;  %v15904_v5 = vld [vmem:[#allocation6_spill] sm:$0xff]  ;;  %v15905_v13 = vld [vmem:[#allocation65_spill] sm:$0xff] }
 0x296   : > { %15899 = vst [vmem:[#allocation77_spill] sm:$0xff] %v13535_v35  ;;  %10501 = vmatmul.mubr.msk.f32.gmra.mxu0 %vm4519_vm4, %v5038_v37  ;;  %v13553_v53 = vld [vmem:[#allocation3 + $0xe8] sm:$0xff]  ;;  %v5340_v0 = vmul.f32 %v10938_v25, %v15904_v5  ;;  %v15906_v21 = vld [vmem:[#allocation10_spill] sm:$0xff]  ;;  %v15909_v5 = vld [vmem:[#allocation7_spill] sm:$0xff] }
 0x297   : > { %4556 = vst.msk [vmem:[#allocation3 + $0x108] sm:$0xff] %vm4519_vm4, %v4517_v31  ;;  %10456 = vmatprep.mubr.msk.f32.mxu1 %vm4519_vm4, %v13553_v53  ;;  %v5040_v42 = vsel %vm1084_vm3, %v5037_v38, %v5039_v1  ;;  %v5042_v61 = vsel %vm1084_vm3, %v5039_v1, %v5041_v55  ;;  %v4625_v28 = vmul.f32 %v13553_v53, %v15905_v13  ;;  %v5409_v31 = vrot.slane %v5341_v4, 1  ;;  %v15908_v35 = vld [vmem:[#allocation5_spill] sm:$0xff]  ;;  %v15911_v52 = vld [vmem:[#allocation14_spill] sm:$0xff] }
 0x298   : > { %v5342_v37 = vmul.f32 %v13225_v39, %v15906_v21  ;;  %10457 = vmatmul.mubr.msk.f32.gmra.mxu1 %vm4519_vm4, %v13545_v46  ;;  %10503 = vmatprep.mubr.msk.f32.mxu0 %vm4519_vm4, %v5040_v42  ;;  %v13568_v25 = vld [vmem:[#allocation3 + $0x100] sm:$0xff]  ;;  %v5794_v26 = vmul.f32 %v10937_v40, %v15908_v35  ;;  %v5795_v38 = vmul.f32 %v13225_v39, %v15909_v5  ;;  %v5045_v7 = vrot.slane %v4626_v36, 7  ;;  %v15913_v36 = vld [vmem:[#allocation73_spill] sm:$0xff] }
 0x299   : > { %15907 = vst [vmem:[#allocation79_spill] sm:$0xff] %v13568_v25  ;;  %v5043_v1 = vrot.slane %v4625_v28, 7  ;;  %v4628_v13 = vmul.f32 %v13568_v25, %v15910_v47  ;;  %v5344_v21 = vmul.f32 %v13255_v60, %v15911_v52  ;;  %v5408_v42 = vrot.slane %v5340_v0, 1  ;;  %v15914_v47 = vld [vmem:[#allocation17_spill] sm:$0xff] }
 0x29a   : > { %10504 = vmatmul.mubr.msk.f32.gmra.mxu0 %vm4519_vm4, %v5042_v61  ;;  %v13578_v46 = vld [vmem:[#allocation3 + $0xf8] sm:$0xff]  ;;  %v5343_v4 = vmul.f32 %v13216_v33, %v15912_v22  ;;  %v5411_v35 = vrot.slane %v5342_v37, 1  ;;  %v5862_v61 = vrot.slane %v5794_v26, 7  ;;  %v5863_v22 = vrot.slane %v5795_v38, 7  ;;  %v15916_v38 = vld [vmem:[#allocation18_spill] sm:$0xff] }
 0x29b   : > { %10459 = vmatprep.mubr.msk.f32.mxu1 %vm4519_vm4, %v13578_v46  ;;  %v5044_v39 = vsel %vm1084_vm3, %v5041_v55, %v5043_v1  ;;  %v5046_v40 = vsel %vm1084_vm3, %v5043_v1, %v5045_v7  ;;  %v4627_v28 = vmul.f32 %v13578_v46, %v15913_v36  ;;  %v5410_v0 = vsel %vm593_vm2, %v5408_v42, %v5409_v31  ;;  %v15915_v36 = vld [vmem:[#allocation8_spill] sm:$0xff] }
 0x29c   : > { %10460 = vmatmul.mubr.msk.f32.gmra.mxu1 %vm4519_vm4, %v13568_v25  ;;  %10506 = vmatprep.mubr.msk.f32.mxu0 %vm4519_vm4, %v5044_v39  ;;  %v5049_v52 = vrot.slane %v4628_v13, 7  ;;  %v5415_v55 = vrot.slane %v5344_v21, 1  ;;  %v5413_v1 = vrot.slane %v5343_v4, 1  ;;  %v5345_v37 = vmul.f32 %v13247_v59, %v15914_v47 }
 0x29d   : > { %10514 = vmatprep.mubr.msk.f32.mxu1 %vm4519_vm4, %v5410_v0  ;;  %v5047_v5 = vrot.slane %v4627_v28, 7  ;;  %v5796_v25 = vmul.f32 %v13216_v33, %v15915_v36  ;;  %v5797_v39 = vmul.f32 %v13255_v60, %v15834_v45  ;;  %v5412_v42 = vsel %vm593_vm2, %v5409_v31, %v5411_v35  ;;  %v13611_v33 = vld [vmem:[%s15257_s2 + $0x30] sm:$0xff]  ;;  %v15917_v31 = vld [vmem:[#allocation21_spill] sm:$0xff]  ;;  %v10939_v28 = vld [vmem:[%s15257_s2 + $0x20] sm:$0xff] }
 0x29e   : > { %10507 = vmatmul.mubr.msk.f32.gmra.mxu0 %vm4519_vm4, %v5046_v40  ;;  %v5346_v21 = vmul.f32 %v13283_v3, %v15916_v38  ;;  %v5414_v4 = vsel %vm593_vm2, %v5411_v35, %v5413_v1  ;;  %v5864_v60 = vsel %vm1084_vm3, %v5862_v61, %v5863_v22  ;;  %v5347_v40 = vmul.f32 %v13274_v43, %v15917_v31 }
 0x29f   : > { %v5048_v26 = vsel %vm1084_vm3, %v5045_v7, %v5047_v5  ;;  %v5050_v13 = vsel %vm1084_vm3, %v5047_v5, %v5049_v52  ;;  %v5416_v52 = vsel %vm593_vm2, %v5413_v1, %v5415_v55  ;;  %v5417_v7 = vrot.slane %v5345_v37, 1  ;;  %v15918_v37 = vld [vmem:[#allocation22_spill] sm:$0xff] }
 0x2a0   : > { %10509 = vmatprep.mubr.msk.f32.mxu0 %vm4519_vm4, %v5048_v26  ;;  %10515 = vmatmul.mubr.msk.f32.vlgmr.msra.gmra.mxu1 %vm4519_vm4, %v5412_v42  ;;  %v5867_v5 = vrot.slane %v5797_v39, 7  ;;  %v5799_v35 = vmul.f32 %v13283_v3, %v15845_v50  ;;  %v5865_v0 = vrot.slane %v5796_v25, 7  ;;  %v5419_v61 = vrot.slane %v5346_v21, 1  ;;  %v15919_v42 = vld [vmem:[#allocation26_spill] sm:$0xff] }
 0x2a1   : > { %10517 = vmatprep.mubr.msk.f32.mxu1 %vm4519_vm4, %v5414_v4  ;;  %10613 = vmatpush3.msra.mxu1 %v10939_v28  ;;  %v5798_v1 = vmul.f32 %v13247_v59, %v15833_v20  ;;  %v5348_v39 = vmul.f32 %v13310_v62, %v15918_v37  ;;  %v5418_v3 = vsel %vm593_vm2, %v5415_v55, %v5417_v7  ;;  %v5421_v21 = vrot.slane %v5347_v40, 1  ;;  %v13645_v55 = vld [vmem:[%s15257_s2 + $0x38] sm:$0xff]  ;;  %v15951_v20 = vld [vmem:[#allocation59_spill] sm:$0xff] }
 0x2a2   : > { %10510 = vmatmul.mubr.msk.f32.gmra.mxu0 %vm4519_vm4, %v5050_v13  ;;  %10712 = vmatprep.subr.mxu1 %v13611_v33  ;;  %v5866_v26 = vsel %vm1084_vm3, %v5863_v22, %v5865_v0  ;;  %v5801_v25 = vmul.f32 %v13310_v62, %v15849_v27  ;;  %v5350_v13 = vmul.f32 %v13337_v56, %v15919_v42  ;;  %v5871_v4 = vrot.slane %v5799_v35, 7 }
 0x2a3   : > { %10564 = vmatprep.mubr.msk.f32.mxu0 %vm4519_vm4, %v5864_v60  ;;  %v5868_v59 = vsel %vm1084_vm3, %v5865_v0, %v5867_v5  ;;  %v15920_v60 = vld [vmem:[#allocation25_spill] sm:$0xff]  ;;  %v5420_v62 = vsel %vm593_vm2, %v5417_v7, %v5419_v61  ;;  %v5869_v22 = vrot.slane %v5798_v1, 7  ;;  %v5423_v28 = vrot.slane %v5348_v39, 1 }
 0x2a4   : > { %10518 = vmatmul.mubr.msk.f32.gmra.mxu1 %vm4519_vm4, %v5416_v52  ;;  %v5349_v52 = vmul.f32 %v13302_v63, %v15920_v60  ;;  %v5422_v40 = vsel %vm593_vm2, %v5419_v61, %v5421_v21  ;;  %v5875_v0 = vrot.slane %v5801_v25, 7  ;;  %v5803_v61 = vmul.f32 %v13337_v56, %v15858_v58 }
 0x2a5   : > { %10520 = vmatprep.mubr.msk.f32.mxu1 %vm4519_vm4, %v5418_v3  ;;  %v5800_v3 = vmul.f32 %v13274_v43, %v15840_v18  ;;  %v5870_v35 = vsel %vm1084_vm3, %v5867_v5, %v5869_v22  ;;  %v5872_v7 = vsel %vm1084_vm3, %v5869_v22, %v5871_v4  ;;  %v15921_v43 = vld [vmem:[#allocation29_spill] sm:$0xff]  ;;  %v5802_v25 = vmul.f32 %v13302_v63, %v15848_v48  ;;  %v15948_v18 = vld [vmem:[#allocation52_spill] sm:$0xff] }
 0x2a6   : > { %10565 = vmatmul.mubr.msk.f32.vlgmr.msra.gmra.mxu0 %vm4519_vm4, %v5866_v26  ;;  %v5427_v26 = vrot.slane %v5350_v13, 1  ;;  %v5425_v1 = vrot.slane %v5349_v52, 1  ;;  %v5351_v39 = vmul.f32 %v13328_v54, %v15921_v43  ;;  %v15922_v13 = vld [vmem:[#allocation30_spill] sm:$0xff]  ;;  %v15923_v63 = vld [vmem:[#allocation33_spill] sm:$0xff]  ;;  %v5818_v27 = vmul.f32 %v13506_v30, %v15948_v18 }
 0x2a7   : > { %10567 = vmatprep.mubr.msk.f32.mxu0 %vm4519_vm4, %v5868_v59  ;;  %10663 = vmatpush3.msra.mxu0 %v13239_v23  ;;  %v5424_v23 = vsel %vm593_vm2, %v5421_v21, %v5423_v28  ;;  %v5873_v5 = vrot.slane %v5800_v3, 7  ;;  %v5352_v59 = vmul.f32 %v13363_v10, %v15922_v13  ;;  %v5879_v3 = vrot.slane %v5803_v61, 7 }
 0x2a8   : > { %10521 = vmatmul.mubr.msk.f32.gmra.mxu1 %vm4519_vm4, %v5420_v62  ;;  %10762 = vmatprep.subr.mxu0 %v13645_v55  ;;  %v5426_v52 = vsel %vm593_vm2, %v5423_v28, %v5425_v1  ;;  %v5428_v22 = vsel %vm593_vm2, %v5425_v1, %v5427_v26  ;;  %v5429_v21 = vrot.slane %v5351_v39, 1  ;;  %v5877_v28 = vrot.slane %v5802_v25, 7 }
 0x2a9   : > { %10523 = vmatprep.mubr.msk.f32.mxu1 %vm4519_vm4, %v5422_v40  ;;  %v5874_v62 = vsel %vm1084_vm3, %v5871_v4, %v5873_v5  ;;  %v5876_v56 = vsel %vm1084_vm3, %v5873_v5, %v5875_v0  ;;  %v5353_v40 = vmul.f32 %v13355_v57, %v15923_v63  ;;  %v5804_v4 = vmul.f32 %v13328_v54, %v15855_v49  ;;  %v15925_v5 = vld [vmem:[#allocation37_spill] sm:$0xff]  ;;  %v15928_v49 = vld [vmem:[#allocation38_spill] sm:$0xff] }
 0x2aa   : > { %10568 = vmatmul.mubr.msk.f32.gmra.mxu0 %vm4519_vm4, %v5870_v35  ;;  %v5805_v35 = vmul.f32 %v13363_v10, %v15862_v44  ;;  %v5430_v39 = vsel %vm593_vm2, %v5427_v26, %v5429_v21  ;;  %v5878_v61 = vsel %vm1084_vm3, %v5875_v0, %v5877_v28  ;;  %v15926_v10 = vld [vmem:[#allocation109_spill] sm:$0xff]  ;;  %v5880_v54 = vsel %vm1084_vm3, %v5877_v28, %v5879_v3  ;;  %v15929_v44 = vld [vmem:[#allocation28_spill] sm:$0xff] }
 0x2ab   : > { %10570 = vmatprep.mubr.msk.f32.mxu0 %vm4519_vm4, %v5872_v7  ;;  %v5431_v7 = vrot.slane %v5352_v59, 1  ;;  %v5433_v59 = vrot.slane %v5353_v40, 1  ;;  %v5881_v0 = vrot.slane %v5804_v4, 7  ;;  %v5806_v48 = vmul.f32 %v13355_v57, %v15929_v44  ;;  %v15930_v4 = vld [vmem:[#allocation41_spill] sm:$0xff]  ;;  %v15936_v44 = vld [vmem:[#allocation36_spill] sm:$0xff] }
 0x2ac   : > { %10524 = vmatmul.mubr.msk.f32.gmra.mxu1 %vm4519_vm4, %v5424_v23  ;;  %v15924_v23 = vld [vmem:[#allocation34_spill] sm:$0xff]  ;;  %v5821_v18 = vmul.f32 %v13553_v53, %v15951_v20 }
 0x2ad   : > { %10526 = vmatprep.mubr.msk.f32.mxu1 %vm4519_vm4, %v5426_v52  ;;  %v5354_v1 = vmul.f32 %v13390_v9, %v15924_v23  ;;  %v5355_v52 = vmul.f32 %v15926_v10, %v15925_v5  ;;  %v5432_v26 = vsel %vm593_vm2, %v5429_v21, %v5431_v7  ;;  %v5882_v40 = vsel %vm1084_vm3, %v5879_v3, %v5881_v0 }
 0x2ae   : > { %10571 = vmatmul.mubr.msk.f32.gmra.mxu0 %vm4519_vm4, %v5874_v62  ;;  %v15927_v62 = vld [vmem:[#allocation31_spill] sm:$0xff]  ;;  %v5915_v36 = vrot.slane %v5821_v18, 7 }
 0x2af   : > { %10573 = vmatprep.mubr.msk.f32.mxu0 %vm4519_vm4, %v5876_v56  ;;  %v5807_v25 = vmul.f32 %v13390_v9, %v15927_v62  ;;  %v5883_v56 = vrot.slane %v5805_v35, 7  ;;  %v5434_v9 = vsel %vm593_vm2, %v5431_v7, %v5433_v59  ;;  %v5437_v35 = vrot.slane %v5355_v52, 1  ;;  %v15933_v52 = vld [vmem:[#allocation42_spill] sm:$0xff] }
 0x2b0   : > { %10527 = vmatmul.mubr.msk.f32.gmra.mxu1 %vm4519_vm4, %v5428_v22  ;;  %v5356_v22 = vmul.f32 %v13415_v17, %v15928_v49 }
 0x2b1   : > { %10529 = vmatprep.mubr.msk.f32.mxu1 %vm4519_vm4, %v5430_v39  ;;  %v5435_v39 = vrot.slane %v5354_v1, 1  ;;  %v5887_v28 = vrot.slane %v5807_v25, 7  ;;  %v5357_v1 = vmul.f32 %v13408_v6, %v15930_v4  ;;  %v5358_v25 = vmul.f32 %v13442_v34, %v15933_v52 }
 0x2b2   : > { %10574 = vmatmul.mubr.msk.f32.gmra.mxu0 %vm4519_vm4, %v5878_v61  ;;  %v5884_v61 = vsel %vm1084_vm3, %v5881_v0, %v5883_v56  ;;  %v5439_v21 = vrot.slane %v5356_v22, 1 }
 0x2b3   : > { %10576 = vmatprep.mubr.msk.f32.mxu0 %vm4519_vm4, %v5880_v54  ;;  %v15931_v54 = vld [vmem:[#allocation35_spill] sm:$0xff]  ;;  %v5436_v7 = vsel %vm593_vm2, %v5433_v59, %v5435_v39  ;;  %v5438_v22 = vsel %vm593_vm2, %v5435_v39, %v5437_v35 }
 0x2b4   : > { %10530 = vmatmul.mubr.msk.f32.gmra.mxu1 %vm4519_vm4, %v5432_v26  ;;  %v5809_v57 = vmul.f32 %v13415_v17, %v15931_v54  ;;  %v5885_v26 = vrot.slane %v5806_v48, 7  ;;  %v5440_v48 = vsel %vm593_vm2, %v5437_v35, %v5439_v21  ;;  %v15935_v54 = vld [vmem:[#allocation39_spill] sm:$0xff] }
 0x2b5   : > { %10532 = vmatprep.mubr.msk.f32.mxu1 %vm4519_vm4, %v5434_v9  ;;  %v15932_v9 = vld [vmem:[#allocation32_spill] sm:$0xff] }
 0x2b6   : > { %10577 = vmatmul.mubr.msk.f32.gmra.mxu0 %vm4519_vm4, %v5882_v40  ;;  %v5808_v3 = vmul.f32 %v15926_v10, %v15932_v9  ;;  %v5886_v0 = vsel %vm1084_vm3, %v5883_v56, %v5885_v26  ;;  %v5888_v40 = vsel %vm1084_vm3, %v5885_v26, %v5887_v28  ;;  %v5441_v10 = vrot.slane %v5357_v1, 1  ;;  %v15937_v26 = vld [vmem:[#allocation46_spill] sm:$0xff] }
 0x2b7   : > { %10579 = vmatprep.mubr.msk.f32.mxu0 %vm4519_vm4, %v5884_v61  ;;  %v15934_v61 = vld [vmem:[#allocation45_spill] sm:$0xff]  ;;  %v5891_v9 = vrot.slane %v5809_v57, 7  ;;  %v5810_v56 = vmul.f32 %v13408_v6, %v15936_v44  ;;  %v5360_v62 = vmul.f32 %v13468_v12, %v15937_v26  ;;  %v5813_v57 = vmul.f32 %v13468_v12, %v15888_v19  ;;  %v15939_v44 = vld [vmem:[#allocation50_spill] sm:$0xff] }
 0x2b8   : > { %10533 = vmatmul.mubr.msk.f32.gmra.mxu1 %vm4519_vm4, %v5436_v7  ;;  %v5359_v59 = vmul.f32 %v13432_v51, %v15934_v61  ;;  %v5811_v7 = vmul.f32 %v13442_v34, %v15935_v54  ;;  %v5889_v39 = vrot.slane %v5808_v3, 7  ;;  %v15941_v54 = vld [vmem:[#allocation53_spill] sm:$0xff] }
 0x2b9   : > { %10535 = vmatprep.mubr.msk.f32.mxu1 %vm4519_vm4, %v5438_v22  ;;  %v5443_v22 = vrot.slane %v5358_v25, 1  ;;  %v15938_v25 = vld [vmem:[#allocation49_spill] sm:$0xff]  ;;  %v5363_v58 = vmul.f32 %v13483_v8, %v15941_v54 }
 0x2ba   : > { %10580 = vmatmul.mubr.msk.f32.gmra.mxu0 %vm4519_vm4, %v5886_v0  ;;  %v5442_v0 = vsel %vm593_vm2, %v5439_v21, %v5441_v10  ;;  %v5890_v35 = vsel %vm1084_vm3, %v5887_v28, %v5889_v39  ;;  %v5445_v1 = vrot.slane %v5359_v59, 1  ;;  %v5892_v3 = vsel %vm1084_vm3, %v5889_v39, %v5891_v9 }
 0x2bb   : > { %10582 = vmatprep.mubr.msk.f32.mxu0 %vm4519_vm4, %v5888_v40  ;;  %v5895_v6 = vrot.slane %v5811_v7, 7  ;;  %v5361_v40 = vmul.f32 %v13461_v16, %v15938_v25  ;;  %v5444_v21 = vsel %vm593_vm2, %v5441_v10, %v5443_v22  ;;  %v5893_v28 = vrot.slane %v5810_v56, 7 }
 0x2bc   : > { %10536 = vmatmul.mubr.msk.f32.gmra.mxu1 %vm4519_vm4, %v5440_v48  ;;  %v5362_v48 = vmul.f32 %v13492_v15, %v15939_v44  ;;  %v5447_v59 = vrot.slane %v5360_v62, 1  ;;  %v5446_v39 = vsel %vm593_vm2, %v5443_v22, %v5445_v1 }
 0x2bd   : > { %10538 = vmatprep.mubr.msk.f32.mxu1 %vm4519_vm4, %v5442_v0  ;;  %v15940_v0 = vld [vmem:[#allocation40_spill] sm:$0xff]  ;;  %v5894_v7 = vsel %vm1084_vm3, %v5891_v9, %v5893_v28  ;;  %v5896_v10 = vsel %vm1084_vm3, %v5893_v28, %v5895_v6  ;;  %v5449_v62 = vrot.slane %v5361_v40, 1 }
 0x2be   : > { %10583 = vmatmul.mubr.msk.f32.gmra.mxu0 %vm4519_vm4, %v5890_v35  ;;  %v5812_v19 = vmul.f32 %v13432_v51, %v15940_v0  ;;  %v5899_v35 = vrot.slane %v5813_v57, 7  ;;  %v5451_v56 = vrot.slane %v5362_v48, 1  ;;  %v5448_v22 = vsel %vm593_vm2, %v5445_v1, %v5447_v59  ;;  %v15943_v57 = vld [vmem:[#allocation54_spill] sm:$0xff] }
 0x2bf   : > { %10585 = vmatprep.mubr.msk.f32.mxu0 %vm4519_vm4, %v5892_v3  ;;  %v5815_v3 = vmul.f32 %v13492_v15, %v15893_v41  ;;  %v5364_v0 = vmul.f32 %v13512_v24, %v15943_v57  ;;  %v5450_v28 = vsel %vm593_vm2, %v5447_v59, %v5449_v62  ;;  %v15947_v41 = vld [vmem:[#allocation63_spill] sm:$0xff] }
 0x2c0   : > { %10539 = vmatmul.mubr.msk.f32.gmra.mxu1 %vm4519_vm4, %v5444_v21  ;;  %v5897_v21 = vrot.slane %v5812_v19, 7  ;;  %v5452_v19 = vsel %vm593_vm2, %v5449_v62, %v5451_v56 }
 0x2c1   : > { %10541 = vmatprep.mubr.msk.f32.mxu1 %vm4519_vm4, %v5446_v39  ;;  %v15942_v39 = vld [vmem:[#allocation44_spill] sm:$0xff]  ;;  %v5903_v1 = vrot.slane %v5815_v3, 7 }
 0x2c2   : > { %10586 = vmatmul.mubr.msk.f32.gmra.mxu0 %vm4519_vm4, %v5894_v7  ;;  %v5814_v9 = vmul.f32 %v13461_v16, %v15942_v39  ;;  %v5898_v40 = vsel %vm1084_vm3, %v5895_v6, %v5897_v21  ;;  %v5900_v48 = vsel %vm1084_vm3, %v5897_v21, %v5899_v35  ;;  %v5453_v7 = vrot.slane %v5363_v58, 1  ;;  %v15945_v21 = vld [vmem:[#allocation58_spill] sm:$0xff] }
 0x2c3   : > { %10588 = vmatprep.mubr.msk.f32.mxu0 %vm4519_vm4, %v5896_v10  ;;  %v15944_v10 = vld [vmem:[#allocation57_spill] sm:$0xff]  ;;  %v5816_v6 = vmul.f32 %v13483_v8, %v15891_v2  ;;  %v5366_v58 = vmul.f32 %v13532_v32, %v15945_v21 }
 0x2c4   : > { %10542 = vmatmul.mubr.msk.f32.gmra.mxu1 %vm4519_vm4, %v5448_v22  ;;  %v5365_v39 = vmul.f32 %v13506_v30, %v15944_v10  ;;  %v5817_v22 = vmul.f32 %v13512_v24, %v15895_v29  ;;  %v5901_v59 = vrot.slane %v5814_v9, 7  ;;  %v5454_v62 = vsel %vm593_vm2, %v5451_v56, %v5453_v7 }
 0x2c5   : > { %10544 = vmatprep.mubr.msk.f32.mxu1 %vm4519_vm4, %v5450_v28  ;;  %v5455_v28 = vrot.slane %v5364_v0, 1  ;;  %v5819_v0 = vmul.f32 %v13532_v32, %v15897_v11 }
 0x2c6   : > { %10589 = vmatmul.mubr.msk.f32.gmra.mxu0 %vm4519_vm4, %v5898_v40  ;;  %v5902_v3 = vsel %vm1084_vm3, %v5899_v35, %v5901_v59  ;;  %v15946_v40 = vld [vmem:[#allocation62_spill] sm:$0xff]  ;;  %v5904_v9 = vsel %vm1084_vm3, %v5901_v59, %v5903_v1  ;;  %v5907_v2 = vrot.slane %v5817_v22, 7  ;;  %v5905_v35 = vrot.slane %v5816_v6, 7  ;;  %v15949_v6 = vld [vmem:[#allocation68_spill] sm:$0xff] }
 0x2c7   : > { %10591 = vmatprep.mubr.msk.f32.mxu0 %vm4519_vm4, %v5900_v48  ;;  %v5367_v29 = vmul.f32 %v13524_v14, %v15946_v40  ;;  %v5457_v48 = vrot.slane %v5365_v39, 1  ;;  %v5456_v56 = vsel %vm593_vm2, %v5453_v7, %v5455_v28  ;;  %v5911_v59 = vrot.slane %v5819_v0, 7 }
 0x2c8   : > { %10545 = vmatmul.mubr.msk.f32.gmra.mxu1 %vm4519_vm4, %v5452_v19  ;;  %v5368_v19 = vmul.f32 %v13553_v53, %v15947_v41  ;;  %v5906_v39 = vsel %vm1084_vm3, %v5903_v1, %v5905_v35  ;;  %v15953_v1 = vld [vmem:[#allocation69_spill] sm:$0xff] }
 0x2c9   : > { %10547 = vmatprep.mubr.msk.f32.mxu1 %vm4519_vm4, %v5454_v62  ;;  %v5459_v62 = vrot.slane %v5366_v58, 1  ;;  %v5461_v22 = vrot.slane %v5367_v29, 1  ;;  %v15950_v58 = vld [vmem:[#allocation111_spill] sm:$0xff]  ;;  %v5370_v0 = vmul.f32 %v13578_v46, %v15953_v1  ;;  %v15957_v1 = vld [vmem:[#allocation60_spill] sm:$0xff] }
 0x2ca   : > { %10592 = vmatmul.mubr.msk.f32.gmra.mxu0 %vm4519_vm4, %v5902_v3  ;;  %v5458_v3 = vsel %vm593_vm2, %v5455_v28, %v5457_v48  ;;  %v5463_v7 = vrot.slane %v5368_v19, 1  ;;  %v5369_v11 = vmul.f32 %v15950_v58, %v15949_v6 }
 0x2cb   : > { %10594 = vmatprep.mubr.msk.f32.mxu0 %vm4519_vm4, %v5904_v9  ;;  %v5908_v9 = vsel %vm1084_vm3, %v5905_v35, %v5907_v2  ;;  %v5460_v28 = vsel %vm593_vm2, %v5457_v48, %v5459_v62  ;;  %v5462_v19 = vsel %vm593_vm2, %v5459_v62, %v5461_v22  ;;  %v13815_v35 = vld [vmem:[#allocation3 + $0x108] sm:$0xff]  ;;  %v15954_v48 = vld [vmem:[#allocation74_spill] sm:$0xff] }
 0x2cc   : > { %10548 = vmatmul.mubr.msk.f32.gmra.mxu1 %vm4519_vm4, %v5456_v56  ;;  %v5909_v56 = vrot.slane %v5818_v27, 7  ;;  %v15955_v27 = vld [vmem:[#allocation79_spill] sm:$0xff]  ;;  %v5465_v50 = vrot.slane %v5369_v11, 1 }
 0x2cd   : > { %10550 = vmatprep.mubr.msk.f32.mxu1 %vm4519_vm4, %v5458_v3  ;;  %v15952_v3 = vld [vmem:[#allocation56_spill] sm:$0xff]  ;;  %v5371_v20 = vmul.f32 %v15955_v27, %v15954_v48 }
 0x2ce   : > { %10595 = vmatmul.mubr.msk.f32.gmra.mxu0 %vm4519_vm4, %v5906_v39  ;;  %v5820_v29 = vmul.f32 %v13524_v14, %v15952_v3  ;;  %v5910_v39 = vsel %vm1084_vm3, %v5907_v2, %v5909_v56  ;;  %v5464_v3 = vsel %vm593_vm2, %v5461_v22, %v5463_v7  ;;  %v5822_v2 = vmul.f32 %v15950_v58, %v15957_v1 }
 0x2cf   : > { %10597 = vmatprep.mubr.msk.f32.mxu0 %vm4519_vm4, %v5908_v9  ;;  %v5912_v9 = vsel %vm1084_vm3, %v5909_v56, %v5911_v59  ;;  %v15958_v56 = vld [vmem:[#allocation70_spill] sm:$0xff]  ;;  %v5469_v22 = vrot.slane %v5371_v20, 1 }
 0x2d0   : > { %10551 = vmatmul.mubr.msk.f32.gmra.mxu1 %vm4519_vm4, %v5460_v28  ;;  %v15956_v28 = vld [vmem:[#allocation65_spill] sm:$0xff]  ;;  %v5913_v45 = vrot.slane %v5820_v29, 7  ;;  %v5372_v6 = vmul.f32 %v13815_v35, %v15958_v56 }
 0x2d1   : > { %10553 = vmatprep.mubr.msk.f32.mxu1 %vm4519_vm4, %v5462_v19  ;;  %v5823_v62 = vmul.f32 %v13578_v46, %v15956_v28  ;;  %v5467_v19 = vrot.slane %v5370_v0, 1  ;;  %v15959_v0 = vld [vmem:[#allocation73_spill] sm:$0xff] }
 0x2d2   : > { %10598 = vmatmul.mubr.msk.f32.gmra.mxu0 %vm4519_vm4, %v5910_v39  ;;  %v5466_v39 = vsel %vm593_vm2, %v5463_v7, %v5465_v50  ;;  %v5914_v18 = vsel %vm1084_vm3, %v5911_v59, %v5913_v45  ;;  %v5916_v11 = vsel %vm1084_vm3, %v5913_v45, %v5915_v36  ;;  %v5471_v28 = vrot.slane %v5372_v6, 1  ;;  %v15960_v7 = vld [vmem:[#allocation66_spill] sm:$0xff] }
 0x2d3   : > { %10600 = vmatprep.mubr.msk.f32.mxu0 %vm4519_vm4, %v5912_v9  ;;  %v5919_v29 = vrot.slane %v5823_v62, 7  ;;  %v5825_v9 = vmul.f32 %v13815_v35, %v15959_v0  ;;  %v5468_v1 = vsel %vm593_vm2, %v5465_v50, %v5467_v19  ;;  %v5470_v59 = vsel %vm593_vm2, %v5467_v19, %v5469_v22  ;;  %v10940_v62 = vld [vmem:[#allocation3 + $0x18] sm:$0xff]  ;;  %v15961_v6 = vld [vmem:[#allocation6_spill] sm:$0xff] }
 0x2d4   : > { %10554 = vmatmul.mubr.msk.f32.gmra.mxu1 %vm4519_vm4, %v5464_v3  ;;  %v5917_v3 = vrot.slane %v5822_v2, 7  ;;  %v6513_v2 = vmul.f32 %v10940_v62, %v15961_v6  ;;  %v15962_v19 = vld [vmem:[#allocation71_spill] sm:$0xff] }
 0x2d5   : > { %10556 = vmatprep.mubr.msk.f32.mxu1 %vm4519_vm4, %v5466_v39  ;;  %v5824_v39 = vmul.f32 %v15955_v27, %v15960_v7  ;;  %v5923_v50 = vrot.slane %v5825_v9, 7 }
 0x2d6   : > { %10601 = vmatmul.mubr.msk.f32.gmra.mxu0 %vm4519_vm4, %v5914_v18  ;;  %v13845_v18 = vld [vmem:[#allocation3 + $0x110] sm:$0xff]  ;;  %v5918_v20 = vsel %vm1084_vm3, %v5915_v36, %v5917_v3  ;;  %v5920_v45 = vsel %vm1084_vm3, %v5917_v3, %v5919_v29  ;;  %v15963_v36 = vld [vmem:[#allocation9_spill] sm:$0xff] }
 0x2d7   : > { %10603 = vmatprep.mubr.msk.f32.mxu0 %vm4519_vm4, %v5916_v11  ;;  %v5921_v11 = vrot.slane %v5824_v39, 7  ;;  %v5826_v0 = vmul.f32 %v13845_v18, %v15962_v19  ;;  %v13863_v3 = vld [vmem:[#allocation3 + $0x28] sm:$0xff]  ;;  %v6581_v39 = vrot.slane %v6513_v2, 1  ;;  %v13884_v2 = vld [vmem:[#allocation3 + $0x38] sm:$0xff] }
 0x2d8   : > { %10557 = vmatmul.mubr.msk.f32.gmra.mxu1 %vm4519_vm4, %v5468_v1  ;;  %v5472_v1 = vsel %vm593_vm2, %v5469_v22, %v5471_v28 }
 0x2d9   : > { %10559 = vmatprep.mubr.msk.f32.mxu1 %vm4519_vm4, %v5470_v59  ;;  %v13857_v59 = vld [vmem:[#allocation3 + $0x20] sm:$0xff]  ;;  %v5922_v9 = vsel %vm1084_vm3, %v5919_v29, %v5921_v11  ;;  %v5924_v22 = vsel %vm1084_vm3, %v5921_v11, %v5923_v50 }
 0x2da   : > { %10604 = vmatmul.mubr.msk.f32.gmra.mxu0 %vm4519_vm4, %v5918_v20  ;;  %v6514_v20 = vmul.f32 %v13857_v59, %v15963_v36  ;;  %v13873_v36 = vld [vmem:[%s15257_s2 + $0x40] sm:$0xff] }
 0x2db   : > { %10606 = vmatprep.mubr.msk.f32.mxu0 %vm4519_vm4, %v5920_v45  ;;  %v15964_v45 = vld [vmem:[#allocation10_spill] sm:$0xff] }
 0x2dc   : > { %10560 = vmatmul.mubr.msk.f32.gmra.mxu1 %vm4519_vm4, %v5472_v1  ;;  %v6515_v28 = vmul.f32 %v13863_v3, %v15964_v45  ;;  %v5925_v1 = vrot.slane %v5826_v0, 7  ;;  %v6582_v29 = vrot.slane %v6514_v20, 1  ;;  %v15965_v45 = vld [vmem:[#allocation13_spill] sm:$0xff] }
 0x2dd   : > { %10614 = vmatprep.mubr.msk.f32.mxu1 %vm4519_vm4, %v10940_v62  ;;  %v13877_v62 = vld [vmem:[#allocation3 + $0x30] sm:$0xff] }
 0x2de   : > { %10607 = vmatmul.mubr.msk.f32.gmra.mxu0 %vm4519_vm4, %v5922_v9  ;;  %v6516_v9 = vmul.f32 %v13877_v62, %v15965_v45  ;;  %v5926_v11 = vsel %vm1084_vm3, %v5923_v50, %v5925_v1  ;;  %v6584_v0 = vrot.slane %v6515_v28, 1  ;;  %v6583_v20 = vsel %vm593_vm2, %v6581_v39, %v6582_v29  ;;  %v13895_v28 = vld [vmem:[#allocation3 + $0x40] sm:$0xff]  ;;  %v13902_v39 = vld [vmem:[#allocation3 + $0x48] sm:$0xff] }
 0x2df   : > { %10609 = vmatprep.mubr.msk.f32.mxu0 %vm4519_vm4, %v5924_v22  ;;  %v15966_v22 = vld [vmem:[#allocation14_spill] sm:$0xff]  ;;  %v6518_v1 = vmul.f32 %v13895_v28, %v15914_v47 }
 0x2e0   : > { %10615 = vmatmul.mubr.msk.f32.vlgmr.msra.gmra.mxu1 %vm4519_vm4, %v13857_v59  ;;  %v6517_v6 = vmul.f32 %v13884_v2, %v15966_v22  ;;  %v6586_v50 = vrot.slane %v6516_v9, 1  ;;  %v13912_v22 = vld [vmem:[#allocation3 + $0x50] sm:$0xff] }
 0x2e1   : > { %10617 = vmatprep.mubr.msk.f32.mxu1 %vm4519_vm4, %v13863_v3  ;;  %10713 = vmatpush3.msra.mxu1 %v13611_v33  ;;  %v6585_v33 = vsel %vm593_vm2, %v6582_v29, %v6584_v0  ;;  %v6590_v47 = vrot.slane %v6518_v1, 1 }
 0x2e2   : > { %10610 = vmatmul.mubr.msk.f32.gmra.mxu0 %vm4519_vm4, %v5926_v11  ;;  %10812 = vmatprep.subr.mxu1 %v13873_v36  ;;  %v6588_v11 = vrot.slane %v6517_v6, 1  ;;  %v6587_v9 = vsel %vm593_vm2, %v6584_v0, %v6586_v50  ;;  %v6520_v6 = vmul.f32 %v13912_v22, %v15917_v31  ;;  %v13919_v0 = vld [vmem:[#allocation3 + $0x58] sm:$0xff]  ;;  %v13928_v31 = vld [vmem:[#allocation3 + $0x60] sm:$0xff] }
 0x2e3   : > { %10664 = vmatprep.mubr.msk.f32.mxu0 %vm4519_vm4, %v6583_v20  ;;  %v6519_v20 = vmul.f32 %v13902_v39, %v15916_v38 }
 0x2e4   : > { %10618 = vmatmul.mubr.msk.f32.gmra.mxu1 %vm4519_vm4, %v13877_v62  ;;  %v6589_v29 = vsel %vm593_vm2, %v6586_v50, %v6588_v11  ;;  %v6591_v1 = vsel %vm593_vm2, %v6588_v11, %v6590_v47  ;;  %v6522_v50 = vmul.f32 %v13928_v31, %v15920_v60  ;;  %v13944_v60 = vld [vmem:[#allocation3 + $0x70] sm:$0xff] }
 0x2e5   : > { %10620 = vmatprep.mubr.msk.f32.mxu1 %vm4519_vm4, %v13884_v2 }
 0x2e6   : > { %10665 = vmatmul.mubr.msk.f32.vlgmr.msra.gmra.mxu0 %vm4519_vm4, %v6585_v33  ;;  %v6592_v33 = vrot.slane %v6519_v20, 1 }
 0x2e7   : > { %10667 = vmatprep.mubr.msk.f32.mxu0 %vm4519_vm4, %v6587_v9  ;;  %10763 = vmatpush3.msra.mxu0 %v13645_v55  ;;  %v6521_v55 = vmul.f32 %v13919_v0, %v15918_v37  ;;  %v6594_v9 = vrot.slane %v6520_v6, 1 }
 0x2e8   : > { %10621 = vmatmul.mubr.msk.f32.gmra.mxu1 %vm4519_vm4, %v13895_v28  ;;  %v6593_v20 = vsel %vm593_vm2, %v6590_v47, %v6592_v33  ;;  %v6524_v47 = vmul.f32 %v13944_v60, %v15921_v43  ;;  %v13960_v43 = vld [vmem:[#allocation3 + $0x80] sm:$0xff] }
 0x2e9   : > { %10623 = vmatprep.mubr.msk.f32.mxu1 %vm4519_vm4, %v13902_v39  ;;  %v6596_v37 = vrot.slane %v6521_v55, 1  ;;  %v6595_v6 = vsel %vm593_vm2, %v6592_v33, %v6594_v9 }
 0x2ea   : > { %10668 = vmatmul.mubr.msk.f32.gmra.mxu0 %vm4519_vm4, %v6589_v29  ;;  %v13935_v29 = vld [vmem:[#allocation3 + $0x68] sm:$0xff] }
 0x2eb   : > { %10670 = vmatprep.mubr.msk.f32.mxu0 %vm4519_vm4, %v6591_v1  ;;  %v6523_v11 = vmul.f32 %v13935_v29, %v15919_v42  ;;  %v6598_v1 = vrot.slane %v6522_v50, 1  ;;  %v6597_v55 = vsel %vm593_vm2, %v6594_v9, %v6596_v37  ;;  %v6526_v9 = vmul.f32 %v13960_v43, %v15923_v63 }
 0x2ec   : > { %10624 = vmatmul.mubr.msk.f32.gmra.mxu1 %vm4519_vm4, %v13912_v22 }
 0x2ed   : > { %10626 = vmatprep.mubr.msk.f32.mxu1 %vm4519_vm4, %v13919_v0  ;;  %v6600_v42 = vrot.slane %v6523_v11, 1  ;;  %v6599_v50 = vsel %vm593_vm2, %v6596_v37, %v6598_v1  ;;  %v6527_v37 = vmul.f32 %v13415_v17, %v15924_v23 }
 0x2ee   : > { %10671 = vmatmul.mubr.msk.f32.gmra.mxu0 %vm4519_vm4, %v6593_v20  ;;  %v13951_v20 = vld [vmem:[#allocation3 + $0x78] sm:$0xff] }
 0x2ef   : > { %10673 = vmatprep.mubr.msk.f32.mxu0 %vm4519_vm4, %v6595_v6  ;;  %v6525_v33 = vmul.f32 %v13951_v20, %v15922_v13  ;;  %v6602_v6 = vrot.slane %v6524_v47, 1  ;;  %v6601_v11 = vsel %vm593_vm2, %v6598_v1, %v6600_v42  ;;  %v6606_v47 = vrot.slane %v6526_v9, 1  ;;  %v13978_v1 = vld [vmem:[#allocation3 + $0x88] sm:$0xff] }
 0x2f0   : > { %10627 = vmatmul.mubr.msk.f32.gmra.mxu1 %vm4519_vm4, %v13928_v31 }
 0x2f1   : > { %10629 = vmatprep.mubr.msk.f32.mxu1 %vm4519_vm4, %v13935_v29  ;;  %v6604_v13 = vrot.slane %v6525_v33, 1  ;;  %v6608_v33 = vrot.slane %v6527_v37, 1 }
 0x2f2   : > { %10674 = vmatmul.mubr.msk.f32.gmra.mxu0 %vm4519_vm4, %v6597_v55  ;;  %v6603_v55 = vsel %vm593_vm2, %v6600_v42, %v6602_v6  ;;  %v6529_v42 = vmul.f32 %v13442_v34, %v15928_v49 }
 0x2f3   : > { %10676 = vmatprep.mubr.msk.f32.mxu0 %vm4519_vm4, %v6599_v50  ;;  %v13974_v50 = vld [vmem:[#allocation3 + $0x90] sm:$0xff]  ;;  %v6605_v17 = vsel %vm593_vm2, %v6602_v6, %v6604_v13  ;;  %v6607_v9 = vsel %vm593_vm2, %v6604_v13, %v6606_v47  ;;  %v6609_v6 = vsel %vm593_vm2, %v6606_v47, %v6608_v33 }
 0x2f4   : > { %10630 = vmatmul.mubr.msk.f32.gmra.mxu1 %vm4519_vm4, %v13944_v60  ;;  %v6528_v63 = vmul.f32 %v13974_v50, %v15925_v5  ;;  %v6612_v37 = vrot.slane %v6529_v42, 1 }
 0x2f5   : > { %10632 = vmatprep.mubr.msk.f32.mxu1 %vm4519_vm4, %v13951_v20 }
 0x2f6   : > { %10677 = vmatmul.mubr.msk.f32.gmra.mxu0 %vm4519_vm4, %v6601_v11  ;;  %v6610_v11 = vrot.slane %v6528_v63, 1 }
 0x2f7   : > { %10679 = vmatprep.mubr.msk.f32.mxu0 %vm4519_vm4, %v6603_v55  ;;  %v6530_v55 = vmul.f32 %v13432_v51, %v15930_v4 }
 0x2f8   : > { %10633 = vmatmul.mubr.msk.f32.gmra.mxu1 %vm4519_vm4, %v13960_v43  ;;  %v6611_v13 = vsel %vm593_vm2, %v6608_v33, %v6610_v11  ;;  %v6613_v63 = vsel %vm593_vm2, %v6610_v11, %v6612_v37  ;;  %v6533_v33 = vmul.f32 %v13492_v15, %v15937_v26 }
 0x2f9   : > { %10635 = vmatprep.mubr.msk.f32.mxu1 %vm4519_vm4, %v13978_v1  ;;  %v6614_v51 = vrot.slane %v6530_v55, 1 }
 0x2fa   : > { %10680 = vmatmul.mubr.msk.f32.gmra.mxu0 %vm4519_vm4, %v6605_v17  ;;  %v6531_v17 = vmul.f32 %v13468_v12, %v15933_v52  ;;  %v6620_v11 = vrot.slane %v6533_v33, 1 }
 0x2fb   : > { %10682 = vmatprep.mubr.msk.f32.mxu0 %vm4519_vm4, %v6607_v9  ;;  %v14000_v9 = vld [vmem:[#allocation3 + $0xa0] sm:$0xff]  ;;  %v6615_v42 = vsel %vm593_vm2, %v6612_v37, %v6614_v51 }
 0x2fc   : > { %10636 = vmatmul.mubr.msk.f32.gmra.mxu1 %vm4519_vm4, %v13974_v50  ;;  %v6616_v47 = vrot.slane %v6531_v17, 1  ;;  %v6535_v17 = vmul.f32 %v13512_v24, %v15939_v44 }
 0x2fd   : > { %10638 = vmatprep.mubr.msk.f32.mxu1 %vm4519_vm4, %v13442_v34  ;;  %v6532_v34 = vmul.f32 %v13461_v16, %v15934_v61 }
 0x2fe   : > { %10683 = vmatmul.mubr.msk.f32.gmra.mxu0 %vm4519_vm4, %v6609_v6  ;;  %v6534_v6 = vmul.f32 %v13483_v8, %v15938_v25 }
 0x2ff   : > { %10685 = vmatprep.mubr.msk.f32.mxu0 %vm4519_vm4, %v6611_v13  ;;  %v6618_v55 = vrot.slane %v6532_v34, 1  ;;  %v6536_v13 = vmul.f32 %v13506_v30, %v15941_v54  ;;  %v6537_v34 = vmul.f32 %v13532_v32, %v15943_v57 }
 0x300   : > { %10639 = vmatmul.mubr.msk.f32.gmra.mxu1 %vm4519_vm4, %v14000_v9 }
 0x301   : > { %10641 = vmatprep.mubr.msk.f32.mxu1 %vm4519_vm4, %v13468_v12  ;;  %v6617_v12 = vsel %vm593_vm2, %v6614_v51, %v6616_v47  ;;  %v6619_v37 = vsel %vm593_vm2, %v6616_v47, %v6618_v55  ;;  %v6624_v51 = vrot.slane %v6535_v17, 1  ;;  %v6538_v47 = vmul.f32 %v13524_v14, %v15944_v10 }
 0x302   : > { %10686 = vmatmul.mubr.msk.f32.gmra.mxu0 %vm4519_vm4, %v6613_v63  ;;  %v6628_v33 = vrot.slane %v6537_v34, 1  ;;  %v15969_v34 = vld [vmem:[#allocation69_spill] sm:$0xff] }
 0x303   : > { %10688 = vmatprep.mubr.msk.f32.mxu0 %vm4519_vm4, %v6615_v42  ;;  %v6539_v42 = vmul.f32 %v13553_v53, %v15945_v21 }
 0x304   : > { %10642 = vmatmul.mubr.msk.f32.gmra.mxu1 %vm4519_vm4, %v13461_v16  ;;  %v6622_v16 = vrot.slane %v6534_v6, 1  ;;  %v6540_v6 = vmul.f32 %v15950_v58, %v15946_v40 }
 0x305   : > { %10644 = vmatprep.mubr.msk.f32.mxu1 %vm4519_vm4, %v13492_v15  ;;  %v6621_v15 = vsel %vm593_vm2, %v6618_v55, %v6620_v11 }
 0x306   : > { %10689 = vmatmul.mubr.msk.f32.gmra.mxu0 %vm4519_vm4, %v6617_v12  ;;  %v6623_v63 = vsel %vm593_vm2, %v6620_v11, %v6622_v16  ;;  %v6632_v12 = vrot.slane %v6539_v42, 1  ;;  %v6541_v11 = vmul.f32 %v13578_v46, %v15947_v41  ;;  %v15971_v42 = vld [vmem:[#allocation11_spill] sm:$0xff] }
 0x307   : > { %10691 = vmatprep.mubr.msk.f32.mxu0 %vm4519_vm4, %v6619_v37  ;;  %v15967_v37 = vld [vmem:[#allocation68_spill] sm:$0xff] }
 0x308   : > { %10645 = vmatmul.mubr.msk.f32.gmra.mxu1 %vm4519_vm4, %v13483_v8  ;;  %v6626_v8 = vrot.slane %v6536_v13, 1 }
 0x309   : > { %10647 = vmatprep.mubr.msk.f32.mxu1 %vm4519_vm4, %v13512_v24  ;;  %v6625_v24 = vsel %vm593_vm2, %v6622_v16, %v6624_v51  ;;  %v6542_v16 = vmul.f32 %v15955_v27, %v15967_v37 }
 0x30a   : > { %10692 = vmatmul.mubr.msk.f32.gmra.mxu0 %vm4519_vm4, %v6621_v15  ;;  %v6627_v55 = vsel %vm593_vm2, %v6624_v51, %v6626_v8  ;;  %v6636_v51 = vrot.slane %v6541_v11, 1  ;;  %v14091_v11 = vld [vmem:[#allocation3 + $0x118] sm:$0xff] }
 0x30b   : > { %10694 = vmatprep.mubr.msk.f32.mxu0 %vm4519_vm4, %v6623_v63  ;;  %v6543_v63 = vmul.f32 %v13815_v35, %v15969_v34 }
 0x30c   : > { %10648 = vmatmul.mubr.msk.f32.gmra.mxu1 %vm4519_vm4, %v13506_v30  ;;  %v6630_v30 = vrot.slane %v6538_v47, 1 }
 0x30d   : > { %10650 = vmatprep.mubr.msk.f32.mxu1 %vm4519_vm4, %v13532_v32  ;;  %v6629_v32 = vsel %vm593_vm2, %v6626_v8, %v6628_v33  ;;  %v15970_v8 = vld [vmem:[#allocation5_spill] sm:$0xff] }
 0x30e   : > { %10695 = vmatmul.mubr.msk.f32.gmra.mxu0 %vm4519_vm4, %v6625_v24  ;;  %v6631_v17 = vsel %vm593_vm2, %v6628_v33, %v6630_v30  ;;  %v6633_v15 = vsel %vm593_vm2, %v6630_v30, %v6632_v12  ;;  %v6967_v47 = vmul.f32 %v13857_v59, %v15970_v8  ;;  %v6638_v24 = vrot.slane %v6542_v16, 1  ;;  %v15972_v59 = vld [vmem:[#allocation8_spill] sm:$0xff] }
 0x30f   : > { %10697 = vmatprep.mubr.msk.f32.mxu0 %vm4519_vm4, %v6627_v55  ;;  %v6544_v33 = vmul.f32 %v13845_v18, %v15954_v48  ;;  %v6970_v55 = vmul.f32 %v13884_v2, %v15971_v42 }
 0x310   : > { %10651 = vmatmul.mubr.msk.f32.gmra.mxu1 %vm4519_vm4, %v13524_v14  ;;  %v6634_v14 = vrot.slane %v6540_v6, 1  ;;  %v6640_v6 = vrot.slane %v6543_v63, 1 }
 0x311   : > { %10653 = vmatprep.mubr.msk.f32.mxu1 %vm4519_vm4, %v13553_v53  ;;  %v15968_v53 = vld [vmem:[#allocation7_spill] sm:$0xff]  ;;  %v6642_v16 = vrot.slane %v6544_v33, 1 }
 0x312   : > { %10698 = vmatmul.mubr.msk.f32.gmra.mxu0 %vm4519_vm4, %v6629_v32  ;;  %v6968_v13 = vmul.f32 %v13863_v3, %v15968_v53  ;;  %v6637_v30 = vsel %vm593_vm2, %v6634_v14, %v6636_v51  ;;  %v6969_v32 = vmul.f32 %v13877_v62, %v15972_v59  ;;  %v7040_v53 = vrot.slane %v6970_v55, 7 }
 0x313   : > { %10700 = vmatprep.mubr.msk.f32.mxu0 %vm4519_vm4, %v6631_v17  ;;  %v6545_v17 = vmul.f32 %v14091_v11, %v15958_v56 }
 0x314   : > { %10654 = vmatmul.mubr.msk.f32.gmra.mxu1 %vm4519_vm4, %v15950_v58  ;;  %v6635_v58 = vsel %vm593_vm2, %v6632_v12, %v6634_v14  ;;  %v7035_v12 = vrot.slane %v6967_v47, 7  ;;  %v7038_v63 = vrot.slane %v6969_v32, 7  ;;  %v6643_v47 = vsel %vm593_vm2, %v6640_v6, %v6642_v16 }
 0x315   : > { %10656 = vmatprep.mubr.msk.f32.mxu1 %vm4519_vm4, %v13578_v46  ;;  %v7036_v46 = vrot.slane %v6968_v13, 7  ;;  %v15973_v13 = vld [vmem:[#allocation15_spill] sm:$0xff]  ;;  %v6644_v42 = vrot.slane %v6545_v17, 1 }
 0x316   : > { %10701 = vmatmul.mubr.msk.f32.gmra.mxu0 %vm4519_vm4, %v6633_v15  ;;  %v6972_v15 = vmul.f32 %v13902_v39, %v15973_v13  ;;  %v7041_v55 = vsel %vm1084_vm3, %v7038_v63, %v7040_v53 }
 0x317   : > { %10703 = vmatprep.mubr.msk.f32.mxu0 %vm4519_vm4, %v6635_v58  ;;  %v7037_v14 = vsel %vm1084_vm3, %v7035_v12, %v7036_v46  ;;  %v15974_v58 = vld [vmem:[#allocation12_spill] sm:$0xff]  ;;  %v7039_v33 = vsel %vm1084_vm3, %v7036_v46, %v7038_v63  ;;  %v6645_v32 = vsel %vm593_vm2, %v6642_v16, %v6644_v42  ;;  %v14118_v46 = vpop.f32.mrf.mxu1 }
 0x318   : > { %10657 = vmatmul.mubr.msk.f32.gmra.mxu1 %vm4519_vm4, %v15955_v27  ;;  %v6639_v27 = vsel %vm593_vm2, %v6636_v51, %v6638_v24  ;;  %v6641_v51 = vsel %vm593_vm2, %v6638_v24, %v6640_v6  ;;  %v6971_v8 = vmul.f32 %v13895_v28, %v15974_v58  ;;  %v7044_v24 = vrot.slane %v6972_v15, 7  ;;  %v15976_v12 = vld [vmem:[#allocation16_spill] sm:$0xff]  ;;  %v15977_v15 = vld [vmem:[#allocation23_spill] sm:$0xff] }
 0x319   : > { %10659 = vmatprep.mubr.msk.f32.mxu1 %vm4519_vm4, %v13815_v35  ;;  %v6973_v6 = vmul.f32 %v13912_v22, %v15976_v12  ;;  %v15978_v63 = vld [vmem:[#allocation20_spill] sm:$0xff] }
 0x31a   : > { %10704 = vmatmul.mubr.msk.f32.gmra.mxu0 %vm4519_vm4, %v6637_v30  ;;  %v15975_v30 = vld [vmem:[#allocation19_spill] sm:$0xff]  ;;  %v6975_v58 = vmul.f32 %v13928_v31, %v15978_v63  ;;  %v15980_v12 = vld [vmem:[#allocation24_spill] sm:$0xff] }
 0x31b   : > { %10706 = vmatprep.mubr.msk.f32.mxu0 %vm4519_vm4, %v6639_v27  ;;  %v6974_v59 = vmul.f32 %v13919_v0, %v15975_v30  ;;  %v7042_v27 = vrot.slane %v6971_v8, 7  ;;  %v15979_v30 = vld [vmem:[#allocation27_spill] sm:$0xff] }
 0x31c   : > { %10660 = vmatmul.mubr.msk.f32.gmra.mxu1 %vm4519_vm4, %v13845_v18 }
 0x31d   : > { %10714 = vmatprep.mubr.msk.f32.mxu1 %vm4519_vm4, %v7037_v14  ;;  %v7043_v17 = vsel %vm1084_vm3, %v7040_v53, %v7042_v27  ;;  %v7045_v16 = vsel %vm1084_vm3, %v7042_v27, %v7044_v24  ;;  %v7048_v13 = vrot.slane %v6974_v59, 7  ;;  %v14133_v53 = vpop.f32.mrf.mxu0  ;;  %v6978_v59 = vmul.f32 %v13951_v20, %v15979_v30  ;;  %v15982_v30 = vld [vmem:[#allocation28_spill] sm:$0xff] }
 0x31e   : > { %10707 = vmatmul.mubr.msk.f32.gmra.mxu0 %vm4519_vm4, %v6641_v51  ;;  %v6976_v51 = vmul.f32 %v13935_v29, %v15977_v15  ;;  %v7050_v27 = vrot.slane %v6975_v58, 7 }
 0x31f   : > { %10709 = vmatprep.mubr.msk.f32.mxu0 %vm4519_vm4, %v6643_v47  ;;  %v7056_v58 = vrot.slane %v6978_v59, 7 }
 0x320   : > { %10715 = vmatmul.mubr.msk.f32.vlgmr.msra.gmra.mxu1 %vm4519_vm4, %v7039_v33  ;;  %v7051_v15 = vsel %vm1084_vm3, %v7048_v13, %v7050_v27 }
 0x321   : > { %10717 = vmatprep.mubr.msk.f32.mxu1 %vm4519_vm4, %v7041_v55  ;;  %10813 = vmatpush3.msra.mxu1 %v13873_v36  ;;  %v7046_v36 = vrot.slane %v6973_v6, 7  ;;  %v7052_v55 = vrot.slane %v6976_v51, 7  ;;  %v6977_v6 = vmul.f32 %v13944_v60, %v15980_v12 }
 0x322   : > { %10710 = vmatmul.mubr.msk.f32.gmra.mxu0 %vm4519_vm4, %v6645_v32 }
 0x323   : > { %10764 = vmatprep.mubr.msk.f32.mxu0 %vm4519_vm4, %v13863_v3  ;;  %v7047_v47 = vsel %vm1084_vm3, %v7044_v24, %v7046_v36  ;;  %v7049_v42 = vsel %vm1084_vm3, %v7046_v36, %v7048_v13  ;;  %v7053_v63 = vsel %vm1084_vm3, %v7050_v27, %v7052_v55 }
 0x324   : > { %v10419_v14 = vpop.f32.mrf.mxu1  ;;  %10718 = vmatmul.mubr.msk.f32.gmra.mxu1 %vm4519_vm4, %v7043_v17 }
 0x325   : > { %10720 = vmatprep.mubr.msk.f32.mxu1 %vm4519_vm4, %v7045_v16 }
 0x326   : > { %10765 = vmatmul.mubr.msk.f32.vlgmr.msra.gmra.mxu0 %vm4519_vm4, %v13877_v62  ;;  %v4804_v8 = vpop.f32.mrf.mxu1 }
 0x327   : > { %10767 = vmatprep.mubr.msk.f32.mxu0 %vm4519_vm4, %v13884_v2 }
 0x328   : > { %v10422_v33 = vpop.f32.mrf.mxu1  ;;  %10721 = vmatmul.mubr.msk.f32.gmra.mxu1 %vm4519_vm4, %v7047_v47 }
 0x329   : > { %10723 = vmatprep.mubr.msk.f32.mxu1 %vm4519_vm4, %v7049_v42  ;;  %v7054_v42 = vrot.slane %v6977_v6, 7 }
 0x32a   : > { %v10469_v32 = vpop.f32.mrf.mxu0  ;;  %10768 = vmatmul.mubr.msk.f32.gmra.mxu0 %vm4519_vm4, %v13895_v28  ;;  %v4814_v24 = vpop.f32.mrf.mxu1 }
 0x32b   : > { %v14145_v17 = vadd.f32 %v10469_v32, %v10419_v14  ;;  %10770 = vmatprep.mubr.msk.f32.mxu0 %vm4519_vm4, %v13902_v39  ;;  %v15981_v14 = vld [vmem:[#allocation31_spill] sm:$0xff]  ;;  %v6979_v32 = vmul.f32 %v13960_v43, %v15982_v30  ;;  %v7055_v59 = vsel %vm1084_vm3, %v7052_v55, %v7054_v42  ;;  %v7057_v6 = vsel %vm1084_vm3, %v7054_v42, %v7056_v58 }
 0x32c   : > { %v5191_v16 = vpop.f32.mrf.mxu0  ;;  %v10425_v36 = vpop.f32.mrf.mxu1  ;;  %10724 = vmatmul.mubr.msk.f32.gmra.mxu1 %vm4519_vm4, %v7051_v15  ;;  %v6980_v47 = vmul.f32 %v13978_v1, %v15981_v14  ;;  %v15983_v14 = vld [vmem:[#allocation35_spill] sm:$0xff] }
 0x32d   : > { %v14152_v51 = vadd.f32 %v5191_v16, %v4804_v8  ;;  %10726 = vmatprep.mubr.msk.f32.mxu1 %vm4519_vm4, %v7053_v63  ;;  %v14170_v63 = vld [vmem:[#allocation3 + $0x98] sm:$0xff] }
 0x32e   : > { %v10472_v12 = vpop.f32.mrf.mxu0  ;;  %10771 = vmatmul.mubr.msk.f32.gmra.mxu0 %vm4519_vm4, %v13912_v22  ;;  %v4824_v13 = vpop.f32.mrf.mxu1  ;;  %v7060_v15 = vrot.slane %v6980_v47, 7  ;;  %v6982_v30 = vmul.f32 %v14170_v63, %v15983_v14  ;;  %v14188_v14 = vld [vmem:[#allocation3 + $0xa8] sm:$0xff] }
 0x32f   : > { %v14163_v8 = vadd.f32 %v10472_v12, %v10422_v33  ;;  %10773 = vmatprep.mubr.msk.f32.mxu0 %vm4519_vm4, %v13919_v0  ;;  %v7058_v33 = vrot.slane %v6979_v32, 7  ;;  %v15984_v12 = vld [vmem:[#allocation32_spill] sm:$0xff] }
 0x330   : > { %v5201_v27 = vpop.f32.mrf.mxu0  ;;  %v10428_v16 = vpop.f32.mrf.mxu1  ;;  %10727 = vmatmul.mubr.msk.f32.gmra.mxu1 %vm4519_vm4, %v7055_v59  ;;  %v6981_v55 = vmul.f32 %v13974_v50, %v15984_v12  ;;  %v15985_v12 = vld [vmem:[#allocation39_spill] sm:$0xff] }
 0x331   : > { %v14174_v56 = vadd.f32 %v5201_v27, %v4814_v24  ;;  %10729 = vmatprep.mubr.msk.f32.mxu1 %vm4519_vm4, %v7057_v6  ;;  %v7059_v47 = vsel %vm1084_vm3, %v7056_v58, %v7058_v33  ;;  %v7061_v32 = vsel %vm1084_vm3, %v7058_v33, %v7060_v15  ;;  %v7064_v6 = vrot.slane %v6982_v30, 7 }
 0x332   : > { %v10475_v34 = vpop.f32.mrf.mxu0  ;;  %10774 = vmatmul.mubr.msk.f32.gmra.mxu0 %vm4519_vm4, %v13928_v31  ;;  %v4834_v59 = vpop.f32.mrf.mxu1  ;;  %v6984_v48 = vmul.f32 %v14188_v14, %v15985_v12  ;;  %v14206_v12 = vld [vmem:[#allocation3 + $0xb8] sm:$0xff] }
 0x333   : > { %v14181_v42 = vadd.f32 %v10475_v34, %v10425_v36  ;;  %10776 = vmatprep.mubr.msk.f32.mxu0 %vm4519_vm4, %v13935_v29  ;;  %v7062_v34 = vrot.slane %v6981_v55, 7  ;;  %v15986_v36 = vld [vmem:[#allocation36_spill] sm:$0xff] }
 0x334   : > { %v5211_v24 = vpop.f32.mrf.mxu0  ;;  %v10431_v27 = vpop.f32.mrf.mxu1  ;;  %10730 = vmatmul.mubr.msk.f32.gmra.mxu1 %vm4519_vm4, %v7059_v47  ;;  %v6983_v58 = vmul.f32 %v14000_v9, %v15986_v36  ;;  %v15987_v36 = vld [vmem:[#allocation43_spill] sm:$0xff] }
 0x335   : > { %v14192_v37 = vadd.f32 %v5211_v24, %v4824_v13  ;;  %10732 = vmatprep.mubr.msk.f32.mxu1 %vm4519_vm4, %v7061_v32  ;;  %v7063_v30 = vsel %vm1084_vm3, %v7060_v15, %v7062_v34  ;;  %v7065_v55 = vsel %vm1084_vm3, %v7062_v34, %v7064_v6  ;;  %v7068_v32 = vrot.slane %v6984_v48, 7  ;;  %v15988_v15 = vld [vmem:[#allocation40_spill] sm:$0xff] }
 0x336   : > { %v10478_v41 = vpop.f32.mrf.mxu0  ;;  %10777 = vmatmul.mubr.msk.f32.gmra.mxu0 %vm4519_vm4, %v13944_v60  ;;  %v4844_v47 = vpop.f32.mrf.mxu1  ;;  %v6986_v40 = vmul.f32 %v14206_v12, %v15987_v36  ;;  %v14226_v36 = vld [vmem:[#allocation3 + $0xc8] sm:$0xff] }
 0x337   : > { %v14199_v33 = vadd.f32 %v10478_v41, %v10428_v16  ;;  %10779 = vmatprep.mubr.msk.f32.mxu0 %vm4519_vm4, %v13951_v20  ;;  %v7066_v41 = vrot.slane %v6983_v58, 7  ;;  %v14213_v16 = vld [vmem:[#allocation3 + $0xb0] sm:$0xff] }
 0x338   : > { %v5221_v13 = vpop.f32.mrf.mxu0  ;;  %v10434_v24 = vpop.f32.mrf.mxu1  ;;  %10733 = vmatmul.mubr.msk.f32.gmra.mxu1 %vm4519_vm4, %v7063_v30  ;;  %v6985_v10 = vmul.f32 %v14213_v16, %v15988_v15  ;;  %v15989_v15 = vld [vmem:[#allocation47_spill] sm:$0xff] }
 0x339   : > { %v14210_v21 = vadd.f32 %v5221_v13, %v4834_v59  ;;  %10735 = vmatprep.mubr.msk.f32.mxu1 %vm4519_vm4, %v7065_v55  ;;  %v7067_v59 = vsel %vm1084_vm3, %v7064_v6, %v7066_v41  ;;  %v7069_v58 = vsel %vm1084_vm3, %v7066_v41, %v7068_v32  ;;  %v7072_v55 = vrot.slane %v6986_v40, 7  ;;  %v15992_v6 = vld [vmem:[#allocation44_spill] sm:$0xff] }
 0x33a   : > { %v10481_v57 = vpop.f32.mrf.mxu0  ;;  %10780 = vmatmul.mubr.msk.f32.gmra.mxu0 %vm4519_vm4, %v13960_v43  ;;  %v4854_v48 = vpop.f32.mrf.mxu1  ;;  %v6988_v54 = vmul.f32 %v14226_v36, %v15989_v15  ;;  %v14246_v15 = vld [vmem:[#allocation3 + $0xd8] sm:$0xff] }
 0x33b   : > { %v14219_v34 = vadd.f32 %v10481_v57, %v10431_v27  ;;  %10782 = vmatprep.mubr.msk.f32.mxu0 %vm4519_vm4, %v13978_v1  ;;  %v7070_v57 = vrot.slane %v6985_v10, 7  ;;  %v14233_v27 = vld [vmem:[#allocation3 + $0xc0] sm:$0xff] }
 0x33c   : > { %v5231_v30 = vpop.f32.mrf.mxu0  ;;  %v10437_v13 = vpop.f32.mrf.mxu1  ;;  %10736 = vmatmul.mubr.msk.f32.gmra.mxu1 %vm4519_vm4, %v7067_v59  ;;  %15991 = vst [vmem:[#allocation81_spill] sm:$0xff] %v14233_v27  ;;  %v6987_v25 = vmul.f32 %v14233_v27, %v15992_v6  ;;  %v15994_v6 = vld [vmem:[#allocation51_spill] sm:$0xff] }
 0x33d   : > { %v14230_v44 = vadd.f32 %v5231_v30, %v4844_v47  ;;  %10738 = vmatprep.mubr.msk.f32.mxu1 %vm4519_vm4, %v7069_v58  ;;  %v7071_v47 = vsel %vm1084_vm3, %v7068_v32, %v7070_v57  ;;  %v7073_v10 = vsel %vm1084_vm3, %v7070_v57, %v7072_v55  ;;  %v7076_v58 = vrot.slane %v6988_v54, 7  ;;  %v15997_v32 = vld [vmem:[#allocation48_spill] sm:$0xff] }
 0x33e   : > { %v10484_v26 = vpop.f32.mrf.mxu0  ;;  %10783 = vmatmul.mubr.msk.f32.gmra.mxu0 %vm4519_vm4, %v13974_v50  ;;  %v4864_v40 = vpop.f32.mrf.mxu1  ;;  %v6990_v61 = vmul.f32 %v14246_v15, %v15994_v6  ;;  %v14268_v6 = vld [vmem:[#allocation3 + $0xe8] sm:$0xff] }
 0x33f   : > { %15990 = vst [vmem:[#allocation78_spill] sm:$0xff] %v14230_v44  ;;  %v14239_v41 = vadd.f32 %v10484_v26, %v10434_v24  ;;  %10785 = vmatprep.mubr.msk.f32.mxu0 %vm4519_vm4, %v14170_v63  ;;  %v7074_v26 = vrot.slane %v6987_v25, 7  ;;  %v14253_v24 = vld [vmem:[#allocation3 + $0xd0] sm:$0xff] }
 0x340   : > { %v5241_v59 = vpop.f32.mrf.mxu0  ;;  %v10440_v30 = vpop.f32.mrf.mxu1  ;;  %10739 = vmatmul.mubr.msk.f32.gmra.mxu1 %vm4519_vm4, %v7071_v47  ;;  %15996 = vst [vmem:[#allocation116_spill] sm:$0xff] %v14253_v24 }
 0x341   : > { %15993 = vst [vmem:[#allocation114_spill] sm:$0xff] %v14239_v41  ;;  %v14250_v52 = vadd.f32 %v5241_v59, %v4854_v48  ;;  %10741 = vmatprep.mubr.msk.f32.mxu1 %vm4519_vm4, %v7073_v10  ;;  %v6989_v41 = vmul.f32 %v14253_v24, %v15997_v32  ;;  %v7075_v48 = vsel %vm1084_vm3, %v7072_v55, %v7074_v26  ;;  %v7080_v10 = vrot.slane %v6990_v61, 7  ;;  %v16000_v32 = vld [vmem:[#allocation55_spill] sm:$0xff]  ;;  %v16002_v55 = vld [vmem:[#allocation52_spill] sm:$0xff] }
 0x342   : > { %v10487_v44 = vpop.f32.mrf.mxu0  ;;  %10786 = vmatmul.mubr.msk.f32.gmra.mxu0 %vm4519_vm4, %v14000_v9  ;;  %v14259_v54 = vpop.f32.mrf.mxu1  ;;  %v7077_v59 = vsel %vm1084_vm3, %v7074_v26, %v7076_v58 }
 0x343   : > { %15995 = vst [vmem:[#allocation84_spill] sm:$0xff] %v14250_v52  ;;  %15998 = vst [vmem:[#allocation86_spill] sm:$0xff] %v14259_v54  ;;  %v14261_v57 = vadd.f32 %v10487_v44, %v10437_v13  ;;  %10788 = vmatprep.mubr.msk.f32.mxu0 %vm4519_vm4, %v14188_v14  ;;  %v6992_v52 = vmul.f32 %v14268_v6, %v16000_v32  ;;  %v7078_v44 = vrot.slane %v6989_v41, 7  ;;  %v14275_v13 = vld [vmem:[#allocation3 + $0xe0] sm:$0xff]  ;;  %v14292_v32 = vld [vmem:[#allocation3 + $0xf8] sm:$0xff] }
 0x344   : > { %v5251_v47 = vpop.f32.mrf.mxu0  ;;  %v10443_v25 = vpop.f32.mrf.mxu1  ;;  %10742 = vmatmul.mubr.msk.f32.gmra.mxu1 %vm4519_vm4, %v7075_v48 }
 0x345   : > { %15999 = vst [vmem:[#allocation110_spill] sm:$0xff] %v14261_v57  ;;  %v14272_v54 = vadd.f32 %v5251_v47, %v4864_v40  ;;  %10744 = vmatprep.mubr.msk.f32.mxu1 %vm4519_vm4, %v7077_v59  ;;  %v6991_v57 = vmul.f32 %v14275_v13, %v16002_v55  ;;  %v7079_v40 = vsel %vm1084_vm3, %v7076_v58, %v7078_v44  ;;  %v7084_v59 = vrot.slane %v6992_v52, 7  ;;  %v16006_v55 = vld [vmem:[#allocation59_spill] sm:$0xff] }
 0x346   : > { %v10490_v4 = vpop.f32.mrf.mxu0  ;;  %10789 = vmatmul.mubr.msk.f32.gmra.mxu0 %vm4519_vm4, %v14213_v16  ;;  %v14281_v61 = vpop.f32.mrf.mxu1  ;;  %v7081_v47 = vsel %vm1084_vm3, %v7078_v44, %v7080_v10 }
 0x347   : > { %16001 = vst [vmem:[#allocation112_spill] sm:$0xff] %v14272_v54  ;;  %16003 = vst [vmem:[#allocation98_spill] sm:$0xff] %v14281_v61  ;;  %v14283_v26 = vadd.f32 %v10490_v4, %v10440_v30  ;;  %10791 = vmatprep.mubr.msk.f32.mxu0 %vm4519_vm4, %v14206_v12  ;;  %v6994_v61 = vmul.f32 %v14292_v32, %v16006_v55  ;;  %v7082_v4 = vrot.slane %v6991_v57, 7  ;;  %v14297_v30 = vld [vmem:[#allocation3 + $0xf0] sm:$0xff]  ;;  %v16011_v54 = vld [vmem:[#allocation65_spill] sm:$0xff] }
 0x348   : > { %v14288_v48 = vpop.f32.mrf.mxu0  ;;  %v10446_v41 = vpop.f32.mrf.mxu1  ;;  %10745 = vmatmul.mubr.msk.f32.gmra.mxu1 %vm4519_vm4, %v7079_v40 }
 0x349   : > { %16004 = vst [vmem:[#allocation113_spill] sm:$0xff] %v14283_v26  ;;  %16005 = vst [vmem:[#allocation115_spill] sm:$0xff] %v14288_v48  ;;  %10747 = vmatprep.mubr.msk.f32.mxu1 %vm4519_vm4, %v7081_v47  ;;  %v16007_v26 = vld [vmem:[#allocation56_spill] sm:$0xff]  ;;  %v7083_v44 = vsel %vm1084_vm3, %v7080_v10, %v7082_v4  ;;  %v7088_v55 = vrot.slane %v6994_v61, 7 }
 0x34a   : > { %v6993_v58 = vmul.f32 %v14297_v30, %v16007_v26  ;;  %v10493_v48 = vpop.f32.mrf.mxu0  ;;  %10792 = vmatmul.mubr.msk.f32.gmra.mxu0 %vm4519_vm4, %v14233_v27  ;;  %v14303_v40 = vpop.f32.mrf.mxu1  ;;  %v7085_v26 = vsel %vm1084_vm3, %v7082_v4, %v7084_v59  ;;  %v6996_v27 = vmul.f32 %v13815_v35, %v16011_v54 }
 0x34b   : > { %16008 = vst [vmem:[#allocation102_spill] sm:$0xff] %v14303_v40  ;;  %v14305_v52 = vadd.f32 %v10493_v48, %v10443_v25  ;;  %10794 = vmatprep.mubr.msk.f32.mxu0 %vm4519_vm4, %v14226_v36  ;;  %v14317_v48 = vld [vmem:[#allocation3 + $0x100] sm:$0xff] }
 0x34c   : > { %v14310_v47 = vpop.f32.mrf.mxu0  ;;  %v10449_v57 = vpop.f32.mrf.mxu1  ;;  %10748 = vmatmul.mubr.msk.f32.gmra.mxu1 %vm4519_vm4, %v7083_v44  ;;  %v7086_v25 = vrot.slane %v6993_v58, 7  ;;  %v16012_v40 = vld [vmem:[#allocation60_spill] sm:$0xff] }
 0x34d   : > { %16009 = vst [vmem:[#allocation106_spill] sm:$0xff] %v14305_v52  ;;  %16010 = vst [vmem:[#allocation91_spill] sm:$0xff] %v14310_v47  ;;  %10750 = vmatprep.mubr.msk.f32.mxu1 %vm4519_vm4, %v7085_v26  ;;  %v6995_v52 = vmul.f32 %v14317_v48, %v16012_v40  ;;  %v7092_v40 = vrot.slane %v6996_v27, 7  ;;  %v6997_v26 = vmul.f32 %v13845_v18, %v15960_v7 }
 0x34e   : > { %v10496_v10 = vpop.f32.mrf.mxu0  ;;  %10795 = vmatmul.mubr.msk.f32.gmra.mxu0 %vm4519_vm4, %v14253_v24  ;;  %v14323_v47 = vpop.f32.mrf.mxu1  ;;  %v7087_v54 = vsel %vm1084_vm3, %v7084_v59, %v7086_v25  ;;  %v7089_v58 = vsel %vm1084_vm3, %v7086_v25, %v7088_v55  ;;  %v14336_v24 = vld [vmem:[#allocation3 + $0x120] sm:$0xff] }
 0x34f   : > { %16013 = vst [vmem:[#allocation103_spill] sm:$0xff] %v14323_v47  ;;  %v14325_v44 = vadd.f32 %v10496_v10, %v10446_v41  ;;  %10797 = vmatprep.mubr.msk.f32.mxu0 %vm4519_vm4, %v14246_v15  ;;  %v7090_v41 = vrot.slane %v6995_v52, 7  ;;  %v16017_v47 = vld [vmem:[#allocation73_spill] sm:$0xff]  ;;  %v6999_v27 = vmul.f32 %v14336_v24, %v15962_v19 }
 0x350   : > { %v14330_v61 = vpop.f32.mrf.mxu0  ;;  %v10452_v4 = vpop.f32.mrf.mxu1  ;;  %10751 = vmatmul.mubr.msk.f32.gmra.mxu1 %vm4519_vm4, %v7087_v54  ;;  %v6998_v54 = vmul.f32 %v14091_v11, %v16017_v47 }
 0x351   : > { %16014 = vst [vmem:[#allocation95_spill] sm:$0xff] %v14325_v44  ;;  %16015 = vst [vmem:[#allocation99_spill] sm:$0xff] %v14330_v61  ;;  %10753 = vmatprep.mubr.msk.f32.mxu1 %vm4519_vm4, %v7089_v58  ;;  %v7091_v7 = vsel %vm1084_vm3, %v7088_v55, %v7090_v41  ;;  %v7093_v58 = vsel %vm1084_vm3, %v7090_v41, %v7092_v40  ;;  %v16020_v61 = vld [vmem:[#allocation6_spill] sm:$0xff] }
 0x352   : > { %v10499_v10 = vpop.f32.mrf.mxu0  ;;  %10798 = vmatmul.mubr.msk.f32.gmra.mxu0 %vm4519_vm4, %v14275_v13  ;;  %v14341_v59 = vpop.f32.mrf.mxu1  ;;  %v7686_v47 = vmul.f32 %v13863_v3, %v16020_v61  ;;  %v7096_v19 = vrot.slane %v6998_v54, 7  ;;  %v7098_v3 = vrot.slane %v6999_v27, 7  ;;  %v16023_v61 = vld [vmem:[#allocation10_spill] sm:$0xff] }
 0x353   : > { %16016 = vst [vmem:[#allocation104_spill] sm:$0xff] %v14341_v59  ;;  %v14345_v44 = vadd.f32 %v10499_v10, %v10449_v57  ;;  %10800 = vmatprep.mubr.msk.f32.mxu0 %vm4519_vm4, %v14268_v6  ;;  %v7094_v59 = vrot.slane %v6997_v26, 7  ;;  %v16022_v10 = vld [vmem:[#allocation9_spill] sm:$0xff]  ;;  %v7688_v41 = vmul.f32 %v13884_v2, %v16023_v61  ;;  %v7689_v2 = vmul.f32 %v13895_v28, %v15965_v45 }
 0x354   : > { %v14352_v52 = vpop.f32.mrf.mxu0  ;;  %v10455_v25 = vpop.f32.mrf.mxu1  ;;  %10754 = vmatmul.mubr.msk.f32.gmra.mxu1 %vm4519_vm4, %v7091_v7 }
 0x355   : > { %16018 = vst [vmem:[#allocation97_spill] sm:$0xff] %v14345_v44  ;;  %16019 = vst [vmem:[#allocation128_spill] sm:$0xff] %v14352_v52  ;;  %10756 = vmatprep.mubr.msk.f32.mxu1 %vm4519_vm4, %v7093_v58  ;;  %v7687_v44 = vmul.f32 %v13877_v62, %v16022_v10  ;;  %v7095_v26 = vsel %vm1084_vm3, %v7092_v40, %v7094_v59  ;;  %v7097_v54 = vsel %vm1084_vm3, %v7094_v59, %v7096_v19 }
 0x356   : > { %v10502_v57 = vpop.f32.mrf.mxu0  ;;  %10801 = vmatmul.mubr.msk.f32.gmra.mxu0 %vm4519_vm4, %v14297_v30  ;;  %v14361_v55 = vpop.f32.mrf.mxu1  ;;  %v7099_v59 = vsel %vm1084_vm3, %v7096_v19, %v7098_v3  ;;  %v7759_v28 = vrot.slane %v7689_v2, 1  ;;  %v16026_v2 = vld [vmem:[#allocation77_spill] sm:$0xff] }
 0x357   : > { %16021 = vst [vmem:[#allocation85_spill] sm:$0xff] %v14361_v55  ;;  %v14365_v52 = vadd.f32 %v10502_v57, %v10452_v4  ;;  %10803 = vmatprep.mubr.msk.f32.mxu0 %vm4519_vm4, %v14292_v32  ;;  %v7754_v55 = vrot.slane %v7686_v47, 1  ;;  %v7755_v40 = vrot.slane %v7687_v44, 1  ;;  %v7757_v47 = vrot.slane %v7688_v41, 1  ;;  %v16024_v57 = vld [vmem:[#allocation14_spill] sm:$0xff] }
 0x358   : > { %v14372_v7 = vpop.f32.mrf.mxu0  ;;  %v10458_v58 = vpop.f32.mrf.mxu1  ;;  %10757 = vmatmul.mubr.msk.f32.gmra.mxu1 %vm4519_vm4, %v7095_v26  ;;  %v7690_v10 = vmul.f32 %v13902_v39, %v16024_v57  ;;  %v7692_v41 = vmul.f32 %v13919_v0, %v15916_v38  ;;  %v16027_v57 = vld [vmem:[#allocation21_spill] sm:$0xff]  ;;  %v16028_v0 = vld [vmem:[#allocation22_spill] sm:$0xff] }
 0x359   : > { %10759 = vmatprep.mubr.msk.f32.mxu1 %vm4519_vm4, %v7097_v54  ;;  %v7756_v44 = vsel %vm593_vm2, %v7754_v55, %v7755_v40  ;;  %v7758_v3 = vsel %vm593_vm2, %v7755_v40, %v7757_v47  ;;  %v7693_v38 = vmul.f32 %v13928_v31, %v16027_v57 }
 0x35a   : > { %v10505_v62 = vpop.f32.mrf.mxu0  ;;  %10804 = vmatmul.mubr.msk.f32.gmra.mxu0 %vm4519_vm4, %v14317_v48  ;;  %v14379_v4 = vpop.f32.mrf.mxu1  ;;  %v7761_v55 = vrot.slane %v7690_v10, 1  ;;  %v7694_v10 = vmul.f32 %v13935_v29, %v16028_v0 }
 0x35b   : > { %v14383_v27 = vadd.f32 %v10505_v62, %v10455_v25  ;;  %10806 = vmatprep.mubr.msk.f32.mxu0 %vm4519_vm4, %v13815_v35  ;;  %v16025_v25 = vld [vmem:[#allocation17_spill] sm:$0xff]  ;;  %v7760_v62 = vsel %vm593_vm2, %v7757_v47, %v7759_v28 }
 0x35c   : > { %v14390_v26 = vpop.f32.mrf.mxu0  ;;  %v10461_v61 = vpop.f32.mrf.mxu1  ;;  %10760 = vmatmul.mubr.msk.f32.gmra.mxu1 %vm4519_vm4, %v7099_v59  ;;  %v7691_v19 = vmul.f32 %v13912_v22, %v16025_v25  ;;  %v7762_v47 = vsel %vm593_vm2, %v7759_v28, %v7761_v55  ;;  %v16029_v28 = vld [vmem:[#allocation25_spill] sm:$0xff] }
 0x35d   : > { %10814 = vmatprep.mubr.msk.f32.mxu1 %vm4519_vm4, %v7756_v44 }
 0x35e   : > { %v10508_v45 = vpop.f32.mrf.mxu0  ;;  %10807 = vmatmul.mubr.msk.f32.gmra.mxu0 %vm4519_vm4, %v13845_v18  ;;  %v14397_v35 = vpop.f32.mrf.mxu1  ;;  %v7763_v59 = vrot.slane %v7691_v19, 1  ;;  %v5182_v19 = vadd.f32 %v14133_v53, %v14118_v46 }
 0x35f   : > { %v14401_v39 = vadd.f32 %v10508_v45, %v10458_v58  ;;  %10809 = vmatprep.mubr.msk.f32.mxu0 %vm4519_vm4, %v14091_v11  ;;  %v7765_v45 = vrot.slane %v7692_v41, 1  ;;  %v7695_v41 = vmul.f32 %v13944_v60, %v16029_v28 }
 0x360   : > { %v14408_v54 = vpop.f32.mrf.mxu0  ;;  %v10516_v18 = vpop.f32.mrf.mxu1  ;;  %10815 = vmatmul.mubr.msk.f32.vlgmr.msra.gmra.mxu1 %vm4519_vm4, %v7758_v3 }
 0x361   : > { %v5763_v22 = vadd.f32 %v10516_v18, %v16026_v2  ;;  %10817 = vmatprep.mubr.msk.f32.mxu1 %vm4519_vm4, %v7760_v62  ;;  %v7764_v18 = vsel %vm593_vm2, %v7761_v55, %v7763_v59  ;;  %v7767_v62 = vrot.slane %v7693_v38, 1  ;;  %v7769_v2 = vrot.slane %v7694_v10, 1 }
 0x362   : > { %v10511_v58 = vpop.f32.mrf.mxu0  ;;  %10810 = vmatmul.mubr.msk.f32.gmra.mxu0 %vm4519_vm4, %v14336_v24  ;;  %v5603_v40 = vpop.f32.mrf.mxu1  ;;  %v7766_v46 = vsel %vm593_vm2, %v7763_v59, %v7765_v45 }
 0x363   : > { %v14420_v44 = vadd.f32 %v10511_v58, %v10461_v61  ;;  %v16030_v58 = vld [vmem:[#allocation26_spill] sm:$0xff]  ;;  %v5762_v0 = vadd.f32 %v5603_v40, %v5182_v19  ;;  %v7768_v38 = vsel %vm593_vm2, %v7765_v45, %v7767_v62 }
 0x364   : > { %v14423_v25 = vpop.f32.mrf.mxu0  ;;  %v10519_v3 = vpop.f32.mrf.mxu1  ;;  %10818 = vmatmul.mubr.msk.f32.gmra.mxu1 %vm4519_vm4, %v7762_v47  ;;  %v7696_v57 = vmul.f32 %v13951_v20, %v16030_v58  ;;  %v16032_v45 = vld [vmem:[#allocation30_spill] sm:$0xff] }
 0x365   : > { %v5765_v31 = vadd.f32 %v10519_v3, %v14145_v17  ;;  %10820 = vmatprep.mubr.msk.f32.mxu1 %vm4519_vm4, %v7764_v18  ;;  %v7771_v3 = vrot.slane %v7695_v41, 1 }
 0x366   : > { %v10566_v29 = vpop.f32.mrf.mxu0  ;;  %v5613_v61 = vpop.f32.mrf.mxu1 }
 0x367   : > { %v14435_v47 = vadd.f32 %v10566_v29, %v5763_v22  ;;  %v5764_v55 = vadd.f32 %v5613_v61, %v14152_v51  ;;  %v7770_v22 = vsel %vm593_vm2, %v7767_v62, %v7769_v2  ;;  %v16031_v51 = vld [vmem:[#allocation29_spill] sm:$0xff]  ;;  %v7773_v29 = vrot.slane %v7696_v57, 1 }
 0x368   : > { %v6057_v53 = vpop.f32.mrf.mxu0  ;;  %v10522_v17 = vpop.f32.mrf.mxu1  ;;  %10821 = vmatmul.mubr.msk.f32.gmra.mxu1 %vm4519_vm4, %v7766_v46  ;;  %v7697_v59 = vmul.f32 %v13960_v43, %v16031_v51  ;;  %v7698_v61 = vmul.f32 %v13978_v1, %v16032_v45  ;;  %v7772_v58 = vsel %vm593_vm2, %v7769_v2, %v7771_v3  ;;  %v7700_v1 = vmul.f32 %v14170_v63, %v15924_v23 }
 0x369   : > { %v14441_v10 = vadd.f32 %v6057_v53, %v5762_v0  ;;  %v5767_v60 = vadd.f32 %v10522_v17, %v14163_v8  ;;  %10823 = vmatprep.mubr.msk.f32.mxu1 %vm4519_vm4, %v7768_v38  ;;  %v7774_v2 = vsel %vm593_vm2, %v7771_v3, %v7773_v29 }
 0x36a   : > { %v10569_v20 = vpop.f32.mrf.mxu0  ;;  %v5623_v40 = vpop.f32.mrf.mxu1  ;;  %v7775_v41 = vrot.slane %v7697_v59, 1  ;;  %v7781_v59 = vrot.slane %v7700_v1, 1 }
 0x36b   : > { %v14448_v18 = vadd.f32 %v10569_v20, %v5765_v31  ;;  %v5766_v19 = vadd.f32 %v5623_v40, %v14174_v56  ;;  %v16033_v56 = vld [vmem:[#allocation33_spill] sm:$0xff]  ;;  %v7702_v40 = vmul.f32 %v14188_v14, %v15928_v49 }
 0x36c   : > { %v6067_v28 = vpop.f32.mrf.mxu0  ;;  %v10525_v8 = vpop.f32.mrf.mxu1  ;;  %10824 = vmatmul.mubr.msk.f32.gmra.mxu1 %vm4519_vm4, %v7770_v22  ;;  %v7699_v57 = vmul.f32 %v13974_v50, %v16033_v56  ;;  %v7776_v38 = vsel %vm593_vm2, %v7773_v29, %v7775_v41 }
 0x36d   : > { %v14455_v0 = vadd.f32 %v6067_v28, %v5764_v55  ;;  %v5769_v62 = vadd.f32 %v10525_v8, %v14181_v42  ;;  %10826 = vmatprep.mubr.msk.f32.mxu1 %vm4519_vm4, %v7772_v58  ;;  %v7777_v55 = vrot.slane %v7698_v61, 1  ;;  %v7785_v61 = vrot.slane %v7702_v40, 1  ;;  %v16035_v58 = vld [vmem:[#allocation78_spill] sm:$0xff] }
 0x36e   : > { %v10572_v43 = vpop.f32.mrf.mxu0  ;;  %v5633_v31 = vpop.f32.mrf.mxu1  ;;  %v16041_v40 = vld [vmem:[#allocation46_spill] sm:$0xff] }
 0x36f   : > { %v14463_v46 = vadd.f32 %v10572_v43, %v5767_v60  ;;  %v5768_v53 = vadd.f32 %v5633_v31, %v14192_v37  ;;  %v7779_v60 = vrot.slane %v7699_v57, 1  ;;  %v7701_v37 = vmul.f32 %v14000_v9, %v15925_v5  ;;  %v16036_v31 = vld [vmem:[#allocation42_spill] sm:$0xff] }
 0x370   : > { %v6077_v17 = vpop.f32.mrf.mxu0  ;;  %v10528_v42 = vpop.f32.mrf.mxu1  ;;  %10827 = vmatmul.mubr.msk.f32.gmra.mxu1 %vm4519_vm4, %v7774_v2  ;;  %v7778_v51 = vsel %vm593_vm2, %v7775_v41, %v7777_v55  ;;  %v7704_v41 = vmul.f32 %v14206_v12, %v16036_v31 }
 0x371   : > { %v14469_v20 = vadd.f32 %v6077_v17, %v5766_v19  ;;  %v5771_v50 = vadd.f32 %v10528_v42, %v14199_v33  ;;  %10829 = vmatprep.mubr.msk.f32.mxu1 %vm4519_vm4, %v7776_v38  ;;  %v7780_v29 = vsel %vm593_vm2, %v7777_v55, %v7779_v60  ;;  %v7783_v14 = vrot.slane %v7701_v37, 1  ;;  %v16038_v38 = vld [vmem:[#allocation45_spill] sm:$0xff] }
 0x372   : > { %v10575_v23 = vpop.f32.mrf.mxu0  ;;  %v5643_v63 = vpop.f32.mrf.mxu1  ;;  %v7782_v43 = vsel %vm593_vm2, %v7779_v60, %v7781_v59  ;;  %v7789_v37 = vrot.slane %v7704_v41, 1  ;;  %v16046_v41 = vld [vmem:[#allocation112_spill] sm:$0xff] }
 0x373   : > { %v14477_v22 = vadd.f32 %v10575_v23, %v5769_v62  ;;  %v5770_v3 = vadd.f32 %v5643_v63, %v14210_v21  ;;  %v16034_v21 = vld [vmem:[#allocation41_spill] sm:$0xff]  ;;  %v7784_v57 = vsel %vm593_vm2, %v7781_v59, %v7783_v14  ;;  %v7786_v17 = vsel %vm593_vm2, %v7783_v14, %v7785_v61  ;;  %v16040_v63 = vld [vmem:[#allocation84_spill] sm:$0xff] }
 0x374   : > { %v6087_v19 = vpop.f32.mrf.mxu0  ;;  %v10531_v33 = vpop.f32.mrf.mxu1  ;;  %10830 = vmatmul.mubr.msk.f32.gmra.mxu1 %vm4519_vm4, %v7778_v51  ;;  %v7703_v28 = vmul.f32 %v14213_v16, %v16034_v21  ;;  %v16043_v21 = vld [vmem:[#allocation49_spill] sm:$0xff] }
 0x375   : > { %v14483_v45 = vadd.f32 %v6087_v19, %v5768_v53  ;;  %v5773_v5 = vadd.f32 %v10531_v33, %v14219_v34  ;;  %10832 = vmatprep.mubr.msk.f32.mxu1 %vm4519_vm4, %v7780_v29  ;;  %v16037_v53 = vld [vmem:[#allocation114_spill] sm:$0xff] }
 0x376   : > { %v10578_v49 = vpop.f32.mrf.mxu0  ;;  %v5653_v9 = vpop.f32.mrf.mxu1  ;;  %v7787_v42 = vrot.slane %v7703_v28, 1  ;;  %v16042_v29 = vld [vmem:[#allocation110_spill] sm:$0xff]  ;;  %v16044_v28 = vld [vmem:[#allocation116_spill] sm:$0xff] }
 0x377   : > { %v14489_v8 = vadd.f32 %v10578_v49, %v5771_v50  ;;  %v5772_v62 = vadd.f32 %v5653_v9, %v16035_v58  ;;  %v16039_v50 = vld [vmem:[#allocation81_spill] sm:$0xff]  ;;  %v7707_v58 = vmul.f32 %v16044_v28, %v16043_v21  ;;  %v16052_v21 = vld [vmem:[#allocation98_spill] sm:$0xff]  ;;  %v16053_v28 = vld [vmem:[#allocation91_spill] sm:$0xff] }
 0x378   : > { %v6097_v56 = vpop.f32.mrf.mxu0  ;;  %v10534_v34 = vpop.f32.mrf.mxu1  ;;  %10833 = vmatmul.mubr.msk.f32.gmra.mxu1 %vm4519_vm4, %v7782_v43  ;;  %v7705_v12 = vmul.f32 %v16039_v50, %v16038_v38  ;;  %v7788_v19 = vsel %vm593_vm2, %v7785_v61, %v7787_v42  ;;  %v16045_v43 = vld [vmem:[#allocation50_spill] sm:$0xff]  ;;  %v7790_v61 = vsel %vm593_vm2, %v7787_v42, %v7789_v37  ;;  %v16049_v50 = vld [vmem:[#allocation113_spill] sm:$0xff] }
 0x379   : > { %v14497_v1 = vadd.f32 %v6097_v56, %v5770_v3  ;;  %v5775_v2 = vadd.f32 %v10534_v34, %v16037_v53  ;;  %10835 = vmatprep.mubr.msk.f32.mxu1 %vm4519_vm4, %v7784_v57  ;;  %v7706_v3 = vmul.f32 %v14226_v36, %v16041_v40  ;;  %v7708_v36 = vmul.f32 %v14246_v15, %v16045_v43  ;;  %v16050_v42 = vld [vmem:[#allocation53_spill] sm:$0xff] }
 0x37a   : > { %v10581_v16 = vpop.f32.mrf.mxu0  ;;  %v5663_v55 = vpop.f32.mrf.mxu1  ;;  %v7791_v14 = vrot.slane %v7705_v12, 1  ;;  %v7709_v40 = vmul.f32 %v14275_v13, %v16050_v42  ;;  %v16054_v13 = vld [vmem:[#allocation106_spill] sm:$0xff] }
 0x37b   : > { %v14504_v23 = vadd.f32 %v10581_v16, %v5773_v5  ;;  %v5774_v60 = vadd.f32 %v5663_v55, %v16040_v63  ;;  %v16047_v16 = vld [vmem:[#allocation86_spill] sm:$0xff]  ;;  %v16048_v55 = vld [vmem:[#allocation115_spill] sm:$0xff]  ;;  %v7795_v63 = vrot.slane %v7707_v58, 1  ;;  %v5272_v58 = vadd.f32 %v16053_v28, %v16052_v21  ;;  %v10970_v21 = vld [vmem:[#allocation3 + $0x108] sm:$0xff] }
 0x37c   : > { %v6107_v51 = vpop.f32.mrf.mxu0  ;;  %v10537_v59 = vpop.f32.mrf.mxu1  ;;  %10836 = vmatmul.mubr.msk.f32.gmra.mxu1 %vm4519_vm4, %v7786_v17  ;;  %v7792_v53 = vsel %vm593_vm2, %v7789_v37, %v7791_v14  ;;  %v5262_v17 = vadd.f32 %v16048_v55, %v16047_v16  ;;  %v16056_v16 = vld [vmem:[#allocation58_spill] sm:$0xff]  ;;  %v16061_v28 = vld [vmem:[#allocation63_spill] sm:$0xff] }
 0x37d   : > { %v14511_v33 = vadd.f32 %v6107_v51, %v5772_v62  ;;  %v5777_v49 = vadd.f32 %v10537_v59, %v16042_v29  ;;  %10838 = vmatprep.mubr.msk.f32.mxu1 %vm4519_vm4, %v7788_v19  ;;  %v7793_v62 = vrot.slane %v7706_v3, 1  ;;  %v16051_v3 = vld [vmem:[#allocation54_spill] sm:$0xff] }
 0x37e   : > { %v10584_v5 = vpop.f32.mrf.mxu0  ;;  %v5673_v9 = vpop.f32.mrf.mxu1  ;;  %v7710_v51 = vmul.f32 %v14268_v6, %v16051_v3 }
 0x37f   : > { %v14519_v31 = vadd.f32 %v10584_v5, %v5775_v2  ;;  %v5776_v56 = vadd.f32 %v5673_v9, %v16046_v41  ;;  %v7794_v19 = vsel %vm593_vm2, %v7791_v14, %v7793_v62  ;;  %v7796_v9 = vsel %vm593_vm2, %v7793_v62, %v7795_v63 }
 0x380   : > { %v6117_v34 = vpop.f32.mrf.mxu0  ;;  %v10540_v57 = vpop.f32.mrf.mxu1  ;;  %10839 = vmatmul.mubr.msk.f32.gmra.mxu1 %vm4519_vm4, %v7790_v61  ;;  %v7799_v61 = vrot.slane %v7709_v40, 1  ;;  %v7801_v14 = vrot.slane %v7710_v51, 1 }
 0x381   : > { %v14527_v38 = vadd.f32 %v6117_v34, %v5774_v60  ;;  %v5779_v15 = vadd.f32 %v10540_v57, %v16049_v50  ;;  %10841 = vmatprep.mubr.msk.f32.mxu1 %vm4519_vm4, %v7792_v53  ;;  %v7797_v60 = vrot.slane %v7708_v36, 1  ;;  %v16055_v36 = vld [vmem:[#allocation57_spill] sm:$0xff] }
 0x382   : > { %v10587_v2 = vpop.f32.mrf.mxu0  ;;  %v5683_v12 = vpop.f32.mrf.mxu1  ;;  %v7711_v34 = vmul.f32 %v14297_v30, %v16055_v36  ;;  %v16059_v30 = vld [vmem:[#allocation95_spill] sm:$0xff]  ;;  %v7802_v51 = vsel %vm593_vm2, %v7799_v61, %v7801_v14  ;;  %v16063_v36 = vld [vmem:[#allocation128_spill] sm:$0xff] }
 0x383   : > { %v14535_v59 = vadd.f32 %v10587_v2, %v5777_v49  ;;  %v5778_v37 = vadd.f32 %v5683_v12, %v5262_v17  ;;  %v7798_v62 = vsel %vm593_vm2, %v7795_v63, %v7797_v60  ;;  %v7800_v50 = vsel %vm593_vm2, %v7797_v60, %v7799_v61  ;;  %v16057_v2 = vld [vmem:[#allocation102_spill] sm:$0xff]  ;;  %v16058_v12 = vld [vmem:[#allocation99_spill] sm:$0xff] }
 0x384   : > { %v6127_v29 = vpop.f32.mrf.mxu0  ;;  %v10543_v5 = vpop.f32.mrf.mxu1  ;;  %10842 = vmatmul.mubr.msk.f32.gmra.mxu1 %vm4519_vm4, %v7794_v19  ;;  %v5282_v42 = vadd.f32 %v16058_v12, %v16057_v2  ;;  %v16060_v19 = vld [vmem:[#allocation62_spill] sm:$0xff] }
 0x385   : > { %v14542_v43 = vadd.f32 %v6127_v29, %v5776_v56  ;;  %v5781_v41 = vadd.f32 %v10543_v5, %v16054_v13  ;;  %10844 = vmatprep.mubr.msk.f32.mxu1 %vm4519_vm4, %v7796_v9  ;;  %v7712_v56 = vmul.f32 %v14292_v32, %v16056_v16  ;;  %v7803_v32 = vrot.slane %v7711_v34, 1 }
 0x386   : > { %v10590_v6 = vpop.f32.mrf.mxu0  ;;  %v5693_v49 = vpop.f32.mrf.mxu1  ;;  %v7713_v29 = vmul.f32 %v14317_v48, %v16060_v19  ;;  %v4595_v19 = vld [vmem:[#allocation3 + $0x128] sm:$0xff] }
 0x387   : > { %v14548_v57 = vadd.f32 %v10590_v6, %v5779_v15  ;;  %v5780_v53 = vadd.f32 %v5693_v49, %v5272_v58  ;;  %v7805_v9 = vrot.slane %v7712_v56, 1  ;;  %v7804_v6 = vsel %vm593_vm2, %v7801_v14, %v7803_v32  ;;  %v16062_v49 = vld [vmem:[#allocation103_spill] sm:$0xff] }
 0x388   : > { %v6137_v55 = vpop.f32.mrf.mxu0  ;;  %v10546_v17 = vpop.f32.mrf.mxu1  ;;  %10845 = vmatmul.mubr.msk.f32.gmra.mxu1 %vm4519_vm4, %v7798_v62  ;;  %v5292_v61 = vadd.f32 %v16063_v36, %v16062_v49  ;;  %v16064_v62 = vld [vmem:[#allocation97_spill] sm:$0xff]  ;;  %v7807_v56 = vrot.slane %v7713_v29, 1  ;;  %v16067_v29 = vld [vmem:[#allocation104_spill] sm:$0xff]  ;;  %v16069_v36 = vld [vmem:[#allocation70_spill] sm:$0xff] }
 0x389   : > { %v14557_v40 = vadd.f32 %v6137_v55, %v5778_v37  ;;  %v5783_v15 = vadd.f32 %v10546_v17, %v16059_v30  ;;  %10847 = vmatprep.mubr.msk.f32.mxu1 %vm4519_vm4, %v7800_v50  ;;  %v7714_v37 = vmul.f32 %v10970_v21, %v16061_v28  ;;  %v10971_v55 = vld [vmem:[#allocation3 + $0x110] sm:$0xff]  ;;  %v16065_v17 = vld [vmem:[#allocation68_spill] sm:$0xff]  ;;  %v7806_v14 = vsel %vm593_vm2, %v7803_v32, %v7805_v9  ;;  %v16068_v32 = vld [vmem:[#allocation69_spill] sm:$0xff] }
 0x38a   : > { %v10593_v3 = vpop.f32.mrf.mxu0  ;;  %v5703_v63 = vpop.f32.mrf.mxu1  ;;  %v7715_v50 = vmul.f32 %v10971_v55, %v16065_v17  ;;  %v5302_v21 = vadd.f32 %v14372_v7, %v16067_v29 }
 0x38b   : > { %v14564_v5 = vadd.f32 %v10593_v3, %v5781_v41  ;;  %v5782_v60 = vadd.f32 %v5703_v63, %v5282_v42  ;;  %v7809_v42 = vrot.slane %v7714_v37, 1  ;;  %v16066_v63 = vld [vmem:[#allocation74_spill] sm:$0xff]  ;;  %v7716_v37 = vmul.f32 %v14091_v11, %v16068_v32 }
 0x38c   : > { %v6147_v58 = vpop.f32.mrf.mxu0  ;;  %v10549_v13 = vpop.f32.mrf.mxu1  ;;  %10848 = vmatmul.mubr.msk.f32.gmra.mxu1 %vm4519_vm4, %v7802_v51  ;;  %v7717_v51 = vmul.f32 %v14336_v24, %v16066_v63 }
 0x38d   : > { %v14571_v34 = vadd.f32 %v6147_v58, %v5780_v53  ;;  %v5785_v48 = vadd.f32 %v10549_v13, %v16064_v62  ;;  %10850 = vmatprep.mubr.msk.f32.mxu1 %vm4519_vm4, %v7804_v6  ;;  %v7808_v53 = vsel %vm593_vm2, %v7805_v9, %v7807_v56  ;;  %v7811_v6 = vrot.slane %v7715_v50, 1 }
 0x38e   : > { %v10596_v41 = vpop.f32.mrf.mxu0  ;;  %v5713_v16 = vpop.f32.mrf.mxu1  ;;  %v7810_v24 = vsel %vm593_vm2, %v7807_v56, %v7809_v42  ;;  %v7815_v62 = vrot.slane %v7717_v51, 1  ;;  %v7813_v55 = vrot.slane %v7716_v37, 1 }
 0x38f   : > { %v14576_v2 = vadd.f32 %v10596_v41, %v5783_v15  ;;  %v5784_v12 = vadd.f32 %v5713_v16, %v5292_v61  ;;  %v7718_v61 = vmul.f32 %v4595_v19, %v16069_v36  ;;  %v16070_v41 = vld [vmem:[#allocation85_spill] sm:$0xff] }
 0x390   : > { %v6157_v30 = vpop.f32.mrf.mxu0  ;;  %v10552_v3 = vpop.f32.mrf.mxu1  ;;  %10851 = vmatmul.mubr.msk.f32.gmra.mxu1 %vm4519_vm4, %v7806_v14  ;;  %v5312_v11 = vadd.f32 %v14390_v26, %v16070_v41  ;;  %v7816_v26 = vsel %vm593_vm2, %v7813_v55, %v7815_v62 }
 0x391   : > { %v14585_v28 = vadd.f32 %v6157_v30, %v5782_v60  ;;  %v5787_v15 = vadd.f32 %v10552_v3, %v14365_v52  ;;  %10853 = vmatprep.mubr.msk.f32.mxu1 %vm4519_vm4, %v7808_v53  ;;  %v7812_v52 = vsel %vm593_vm2, %v7809_v42, %v7811_v6  ;;  %v7814_v30 = vsel %vm593_vm2, %v7811_v6, %v7813_v55 }
 0x392   : > { %v10599_v58 = vpop.f32.mrf.mxu0  ;;  %v5723_v13 = vpop.f32.mrf.mxu1  ;;  %v7817_v3 = vrot.slane %v7718_v61, 1 }
 0x393   : > { %v14591_v9 = vadd.f32 %v10599_v58, %v5785_v48  ;;  %v5786_v49 = vadd.f32 %v5723_v13, %v5302_v21 }
 0x394   : > { %v6167_v7 = vpop.f32.mrf.mxu0  ;;  %v10555_v60 = vpop.f32.mrf.mxu1  ;;  %10854 = vmatmul.mubr.msk.f32.gmra.mxu1 %vm4519_vm4, %v7810_v24 }
 0x395   : > { %v14599_v16 = vadd.f32 %v6167_v7, %v5784_v12  ;;  %v5789_v48 = vadd.f32 %v10555_v60, %v14383_v27  ;;  %10856 = vmatprep.mubr.msk.f32.mxu1 %vm4519_vm4, %v7812_v52  ;;  %v5322_v27 = vadd.f32 %v14408_v54, %v14379_v4  ;;  %v5332_v4 = vadd.f32 %v14423_v25, %v14397_v35 }
 0x396   : > { %v10602_v56 = vpop.f32.mrf.mxu0  ;;  %v5733_v17 = vpop.f32.mrf.mxu1 }
 0x397   : > { %v14603_v50 = vadd.f32 %v10602_v56, %v5787_v15  ;;  %v5788_v14 = vadd.f32 %v5733_v17, %v5312_v11  ;;  %v7818_v15 = vsel %vm593_vm2, %v7815_v62, %v7817_v3 }
 0x398   : > { %v6177_v42 = vpop.f32.mrf.mxu0  ;;  %v10558_v53 = vpop.f32.mrf.mxu1  ;;  %10857 = vmatmul.mubr.msk.f32.gmra.mxu1 %vm4519_vm4, %v7814_v30 }
 0x399   : > { %v14610_v12 = vadd.f32 %v6177_v42, %v5786_v49  ;;  %v5791_v63 = vadd.f32 %v10558_v53, %v14401_v39  ;;  %10859 = vmatprep.mubr.msk.f32.mxu1 %vm4519_vm4, %v7816_v26 }
 0x39a   : > { %v10605_v51 = vpop.f32.mrf.mxu0  ;;  %v5743_v19 = vpop.f32.mrf.mxu1 }
 0x39b   : > { %v14614_v29 = vadd.f32 %v10605_v51, %v5789_v48  ;;  %v5790_v21 = vadd.f32 %v5743_v19, %v5322_v27 }
 0x39c   : > { %v6187_v32 = vpop.f32.mrf.mxu0  ;;  %v10561_v37 = vpop.f32.mrf.mxu1  ;;  %10860 = vmatmul.mubr.msk.f32.gmra.mxu1 %vm4519_vm4, %v7818_v15 }
 0x39d   : > { %v14620_v54 = vadd.f32 %v6187_v32, %v5788_v14  ;;  %v5793_v39 = vadd.f32 %v10561_v37, %v14420_v44 }
 0x39e   : > { %v10608_v58 = vpop.f32.mrf.mxu0  ;;  %v5753_v13 = vpop.f32.mrf.mxu1 }
 0x39f   : > { %v14623_v6 = vadd.f32 %v10608_v58, %v5791_v63  ;;  %v5792_v49 = vadd.f32 %v5753_v13, %v5332_v4 }
 0x3a0   : > { %v6197_v24 = vpop.f32.mrf.mxu0  ;;  %v10616_v36 = vpop.f32.mrf.mxu1 }
 0x3a1   : > { %v14625_v61 = vadd.f32 %v6197_v24, %v5790_v21  ;;  %v14628_v7 = vadd.f32 %v10616_v36, %v14435_v47 }
 0x3a2   : > { %v10611_v60 = vpop.f32.mrf.mxu0  ;;  %v6322_v52 = vpop.f32.mrf.mxu1 }
 0x3a3   : > { %v14630_v62 = vadd.f32 %v10611_v60, %v5793_v39  ;;  %v14633_v35 = vadd.f32 %v6322_v52, %v14441_v10 }
 0x3a4   : > { %v6207_v44 = vpop.f32.mrf.mxu0  ;;  %v10619_v25 = vpop.f32.mrf.mxu1 }
 0x3a5   : > { %v14635_v41 = vadd.f32 %v6207_v44, %v5792_v49  ;;  %v14638_v11 = vadd.f32 %v10619_v25, %v14448_v18 }
 0x3a6   : > { %v14640_v48 = vpop.f32.mrf.mxu0  ;;  %v6332_v55 = vpop.f32.mrf.mxu1 }
 0x3a7   : > { %v14643_v47 = vadd.f32 %v6332_v55, %v14455_v0 }
 0x3a8   : > { %v14645_v56 = vpop.f32.mrf.mxu0  ;;  %v10622_v17 = vpop.f32.mrf.mxu1 }
 0x3a9   : > { %v14648_v14 = vadd.f32 %v10622_v17, %v14463_v46 }
 0x3aa   : > { %v14650_v10 = vpop.f32.mrf.mxu0  ;;  %v6342_v30 = vpop.f32.mrf.mxu1 }
 0x3ab   : > { %v14653_v3 = vadd.f32 %v6342_v30, %v14469_v20 }
 0x3ac   : > { %v14655_v18 = vpop.f32.mrf.mxu0  ;;  %v10625_v42 = vpop.f32.mrf.mxu1 }
 0x3ad   : > { %v14658_v53 = vadd.f32 %v10625_v42, %v14477_v22 }
 0x3ae   : > { %v14660_v0 = vpop.f32.mrf.mxu0  ;;  %v6352_v26 = vpop.f32.mrf.mxu1 }
 0x3af   : > { %v14663_v27 = vadd.f32 %v6352_v26, %v14483_v45 }
 0x3b0   : > { %v14665_v46 = vpop.f32.mrf.mxu0  ;;  %v10628_v63 = vpop.f32.mrf.mxu1 }
 0x3b1   : > { %v14668_v51 = vadd.f32 %v10628_v63, %v14489_v8 }
 0x3b2   : > { %v14670_v20 = vpop.f32.mrf.mxu0  ;;  %v6362_v19 = vpop.f32.mrf.mxu1 }
 0x3b3   : > { %v14673_v21 = vadd.f32 %v6362_v19, %v14497_v1 }
 0x3b4   : > { %v14675_v22 = vpop.f32.mrf.mxu0  ;;  %v10631_v15 = vpop.f32.mrf.mxu1 }
 0x3b5   : > { %v14678_v32 = vadd.f32 %v10631_v15, %v14504_v23 }
 0x3b6   : > { %v14680_v45 = vpop.f32.mrf.mxu0  ;;  %v6372_v37 = vpop.f32.mrf.mxu1 }
 0x3b7   : > { %v14683_v4 = vadd.f32 %v6372_v37, %v14511_v33 }
 0x3b8   : > { %v14685_v8 = vpop.f32.mrf.mxu0  ;;  %v10634_v39 = vpop.f32.mrf.mxu1 }
 0x3b9   : > { %v14688_v58 = vadd.f32 %v10634_v39, %v14519_v31 }
 0x3ba   : > { %v14690_v1 = vpop.f32.mrf.mxu0  ;;  %v6382_v13 = vpop.f32.mrf.mxu1 }
 0x3bb   : > { %v14693_v49 = vadd.f32 %v6382_v13, %v14527_v38 }
 0x3bc   : > { %v14695_v23 = vpop.f32.mrf.mxu0  ;;  %v10637_v24 = vpop.f32.mrf.mxu1 }
 0x3bd   : > { %v14698_v36 = vadd.f32 %v10637_v24, %v14535_v59 }
 0x3be   : > { %v14700_v33 = vpop.f32.mrf.mxu0  ;;  %v6392_v60 = vpop.f32.mrf.mxu1 }
 0x3bf   : > { %16071 = vst [vmem:[#allocation130_spill] sm:$0xff] %v14698_v36  ;;  %v14703_v52 = vadd.f32 %v6392_v60, %v14542_v43 }
 0x3c0   : > { %v14705_v31 = vpop.f32.mrf.mxu0  ;;  %v10640_v44 = vpop.f32.mrf.mxu1 }
 0x3c1   : > { %16072 = vst [vmem:[#allocation92_spill] sm:$0xff] %v14703_v52  ;;  %v14708_v25 = vadd.f32 %v10640_v44, %v14548_v57 }
 0x3c2   : > { %v14710_v38 = vpop.f32.mrf.mxu0  ;;  %v6402_v55 = vpop.f32.mrf.mxu1 }
 0x3c3   : > { %16073 = vst [vmem:[#allocation82_spill] sm:$0xff] %v14708_v25  ;;  %16074 = vst [vmem:[#allocation100_spill] sm:$0xff] %v14710_v38  ;;  %v14713_v17 = vadd.f32 %v6402_v55, %v14557_v40 }
 0x3c4   : > { %v14715_v59 = vpop.f32.mrf.mxu0  ;;  %v10643_v30 = vpop.f32.mrf.mxu1 }
 0x3c5   : > { %16075 = vst [vmem:[#allocation132_spill] sm:$0xff] %v14713_v17  ;;  %16076 = vst [vmem:[#allocation129_spill] sm:$0xff] %v14715_v59  ;;  %v14718_v42 = vadd.f32 %v10643_v30, %v14564_v5 }
 0x3c6   : > { %v14720_v43 = vpop.f32.mrf.mxu0  ;;  %v6412_v26 = vpop.f32.mrf.mxu1 }
 0x3c7   : > { %16077 = vst [vmem:[#allocation89_spill] sm:$0xff] %v14718_v42  ;;  %16078 = vst [vmem:[#allocation101_spill] sm:$0xff] %v14720_v43  ;;  %v14723_v63 = vadd.f32 %v6412_v26, %v14571_v34 }
 0x3c8   : > { %v14725_v57 = vpop.f32.mrf.mxu0  ;;  %v10646_v19 = vpop.f32.mrf.mxu1 }
 0x3c9   : > { %16079 = vst [vmem:[#allocation67_spill] sm:$0xff] %v14723_v63  ;;  %16080 = vst [vmem:[#allocation88_spill] sm:$0xff] %v14725_v57  ;;  %v14728_v15 = vadd.f32 %v10646_v19, %v14576_v2 }
 0x3ca   : > { %v14730_v40 = vpop.f32.mrf.mxu0  ;;  %v6422_v37 = vpop.f32.mrf.mxu1 }
 0x3cb   : > { %16081 = vst [vmem:[#allocation134_spill] sm:$0xff] %v14728_v15  ;;  %16082 = vst [vmem:[#allocation131_spill] sm:$0xff] %v14730_v40  ;;  %v14733_v39 = vadd.f32 %v6422_v37, %v14585_v28 }
 0x3cc   : > { %v14735_v5 = vpop.f32.mrf.mxu0  ;;  %v10649_v13 = vpop.f32.mrf.mxu1 }
 0x3cd   : > { %16083 = vst [vmem:[#allocation83_spill] sm:$0xff] %v14733_v39  ;;  %16084 = vst [vmem:[#allocation119_spill] sm:$0xff] %v14735_v5  ;;  %v14738_v24 = vadd.f32 %v10649_v13, %v14591_v9 }
 0x3ce   : > { %v14740_v34 = vpop.f32.mrf.mxu0  ;;  %v6432_v60 = vpop.f32.mrf.mxu1 }
 0x3cf   : > { %16085 = vst [vmem:[#allocation122_spill] sm:$0xff] %v14738_v24  ;;  %16086 = vst [vmem:[#allocation133_spill] sm:$0xff] %v14740_v34  ;;  %v14743_v44 = vadd.f32 %v6432_v60, %v14599_v16 }
 0x3d0   : > { %v14745_v2 = vpop.f32.mrf.mxu0  ;;  %v10652_v55 = vpop.f32.mrf.mxu1 }
 0x3d1   : > { %16087 = vst [vmem:[#allocation136_spill] sm:$0xff] %v14743_v44  ;;  %16088 = vst [vmem:[#allocation76_spill] sm:$0xff] %v14745_v2  ;;  %v14748_v30 = vadd.f32 %v10652_v55, %v14603_v50 }
 0x3d2   : > { %v14750_v28 = vpop.f32.mrf.mxu0  ;;  %v6442_v26 = vpop.f32.mrf.mxu1 }
 0x3d3   : > { %16089 = vst [vmem:[#allocation125_spill] sm:$0xff] %v14748_v30  ;;  %16090 = vst [vmem:[#allocation135_spill] sm:$0xff] %v14750_v28  ;;  %v14753_v19 = vadd.f32 %v6442_v26, %v14610_v12 }
 0x3d4   : > { %v14755_v9 = vpop.f32.mrf.mxu0  ;;  %v10655_v37 = vpop.f32.mrf.mxu1 }
 0x3d5   : > { %16091 = vst [vmem:[#allocation90_spill] sm:$0xff] %v14753_v19  ;;  %16092 = vst [vmem:[#allocation138_spill] sm:$0xff] %v14755_v9  ;;  %v14758_v13 = vadd.f32 %v10655_v37, %v14614_v29 }
 0x3d6   : > { %v14760_v16 = vpop.f32.mrf.mxu0  ;;  %v6452_v60 = vpop.f32.mrf.mxu1 }
 0x3d7   : > { %16093 = vst [vmem:[#allocation140_spill] sm:$0xff] %v14758_v13  ;;  %16094 = vst [vmem:[#allocation117_spill] sm:$0xff] %v14760_v16  ;;  %v14763_v44 = vadd.f32 %v6452_v60, %v14620_v54 }
 0x3d8   : > { %v14765_v50 = vpop.f32.mrf.mxu0  ;;  %v10658_v55 = vpop.f32.mrf.mxu1 }
 0x3d9   : > { %16095 = vst [vmem:[#allocation120_spill] sm:$0xff] %v14763_v44  ;;  %16096 = vst [vmem:[#allocation123_spill] sm:$0xff] %v14765_v50  ;;  %v14768_v30 = vadd.f32 %v10658_v55, %v14623_v6 }
 0x3da   : > { %v14770_v12 = vpop.f32.mrf.mxu0  ;;  %v6462_v26 = vpop.f32.mrf.mxu1 }
 0x3db   : > { %16097 = vst [vmem:[#allocation105_spill] sm:$0xff] %v14768_v30  ;;  %16098 = vst [vmem:[#allocation142_spill] sm:$0xff] %v14770_v12  ;;  %v14773_v19 = vadd.f32 %v6462_v26, %v14625_v61 }
 0x3dc   : > { %v14775_v29 = vpop.f32.mrf.mxu0  ;;  %v10661_v37 = vpop.f32.mrf.mxu1 }
 0x3dd   : > { %16099 = vst [vmem:[#allocation137_spill] sm:$0xff] %v14773_v19  ;;  %16100 = vst [vmem:[#allocation126_spill] sm:$0xff] %v14775_v29  ;;  %v14778_v13 = vadd.f32 %v10661_v37, %v14630_v62 }
 0x3de   : > { %v14780_v54 = vpop.f32.mrf.mxu0  ;;  %v6472_v60 = vpop.f32.mrf.mxu1 }
 0x3df   : > { %16101 = vst [vmem:[#allocation139_spill] sm:$0xff] %v14778_v13  ;;  %16102 = vst [vmem:[#allocation144_spill] sm:$0xff] %v14780_v54  ;;  %v14783_v44 = vadd.f32 %v6472_v60, %v14635_v41 }
 0x3e0   : > { %v14785_v6 = vpop.f32.mrf.mxu0  ;;  %v10716_v55 = vpop.f32.mrf.mxu1 }
 0x3e1   : > { %16103 = vst [vmem:[#allocation94_spill] sm:$0xff] %v14783_v44  ;;  %16104 = vst [vmem:[#allocation146_spill] sm:$0xff] %v14785_v6 }
 0x3e2   : > { %v14787_v30 = vpop.f32.mrf.mxu0  ;;  %v7230_v12 = vpop.f32.mrf.mxu1 }
 0x3e3   : > { %16105 = vst [vmem:[#allocation141_spill] sm:$0xff] %v14787_v30 }
 0x3e4   : > { %v14789_v61 = vpop.f32.mrf.mxu0  ;;  %v10719_v26 = vpop.f32.mrf.mxu1 }
 0x3e5   : > { %16106 = vst [vmem:[#allocation143_spill] sm:$0xff] %v14789_v61 }
 0x3e6   : > { %v10766_v19 = vpop.f32.mrf.mxu0  ;;  %v7240_v29 = vpop.f32.mrf.mxu1 }
 0x3e8   : > { %v7495_v50 = vpop.f32.mrf.mxu0  ;;  %v14791_v62 = vpop.f32.mrf.mxu1 }
 0x3ea   : > { %v10769_v37 = vpop.f32.mrf.mxu0  ;;  %v14793_v13 = vpop.f32.mrf.mxu1 }
 0x3ec   : > { %v14795_v54 = vpop.f32.mrf.mxu0  ;;  %v14797_v41 = vpop.f32.mrf.mxu1 }
 0x3ee   : > { %v14799_v60 = vpop.f32.mrf.mxu0  ;;  %v14801_v44 = vpop.f32.mrf.mxu1 }
 0x3f0   : > { %v14803_v30 = vpop.f32.mrf.mxu1  ;;  %v14805_v61 = vpop.f32.mrf.mxu0 }
 0x3f2   : > { %v14807_v6 = vpop.f32.mrf.mxu1  ;;  %v14811_v9 = vpop.f32.mrf.mxu0 }
 0x3f4   : > { %v14809_v16 = vpop.f32.mrf.mxu1  ;;  %v14817_v2 = vpop.f32.mrf.mxu0 }
 0x3f6   : > { %v14813_v28 = vpop.f32.mrf.mxu1  ;;  %v14823_v15 = vpop.f32.mrf.mxu0 }
 0x3f8   : > { %v14815_v24 = vpop.f32.mrf.mxu1  ;;  %v14829_v40 = vpop.f32.mrf.mxu0 }
 0x3fa   : > { %v14819_v39 = vpop.f32.mrf.mxu1  ;;  %v14835_v17 = vpop.f32.mrf.mxu0 }
 0x3fb   : > { %16107 = vst [vmem:[#allocation148_spill] sm:$0xff] %v14819_v39 }
 0x3fc   : > { %v14821_v34 = vpop.f32.mrf.mxu1  ;;  %v14841_v59 = vpop.f32.mrf.mxu0 }
 0x3fd   : > { %16108 = vst [vmem:[#allocation96_spill] sm:$0xff] %v14821_v34 }
 0x3fe   : > { %v14825_v5 = vpop.f32.mrf.mxu1 }
 0x3ff   : > { %16109 = vst [vmem:[#allocation150_spill] sm:$0xff] %v14825_v5  ;;  %v14847_v5 = vpop.f32.mrf.mxu0 }
 0x400   : > { %v14827_v63 = vpop.f32.mrf.mxu1  ;;  %16117 = vst [vmem:[#allocation154_spill] sm:$0xff] %v14847_v5 }
 0x401   : > { %16110 = vst [vmem:[#allocation145_spill] sm:$0xff] %v14827_v63 }
 0x402   : > { %v14831_v42 = vpop.f32.mrf.mxu1 }
 0x403   : > { %16111 = vst [vmem:[#allocation147_spill] sm:$0xff] %v14831_v42 }
 0x404   : > { %v14833_v57 = vpop.f32.mrf.mxu1 }
 0x405   : > { %16112 = vst [vmem:[#allocation152_spill] sm:$0xff] %v14833_v57  ;;  %v8479_v57 = vld [vmem:[%s15260_s5 + $0x8] sm:$0xff] }
 0x406   : > { %v14837_v43 = vpop.f32.mrf.mxu1  ;;  %8558 = vmatprep.mubr.f32.mxu0 %v8479_v57 }
 0x407   : > { %16113 = vst [vmem:[#allocation149_spill] sm:$0xff] %v14837_v43  ;;  %v14856_v43 = vpop.f32.mrf.mxu0 }
 0x408   : > { %v14839_v25 = vpop.f32.mrf.mxu1  ;;  %16120 = vst [vmem:[#allocation155_spill] sm:$0xff] %v14856_v43 }
 0x409   : > { %16114 = vst [vmem:[#allocation151_spill] sm:$0xff] %v14839_v25 }
 0x40a   : > { %v14843_v34 = vpop.f32.mrf.mxu1 }
 0x40b   : > { %16115 = vst [vmem:[#allocation75_spill] sm:$0xff] %v14843_v34  ;;  %v14862_v34 = vpop.f32.mrf.mxu0 }
 0x40c   : > { %v14845_v52 = vpop.f32.mrf.mxu1  ;;  %16123 = vst [vmem:[#allocation157_spill] sm:$0xff] %v14862_v34 }
 0x40d   : > { %16116 = vst [vmem:[#allocation87_spill] sm:$0xff] %v14845_v52 }
 0x40e   : > { %v14849_v63 = vpop.f32.mrf.mxu1 }
 0x40f   : > { %16118 = vst [vmem:[#allocation153_spill] sm:$0xff] %v14849_v63  ;;  %v14868_v63 = vpop.f32.mrf.mxu0 }
 0x410   : > { %v14854_v42 = vpop.f32.mrf.mxu1  ;;  %16126 = vst [vmem:[#allocation162_spill] sm:$0xff] %v14868_v63 }
 0x411   : > { %16119 = vst [vmem:[#allocation156_spill] sm:$0xff] %v14854_v42  ;;  %v6936_v42 = vadd.f32 %v14640_v48, %v14628_v7  ;;  %v14878_v43 = vpop.f32.mrf.mxu0  ;;  %v6937_v7 = vadd.f32 %v14655_v18, %v14643_v47 }
 0x412   : > { %v14858_v25 = vpop.f32.mrf.mxu1 }
 0x413   : > { %16121 = vst [vmem:[#allocation93_spill] sm:$0xff] %v14858_v25  ;;  %v6935_v25 = vadd.f32 %v14645_v56, %v14633_v35  ;;  %v6940_v35 = vadd.f32 %v14660_v0, %v14648_v14  ;;  %v14888_v56 = vpop.f32.mrf.mxu0 }
 0x414   : > { %v14860_v39 = vpop.f32.mrf.mxu1 }
 0x415   : > { %16122 = vst [vmem:[#allocation158_spill] sm:$0xff] %v14860_v39  ;;  %v7390_v39 = vadd.f32 %v10716_v55, %v6936_v42  ;;  %v7394_v14 = vadd.f32 %v14791_v62, %v6940_v35  ;;  %v6944_v55 = vadd.f32 %v14680_v45, %v14668_v51  ;;  %v6945_v35 = vadd.f32 %v14695_v23, %v14683_v4 }
 0x416   : > { %v14864_v52 = vpop.f32.mrf.mxu1 }
 0x417   : > { %16124 = vst [vmem:[#allocation160_spill] sm:$0xff] %v14864_v52  ;;  %v7389_v52 = vadd.f32 %v7230_v12, %v6935_v25  ;;  %v7655_v63 = vadd.f32 %v10766_v19, %v7390_v39  ;;  %v6942_v39 = vadd.f32 %v14670_v20, %v14658_v53  ;;  %v6941_v12 = vadd.f32 %v14675_v22, %v14663_v27 }
 0x418   : > { %v14866_v5 = vpop.f32.mrf.mxu1  ;;  %v7398_v51 = vadd.f32 %v14803_v30, %v6944_v55  ;;  %v7399_v4 = vadd.f32 %v14813_v28, %v6945_v35  ;;  %v16137_v55 = vld [vmem:[#allocation82_spill] sm:$0xff] }
 0x419   : > { %16125 = vst [vmem:[#allocation61_spill] sm:$0xff] %v14866_v5  ;;  %v6938_v5 = vadd.f32 %v14650_v10, %v14638_v11  ;;  %v7654_v36 = vadd.f32 %v7495_v50, %v7389_v52  ;;  %v7391_v10 = vadd.f32 %v7240_v29, %v6937_v7  ;;  %v6939_v52 = vadd.f32 %v14665_v46, %v14653_v3 }
 0x41a   : > { %v14870_v38 = vpop.f32.mrf.mxu1  ;;  %v7659_v46 = vadd.f32 %v14799_v60, %v7394_v14  ;;  %v7396_v53 = vadd.f32 %v14797_v41, %v6942_v39  ;;  %v7395_v27 = vadd.f32 %v14801_v44, %v6941_v12  ;;  %v6943_v41 = vadd.f32 %v14685_v8, %v14673_v21  ;;  %v16130_v14 = vld [vmem:[#allocation100_spill] sm:$0xff] }
 0x41b   : > { %16127 = vst [vmem:[#allocation159_spill] sm:$0xff] %v14870_v38  ;;  %v7392_v48 = vadd.f32 %v10719_v26, %v6938_v5  ;;  %v7656_v0 = vadd.f32 %v14795_v54, %v7391_v10  ;;  %v14906_v5 = vpop.f32.mrf.mxu0  ;;  %v7393_v3 = vadd.f32 %v14793_v13, %v6939_v52  ;;  %v7663_v8 = vadd.f32 %v14823_v15, %v7398_v51  ;;  %v16131_v39 = vld [vmem:[#allocation148_spill] sm:$0xff] }
 0x41c   : > { %v14874_v57 = vpop.f32.mrf.mxu1  ;;  %v7661_v22 = vadd.f32 %v14811_v9, %v7396_v53  ;;  %v7660_v45 = vadd.f32 %v14817_v2, %v7395_v27  ;;  %v7397_v21 = vadd.f32 %v14807_v6, %v6943_v41  ;;  %v6948_v10 = vadd.f32 %v14700_v33, %v14688_v58  ;;  %v16135_v12 = vld [vmem:[#allocation96_spill] sm:$0xff]  ;;  %v16136_v53 = vld [vmem:[#allocation155_spill] sm:$0xff] }
 0x41d   : > { %16128 = vst [vmem:[#allocation164_spill] sm:$0xff] %v14874_v57  ;;  %v7657_v25 = vadd.f32 %v10769_v37, %v7392_v48  ;;  %v7658_v20 = vadd.f32 %v14805_v61, %v7393_v3  ;;  %v14922_v26 = vpop.f32.mrf.mxu0  ;;  %v7664_v33 = vadd.f32 %v14841_v59, %v7399_v4  ;;  %v16133_v3 = vld [vmem:[#allocation92_spill] sm:$0xff]  ;;  %v16147_v4 = vld [vmem:[#allocation147_spill] sm:$0xff] }
 0x41e   : > { %v14880_v34 = vpop.f32.mrf.mxu1  ;;  %v7402_v58 = vadd.f32 %v14815_v24, %v6948_v10 }
 0x41f   : > { %v14938_v7 = vpop.f32.mrf.mxu0 }
 0x420   : > { %v10816_v38 = vpop.f32.mrf.mxu1 }
 0x421   : > { %v8109_v57 = vadd.f32 %v10816_v38, %v7655_v63 }
 0x422   : > { %v7949_v11 = vpop.f32.mrf.mxu1 }
 0x423   : > { %v8141_v47 = vmax.f32 %v8109_v57, 0.0  ;;  %v8108_v18 = vadd.f32 %v7949_v11, %v7654_v36  ;;  %v6946_v57 = vadd.f32 %v14690_v1, %v14678_v32  ;;  %v7662_v1 = vadd.f32 %v14829_v40, %v7397_v21 }
 0x424   : > { %v10819_v38 = vpop.f32.mrf.mxu1 }
 0x425   : > { %8173 = vst.msk [vmem:[%s14895_s26 + $0x8] sm:$0xff] %vm4519_vm4, %v8141_v47  ;;  %8205 = vst.msk [vmem:[#allocation4 + $0x8] sm:$0xff] %vm4519_vm4, %v8141_v47  ;;  %v8140_v42 = vmax.f32 %v8108_v18, 0.0  ;;  %v8111_v63 = vadd.f32 %v10819_v38, %v7657_v25  ;;  %v7400_v32 = vadd.f32 %v14809_v16, %v6946_v57  ;;  %v14954_v25 = vpop.f32.mrf.mxu0  ;;  %v6947_v18 = vadd.f32 %v14705_v31, %v14693_v49  ;;  %v16129_v38 = vld [vmem:[#allocation130_spill] sm:$0xff]  ;;  %v16142_v57 = vld [vmem:[#allocation88_spill] sm:$0xff] }
 0x426   : > { %v7959_v36 = vpop.f32.mrf.mxu1  ;;  %v16132_v31 = vld [vmem:[#allocation154_spill] sm:$0xff] }
 0x427   : > { %8172 = vst.msk [vmem:[%s14895_s26] sm:$0xff] %vm4519_vm4, %v8140_v42  ;;  %8204 = vst.msk [vmem:[#allocation4] sm:$0xff] %vm4519_vm4, %v8140_v42  ;;  %v8143_v19 = vmax.f32 %v8111_v63, 0.0  ;;  %v8110_v50 = vadd.f32 %v7959_v36, %v7656_v0  ;;  %v7665_v23 = vadd.f32 %v14835_v17, %v7400_v32  ;;  %v6950_v0 = vadd.f32 %v16130_v14, %v16129_v38  ;;  %v14970_v42 = vpop.f32.mrf.mxu0 }
 0x428   : > { %v10822_v29 = vpop.f32.mrf.mxu1  ;;  %v7401_v49 = vadd.f32 %v16131_v39, %v6947_v18  ;;  %v7667_v36 = vadd.f32 %v16132_v31, %v7402_v58  ;;  %v16149_v58 = vld [vmem:[#allocation119_spill] sm:$0xff]  ;;  %v16152_v39 = vld [vmem:[#allocation133_spill] sm:$0xff] }
 0x429   : > { %8175 = vst.msk [vmem:[%s14895_s26 + $0x18] sm:$0xff] %vm4519_vm4, %v8143_v19  ;;  %8207 = vst.msk [vmem:[#allocation4 + $0x18] sm:$0xff] %vm4519_vm4, %v8143_v19  ;;  %v8142_v13 = vmax.f32 %v8110_v50, 0.0  ;;  %v8113_v54 = vadd.f32 %v10822_v29, %v7659_v46  ;;  %v16134_v46 = vld [vmem:[#allocation129_spill] sm:$0xff]  ;;  %v7404_v29 = vadd.f32 %v16135_v12, %v6950_v0 }
 0x42a   : > { %v7969_v62 = vpop.f32.mrf.mxu1  ;;  %v6949_v19 = vadd.f32 %v16134_v46, %v16133_v3 }
 0x42b   : > { %8174 = vst.msk [vmem:[%s14895_s26 + $0x10] sm:$0xff] %vm4519_vm4, %v8142_v13  ;;  %8206 = vst.msk [vmem:[#allocation4 + $0x10] sm:$0xff] %vm4519_vm4, %v8142_v13  ;;  %v8145_v61 = vmax.f32 %v8113_v54, 0.0  ;;  %v8112_v37 = vadd.f32 %v7969_v62, %v7658_v20  ;;  %v7666_v20 = vadd.f32 %v16136_v53, %v7401_v49  ;;  %v16138_v62 = vld [vmem:[#allocation101_spill] sm:$0xff]  ;;  %v16156_v53 = vld [vmem:[#allocation151_spill] sm:$0xff] }
 0x42c   : > { %v10825_v60 = vpop.f32.mrf.mxu1  ;;  %v6952_v27 = vadd.f32 %v16138_v62, %v16137_v55  ;;  %v16157_v55 = vld [vmem:[#allocation122_spill] sm:$0xff]  ;;  %v16158_v62 = vld [vmem:[#allocation135_spill] sm:$0xff] }
 0x42d   : > { %8177 = vst.msk [vmem:[%s14895_s26 + $0x28] sm:$0xff] %vm4519_vm4, %v8145_v61  ;;  %8209 = vst.msk [vmem:[#allocation4 + $0x28] sm:$0xff] %vm4519_vm4, %v8145_v61  ;;  %v8144_v44 = vmax.f32 %v8112_v37, 0.0  ;;  %v8115_v9 = vadd.f32 %v10825_v60, %v7661_v22  ;;  %v14986_v22 = vpop.f32.mrf.mxu0  ;;  %v16139_v37 = vld [vmem:[#allocation150_spill] sm:$0xff]  ;;  %v16140_v60 = vld [vmem:[#allocation157_spill] sm:$0xff] }
 0x42e   : > { %v7979_v48 = vpop.f32.mrf.mxu1  ;;  %v7403_v41 = vadd.f32 %v16139_v37, %v6949_v19  ;;  %v7669_v51 = vadd.f32 %v16140_v60, %v7404_v29  ;;  %v16154_v19 = vld [vmem:[#allocation83_spill] sm:$0xff] }
 0x42f   : > { %8176 = vst.msk [vmem:[%s14895_s26 + $0x20] sm:$0xff] %vm4519_vm4, %v8144_v44  ;;  %8208 = vst.msk [vmem:[#allocation4 + $0x20] sm:$0xff] %vm4519_vm4, %v8144_v44  ;;  %v8147_v2 = vmax.f32 %v8115_v9, 0.0  ;;  %v8114_v30 = vadd.f32 %v7979_v48, %v7660_v45  ;;  %v16141_v9 = vld [vmem:[#allocation132_spill] sm:$0xff]  ;;  %v15002_v10 = vpop.f32.mrf.mxu0 }
 0x430   : > { %v10828_v11 = vpop.f32.mrf.mxu1  ;;  %v6951_v48 = vadd.f32 %v16142_v57, %v16141_v9  ;;  %v16161_v9 = vld [vmem:[#allocation138_spill] sm:$0xff] }
 0x431   : > { %8179 = vst.msk [vmem:[%s14895_s26 + $0x38] sm:$0xff] %vm4519_vm4, %v8147_v2  ;;  %8211 = vst.msk [vmem:[#allocation4 + $0x38] sm:$0xff] %vm4519_vm4, %v8147_v2  ;;  %v8146_v15 = vmax.f32 %v8114_v30, 0.0  ;;  %v8117_v6 = vadd.f32 %v10828_v11, %v7663_v8  ;;  %v16143_v8 = vld [vmem:[#allocation145_spill] sm:$0xff]  ;;  %v16144_v30 = vld [vmem:[#allocation162_spill] sm:$0xff]  ;;  %v7615_v31 = vpop.f32.mrf.mxu0 }
 0x432   : > { %v7989_v47 = vpop.f32.mrf.mxu1  ;;  %v7406_v2 = vadd.f32 %v16143_v8, %v6952_v27  ;;  %v7668_v35 = vadd.f32 %v16144_v30, %v7403_v41  ;;  %v6958_v27 = vadd.f32 %v16158_v62, %v16157_v55  ;;  %v16159_v41 = vld [vmem:[#allocation75_spill] sm:$0xff]  ;;  %v16177_v55 = vld [vmem:[#allocation160_spill] sm:$0xff] }
 0x433   : > { %8178 = vst.msk [vmem:[%s14895_s26 + $0x30] sm:$0xff] %vm4519_vm4, %v8146_v15  ;;  %8210 = vst.msk [vmem:[#allocation4 + $0x30] sm:$0xff] %vm4519_vm4, %v8146_v15  ;;  %v8149_v40 = vmax.f32 %v8117_v6, 0.0  ;;  %v8116_v16 = vadd.f32 %v7989_v47, %v7662_v1  ;;  %v16145_v1 = vld [vmem:[#allocation89_spill] sm:$0xff]  ;;  %v16146_v15 = vld [vmem:[#allocation131_spill] sm:$0xff] }
 0x434   : > { %v10831_v52 = vpop.f32.mrf.mxu1  ;;  %v6954_v6 = vadd.f32 %v16146_v15, %v16145_v1 }
 0x435   : > { %8181 = vst.msk [vmem:[%s14895_s26 + $0x48] sm:$0xff] %vm4519_vm4, %v8149_v40  ;;  %8213 = vst.msk [vmem:[#allocation4 + $0x48] sm:$0xff] %vm4519_vm4, %v8149_v40  ;;  %v8148_v17 = vmax.f32 %v8116_v16, 0.0  ;;  %v8119_v28 = vadd.f32 %v10831_v52, %v7665_v23  ;;  %v7405_v23 = vadd.f32 %v16147_v4, %v6951_v48  ;;  %v7671_v40 = vadd.f32 %v14878_v43, %v7406_v2  ;;  %v16148_v52 = vld [vmem:[#allocation67_spill] sm:$0xff] }
 0x436   : > { %v7999_v63 = vpop.f32.mrf.mxu1 }
 0x437   : > { %8180 = vst.msk [vmem:[%s14895_s26 + $0x40] sm:$0xff] %vm4519_vm4, %v8148_v17  ;;  %8212 = vst.msk [vmem:[#allocation4 + $0x40] sm:$0xff] %vm4519_vm4, %v8148_v17  ;;  %v8151_v59 = vmax.f32 %v8119_v28, 0.0  ;;  %v8118_v24 = vadd.f32 %v7999_v63, %v7664_v33  ;;  %v6953_v33 = vadd.f32 %v16149_v58, %v16148_v52  ;;  %v16150_v28 = vld [vmem:[#allocation152_spill] sm:$0xff]  ;;  %v7670_v14 = vadd.f32 %v14888_v56, %v7405_v23  ;;  %v16151_v63 = vld [vmem:[#allocation134_spill] sm:$0xff] }
 0x438   : > { %v10834_v50 = vpop.f32.mrf.mxu1  ;;  %v7408_v38 = vadd.f32 %v16150_v28, %v6954_v6  ;;  %v6956_v49 = vadd.f32 %v16152_v39, %v16151_v63  ;;  %v16165_v6 = vld [vmem:[#allocation153_spill] sm:$0xff]  ;;  %v16168_v58 = vld [vmem:[#allocation156_spill] sm:$0xff] }
 0x439   : > { %8183 = vst.msk [vmem:[%s14895_s26 + $0x58] sm:$0xff] %vm4519_vm4, %v8151_v59  ;;  %8215 = vst.msk [vmem:[#allocation4 + $0x58] sm:$0xff] %vm4519_vm4, %v8151_v59  ;;  %v8150_v13 = vmax.f32 %v8118_v24, 0.0  ;;  %v8121_v54 = vadd.f32 %v10834_v50, %v7667_v36  ;;  %v16153_v59 = vld [vmem:[#allocation149_spill] sm:$0xff]  ;;  %v16155_v50 = vld [vmem:[#allocation76_spill] sm:$0xff] }
 0x43a   : > { %v8009_v61 = vpop.f32.mrf.mxu1  ;;  %v7407_v24 = vadd.f32 %v16153_v59, %v6953_v33  ;;  %v7673_v3 = vadd.f32 %v14906_v5, %v7408_v38  ;;  %v6955_v12 = vadd.f32 %v16155_v50, %v16154_v19  ;;  %v16169_v38 = vld [vmem:[#allocation140_spill] sm:$0xff]  ;;  %v16171_v39 = vld [vmem:[#allocation93_spill] sm:$0xff]  ;;  %v16174_v19 = vld [vmem:[#allocation158_spill] sm:$0xff] }
 0x43b   : > { %8182 = vst.msk [vmem:[%s14895_s26 + $0x50] sm:$0xff] %vm4519_vm4, %v8150_v13  ;;  %8214 = vst.msk [vmem:[#allocation4 + $0x50] sm:$0xff] %vm4519_vm4, %v8150_v13  ;;  %v8153_v45 = vmax.f32 %v8121_v54, 0.0  ;;  %v8120_v44 = vadd.f32 %v8009_v61, %v7666_v20  ;;  %v7410_v20 = vadd.f32 %v16156_v53, %v6956_v49  ;;  %v10805_v61 = vpop.f32.mrf.mxu0  ;;  %v16175_v53 = vld [vmem:[#allocation105_spill] sm:$0xff] }
 0x43c   : > { %v10837_v21 = vpop.f32.mrf.mxu1  ;;  %v7672_v13 = vadd.f32 %v14922_v26, %v7407_v24  ;;  %v7409_v60 = vadd.f32 %v16159_v41, %v6955_v12  ;;  %v16172_v24 = vld [vmem:[#allocation120_spill] sm:$0xff]  ;;  %v16178_v41 = vld [vmem:[#allocation137_spill] sm:$0xff] }
 0x43d   : > { %8185 = vst.msk [vmem:[%s14895_s26 + $0x68] sm:$0xff] %vm4519_vm4, %v8153_v45  ;;  %8217 = vst.msk [vmem:[#allocation4 + $0x68] sm:$0xff] %vm4519_vm4, %v8153_v45  ;;  %v8152_v11 = vmax.f32 %v8120_v44, 0.0  ;;  %v8123_v32 = vadd.f32 %v10837_v21, %v7669_v51  ;;  %v7675_v51 = vadd.f32 %v14938_v7, %v7410_v20  ;;  %v16160_v44 = vld [vmem:[#allocation136_spill] sm:$0xff]  ;;  %v16162_v21 = vld [vmem:[#allocation87_spill] sm:$0xff]  ;;  %v7625_v1 = vpop.f32.mrf.mxu0 }
 0x43e   : > { %v8019_v47 = vpop.f32.mrf.mxu1  ;;  %v6957_v57 = vadd.f32 %v16161_v9, %v16160_v44  ;;  %v7412_v8 = vadd.f32 %v16162_v21, %v6958_v27  ;;  %v7674_v2 = vadd.f32 %v14954_v25, %v7409_v60  ;;  %v16176_v20 = vld [vmem:[#allocation144_spill] sm:$0xff]  ;;  %v16179_v60 = vld [vmem:[#allocation146_spill] sm:$0xff]  ;;  %v16182_v21 = vld [vmem:[#allocation141_spill] sm:$0xff] }
 0x43f   : > { %8184 = vst.msk [vmem:[%s14895_s26 + $0x60] sm:$0xff] %vm4519_vm4, %v8152_v11  ;;  %8216 = vst.msk [vmem:[#allocation4 + $0x60] sm:$0xff] %vm4519_vm4, %v8152_v11  ;;  %v8155_v16 = vmax.f32 %v8123_v32, 0.0  ;;  %v8122_v18 = vadd.f32 %v8019_v47, %v7668_v35  ;;  %v16163_v35 = vld [vmem:[#allocation125_spill] sm:$0xff] }
 0x440   : > { %v10840_v17 = vpop.f32.mrf.mxu1  ;;  %v16164_v11 = vld [vmem:[#allocation117_spill] sm:$0xff]  ;;  %v7411_v47 = vadd.f32 %v16165_v6, %v6957_v57  ;;  %v7677_v4 = vadd.f32 %v14970_v42, %v7412_v8  ;;  %v16185_v6 = vld [vmem:[#allocation143_spill] sm:$0xff] }
 0x441   : > { %8187 = vst.msk [vmem:[%s14895_s26 + $0x78] sm:$0xff] %vm4519_vm4, %v8155_v16  ;;  %8219 = vst.msk [vmem:[#allocation4 + $0x78] sm:$0xff] %vm4519_vm4, %v8155_v16  ;;  %v8154_v43 = vmax.f32 %v8122_v18, 0.0  ;;  %v8125_v0 = vadd.f32 %v10840_v17, %v7671_v40  ;;  %v6960_v32 = vadd.f32 %v16164_v11, %v16163_v35  ;;  %v16166_v40 = vld [vmem:[#allocation90_spill] sm:$0xff]  ;;  %v16167_v16 = vld [vmem:[#allocation123_spill] sm:$0xff] }
 0x442   : > { %v8029_v36 = vpop.f32.mrf.mxu1  ;;  %v6959_v18 = vadd.f32 %v16167_v16, %v16166_v40  ;;  %v7676_v17 = vadd.f32 %v14986_v22, %v7411_v47 }
 0x443   : > { %8186 = vst.msk [vmem:[%s14895_s26 + $0x70] sm:$0xff] %vm4519_vm4, %v8154_v43  ;;  %8218 = vst.msk [vmem:[#allocation4 + $0x70] sm:$0xff] %vm4519_vm4, %v8154_v43  ;;  %v8157_v56 = vmax.f32 %v8125_v0, 0.0  ;;  %v8124_v46 = vadd.f32 %v8029_v36, %v7670_v14  ;;  %v7414_v33 = vadd.f32 %v16168_v58, %v6960_v32  ;;  %v16170_v14 = vld [vmem:[#allocation142_spill] sm:$0xff]  ;;  %v10808_v0 = vpop.f32.mrf.mxu0 }
 0x444   : > { %v10843_v29 = vpop.f32.mrf.mxu1  ;;  %v6962_v43 = vadd.f32 %v16170_v14, %v16169_v38  ;;  %v7413_v49 = vadd.f32 %v16171_v39, %v6959_v18  ;;  %v15102_v39 = vld [vmem:[#allocation4 + $0x108] sm:$0xff] }
 0x445   : > { %8189 = vst.msk [vmem:[%s14895_s26 + $0x88] sm:$0xff] %vm4519_vm4, %v8157_v56  ;;  %8221 = vst.msk [vmem:[#allocation4 + $0x88] sm:$0xff] %vm4519_vm4, %v8157_v56  ;;  %v8156_v5 = vmax.f32 %v8124_v46, 0.0  ;;  %v8127_v54 = vadd.f32 %v10843_v29, %v7673_v3  ;;  %v7679_v36 = vadd.f32 %v15002_v10, %v7414_v33  ;;  %v16173_v3 = vld [vmem:[#allocation126_spill] sm:$0xff] }
 0x446   : > { %v8039_v37 = vpop.f32.mrf.mxu1  ;;  %v6961_v56 = vadd.f32 %v16173_v3, %v16172_v24  ;;  %v7416_v50 = vadd.f32 %v16174_v19, %v6962_v43  ;;  %v7678_v12 = vadd.f32 %v7615_v31, %v7413_v49  ;;  %v8271_v24 = vld [vmem:[#allocation4 + $0x100] sm:$0xff]  ;;  %v8438_v3 = vrot.slane %v15102_v39, 1 }
 0x447   : > { %8188 = vst.msk [vmem:[%s14895_s26 + $0x80] sm:$0xff] %vm4519_vm4, %v8156_v5  ;;  %8220 = vst.msk [vmem:[#allocation4 + $0x80] sm:$0xff] %vm4519_vm4, %v8156_v5  ;;  %v8159_v26 = vmax.f32 %v8127_v54, 0.0  ;;  %v8126_v45 = vadd.f32 %v8039_v37, %v7672_v13  ;;  %v6964_v13 = vadd.f32 %v16176_v20, %v16175_v53  ;;  %v7635_v5 = vpop.f32.mrf.mxu0 }
 0x448   : > { %v10846_v48 = vpop.f32.mrf.mxu1  ;;  %v7415_v62 = vadd.f32 %v16177_v55, %v6961_v56  ;;  %v7681_v27 = vadd.f32 %v10805_v61, %v7416_v50 }
 0x449   : > { %8191 = vst.msk [vmem:[%s14895_s26 + $0x98] sm:$0xff] %vm4519_vm4, %v8159_v26  ;;  %8223 = vst.msk [vmem:[#allocation4 + $0x98] sm:$0xff] %vm4519_vm4, %v8159_v26  ;;  %v8158_v7 = vmax.f32 %v8126_v45, 0.0  ;;  %v8129_v30 = vadd.f32 %v10846_v48, %v7675_v51  ;;  %v6963_v51 = vadd.f32 %v16179_v60, %v16178_v41  ;;  %v16180_v45 = vld [vmem:[#allocation61_spill] sm:$0xff]  ;;  %v16181_v48 = vld [vmem:[#allocation139_spill] sm:$0xff] }
 0x44a   : > { %v8049_v15 = vpop.f32.mrf.mxu1  ;;  %v7418_v44 = vadd.f32 %v16180_v45, %v6964_v13  ;;  %v7680_v9 = vadd.f32 %v7625_v1, %v7415_v62  ;;  %v6966_v8 = vadd.f32 %v16182_v21, %v16181_v48  ;;  %v8253_v19 = vld [vmem:[#allocation4 + $0x70] sm:$0xff]  ;;  %v15121_v62 = vld [vmem:[#allocation4 + $0x58] sm:$0xff] }
 0x44b   : > { %8190 = vst.msk [vmem:[%s14895_s26 + $0x90] sm:$0xff] %vm4519_vm4, %v8158_v7  ;;  %8222 = vst.msk [vmem:[#allocation4 + $0x90] sm:$0xff] %vm4519_vm4, %v8158_v7  ;;  %v8161_v25 = vmax.f32 %v8129_v30, 0.0  ;;  %v8128_v23 = vadd.f32 %v8049_v15, %v7674_v2  ;;  %v10811_v2 = vpop.f32.mrf.mxu0  ;;  %v16183_v30 = vld [vmem:[#allocation159_spill] sm:$0xff]  ;;  %v16184_v15 = vld [vmem:[#allocation94_spill] sm:$0xff]  ;;  %v8334_v13 = vrot.slane %v8253_v19, 1 }
 0x44c   : > { %v10849_v52 = vpop.f32.mrf.mxu1  ;;  %v7417_v35 = vadd.f32 %v16183_v30, %v6963_v51  ;;  %v7683_v11 = vadd.f32 %v10808_v0, %v7418_v44  ;;  %v6965_v47 = vadd.f32 %v16185_v6, %v16184_v15  ;;  %v15130_v48 = vld [vmem:[#allocation4 + $0x50] sm:$0xff] }
 0x44d   : > { %8193 = vst.msk [vmem:[%s14895_s26 + $0xa8] sm:$0xff] %vm4519_vm4, %v8161_v25  ;;  %8225 = vst.msk [vmem:[#allocation4 + $0xa8] sm:$0xff] %vm4519_vm4, %v8161_v25  ;;  %v8160_v42 = vmax.f32 %v8128_v23, 0.0  ;;  %v8131_v28 = vadd.f32 %v10849_v52, %v7677_v4  ;;  %v16186_v25 = vld [vmem:[#allocation164_spill] sm:$0xff]  ;;  %v7645_v52 = vpop.f32.mrf.mxu0 }
 0x44e   : > { %v8059_v63 = vpop.f32.mrf.mxu1  ;;  %v7420_v23 = vadd.f32 %v16186_v25, %v6966_v8  ;;  %v7682_v40 = vadd.f32 %v7635_v5, %v7417_v35  ;;  %v7419_v33 = vadd.f32 %v14880_v34, %v6965_v47  ;;  %v8273_v34 = vld [vmem:[#allocation4 + $0x110] sm:$0xff]  ;;  %v8255_v50 = vld [vmem:[#allocation4 + $0x80] sm:$0xff] }
 0x44f   : > { %8192 = vst.msk [vmem:[%s14895_s26 + $0xa0] sm:$0xff] %vm4519_vm4, %v8160_v42  ;;  %8224 = vst.msk [vmem:[#allocation4 + $0xa0] sm:$0xff] %vm4519_vm4, %v8160_v42  ;;  %v8163_v22 = vmax.f32 %v8131_v28, 0.0  ;;  %v8130_v59 = vadd.f32 %v8059_v63, %v7676_v17  ;;  %v8440_v56 = vrot.slane %v8273_v34, 1  ;;  %v15118_v5 = vld [vmem:[#allocation4 + $0x60] sm:$0xff] }
 0x450   : > { %v10852_v46 = vpop.f32.mrf.mxu1  ;;  %v7685_v17 = vadd.f32 %v10811_v2, %v7420_v23  ;;  %v7684_v14 = vadd.f32 %v7645_v52, %v7419_v33  ;;  %v8330_v45 = vrot.slane %v15118_v5, 1  ;;  %v8326_v23 = vrot.slane %v15130_v48, 1  ;;  %v15145_v33 = vld [vmem:[#allocation4 + $0x40] sm:$0xff] }
 0x451   : > { %8195 = vst.msk [vmem:[%s14895_s26 + $0xb8] sm:$0xff] %vm4519_vm4, %v8163_v22  ;;  %8227 = vst.msk [vmem:[#allocation4 + $0xb8] sm:$0xff] %vm4519_vm4, %v8163_v22  ;;  %v8162_v10 = vmax.f32 %v8130_v59, 0.0  ;;  %v8133_v29 = vadd.f32 %v10852_v46, %v7679_v36  ;;  %v8256_v46 = vld [vmem:[#allocation4 + $0x88] sm:$0xff]  ;;  %v8441_v53 = vsel %vm593_vm2, %v8438_v3, %v8440_v56 }
 0x452   : > { %v8069_v54 = vpop.f32.mrf.mxu1  ;;  %v15107_v22 = vld [vmem:[#allocation4 + $0x90] sm:$0xff]  ;;  %v8340_v20 = vrot.slane %v8256_v46, 1  ;;  %v8445_v60 = vmax.f32 %v15102_v39, %v8441_v53 }
 0x453   : > { %8194 = vst.msk [vmem:[%s14895_s26 + $0xb0] sm:$0xff] %vm4519_vm4, %v8162_v10  ;;  %8226 = vst.msk [vmem:[#allocation4 + $0xb0] sm:$0xff] %vm4519_vm4, %v8162_v10  ;;  %v8165_v31 = vmax.f32 %v8133_v29, 0.0  ;;  %v8132_v37 = vadd.f32 %v8069_v54, %v7678_v12  ;;  %v8342_v12 = vrot.slane %v15107_v22, 1  ;;  %v8370_v10 = vrot.slane %v8271_v24, 1  ;;  %v8254_v29 = vld [vmem:[#allocation4 + $0x78] sm:$0xff] }
 0x454   : > { %v10855_v26 = vpop.f32.mrf.mxu1  ;;  %v8338_v54 = vrot.slane %v8255_v50, 1 }
 0x455   : > { %8197 = vst.msk [vmem:[%s14895_s26 + $0xc8] sm:$0xff] %vm4519_vm4, %v8165_v31  ;;  %8229 = vst.msk [vmem:[#allocation4 + $0xc8] sm:$0xff] %vm4519_vm4, %v8165_v31  ;;  %v8164_v61 = vmax.f32 %v8132_v37, 0.0  ;;  %v8135_v57 = vadd.f32 %v10855_v26, %v7681_v27  ;;  %v8439_v55 = vsel %vm593_vm2, %v8370_v10, %v8438_v3  ;;  %v8336_v27 = vrot.slane %v8254_v29, 1  ;;  %v8252_v37 = vld [vmem:[#allocation4 + $0x68] sm:$0xff] }
 0x456   : > { %v8079_v7 = vpop.f32.mrf.mxu1  ;;  %v8343_v31 = vsel %vm593_vm2, %v8340_v20, %v8342_v12  ;;  %v8332_v30 = vrot.slane %v8252_v37, 1 }
 0x457   : > { %8196 = vst.msk [vmem:[%s14895_s26 + $0xc0] sm:$0xff] %vm4519_vm4, %v8164_v61  ;;  %8228 = vst.msk [vmem:[#allocation4 + $0xc0] sm:$0xff] %vm4519_vm4, %v8164_v61  ;;  %v8167_v32 = vmax.f32 %v8135_v57, 0.0  ;;  %v8134_v1 = vadd.f32 %v8079_v7, %v7680_v9  ;;  %v8444_v9 = vmax.f32 %v8271_v24, %v8439_v55  ;;  %v8337_v61 = vsel %vm593_vm2, %v8334_v13, %v8336_v27 }
 0x458   : > { %v10858_v4 = vpop.f32.mrf.mxu1  ;;  %v8328_v57 = vrot.slane %v15121_v62, 1  ;;  %v8339_v21 = vsel %vm593_vm2, %v8336_v27, %v8338_v54  ;;  %v15133_v8 = vmax.f32 %v8256_v46, %v8343_v31  ;;  %v8341_v7 = vsel %vm593_vm2, %v8338_v54, %v8340_v20  ;;  %v8262_v31 = vld [vmem:[#allocation4 + $0xb8] sm:$0xff] }
 0x459   : > { %8199 = vst.msk [vmem:[%s14895_s26 + $0xd8] sm:$0xff] %vm4519_vm4, %v8167_v32  ;;  %8231 = vst.msk [vmem:[#allocation4 + $0xd8] sm:$0xff] %vm4519_vm4, %v8167_v32  ;;  %v8166_v16 = vmax.f32 %v8134_v1, 0.0  ;;  %v8137_v18 = vadd.f32 %v10858_v4, %v7683_v11  ;;  %v8418_v6 = vmax.f32 %v8253_v19, %v8337_v61  ;;  %v8333_v47 = vsel %vm593_vm2, %v8330_v45, %v8332_v30 }
 0x45a   : > { %v8089_v58 = vpop.f32.mrf.mxu1  ;;  %v8329_v46 = vsel %vm593_vm2, %v8326_v23, %v8328_v57 }
 0x45b   : > { %8198 = vst.msk [vmem:[%s14895_s26 + $0xd0] sm:$0xff] %vm4519_vm4, %v8166_v16  ;;  %8230 = vst.msk [vmem:[#allocation4 + $0xd0] sm:$0xff] %vm4519_vm4, %v8166_v16  ;;  %v8169_v42 = vmax.f32 %v8137_v18, 0.0  ;;  %v8136_v28 = vadd.f32 %v8089_v58, %v7682_v40  ;;  %v8419_v40 = vmax.f32 %v8254_v29, %v8339_v21  ;;  %v15140_v18 = vmax.f32 %v8255_v50, %v8341_v7  ;;  %v15143_v58 = vld [vmem:[#allocation4 + $0x48] sm:$0xff] }
 0x45c   : > { %v10861_v38 = vpop.f32.mrf.mxu1  ;;  %v8264_v34 = vld [vmem:[#allocation4 + $0xc8] sm:$0xff]  ;;  %v8331_v29 = vsel %vm593_vm2, %v8328_v57, %v8330_v45  ;;  %v8245_v45 = vld [vmem:[#allocation4 + $0x30] sm:$0xff]  ;;  %v8414_v61 = vmax.f32 %v15130_v48, %v8329_v46 }
 0x45d   : > { %8201 = vst.msk [vmem:[%s14895_s26 + $0xe8] sm:$0xff] %vm4519_vm4, %v8169_v42  ;;  %8233 = vst.msk [vmem:[#allocation4 + $0xe8] sm:$0xff] %vm4519_vm4, %v8169_v42  ;;  %v8168_v43 = vmax.f32 %v8136_v28, 0.0  ;;  %v8139_v0 = vadd.f32 %v10861_v38, %v7685_v17  ;;  %v8335_v38 = vsel %vm593_vm2, %v8332_v30, %v8334_v13  ;;  %v8460_v24 = vmax.f32 %v8418_v6, %v15140_v18  ;;  %v8244_v21 = vld [vmem:[#allocation4 + $0x28] sm:$0xff] }
 0x45e   : > { %v8099_v63 = vpop.f32.mrf.mxu1  ;;  %v8417_v3 = vmax.f32 %v8252_v37, %v8335_v38  ;;  %v8356_v13 = vrot.slane %v8264_v34, 1  ;;  %v8261_v37 = vld [vmem:[#allocation4 + $0xb0] sm:$0xff]  ;;  %v8352_v30 = vrot.slane %v8262_v31, 1 }
 0x45f   : > { %8200 = vst.msk [vmem:[%s14895_s26 + $0xe0] sm:$0xff] %vm4519_vm4, %v8168_v43  ;;  %8232 = vst.msk [vmem:[#allocation4 + $0xe0] sm:$0xff] %vm4519_vm4, %v8168_v43  ;;  %v8171_v49 = vmax.f32 %v8139_v0, 0.0  ;;  %v8138_v36 = vadd.f32 %v8099_v63, %v7684_v14  ;;  %v8461_v14 = vmax.f32 %v8419_v40, %v15133_v8 }
 0x460   : > { %v8266_v4 = vld [vmem:[#allocation4 + $0xd8] sm:$0xff]  ;;  %v8459_v53 = vmax.f32 %v8417_v3, %v8419_v40 }
 0x461   : > { %8203 = vst.msk [vmem:[%s14895_s26 + $0xf8] sm:$0xff] %vm4519_vm4, %v8171_v49  ;;  %8235 = vst.msk [vmem:[#allocation4 + $0xf8] sm:$0xff] %vm4519_vm4, %v8171_v49  ;;  %v8170_v59 = vmax.f32 %v8138_v36, 0.0  ;;  %v8360_v0 = vrot.slane %v8266_v4, 1  ;;  %v8324_v49 = vrot.slane %v15143_v58, 1  ;;  %v8263_v36 = vld [vmem:[#allocation4 + $0xc0] sm:$0xff] }
 0x462   : > { %v8265_v25 = vld [vmem:[#allocation4 + $0xd0] sm:$0xff]  ;;  %v8354_v54 = vrot.slane %v8263_v36, 1 }
 0x463   : > { %8202 = vst.msk [vmem:[%s14895_s26 + $0xf0] sm:$0xff] %vm4519_vm4, %v8170_v59  ;;  %8234 = vst.msk [vmem:[#allocation4 + $0xf0] sm:$0xff] %vm4519_vm4, %v8170_v59  ;;  %v8358_v63 = vrot.slane %v8265_v25, 1  ;;  %v8322_v59 = vrot.slane %v15145_v33, 1  ;;  %v8327_v57 = vsel %vm593_vm2, %v8324_v49, %v8326_v23  ;;  %v8243_v23 = vld [vmem:[#allocation4 + $0x20] sm:$0xff] }
 0x464   : > { %v8268_v51 = vld [vmem:[#allocation4 + $0xe8] sm:$0xff]  ;;  %v8357_v7 = vsel %vm593_vm2, %v8354_v54, %v8356_v13  ;;  %v8413_v48 = vmax.f32 %v15143_v58, %v8327_v57 }
 0x465   : > { %v8364_v32 = vrot.slane %v8268_v51, 1  ;;  %v8361_v20 = vsel %vm593_vm2, %v8358_v63, %v8360_v0 }
 0x466   : > { %v8267_v26 = vld [vmem:[#allocation4 + $0xe0] sm:$0xff] }
 0x467   : > { %v8362_v1 = vrot.slane %v8267_v26, 1 }
 0x468   : > { %v8270_v41 = vld [vmem:[#allocation4 + $0xf8] sm:$0xff] }
 0x469   : > { %v8368_v44 = vrot.slane %v8270_v41, 1  ;;  %v8365_v43 = vsel %vm593_vm2, %v8362_v1, %v8364_v32  ;;  %v8363_v56 = vsel %vm593_vm2, %v8360_v0, %v8362_v1  ;;  %v8318_v1 = vrot.slane %v8245_v45, 1 }
 0x46a   : > { %v8269_v2 = vld [vmem:[#allocation4 + $0xf0] sm:$0xff]  ;;  %v8432_v50 = vmax.f32 %v8267_v26, %v8365_v43  ;;  %v8431_v27 = vmax.f32 %v8266_v4, %v8363_v56  ;;  %v8246_v26 = vld [vmem:[#allocation4 + $0x38] sm:$0xff]  ;;  %v8355_v4 = vsel %vm593_vm2, %v8352_v30, %v8354_v54 }
 0x46b   : > { %v8371_v35 = vsel %vm593_vm2, %v8368_v44, %v8370_v10  ;;  %v8366_v11 = vrot.slane %v8269_v2, 1  ;;  %v8416_v10 = vmax.f32 %v15118_v5, %v8333_v47  ;;  %v8325_v5 = vsel %vm593_vm2, %v8322_v59, %v8324_v49  ;;  %v8242_v43 = vld [vmem:[#allocation4 + $0x18] sm:$0xff] }
 0x46c   : > { %v8435_v15 = vmax.f32 %v8270_v41, %v8371_v35  ;;  %v8427_v0 = vmax.f32 %v8262_v31, %v8355_v4  ;;  %v8312_v46 = vrot.slane %v8242_v43, 1 }
 0x46d   : > { %v8369_v16 = vsel %vm593_vm2, %v8366_v11, %v8368_v44  ;;  %v8367_v52 = vsel %vm593_vm2, %v8364_v32, %v8366_v11  ;;  %v8458_v41 = vmax.f32 %v8416_v10, %v8418_v6  ;;  %v8320_v32 = vrot.slane %v8246_v26, 1  ;;  %v8259_v6 = vld [vmem:[#allocation4 + $0xa0] sm:$0xff] }
 0x46e   : > { %v8477_v17 = vmax.f32 %v8435_v15, %v8445_v60  ;;  %v8434_v42 = vmax.f32 %v8269_v2, %v8369_v16  ;;  %v8433_v28 = vmax.f32 %v8268_v51, %v8367_v52  ;;  %v8415_v60 = vmax.f32 %v15121_v62, %v8331_v29 }
 0x46f   : > { %v8359_v51 = vsel %vm593_vm2, %v8356_v13, %v8358_v63  ;;  %v8350_v62 = vrot.slane %v8261_v37, 1  ;;  %v8456_v47 = vmax.f32 %v8414_v61, %v8416_v10  ;;  %v8428_v16 = vmax.f32 %v8263_v36, %v8357_v7 }
 0x470   : > { %9906 = vmatprep.subr.mxu0 %v8477_v17  ;;  %v8476_v39 = vmax.f32 %v8434_v42, %v8444_v9  ;;  %v8475_v19 = vmax.f32 %v8433_v28, %v8435_v15  ;;  %v8474_v55 = vmax.f32 %v8432_v50, %v8434_v42  ;;  %v8473_v44 = vmax.f32 %v8431_v27, %v8433_v28  ;;  %v8260_v15 = vld [vmem:[#allocation4 + $0xa8] sm:$0xff] }
 0x471   : > { %9907 = vmatpush3.msra.mxu0 %v8461_v14  ;;  %v8430_v9 = vmax.f32 %v8265_v25, %v8361_v20  ;;  %v8457_v2 = vmax.f32 %v8415_v60, %v8417_v3  ;;  %v8429_v11 = vmax.f32 %v8264_v34, %v8359_v51  ;;  %v8316_v25 = vrot.slane %v8244_v21, 1  ;;  %v8258_v34 = vld [vmem:[#allocation4 + $0x98] sm:$0xff] }
 0x472   : > { %9908 = vmatprep.subr.mxu0 %v8476_v39  ;;  %v8412_v52 = vmax.f32 %v15145_v33, %v8325_v5  ;;  %v8323_v17 = vsel %vm593_vm2, %v8320_v32, %v8322_v59  ;;  %v8455_v42 = vmax.f32 %v8413_v48, %v8415_v60  ;;  %v8353_v28 = vsel %vm593_vm2, %v8350_v62, %v8352_v30  ;;  %v8241_v59 = vld [vmem:[#allocation4 + $0x10] sm:$0xff] }
 0x473   : > { %9909 = vmatpush3.msra.mxu0 %v8460_v24  ;;  %v8472_v35 = vmax.f32 %v8430_v9, %v8432_v50  ;;  %v8471_v40 = vmax.f32 %v8429_v11, %v8431_v27  ;;  %v8348_v38 = vrot.slane %v8260_v15, 1  ;;  %v8346_v14 = vrot.slane %v8259_v6, 1 }
 0x474   : > { %9910 = vmatprep.subr.mxu0 %v8475_v19  ;;  %v8470_v58 = vmax.f32 %v8428_v16, %v8430_v9  ;;  %v8321_v63 = vsel %vm593_vm2, %v8318_v1, %v8320_v32  ;;  %v8314_v39 = vrot.slane %v8243_v23, 1  ;;  %v8454_v49 = vmax.f32 %v8412_v52, %v8414_v61 }
 0x475   : > { %9911 = vmatpush3.msra.mxu0 %v8459_v53  ;;  %v8411_v36 = vmax.f32 %v8246_v26, %v8323_v17  ;;  %v8351_v33 = vsel %vm593_vm2, %v8348_v38, %v8350_v62  ;;  %v8469_v24 = vmax.f32 %v8427_v0, %v8429_v11  ;;  %v8426_v3 = vmax.f32 %v8261_v37, %v8353_v28  ;;  %v8485_v17 = vld [vmem:[%s15260_s5 + $0x38] sm:$0xff]  ;;  %v8487_v28 = vld [vmem:[%s15260_s5 + $0x48] sm:$0xff] }
 0x476   : > { %9912 = vmatprep.subr.mxu0 %v8474_v55  ;;  %v8319_v56 = vsel %vm593_vm2, %v8316_v25, %v8318_v1  ;;  %v8410_v50 = vmax.f32 %v8245_v45, %v8321_v63  ;;  %v8349_v10 = vsel %vm593_vm2, %v8346_v14, %v8348_v38  ;;  %v8344_v29 = vrot.slane %v8258_v34, 1  ;;  %v8240_v55 = vld [vmem:[#allocation4 + $0x8] sm:$0xff]  ;;  %v8486_v38 = vld [vmem:[%s15260_s5 + $0x40] sm:$0xff]  ;;  %v8493_v63 = vld [vmem:[%s15260_s5 + $0x78] sm:$0xff] }
 0x477   : > { %9913 = vmatpush3.msra.mxu0 %v8458_v41  ;;  %v8453_v19 = vmax.f32 %v8411_v36, %v8413_v48  ;;  %v8468_v53 = vmax.f32 %v8426_v3, %v8428_v16  ;;  %v8425_v20 = vmax.f32 %v8260_v15, %v8351_v33  ;;  %v8317_v13 = vsel %vm593_vm2, %v8314_v39, %v8316_v25  ;;  %v8239_v41 = vld [vmem:[#allocation4] sm:$0xff]  ;;  %v8481_v16 = vld [vmem:[%s15260_s5 + $0x18] sm:$0xff] }
 0x478   : > { %9914 = vmatprep.subr.mxu0 %v8473_v44  ;;  %v8310_v54 = vrot.slane %v8241_v59, 1  ;;  %v8452_v27 = vmax.f32 %v8410_v50, %v8412_v52  ;;  %v8409_v31 = vmax.f32 %v8244_v21, %v8319_v56  ;;  %v8347_v37 = vsel %vm593_vm2, %v8344_v29, %v8346_v14  ;;  %v8482_v52 = vld [vmem:[%s15260_s5 + $0x20] sm:$0xff]  ;;  %v8489_v14 = vld [vmem:[%s15260_s5 + $0x58] sm:$0xff] }
 0x479   : > { %9915 = vmatpush3.msra.mxu0 %v8457_v2  ;;  %v8467_v60 = vmax.f32 %v8425_v20, %v8427_v0  ;;  %v8424_v51 = vmax.f32 %v8259_v6, %v8349_v10  ;;  %v8315_v5 = vsel %vm593_vm2, %v8312_v46, %v8314_v39  ;;  %v8408_v45 = vmax.f32 %v8243_v23, %v8317_v13  ;;  %v8490_v0 = vld [vmem:[%s15260_s5 + $0x60] sm:$0xff]  ;;  %v8492_v39 = vld [vmem:[%s15260_s5 + $0x70] sm:$0xff] }
 0x47a   : > { %9916 = vmatprep.subr.mxu0 %v8472_v35  ;;  %v8451_v26 = vmax.f32 %v8409_v31, %v8411_v36  ;;  %v8345_v44 = vsel %vm593_vm2, %v8342_v12, %v8344_v29  ;;  %v8308_v9 = vrot.slane %v8240_v55, 1  ;;  %v8423_v57 = vmax.f32 %v8258_v34, %v8347_v37 }
 0x47b   : > { %9917 = vmatpush3.msra.mxu0 %v8456_v47  ;;  %v8466_v61 = vmax.f32 %v8424_v51, %v8426_v3  ;;  %v8313_v21 = vsel %vm593_vm2, %v8310_v54, %v8312_v46  ;;  %v8307_v2 = vrot.slane %v8239_v41, 1  ;;  %v8450_v7 = vmax.f32 %v8408_v45, %v8410_v50 }
 0x47c   : > { %9918 = vmatprep.subr.mxu0 %v8471_v40  ;;  %v8407_v30 = vmax.f32 %v8242_v43, %v8315_v5  ;;  %v8465_v62 = vmax.f32 %v8423_v57, %v8425_v20  ;;  %v8422_v35 = vmax.f32 %v15107_v22, %v8345_v44  ;;  %v8311_v11 = vsel %vm593_vm2, %v8308_v9, %v8310_v54  ;;  %v8478_v40 = vld [vmem:[%s15260_s5] sm:$0xff]  ;;  %v8488_v43 = vld [vmem:[%s15260_s5 + $0x50] sm:$0xff] }
 0x47d   : > { %9919 = vmatpush3.msra.mxu0 %v8455_v42  ;;  %v8406_v1 = vmax.f32 %v8241_v59, %v8313_v21  ;;  %v8309_v15 = vsel %vm593_vm2, %v8307_v2, %v8308_v9  ;;  %v8405_v47 = vmax.f32 %v8240_v55, %v8311_v11  ;;  %v8463_v48 = vmax.f32 %v15133_v8, %v8423_v57  ;;  %v8480_v8 = vld [vmem:[%s15260_s5 + $0x10] sm:$0xff] }
 0x47e   : > { %9920 = vmatprep.subr.mxu0 %v8470_v58  ;;  %v8449_v32 = vmax.f32 %v8407_v30, %v8409_v31  ;;  %v8464_v12 = vmax.f32 %v8422_v35, %v8424_v51  ;;  %v8404_v25 = vmax.f32 %v8239_v41, %v8309_v15  ;;  %v8462_v22 = vmax.f32 %v15140_v18, %v8422_v35  ;;  %v8483_v18 = vld [vmem:[%s15260_s5 + $0x28] sm:$0xff]  ;;  %v8484_v42 = vld [vmem:[%s15260_s5 + $0x30] sm:$0xff] }
 0x47f   : > { %9921 = vmatpush3.msra.mxu0 %v8454_v49  ;;  %v8448_v6 = vmax.f32 %v8406_v1, %v8408_v45  ;;  %v8447_v4 = vmax.f32 %v8405_v47, %v8407_v30  ;;  %v8491_v58 = vld [vmem:[%s15260_s5 + $0x68] sm:$0xff] }
 0x480   : > { %9922 = vmatprep.subr.mxu0 %v8469_v24  ;;  %v8446_v23 = vmax.f32 %v8404_v25, %v8406_v1 }
 0x481   : > { %9923 = vmatpush3.msra.mxu0 %v8453_v19 }
 0x482   : > { %9924 = vmatprep.subr.mxu0 %v8468_v53 }
 0x483   : > { %9925 = vmatpush3.msra.mxu0 %v8452_v27 }
 0x484   : > { %9926 = vmatprep.subr.mxu0 %v8467_v60 }
 0x485   : > { %9927 = vmatpush3.msra.mxu0 %v8451_v26 }
 0x486   : > { %9928 = vmatprep.subr.mxu0 %v8466_v61 }
 0x487   : > { %9929 = vmatpush3.msra.mxu0 %v8450_v7 }
 0x488   : > { %9930 = vmatprep.subr.mxu0 %v8465_v62 }
 0x489   : > { %9931 = vmatpush3.msra.mxu0 %v8449_v32 }
 0x48a   : > { %9932 = vmatprep.subr.mxu0 %v8464_v12 }
 0x48b   : > { %9933 = vmatpush3.msra.mxu0 %v8448_v6 }
 0x48c   : > { %9934 = vmatprep.subr.mxu0 %v8463_v48 }
 0x48d   : > { %9935 = vmatpush3.msra.mxu0 %v8447_v4 }
 0x48e   : > { %9936 = vmatprep.subr.mxu0 %v8462_v22 }
 0x48f   : > { %9937 = vmatpush3.msra.mxu0 %v8446_v23 }
 0x490   : > { %8559 = vmatmul.mubr.f32.vlgmr.msra.gmra.mxu0 %v8478_v40 }
 0x491   : > { %8563 = vmatprep.mubr.f32.mxu0 %v8481_v16 }
 0x494   : > { %8564 = vmatmul.mubr.f32.gmra.mxu0 %v8480_v8 }
 0x495   : > { %8568 = vmatprep.mubr.f32.mxu0 %v8483_v18 }
 0x498   : > { %8569 = vmatmul.mubr.f32.gmra.mxu0 %v8482_v52 }
 0x499   : > { %8573 = vmatprep.mubr.f32.mxu0 %v8485_v17 }
 0x49c   : > { %8574 = vmatmul.mubr.f32.gmra.mxu0 %v8484_v42 }
 0x49d   : > { %8578 = vmatprep.mubr.f32.mxu0 %v8487_v28 }
 0x4a0   : > { %8579 = vmatmul.mubr.f32.gmra.mxu0 %v8486_v38 }
 0x4a1   : > { %8583 = vmatprep.mubr.f32.mxu0 %v8489_v14 }
 0x4a4   : > { %8584 = vmatmul.mubr.f32.gmra.mxu0 %v8488_v43 }
 0x4a5   : > { %8588 = vmatprep.mubr.f32.mxu0 %v8491_v58 }
 0x4a8   : > { %8589 = vmatmul.mubr.f32.gmra.mxu0 %v8490_v0 }
 0x4a9   : > { %8593 = vmatprep.mubr.f32.mxu0 %v8493_v63 }
 0x4ac   : > { %8594 = vmatmul.mubr.f32.gmra.mxu0 %v8492_v39 }
 0x550   : > { %v9938_v34 = vpop.f32.mrf.mxu0 }
 0x552   : > { %v9939_v49 = vpop.f32.mrf.mxu0 }
 0x553   : > { %v9940_v36 = vadd.f32 %v9939_v49, %v9938_v34 }
 0x554   : > { %v9941_v33 = vpop.f32.mrf.mxu0 }
 0x555   : > { %8599 = vst.msk [vmem:[%s15234_s13] sm:$0xff] %vm4519_vm4, %v9940_v36 }
 0x556   : > { %v9942_v59 = vpop.f32.mrf.mxu0 }
 0x557   : > { %v9943_v24 = vadd.f32 %v9942_v59, %v9941_v33 }
 0x558   : > { %v9944_v3 = vpop.f32.mrf.mxu0 }
 0x559   : > { %8600 = vst.msk [vmem:[%s15234_s13 + $0x8] sm:$0xff] %vm4519_vm4, %v9943_v24 }
 0x55a   : > { %v9945_v56 = vpop.f32.mrf.mxu0 }
 0x55b   : > { %v9946_v46 = vadd.f32 %v9945_v56, %v9944_v3 }
 0x55c   : > { %v9947_v19 = vpop.f32.mrf.mxu0 }
 0x55d   : > { %8601 = vst.msk [vmem:[%s15234_s13 + $0x10] sm:$0xff] %vm4519_vm4, %v9946_v46 }
 0x55e   : > { %v9948_v50 = vpop.f32.mrf.mxu0 }
 0x55f   : > { %v9949_v10 = vadd.f32 %v9948_v50, %v9947_v19 }
 0x560   : > { %v9950_v29 = vpop.f32.mrf.mxu0 }
 0x561   : > { %8602 = vst.msk [vmem:[%s15234_s13 + $0x18] sm:$0xff] %vm4519_vm4, %v9949_v10 }
 0x562   : > { %v9951_v53 = vpop.f32.mrf.mxu0 }
 0x563   : > { %v9952_v20 = vadd.f32 %v9951_v53, %v9950_v29 }
 0x564   : > { %v9953_v13 = vpop.f32.mrf.mxu0 }
 0x565   : > { %8603 = vst.msk [vmem:[%s15234_s13 + $0x20] sm:$0xff] %vm4519_vm4, %v9952_v20 }
 0x566   : > { %v9954_v54 = vpop.f32.mrf.mxu0 }
 0x567   : > { %v9955_v55 = vadd.f32 %v9954_v54, %v9953_v13 }
 0x568   : > { %v9956_v27 = vpop.f32.mrf.mxu0 }
 0x569   : > { %8604 = vst.msk [vmem:[%s15234_s13 + $0x28] sm:$0xff] %vm4519_vm4, %v9955_v55 }
 0x56a   : > { %v9957_v31 = vpop.f32.mrf.mxu0 }
 0x56b   : > { %v9958_v37 = vadd.f32 %v9957_v31, %v9956_v27 }
 0x56c   : > { %v9959_v41 = vpop.f32.mrf.mxu0 }
 0x56d   : > { %8605 = vst.msk [vmem:[%s15234_s13 + $0x30] sm:$0xff] %vm4519_vm4, %v9958_v37 }
 0x56e   : > { %v9960_v60 = vpop.f32.mrf.mxu0 }
 0x56f   : > { %v9961_v51 = vadd.f32 %v9960_v60, %v9959_v41 }
 0x571   : > { %8606 = vst.msk [vmem:[%s15234_s13 + $0x38] sm:$0xff] %vm4519_vm4, %v9961_v51 }
 0x572 PF: > { %s18_s24 = sadd.s32 1, %s10978_s24  }
 0x573   : > { %p15_p4 = scmp.ge.s32.totalorder %s18_s24, 4  }
 0x575   :  { %17 = sbr.rel (!%p15_p4) target bundleno = 1 (0x1), region = 102 }

</bundles_post_ra>
